<compile_context>
chip_gen: v7x
topology: tpu7x:2x2x1
jax: 0.10.0
libtpu: 0.0.40
codegen_flags: <defaults>
</compile_context>

<pallas_src>
import functools

import jax
import jax.numpy as jnp
from jax.experimental import pallas as pl
from jax.experimental.pallas import tpu as pltpu

# ----- config (XLNet-base geometry, scaled down in depth/vocab for the demo) ----
VOCAB = 128
HIDDEN = 768
N_LAYERS = 2            # xlnet-base-cased has 12; depth scaled down for the demo
N_HEADS = 12
HEAD_DIM = HIDDEN // N_HEADS
NH2 = N_HEADS // 2      # head pairs (2 heads share one 128-lane block)
FFN = 3072
LN_EPS = 1e-12
SHARED_DIM = 32
OUT_DIM = 4
LEAKY_SLOPE = 0.01      # nn.LeakyReLU default negative_slope
HEAD_PAD = 128          # lane-dense MTL head output width


def _pick_tile(dim, target, base):
    """Largest multiple of `base` that divides `dim` and is <= target (or dim itself)."""
    if dim <= target:
        return dim
    best = base
    for t in range(base, target + 1, base):
        if dim % t == 0:
            best = t
    return best


# --------------------------- tiled linear (optionally fused GELU) ----------------
def _matmul_kernel(x_ref, w_ref, b_ref, o_ref, acc_ref, *, activation):
    @pl.when(pl.program_id(2) == 0)
    def _():
        acc_ref[...] = jnp.zeros_like(acc_ref)

    acc_ref[...] += jnp.dot(x_ref[...], w_ref[...],
                            preferred_element_type=jnp.float32)

    @pl.when(pl.program_id(2) == pl.num_programs(2) - 1)
    def _():
        y = acc_ref[...] + b_ref[...]
        if activation == "gelu":
            # TODO(synk): HF XLNet uses erf-based GELU; tanh approximation used here.
            y = jax.nn.gelu(y)
        o_ref[...] = y.astype(o_ref.dtype)


def linear(x, w, b, activation="none"):
    """x: [M, K] bf16, w: [K, N] bf16, b: [N] f32 -> [M, N] bf16 (optional fused GELU)."""
    m, kdim = x.shape
    n = w.shape[1]
    tm = _pick_tile(m, 256, 8)
    tn = _pick_tile(n, 512, 128)
    tk = _pick_tile(kdim, 512, 128)
    kernel = functools.partial(_matmul_kernel, activation=activation)
    return pl.pallas_call(
        kernel,
        out_shape=jax.ShapeDtypeStruct((m, n), jnp.bfloat16),
        grid_spec=pltpu.PrefetchScalarGridSpec(
            num_scalar_prefetch=0,
            grid=(m // tm, n // tn, kdim // tk),
            in_specs=[
                pl.BlockSpec((tm, tk), lambda i, j, k: (i, k)),
                pl.BlockSpec((tk, tn), lambda i, j, k: (k, j)),
                pl.BlockSpec((1, tn), lambda i, j, k: (0, j)),
            ],
            out_specs=pl.BlockSpec((tm, tn), lambda i, j, k: (i, j)),
            scratch_shapes=[pltpu.VMEM((tm, tn), jnp.float32)],
        ),
        compiler_params=pltpu.CompilerParams(
            dimension_semantics=("parallel", "parallel", "arbitrary")),
    )(x, w, b.reshape(1, n))


# ------------------ tiled linear with fused residual + post-LayerNorm ------------
def _matmul_res_ln_kernel(x_ref, w_ref, b_ref, r_ref, g_ref, bb_ref, o_ref, acc_ref):
    @pl.when(pl.program_id(1) == 0)
    def _():
        acc_ref[...] = jnp.zeros_like(acc_ref)

    acc_ref[...] += jnp.dot(x_ref[...], w_ref[...],
                            preferred_element_type=jnp.float32)

    @pl.when(pl.program_id(1) == pl.num_programs(1) - 1)
    def _():
        h = acc_ref[...] + b_ref[...] + r_ref[...].astype(jnp.float32)
        mu = jnp.mean(h, axis=-1, keepdims=True)
        var = jnp.mean(jnp.square(h - mu), axis=-1, keepdims=True)
        y = (h - mu) * jax.lax.rsqrt(var + LN_EPS) * g_ref[...] + bb_ref[...]
        o_ref[...] = y.astype(o_ref.dtype)


def linear_res_ln(x, w, b, residual, gamma, beta):
    """LayerNorm(x @ w + b + residual); N (=HIDDEN) untiled so LN sees the full row."""
    m, kdim = x.shape
    n = w.shape[1]
    tm = _pick_tile(m, 256, 8)
    tk = _pick_tile(kdim, 512, 128)
    return pl.pallas_call(
        _matmul_res_ln_kernel,
        out_shape=jax.ShapeDtypeStruct((m, n), jnp.bfloat16),
        grid_spec=pltpu.PrefetchScalarGridSpec(
            num_scalar_prefetch=0,
            grid=(m // tm, kdim // tk),
            in_specs=[
                pl.BlockSpec((tm, tk), lambda i, k: (i, k)),
                pl.BlockSpec((tk, n), lambda i, k: (k, 0)),
                pl.BlockSpec((1, n), lambda i, k: (0, 0)),
                pl.BlockSpec((tm, n), lambda i, k: (i, 0)),
                pl.BlockSpec((1, n), lambda i, k: (0, 0)),
                pl.BlockSpec((1, n), lambda i, k: (0, 0)),
            ],
            out_specs=pl.BlockSpec((tm, n), lambda i, k: (i, 0)),
            scratch_shapes=[pltpu.VMEM((tm, n), jnp.float32)],
        ),
        compiler_params=pltpu.CompilerParams(
            dimension_semantics=("parallel", "arbitrary")),
    )(x, w, b.reshape(1, n), residual, gamma.reshape(1, n), beta.reshape(1, n))


# --------------------------- flash-style attention -------------------------------
def _flash_attn_kernel(q_ref, k_ref, v_ref, mask_ref, o_ref,
                       m_sc, l_sc, acc_sc, *, scale):
    ki = pl.program_id(3)

    @pl.when(ki == 0)
    def _():
        m_sc[...] = jnp.full_like(m_sc, -1e30)
        l_sc[...] = jnp.zeros_like(l_sc)
        acc_sc[...] = jnp.zeros_like(acc_sc)

    q = q_ref[0]                             # [tq, 128] bf16 (two heads packed)
    k = k_ref[0]                             # [tk, 128] bf16
    v = v_ref[0]                             # [tk, 128] bf16
    bias = (mask_ref[0] - 1.0) * 1e9         # [1, tk] f32: 0 keep, -1e9 pad

    for h in range(2):                       # the two heads of this head-pair block
        sl = slice(h * HEAD_DIM, (h + 1) * HEAD_DIM)
        s = jax.lax.dot_general(q[:, sl], k[:, sl],
                                (((1,), (1,)), ((), ())),
                                preferred_element_type=jnp.float32)
        s = s * scale + bias                                  # [tq, tk]
        m_prev = m_sc[h]                                      # [tq, 1]
        m_new = jnp.maximum(m_prev, s.max(axis=-1, keepdims=True))
        alpha = jnp.exp(m_prev - m_new)
        p = jnp.exp(s - m_new)
        l_sc[h] = alpha * l_sc[h] + p.sum(axis=-1, keepdims=True)
        acc_sc[h] = alpha * acc_sc[h] + jnp.dot(
            p.astype(v.dtype), v[:, sl], preferred_element_type=jnp.float32)
        m_sc[h] = m_new

    @pl.when(ki == pl.num_programs(3) - 1)
    def _():
        o0 = acc_sc[0] * pl.reciprocal(l_sc[0], approx=True)
        o1 = acc_sc[1] * pl.reciprocal(l_sc[1], approx=True)
        o_ref[0] = jnp.concatenate([o0, o1], axis=-1).astype(o_ref.dtype)


def attention(qkv, mask3, B, S):
    """qkv: [B, S, 3*HIDDEN] bf16 (Q|K|V, heads contiguous); mask3: [B, 1, S] f32."""
    tq = S if S <= 128 else _pick_tile(S, 128, 8)
    tk = S if S <= 128 else _pick_tile(S, 128, 128)
    kernel = functools.partial(_flash_attn_kernel, scale=1.0 / (HEAD_DIM ** 0.5))
    return pl.pallas_call(
        kernel,
        out_shape=jax.ShapeDtypeStruct((B, S, HIDDEN), jnp.bfloat16),
        grid_spec=pltpu.PrefetchScalarGridSpec(
            num_scalar_prefetch=0,
            grid=(B, NH2, S // tq, S // tk),
            in_specs=[
                # head-pair p: Q cols [128p, 128p+128), K offset by HIDDEN, V by 2*HIDDEN
                pl.BlockSpec((1, tq, 2 * HEAD_DIM), lambda b, p, qi, ki: (b, qi, p)),
                pl.BlockSpec((1, tk, 2 * HEAD_DIM), lambda b, p, qi, ki: (b, ki, NH2 + p)),
                pl.BlockSpec((1, tk, 2 * HEAD_DIM), lambda b, p, qi, ki: (b, ki, 2 * NH2 + p)),
                pl.BlockSpec((1, 1, tk), lambda b, p, qi, ki: (b, 0, ki)),
            ],
            out_specs=pl.BlockSpec((1, tq, 2 * HEAD_DIM), lambda b, p, qi, ki: (b, qi, p)),
            scratch_shapes=[
                pltpu.VMEM((2, tq, 1), jnp.float32),          # running max per head
                pltpu.VMEM((2, tq, 1), jnp.float32),          # running sum per head
                pltpu.VMEM((2, tq, HEAD_DIM), jnp.float32),   # output accumulator per head
            ],
        ),
        compiler_params=pltpu.CompilerParams(
            dimension_semantics=("parallel", "parallel", "parallel", "arbitrary")),
    )(qkv, qkv, qkv, mask3)


# --------------------------- fused MTL heads (lane-dense output) ------------------
def _head_kernel(h_ref, ws_ref, bs_ref, we_ref, bep_ref, wva_ref, bva_ref, o_ref):
    h = h_ref[...].astype(jnp.float32)            # [B, S, H]
    pooled = jnp.mean(h, axis=1)                  # pool_hidden_state: mean over seq
    shared = jnp.dot(pooled, ws_ref[...],
                     preferred_element_type=jnp.float32) + bs_ref[...]
    # nn.Dropout(p=0.1) is the identity in eval/inference mode.
    act = jnp.where(shared > 0, shared, LEAKY_SLOPE * shared)    # LeakyReLU
    out = (jnp.dot(act, we_ref[...], preferred_element_type=jnp.float32) + bep_ref[...]
           + jnp.dot(shared, wva_ref[...], preferred_element_type=jnp.float32) + bva_ref[...])
    o_ref[...] = out                               # [B, 128] lane-dense slab


def mtl_heads(last_hidden, params):
    """Fused mean-pool + shared layer + (emotion, valence, arousal) heads."""
    B = last_hidden.shape[0]
    # Pack the three tiny heads into two 128-lane matrices so the kernel emits one
    # lane-dense [B, 128] output (emotion lanes 0..3, valence lane 4, arousal lane 5).
    w_emo_pad = jnp.zeros((SHARED_DIM, HEAD_PAD), jnp.float32).at[:, :OUT_DIM].set(params["w_emo"])
    b_emo_pad = jnp.zeros((1, HEAD_PAD), jnp.float32).at[0, :OUT_DIM].set(params["b_emo"])
    w_va_pad = (jnp.zeros((SHARED_DIM, HEAD_PAD), jnp.float32)
                .at[:, OUT_DIM:OUT_DIM + 1].set(params["w_val"])
                .at[:, OUT_DIM + 1:OUT_DIM + 2].set(params["w_aro"]))
    b_va_pad = (jnp.zeros((1, HEAD_PAD), jnp.float32)
                .at[0, OUT_DIM].set(params["b_val"][0])
                .at[0, OUT_DIM + 1].set(params["b_aro"][0]))

    out = pl.pallas_call(
        _head_kernel,
        out_shape=jax.ShapeDtypeStruct((B, HEAD_PAD), jnp.float32),
    )(last_hidden, params["w_shared"], params["b_shared"].reshape(1, -1),
      w_emo_pad, b_emo_pad, w_va_pad, b_va_pad)

    emotion_out = out[:, :OUT_DIM]
    valence_out = out[:, OUT_DIM:OUT_DIM + 1]
    arousal_out = out[:, OUT_DIM + 1:OUT_DIM + 2]
    return emotion_out, valence_out, arousal_out


# ----------------------------- model glue ---------------------------------------
def encoder_layer(x2, mask3, lp, B, S):
    """One XLNet-style (post-LN) transformer layer; x2: [B*S, H] bf16."""
    qkv = linear(x2, lp["w_qkv"], lp["b_qkv"])                         # [B*S, 3H]
    ctx = attention(qkv.reshape(B, S, 3 * HIDDEN), mask3, B, S)        # [B, S, H]
    h = linear_res_ln(ctx.reshape(B * S, HIDDEN), lp["w_o"], lp["b_o"],
                      x2, lp["ln1_g"], lp["ln1_b"])                    # attn-out + LN fused
    ff = linear(h, lp["w_ff1"], lp["b_ff1"], activation="gelu")
    return linear_res_ln(ff, lp["w_ff2"], lp["b_ff2"],
                         h, lp["ln2_g"], lp["ln2_b"])                  # ffn-out + LN fused


def multitask_forward(ids, mask, token_type_ids, params):
    # TODO(synk): XLNet's relative positional attention, segment-aware relative
    # encoding (token_type_ids) and two-stream attention have no compact Pallas
    # equivalent here; the backbone uses standard masked self-attention with the
    # same tensor geometry, so token_type_ids is accepted but unused.
    del token_type_ids
    B, S = ids.shape
    x = params["word_emb"][ids].astype(jnp.bfloat16).reshape(B * S, HIDDEN)  # gather (glue)
    mask3 = mask.astype(jnp.float32).reshape(B, 1, S)      # 1 = keep, 0 = pad; expanded in-kernel
    for lp in params["layers"]:
        x = encoder_layer(x, mask3, lp, B, S)
    last_hidden = x.reshape(B, S, HIDDEN)                  # last_hidden_state [B, S, 768]
    return mtl_heads(last_hidden, params)


def init_params(seed=1):
    key = jax.random.PRNGKey(seed)

    def take(shape, scale=0.02, dtype=jnp.bfloat16):
        nonlocal key
        key, sub = jax.random.split(key)
        return (scale * jax.random.normal(sub, shape, jnp.float32)).astype(dtype)

    params = {"word_emb": take((VOCAB, HIDDEN)), "layers": []}
    for _ in range(N_LAYERS):
        params["layers"].append(dict(
            w_qkv=take((HIDDEN, 3 * HIDDEN)),            # [Q | K | V], heads contiguous
            b_qkv=jnp.zeros((3 * HIDDEN,), jnp.float32),
            w_o=take((HIDDEN, HIDDEN)),
            b_o=jnp.zeros((HIDDEN,), jnp.float32),
            ln1_g=jnp.ones((HIDDEN,), jnp.float32),
            ln1_b=jnp.zeros((HIDDEN,), jnp.float32),
            w_ff1=take((HIDDEN, FFN)),
            b_ff1=jnp.zeros((FFN,), jnp.float32),
            w_ff2=take((FFN, HIDDEN)),
            b_ff2=jnp.zeros((HIDDEN,), jnp.float32),
            ln2_g=jnp.ones((HIDDEN,), jnp.float32),
            ln2_b=jnp.zeros((HIDDEN,), jnp.float32),
        ))
    params.update(
        w_shared=take((HIDDEN, SHARED_DIM), dtype=jnp.float32),
        b_shared=jnp.zeros((SHARED_DIM,), jnp.float32),
        w_emo=take((SHARED_DIM, OUT_DIM), dtype=jnp.float32),
        b_emo=jnp.zeros((OUT_DIM,), jnp.float32),
        w_val=take((SHARED_DIM, 1), dtype=jnp.float32),
        b_val=jnp.zeros((1,), jnp.float32),
        w_aro=take((SHARED_DIM, 1), dtype=jnp.float32),
        b_aro=jnp.zeros((1,), jnp.float32),
    )
    return params


if __name__ == "__main__":
    B, S = 2, 8
    params = init_params(seed=1)

    key = jax.random.PRNGKey(0)
    k_ids, _ = jax.random.split(key)
    ids = jax.random.randint(k_ids, (B, S), 0, VOCAB, dtype=jnp.int32)
    mask = jnp.ones((B, S), jnp.float32).at[1, 6:].set(0.0)   # pad last 2 tokens of sample 1
    token_type_ids = jnp.zeros((B, S), jnp.int32)

    emotion_out, valence_out, arousal_out = jax.jit(multitask_forward)(
        ids, mask, token_type_ids, params)
    jax.block_until_ready((emotion_out, valence_out, arousal_out))

    assert emotion_out.shape == (B, OUT_DIM)
    assert valence_out.shape == (B, 1)
    assert arousal_out.shape == (B, 1)
    print("KERNEL_OK")
</pallas_src>

<mosaic_0001>
module attributes {stable_mosaic.version = 11 : i64} {
  func.func @_matmul_kernel(%arg0: i32, %arg1: i32, %arg2: i32, %arg3: memref<16x384xbf16, #tpu.memory_space<vmem>>, %arg4: memref<384x384xbf16, #tpu.memory_space<vmem>>, %arg5: memref<1x384xf32, #tpu.memory_space<vmem>>, %arg6: memref<16x384xbf16, #tpu.memory_space<vmem>>, %arg7: memref<16x384xf32, #tpu.memory_space<vmem>>) attributes {dimension_semantics = [#tpu.dimension_semantics<parallel>, #tpu.dimension_semantics<parallel>, #tpu.dimension_semantics<arbitrary>], iteration_bounds = array<i64: 1, 6, 2>, scalar_prefetch = 0 : i64, scratch_operands = 1 : i64, tpu.core_type = #tpu.core_type<tc>, window_params = [{transform_indices = @transform_0, window_bounds = array<i64: 16, 384>}, {transform_indices = @transform_1, window_bounds = array<i64: 384, 384>}, {transform_indices = @transform_2, window_bounds = array<i64: 1, 384>}, {transform_indices = @transform_3, window_bounds = array<i64: 16, 384>}]} {
    %c0_i32 = arith.constant 0 : i32
    %0 = arith.cmpi eq, %arg2, %c0_i32 : i32
    %1 = arith.extui %0 : i1 to i32
    %c0_i32_0 = arith.constant 0 : i32
    %2 = arith.cmpi ne, %1, %c0_i32_0 : i32
    scf.if %2 {
      %cst_9 = arith.constant 0.000000e+00 : f32
      %12 = vector.broadcast %cst_9 : f32 to vector<16x384xf32>
      %c0_10 = arith.constant 0 : index
      %c0_11 = arith.constant 0 : index
      %13 = vector.load %arg7[%c0_10, %c0_11] : memref<16x384xf32, #tpu.memory_space<vmem>>, vector<16x384xf32>
      tpu.vector_store %arg7[%c0_10, %c0_11], %12 {strides = array<i32>} : memref<16x384xf32, #tpu.memory_space<vmem>>, vector<16x384xf32>,
    } else {
    }
    %c0 = arith.constant 0 : index
    %c0_1 = arith.constant 0 : index
    %3 = vector.load %arg7[%c0, %c0_1] : memref<16x384xf32, #tpu.memory_space<vmem>>, vector<16x384xf32>
    %c0_2 = arith.constant 0 : index
    %c0_3 = arith.constant 0 : index
    %4 = vector.load %arg3[%c0_2, %c0_3] : memref<16x384xbf16, #tpu.memory_space<vmem>>, vector<16x384xbf16>
    %c0_4 = arith.constant 0 : index
    %c0_5 = arith.constant 0 : index
    %5 = vector.load %arg4[%c0_4, %c0_5] : memref<384x384xbf16, #tpu.memory_space<vmem>>, vector<384x384xbf16>
    %cst = arith.constant dense<0.000000e+00> : vector<16x384xf32>
    %6 = tpu.matmul %4, %5, %cst {dimension_numbers = #tpu.dot_dimension_numbers<[1], [0], [0], [1], [0, 0, 1, 1], [], []>} : vector<16x384xbf16>, vector<384x384xbf16>, vector<16x384xf32> -> vector<16x384xf32>
    %7 = arith.addf %3, %6 : vector<16x384xf32>
    %c0_6 = arith.constant 0 : index
    %c0_7 = arith.constant 0 : index
    %8 = vector.load %arg7[%c0_6, %c0_7] : memref<16x384xf32, #tpu.memory_space<vmem>>, vector<16x384xf32>
    tpu.vector_store %arg7[%c0_6, %c0_7], %7 {strides = array<i32>} : memref<16x384xf32, #tpu.memory_space<vmem>>, vector<16x384xf32>,
    %c1_i32 = arith.constant 1 : i32
    %9 = arith.cmpi eq, %arg2, %c1_i32 : i32
    %10 = arith.extui %9 : i1 to i32
    %c0_i32_8 = arith.constant 0 : i32
    %11 = arith.cmpi ne, %10, %c0_i32_8 : i32
    scf.if %11 {
      %c0_9 = arith.constant 0 : index
      %c0_10 = arith.constant 0 : index
      %12 = vector.load %arg7[%c0_9, %c0_10] : memref<16x384xf32, #tpu.memory_space<vmem>>, vector<16x384xf32>
      %c0_11 = arith.constant 0 : index
      %c0_12 = arith.constant 0 : index
      %13 = vector.load %arg5[%c0_11, %c0_12] : memref<1x384xf32, #tpu.memory_space<vmem>>, vector<1x384xf32>
      %14 = vector.broadcast %13 : vector<1x384xf32> to vector<16x384xf32>
      %15 = arith.addf %12, %14 : vector<16x384xf32>
      %16 = arith.truncf %15 : vector<16x384xf32> to vector<16x384xbf16>
      %c0_13 = arith.constant 0 : index
      %c0_14 = arith.constant 0 : index
      %17 = vector.load %arg6[%c0_13, %c0_14] : memref<16x384xbf16, #tpu.memory_space<vmem>>, vector<16x384xbf16>
      tpu.vector_store %arg6[%c0_13, %c0_14], %16 {strides = array<i32>} : memref<16x384xbf16, #tpu.memory_space<vmem>>, vector<16x384xbf16>,
    } else {
    }
    return
  }
  func.func @transform_0(%arg0: i32, %arg1: i32, %arg2: i32) -> (i32, i32) {
    %c0_i32 = arith.constant 0 : i32
    return %arg0, %arg2 : i32, i32
  }
  func.func @transform_1(%arg0: i32, %arg1: i32, %arg2: i32) -> (i32, i32) {
    %c0_i32 = arith.constant 0 : i32
    return %arg2, %arg1 : i32, i32
  }
  func.func @transform_2(%arg0: i32, %arg1: i32, %arg2: i32) -> (i32, i32) {
    %c0_i32 = arith.constant 0 : i32
    %c0_i32_0 = arith.constant 0 : i32
    return %c0_i32, %arg1 : i32, i32
  }
  func.func @transform_3(%arg0: i32, %arg1: i32, %arg2: i32) -> (i32, i32) {
    %c0_i32 = arith.constant 0 : i32
    return %arg0, %arg1 : i32, i32
  }
}

module attributes {stable_mosaic.version = 11 : i64} {
  func.func @_flash_attn_kernel(%arg0: i32, %arg1: i32, %arg2: i32, %arg3: i32, %arg4: memref<1x8x128xbf16, #tpu.memory_space<vmem>>, %arg5: memref<1x8x128xbf16, #tpu.memory_space<vmem>>, %arg6: memref<1x8x128xbf16, #tpu.memory_space<vmem>>, %arg7: memref<1x1x8xf32, #tpu.memory_space<vmem>>, %arg8: memref<1x8x128xbf16, #tpu.memory_space<vmem>>, %arg9: memref<2x8x1xf32, #tpu.memory_space<vmem>>, %arg10: memref<2x8x1xf32, #tpu.memory_space<vmem>>, %arg11: memref<2x8x64xf32, #tpu.memory_space<vmem>>) attributes {dimension_semantics = [#tpu.dimension_semantics<parallel>, #tpu.dimension_semantics<parallel>, #tpu.dimension_semantics<parallel>, #tpu.dimension_semantics<arbitrary>], iteration_bounds = array<i64: 2, 6, 1, 1>, scalar_prefetch = 0 : i64, scratch_operands = 3 : i64, tpu.core_type = #tpu.core_type<tc>, window_params = [{transform_indices = @transform_0, window_bounds = array<i64: 1, 8, 128>}, {transform_indices = @transform_1, window_bounds = array<i64: 1, 8, 128>}, {transform_indices = @transform_2, window_bounds = array<i64: 1, 8, 128>}, {transform_indices = @transform_3, window_bounds = array<i64: 1, 1, 8>}, {transform_indices = @transform_4, window_bounds = array<i64: 1, 8, 128>}]} {
    %c0_i32 = arith.constant 0 : i32
    %0 = arith.cmpi eq, %arg3, %c0_i32 : i32
    %1 = arith.extui %0 : i1 to i32
    %c0_i32_0 = arith.constant 0 : i32
    %2 = arith.cmpi ne, %1, %c0_i32_0 : i32
    scf.if %2 {
      %cst_60 = arith.constant -1.000000e+30 : f32
      %98 = vector.broadcast %cst_60 : f32 to vector<2x8x1xf32>
      %c0_61 = arith.constant 0 : index
      %c0_62 = arith.constant 0 : index
      %c0_63 = arith.constant 0 : index
      %99 = vector.load %arg9[%c0_61, %c0_62, %c0_63] : memref<2x8x1xf32, #tpu.memory_space<vmem>>, vector<2x8x1xf32>
      tpu.vector_store %arg9[%c0_61, %c0_62, %c0_63], %98 {strides = array<i32>} : memref<2x8x1xf32, #tpu.memory_space<vmem>>, vector<2x8x1xf32>,
      %cst_64 = arith.constant 0.000000e+00 : f32
      %100 = vector.broadcast %cst_64 : f32 to vector<2x8x1xf32>
      %c0_65 = arith.constant 0 : index
      %c0_66 = arith.constant 0 : index
      %c0_67 = arith.constant 0 : index
      %101 = vector.load %arg10[%c0_65, %c0_66, %c0_67] : memref<2x8x1xf32, #tpu.memory_space<vmem>>, vector<2x8x1xf32>
      tpu.vector_store %arg10[%c0_65, %c0_66, %c0_67], %100 {strides = array<i32>} : memref<2x8x1xf32, #tpu.memory_space<vmem>>, vector<2x8x1xf32>,
      %cst_68 = arith.constant 0.000000e+00 : f32
      %102 = vector.broadcast %cst_68 : f32 to vector<2x8x64xf32>
      %c0_69 = arith.constant 0 : index
      %c0_70 = arith.constant 0 : index
      %c0_71 = arith.constant 0 : index
      %103 = vector.load %arg11[%c0_69, %c0_70, %c0_71] : memref<2x8x64xf32, #tpu.memory_space<vmem>>, vector<2x8x64xf32>
      tpu.vector_store %arg11[%c0_69, %c0_70, %c0_71], %102 {strides = array<i32>} : memref<2x8x64xf32, #tpu.memory_space<vmem>>, vector<2x8x64xf32>,
    } else {
    }
    %c0 = arith.constant 0 : index
    %c0_1 = arith.constant 0 : index
    %c0_2 = arith.constant 0 : index
    %3 = vector.load %arg4[%c0, %c0_1, %c0_2] : memref<1x8x128xbf16, #tpu.memory_space<vmem>>, vector<1x8x128xbf16>
    %4 = vector.shape_cast %3 : vector<1x8x128xbf16> to vector<8x128xbf16>
    %c0_3 = arith.constant 0 : index
    %c0_4 = arith.constant 0 : index
    %c0_5 = arith.constant 0 : index
    %5 = vector.load %arg5[%c0_3, %c0_4, %c0_5] : memref<1x8x128xbf16, #tpu.memory_space<vmem>>, vector<1x8x128xbf16>
    %6 = vector.shape_cast %5 : vector<1x8x128xbf16> to vector<8x128xbf16>
    %c0_6 = arith.constant 0 : index
    %c0_7 = arith.constant 0 : index
    %c0_8 = arith.constant 0 : index
    %7 = vector.load %arg6[%c0_6, %c0_7, %c0_8] : memref<1x8x128xbf16, #tpu.memory_space<vmem>>, vector<1x8x128xbf16>
    %8 = vector.shape_cast %7 : vector<1x8x128xbf16> to vector<8x128xbf16>
    %c0_9 = arith.constant 0 : index
    %c0_10 = arith.constant 0 : index
    %c0_11 = arith.constant 0 : index
    %9 = vector.load %arg7[%c0_9, %c0_10, %c0_11] : memref<1x1x8xf32, #tpu.memory_space<vmem>>, vector<1x1x8xf32>
    %10 = vector.shape_cast %9 : vector<1x1x8xf32> to vector<1x8xf32>
    %cst = arith.constant 1.000000e+00 : f32
    %11 = vector.broadcast %cst : f32 to vector<1x8xf32>
    %12 = arith.subf %10, %11 : vector<1x8xf32>
    %cst_12 = arith.constant 1.000000e+09 : f32
    %13 = vector.broadcast %cst_12 : f32 to vector<1x8xf32>
    %14 = arith.mulf %12, %13 : vector<1x8xf32>
    %15 = vector.extract_strided_slice %4 {offsets = [0, 0], sizes = [8, 64], strides = [1, 1]} : vector<8x128xbf16> to vector<8x64xbf16>
    %16 = vector.extract_strided_slice %6 {offsets = [0, 0], sizes = [8, 64], strides = [1, 1]} : vector<8x128xbf16> to vector<8x64xbf16>
    %cst_13 = arith.constant dense<0.000000e+00> : vector<8x8xf32>
    %17 = tpu.matmul %15, %16, %cst_13 {dimension_numbers = #tpu.dot_dimension_numbers<[1], [1], [0], [0], [0, 0, 1, 0], [], []>} : vector<8x64xbf16>, vector<8x64xbf16>, vector<8x8xf32> -> vector<8x8xf32>
    %cst_14 = arith.constant 1.250000e-01 : f32
    %18 = vector.broadcast %cst_14 : f32 to vector<8x8xf32>
    %19 = arith.mulf %17, %18 : vector<8x8xf32>
    %20 = vector.broadcast %14 : vector<1x8xf32> to vector<8x8xf32>
    %21 = arith.addf %19, %20 : vector<8x8xf32>
    %c0_15 = arith.constant 0 : index
    %c0_16 = arith.constant 0 : index
    %c0_17 = arith.constant 0 : index
    %22 = vector.load %arg9[%c0_15, %c0_16, %c0_17] : memref<2x8x1xf32, #tpu.memory_space<vmem>>, vector<1x8x1xf32>
    %23 = vector.shape_cast %22 : vector<1x8x1xf32> to vector<8x1xf32>
    %cst_18 = arith.constant dense<0xFF800000> : vector<8xf32>
    %24 = vector.multi_reduction <maximumf>, %21, %cst_18 [1] : vector<8x8xf32> to vector<8xf32>
    %25 = vector.shape_cast %24 : vector<8xf32> to vector<8x1xf32>
    %26 = arith.maximumf %23, %25 : vector<8x1xf32>
    %27 = arith.subf %23, %26 : vector<8x1xf32>
    %28 = math.exp %27 : vector<8x1xf32>
    %29 = vector.broadcast %26 : vector<8x1xf32> to vector<8x8xf32>
    %30 = arith.subf %21, %29 : vector<8x8xf32>
    %31 = math.exp %30 : vector<8x8xf32>
    %c0_19 = arith.constant 0 : index
    %c0_20 = arith.constant 0 : index
    %c0_21 = arith.constant 0 : index
    %32 = vector.load %arg10[%c0_19, %c0_20, %c0_21] : memref<2x8x1xf32, #tpu.memory_space<vmem>>, vector<1x8x1xf32>
    %33 = vector.shape_cast %32 : vector<1x8x1xf32> to vector<8x1xf32>
    %34 = arith.mulf %28, %33 : vector<8x1xf32>
    %cst_22 = arith.constant dense<0.000000e+00> : vector<8xf32>
    %35 = vector.multi_reduction <add>, %31, %cst_22 [1] : vector<8x8xf32> to vector<8xf32>
    %36 = vector.shape_cast %35 : vector<8xf32> to vector<8x1xf32>
    %37 = arith.addf %34, %36 : vector<8x1xf32>
    %c0_23 = arith.constant 0 : index
    %c0_24 = arith.constant 0 : index
    %c0_25 = arith.constant 0 : index
    %38 = vector.load %arg10[%c0_23, %c0_24, %c0_25] : memref<2x8x1xf32, #tpu.memory_space<vmem>>, vector<1x8x1xf32>
    %39 = vector.shape_cast %38 : vector<1x8x1xf32> to vector<8x1xf32>
    %40 = vector.shape_cast %37 : vector<8x1xf32> to vector<1x8x1xf32>
    tpu.vector_store %arg10[%c0_23, %c0_24, %c0_25], %40 {strides = array<i32>} : memref<2x8x1xf32, #tpu.memory_space<vmem>>, vector<1x8x1xf32>,
    %c0_26 = arith.constant 0 : index
    %c0_27 = arith.constant 0 : index
    %c0_28 = arith.constant 0 : index
    %41 = vector.load %arg11[%c0_26, %c0_27, %c0_28] : memref<2x8x64xf32, #tpu.memory_space<vmem>>, vector<1x8x64xf32>
    %42 = vector.shape_cast %41 : vector<1x8x64xf32> to vector<8x64xf32>
    %43 = vector.broadcast %28 : vector<8x1xf32> to vector<8x64xf32>
    %44 = arith.mulf %43, %42 : vector<8x64xf32>
    %45 = arith.truncf %31 : vector<8x8xf32> to vector<8x8xbf16>
    %46 = vector.extract_strided_slice %8 {offsets = [0, 0], sizes = [8, 64], strides = [1, 1]} : vector<8x128xbf16> to vector<8x64xbf16>
    %cst_29 = arith.constant dense<0.000000e+00> : vector<8x64xf32>
    %47 = tpu.matmul %45, %46, %cst_29 {dimension_numbers = #tpu.dot_dimension_numbers<[1], [0], [0], [1], [0, 0, 1, 1], [], []>} : vector<8x8xbf16>, vector<8x64xbf16>, vector<8x64xf32> -> vector<8x64xf32>
    %48 = arith.addf %44, %47 : vector<8x64xf32>
    %c0_30 = arith.constant 0 : index
    %c0_31 = arith.constant 0 : index
    %c0_32 = arith.constant 0 : index
    %49 = vector.load %arg11[%c0_30, %c0_31, %c0_32] : memref<2x8x64xf32, #tpu.memory_space<vmem>>, vector<1x8x64xf32>
    %50 = vector.shape_cast %49 : vector<1x8x64xf32> to vector<8x64xf32>
    %51 = vector.shape_cast %48 : vector<8x64xf32> to vector<1x8x64xf32>
    tpu.vector_store %arg11[%c0_30, %c0_31, %c0_32], %51 {strides = array<i32>} : memref<2x8x64xf32, #tpu.memory_space<vmem>>, vector<1x8x64xf32>,
    %c0_33 = arith.constant 0 : index
    %c0_34 = arith.constant 0 : index
    %c0_35 = arith.constant 0 : index
    %52 = vector.load %arg9[%c0_33, %c0_34, %c0_35] : memref<2x8x1xf32, #tpu.memory_space<vmem>>, vector<1x8x1xf32>
    %53 = vector.shape_cast %52 : vector<1x8x1xf32> to vector<8x1xf32>
    %54 = vector.shape_cast %26 : vector<8x1xf32> to vector<1x8x1xf32>
    tpu.vector_store %arg9[%c0_33, %c0_34, %c0_35], %54 {strides = array<i32>} : memref<2x8x1xf32, #tpu.memory_space<vmem>>, vector<1x8x1xf32>,
    %55 = vector.extract_strided_slice %4 {offsets = [0, 64], sizes = [8, 64], strides = [1, 1]} : vector<8x128xbf16> to vector<8x64xbf16>
    %56 = vector.extract_strided_slice %6 {offsets = [0, 64], sizes = [8, 64], strides = [1, 1]} : vector<8x128xbf16> to vector<8x64xbf16>
    %cst_36 = arith.constant dense<0.000000e+00> : vector<8x8xf32>
    %57 = tpu.matmul %55, %56, %cst_36 {dimension_numbers = #tpu.dot_dimension_numbers<[1], [1], [0], [0], [0, 0, 1, 0], [], []>} : vector<8x64xbf16>, vector<8x64xbf16>, vector<8x8xf32> -> vector<8x8xf32>
    %cst_37 = arith.constant 1.250000e-01 : f32
    %58 = vector.broadcast %cst_37 : f32 to vector<8x8xf32>
    %59 = arith.mulf %57, %58 : vector<8x8xf32>
    %60 = vector.broadcast %14 : vector<1x8xf32> to vector<8x8xf32>
    %61 = arith.addf %59, %60 : vector<8x8xf32>
    %c1 = arith.constant 1 : index
    %c0_38 = arith.constant 0 : index
    %c0_39 = arith.constant 0 : index
    %62 = vector.load %arg9[%c1, %c0_38, %c0_39] : memref<2x8x1xf32, #tpu.memory_space<vmem>>, vector<1x8x1xf32>
    %63 = vector.shape_cast %62 : vector<1x8x1xf32> to vector<8x1xf32>
    %cst_40 = arith.constant dense<0xFF800000> : vector<8xf32>
    %64 = vector.multi_reduction <maximumf>, %61, %cst_40 [1] : vector<8x8xf32> to vector<8xf32>
    %65 = vector.shape_cast %64 : vector<8xf32> to vector<8x1xf32>
    %66 = arith.maximumf %63, %65 : vector<8x1xf32>
    %67 = arith.subf %63, %66 : vector<8x1xf32>
    %68 = math.exp %67 : vector<8x1xf32>
    %69 = vector.broadcast %66 : vector<8x1xf32> to vector<8x8xf32>
    %70 = arith.subf %61, %69 : vector<8x8xf32>
    %71 = math.exp %70 : vector<8x8xf32>
    %c1_41 = arith.constant 1 : index
    %c0_42 = arith.constant 0 : index
    %c0_43 = arith.constant 0 : index
    %72 = vector.load %arg10[%c1_41, %c0_42, %c0_43] : memref<2x8x1xf32, #tpu.memory_space<vmem>>, vector<1x8x1xf32>
    %73 = vector.shape_cast %72 : vector<1x8x1xf32> to vector<8x1xf32>
    %74 = arith.mulf %68, %73 : vector<8x1xf32>
    %cst_44 = arith.constant dense<0.000000e+00> : vector<8xf32>
    %75 = vector.multi_reduction <add>, %71, %cst_44 [1] : vector<8x8xf32> to vector<8xf32>
    %76 = vector.shape_cast %75 : vector<8xf32> to vector<8x1xf32>
    %77 = arith.addf %74, %76 : vector<8x1xf32>
    %c1_45 = arith.constant 1 : index
    %c0_46 = arith.constant 0 : index
    %c0_47 = arith.constant 0 : index
    %78 = vector.load %arg10[%c1_45, %c0_46, %c0_47] : memref<2x8x1xf32, #tpu.memory_space<vmem>>, vector<1x8x1xf32>
    %79 = vector.shape_cast %78 : vector<1x8x1xf32> to vector<8x1xf32>
    %80 = vector.shape_cast %77 : vector<8x1xf32> to vector<1x8x1xf32>
    tpu.vector_store %arg10[%c1_45, %c0_46, %c0_47], %80 {strides = array<i32>} : memref<2x8x1xf32, #tpu.memory_space<vmem>>, vector<1x8x1xf32>,
    %c1_48 = arith.constant 1 : index
    %c0_49 = arith.constant 0 : index
    %c0_50 = arith.constant 0 : index
    %81 = vector.load %arg11[%c1_48, %c0_49, %c0_50] : memref<2x8x64xf32, #tpu.memory_space<vmem>>, vector<1x8x64xf32>
    %82 = vector.shape_cast %81 : vector<1x8x64xf32> to vector<8x64xf32>
    %83 = vector.broadcast %68 : vector<8x1xf32> to vector<8x64xf32>
    %84 = arith.mulf %83, %82 : vector<8x64xf32>
    %85 = arith.truncf %71 : vector<8x8xf32> to vector<8x8xbf16>
    %86 = vector.extract_strided_slice %8 {offsets = [0, 64], sizes = [8, 64], strides = [1, 1]} : vector<8x128xbf16> to vector<8x64xbf16>
    %cst_51 = arith.constant dense<0.000000e+00> : vector<8x64xf32>
    %87 = tpu.matmul %85, %86, %cst_51 {dimension_numbers = #tpu.dot_dimension_numbers<[1], [0], [0], [1], [0, 0, 1, 1], [], []>} : vector<8x8xbf16>, vector<8x64xbf16>, vector<8x64xf32> -> vector<8x64xf32>
    %88 = arith.addf %84, %87 : vector<8x64xf32>
    %c1_52 = arith.constant 1 : index
    %c0_53 = arith.constant 0 : index
    %c0_54 = arith.constant 0 : index
    %89 = vector.load %arg11[%c1_52, %c0_53, %c0_54] : memref<2x8x64xf32, #tpu.memory_space<vmem>>, vector<1x8x64xf32>
    %90 = vector.shape_cast %89 : vector<1x8x64xf32> to vector<8x64xf32>
    %91 = vector.shape_cast %88 : vector<8x64xf32> to vector<1x8x64xf32>
    tpu.vector_store %arg11[%c1_52, %c0_53, %c0_54], %91 {strides = array<i32>} : memref<2x8x64xf32, #tpu.memory_space<vmem>>, vector<1x8x64xf32>,
    %c1_55 = arith.constant 1 : index
    %c0_56 = arith.constant 0 : index
    %c0_57 = arith.constant 0 : index
    %92 = vector.load %arg9[%c1_55, %c0_56, %c0_57] : memref<2x8x1xf32, #tpu.memory_space<vmem>>, vector<1x8x1xf32>
    %93 = vector.shape_cast %92 : vector<1x8x1xf32> to vector<8x1xf32>
    %94 = vector.shape_cast %66 : vector<8x1xf32> to vector<1x8x1xf32>
    tpu.vector_store %arg9[%c1_55, %c0_56, %c0_57], %94 {strides = array<i32>} : memref<2x8x1xf32, #tpu.memory_space<vmem>>, vector<1x8x1xf32>,
    %c0_i32_58 = arith.constant 0 : i32
    %95 = arith.cmpi eq, %arg3, %c0_i32_58 : i32
    %96 = arith.extui %95 : i1 to i32
    %c0_i32_59 = arith.constant 0 : i32
    %97 = arith.cmpi ne, %96, %c0_i32_59 : i32
    scf.if %97 {
      %c0_60 = arith.constant 0 : index
      %c0_61 = arith.constant 0 : index
      %c0_62 = arith.constant 0 : index
      %98 = vector.load %arg11[%c0_60, %c0_61, %c0_62] : memref<2x8x64xf32, #tpu.memory_space<vmem>>, vector<1x8x64xf32>
      %99 = vector.shape_cast %98 : vector<1x8x64xf32> to vector<8x64xf32>
      %c0_63 = arith.constant 0 : index
      %c0_64 = arith.constant 0 : index
      %c0_65 = arith.constant 0 : index
      %100 = vector.load %arg10[%c0_63, %c0_64, %c0_65] : memref<2x8x1xf32, #tpu.memory_space<vmem>>, vector<1x8x1xf32>
      %101 = vector.shape_cast %100 : vector<1x8x1xf32> to vector<8x1xf32>
      %102 = tpu.reciprocal %101 {approx = true} : vector<8x1xf32> -> vector<8x1xf32>
      %103 = vector.broadcast %102 : vector<8x1xf32> to vector<8x64xf32>
      %104 = arith.mulf %99, %103 : vector<8x64xf32>
      %c1_66 = arith.constant 1 : index
      %c0_67 = arith.constant 0 : index
      %c0_68 = arith.constant 0 : index
      %105 = vector.load %arg11[%c1_66, %c0_67, %c0_68] : memref<2x8x64xf32, #tpu.memory_space<vmem>>, vector<1x8x64xf32>
      %106 = vector.shape_cast %105 : vector<1x8x64xf32> to vector<8x64xf32>
      %c1_69 = arith.constant 1 : index
      %c0_70 = arith.constant 0 : index
      %c0_71 = arith.constant 0 : index
      %107 = vector.load %arg10[%c1_69, %c0_70, %c0_71] : memref<2x8x1xf32, #tpu.memory_space<vmem>>, vector<1x8x1xf32>
      %108 = vector.shape_cast %107 : vector<1x8x1xf32> to vector<8x1xf32>
      %109 = tpu.reciprocal %108 {approx = true} : vector<8x1xf32> -> vector<8x1xf32>
      %110 = vector.broadcast %109 : vector<8x1xf32> to vector<8x64xf32>
      %111 = arith.mulf %106, %110 : vector<8x64xf32>
      %112 = tpu.concatenate %104, %111 in 1 : vector<8x64xf32>, vector<8x64xf32> -> vector<8x128xf32>
      %113 = arith.truncf %112 : vector<8x128xf32> to vector<8x128xbf16>
      %c0_72 = arith.constant 0 : index
      %c0_73 = arith.constant 0 : index
      %c0_74 = arith.constant 0 : index
      %114 = vector.load %arg8[%c0_72, %c0_73, %c0_74] : memref<1x8x128xbf16, #tpu.memory_space<vmem>>, vector<1x8x128xbf16>
      %115 = vector.shape_cast %114 : vector<1x8x128xbf16> to vector<8x128xbf16>
      %116 = vector.shape_cast %113 : vector<8x128xbf16> to vector<1x8x128xbf16>
      tpu.vector_store %arg8[%c0_72, %c0_73, %c0_74], %116 {strides = array<i32>} : memref<1x8x128xbf16, #tpu.memory_space<vmem>>, vector<1x8x128xbf16>,
    } else {
    }
    return
  }
  func.func @transform_0(%arg0: i32, %arg1: i32, %arg2: i32, %arg3: i32) -> (i32, i32, i32) {
    %c0_i32 = arith.constant 0 : i32
    return %arg0, %arg2, %arg1 : i32, i32, i32
  }
  func.func @transform_1(%arg0: i32, %arg1: i32, %arg2: i32, %arg3: i32) -> (i32, i32, i32) {
    %c6_i32 = arith.constant 6 : i32
    %0 = arith.addi %c6_i32, %arg1 : i32
    %c0_i32 = arith.constant 0 : i32
    return %arg0, %arg3, %0 : i32, i32, i32
  }
  func.func @transform_2(%arg0: i32, %arg1: i32, %arg2: i32, %arg3: i32) -> (i32, i32, i32) {
    %c12_i32 = arith.constant 12 : i32
    %0 = arith.addi %c12_i32, %arg1 : i32
    %c0_i32 = arith.constant 0 : i32
    return %arg0, %arg3, %0 : i32, i32, i32
  }
  func.func @transform_3(%arg0: i32, %arg1: i32, %arg2: i32, %arg3: i32) -> (i32, i32, i32) {
    %c0_i32 = arith.constant 0 : i32
    %c0_i32_0 = arith.constant 0 : i32
    return %arg0, %c0_i32, %arg3 : i32, i32, i32
  }
  func.func @transform_4(%arg0: i32, %arg1: i32, %arg2: i32, %arg3: i32) -> (i32, i32, i32) {
    %c0_i32 = arith.constant 0 : i32
    return %arg0, %arg2, %arg1 : i32, i32, i32
  }
}

module attributes {stable_mosaic.version = 11 : i64} {
  func.func @_matmul_res_ln_kernel(%arg0: i32, %arg1: i32, %arg2: memref<16x384xbf16, #tpu.memory_space<vmem>>, %arg3: memref<384x768xbf16, #tpu.memory_space<vmem>>, %arg4: memref<1x768xf32, #tpu.memory_space<vmem>>, %arg5: memref<16x768xbf16, #tpu.memory_space<vmem>>, %arg6: memref<1x768xf32, #tpu.memory_space<vmem>>, %arg7: memref<1x768xf32, #tpu.memory_space<vmem>>, %arg8: memref<16x768xbf16, #tpu.memory_space<vmem>>, %arg9: memref<16x768xf32, #tpu.memory_space<vmem>>) attributes {dimension_semantics = [#tpu.dimension_semantics<parallel>, #tpu.dimension_semantics<arbitrary>], iteration_bounds = array<i64: 1, 2>, scalar_prefetch = 0 : i64, scratch_operands = 1 : i64, tpu.core_type = #tpu.core_type<tc>, window_params = [{transform_indices = @transform_0, window_bounds = array<i64: 16, 384>}, {transform_indices = @transform_1, window_bounds = array<i64: 384, 768>}, {pipeline_mode = #tpu.pipeline_mode<synchronous>, transform_indices = @transform_2, window_bounds = array<i64: 1, 768>}, {transform_indices = @transform_3, window_bounds = array<i64: 16, 768>}, {pipeline_mode = #tpu.pipeline_mode<synchronous>, transform_indices = @transform_4, window_bounds = array<i64: 1, 768>}, {pipeline_mode = #tpu.pipeline_mode<synchronous>, transform_indices = @transform_5, window_bounds = array<i64: 1, 768>}, {transform_indices = @transform_6, window_bounds = array<i64: 16, 768>}]} {
    %c0_i32 = arith.constant 0 : i32
    %0 = arith.cmpi eq, %arg1, %c0_i32 : i32
    %1 = arith.extui %0 : i1 to i32
    %c0_i32_0 = arith.constant 0 : i32
    %2 = arith.cmpi ne, %1, %c0_i32_0 : i32
    scf.if %2 {
      %cst_9 = arith.constant 0.000000e+00 : f32
      %12 = vector.broadcast %cst_9 : f32 to vector<16x768xf32>
      %c0_10 = arith.constant 0 : index
      %c0_11 = arith.constant 0 : index
      %13 = vector.load %arg9[%c0_10, %c0_11] : memref<16x768xf32, #tpu.memory_space<vmem>>, vector<16x768xf32>
      tpu.vector_store %arg9[%c0_10, %c0_11], %12 {strides = array<i32>} : memref<16x768xf32, #tpu.memory_space<vmem>>, vector<16x768xf32>,
    } else {
    }
    %c0 = arith.constant 0 : index
    %c0_1 = arith.constant 0 : index
    %3 = vector.load %arg9[%c0, %c0_1] : memref<16x768xf32, #tpu.memory_space<vmem>>, vector<16x768xf32>
    %c0_2 = arith.constant 0 : index
    %c0_3 = arith.constant 0 : index
    %4 = vector.load %arg2[%c0_2, %c0_3] : memref<16x384xbf16, #tpu.memory_space<vmem>>, vector<16x384xbf16>
    %c0_4 = arith.constant 0 : index
    %c0_5 = arith.constant 0 : index
    %5 = vector.load %arg3[%c0_4, %c0_5] : memref<384x768xbf16, #tpu.memory_space<vmem>>, vector<384x768xbf16>
    %cst = arith.constant dense<0.000000e+00> : vector<16x768xf32>
    %6 = tpu.matmul %4, %5, %cst {dimension_numbers = #tpu.dot_dimension_numbers<[1], [0], [0], [1], [0, 0, 1, 1], [], []>} : vector<16x384xbf16>, vector<384x768xbf16>, vector<16x768xf32> -> vector<16x768xf32>
    %7 = arith.addf %3, %6 : vector<16x768xf32>
    %c0_6 = arith.constant 0 : index
    %c0_7 = arith.constant 0 : index
    %8 = vector.load %arg9[%c0_6, %c0_7] : memref<16x768xf32, #tpu.memory_space<vmem>>, vector<16x768xf32>
    tpu.vector_store %arg9[%c0_6, %c0_7], %7 {strides = array<i32>} : memref<16x768xf32, #tpu.memory_space<vmem>>, vector<16x768xf32>,
    %c1_i32 = arith.constant 1 : i32
    %9 = arith.cmpi eq, %arg1, %c1_i32 : i32
    %10 = arith.extui %9 : i1 to i32
    %c0_i32_8 = arith.constant 0 : i32
    %11 = arith.cmpi ne, %10, %c0_i32_8 : i32
    scf.if %11 {
      %c0_9 = arith.constant 0 : index
      %c0_10 = arith.constant 0 : index
      %12 = vector.load %arg9[%c0_9, %c0_10] : memref<16x768xf32, #tpu.memory_space<vmem>>, vector<16x768xf32>
      %c0_11 = arith.constant 0 : index
      %c0_12 = arith.constant 0 : index
      %13 = vector.load %arg4[%c0_11, %c0_12] : memref<1x768xf32, #tpu.memory_space<vmem>>, vector<1x768xf32>
      %14 = vector.broadcast %13 : vector<1x768xf32> to vector<16x768xf32>
      %15 = arith.addf %12, %14 : vector<16x768xf32>
      %c0_13 = arith.constant 0 : index
      %c0_14 = arith.constant 0 : index
      %16 = vector.load %arg5[%c0_13, %c0_14] : memref<16x768xbf16, #tpu.memory_space<vmem>>, vector<16x768xbf16>
      %17 = arith.extf %16 : vector<16x768xbf16> to vector<16x768xf32>
      %18 = arith.addf %15, %17 : vector<16x768xf32>
      %cst_15 = arith.constant dense<0.000000e+00> : vector<16xf32>
      %19 = vector.multi_reduction <add>, %18, %cst_15 [1] : vector<16x768xf32> to vector<16xf32>
      %20 = vector.shape_cast %19 : vector<16xf32> to vector<16x1xf32>
      %cst_16 = arith.constant 7.680000e+02 : f32
      %21 = vector.broadcast %cst_16 : f32 to vector<16x1xf32>
      %22 = arith.divf %20, %21 : vector<16x1xf32>
      %23 = vector.broadcast %22 : vector<16x1xf32> to vector<16x768xf32>
      %24 = arith.subf %18, %23 : vector<16x768xf32>
      %25 = arith.mulf %24, %24 : vector<16x768xf32>
      %cst_17 = arith.constant dense<0.000000e+00> : vector<16xf32>
      %26 = vector.multi_reduction <add>, %25, %cst_17 [1] : vector<16x768xf32> to vector<16xf32>
      %27 = vector.shape_cast %26 : vector<16xf32> to vector<16x1xf32>
      %cst_18 = arith.constant 7.680000e+02 : f32
      %28 = vector.broadcast %cst_18 : f32 to vector<16x1xf32>
      %29 = arith.divf %27, %28 : vector<16x1xf32>
      %30 = vector.broadcast %22 : vector<16x1xf32> to vector<16x768xf32>
      %31 = arith.subf %18, %30 : vector<16x768xf32>
      %cst_19 = arith.constant 9.99999996E-13 : f32
      %32 = vector.broadcast %cst_19 : f32 to vector<16x1xf32>
      %33 = arith.addf %29, %32 : vector<16x1xf32>
      %34 = math.rsqrt %33 : vector<16x1xf32>
      %35 = vector.broadcast %34 : vector<16x1xf32> to vector<16x768xf32>
      %36 = arith.mulf %31, %35 : vector<16x768xf32>
      %c0_20 = arith.constant 0 : index
      %c0_21 = arith.constant 0 : index
      %37 = vector.load %arg6[%c0_20, %c0_21] : memref<1x768xf32, #tpu.memory_space<vmem>>, vector<1x768xf32>
      %38 = vector.broadcast %37 : vector<1x768xf32> to vector<16x768xf32>
      %39 = arith.mulf %36, %38 : vector<16x768xf32>
      %c0_22 = arith.constant 0 : index
      %c0_23 = arith.constant 0 : index
      %40 = vector.load %arg7[%c0_22, %c0_23] : memref<1x768xf32, #tpu.memory_space<vmem>>, vector<1x768xf32>
      %41 = vector.broadcast %40 : vector<1x768xf32> to vector<16x768xf32>
      %42 = arith.addf %39, %41 : vector<16x768xf32>
      %43 = arith.truncf %42 : vector<16x768xf32> to vector<16x768xbf16>
      %c0_24 = arith.constant 0 : index
      %c0_25 = arith.constant 0 : index
      %44 = vector.load %arg8[%c0_24, %c0_25] : memref<16x768xbf16, #tpu.memory_space<vmem>>, vector<16x768xbf16>
      tpu.vector_store %arg8[%c0_24, %c0_25], %43 {strides = array<i32>} : memref<16x768xbf16, #tpu.memory_space<vmem>>, vector<16x768xbf16>,
    } else {
    }
    return
  }
  func.func @transform_0(%arg0: i32, %arg1: i32) -> (i32, i32) {
    %c0_i32 = arith.constant 0 : i32
    return %arg0, %arg1 : i32, i32
  }
  func.func @transform_1(%arg0: i32, %arg1: i32) -> (i32, i32) {
    %c0_i32 = arith.constant 0 : i32
    %c0_i32_0 = arith.constant 0 : i32
    return %arg1, %c0_i32 : i32, i32
  }
  func.func @transform_2(%arg0: i32, %arg1: i32) -> (i32, i32) {
    %c0_i32 = arith.constant 0 : i32
    %c0_i32_0 = arith.constant 0 : i32
    %c0_i32_1 = arith.constant 0 : i32
    return %c0_i32, %c0_i32_0 : i32, i32
  }
  func.func @transform_3(%arg0: i32, %arg1: i32) -> (i32, i32) {
    %c0_i32 = arith.constant 0 : i32
    %c0_i32_0 = arith.constant 0 : i32
    return %arg0, %c0_i32 : i32, i32
  }
  func.func @transform_4(%arg0: i32, %arg1: i32) -> (i32, i32) {
    %c0_i32 = arith.constant 0 : i32
    %c0_i32_0 = arith.constant 0 : i32
    %c0_i32_1 = arith.constant 0 : i32
    return %c0_i32, %c0_i32_0 : i32, i32
  }
  func.func @transform_5(%arg0: i32, %arg1: i32) -> (i32, i32) {
    %c0_i32 = arith.constant 0 : i32
    %c0_i32_0 = arith.constant 0 : i32
    %c0_i32_1 = arith.constant 0 : i32
    return %c0_i32, %c0_i32_0 : i32, i32
  }
  func.func @transform_6(%arg0: i32, %arg1: i32) -> (i32, i32) {
    %c0_i32 = arith.constant 0 : i32
    %c0_i32_0 = arith.constant 0 : i32
    return %arg0, %c0_i32 : i32, i32
  }
}

module attributes {stable_mosaic.version = 11 : i64} {
  func.func @_matmul_kernel(%arg0: i32, %arg1: i32, %arg2: i32, %arg3: memref<16x384xbf16, #tpu.memory_space<vmem>>, %arg4: memref<384x512xbf16, #tpu.memory_space<vmem>>, %arg5: memref<1x512xf32, #tpu.memory_space<vmem>>, %arg6: memref<16x512xbf16, #tpu.memory_space<vmem>>, %arg7: memref<16x512xf32, #tpu.memory_space<vmem>>) attributes {dimension_semantics = [#tpu.dimension_semantics<parallel>, #tpu.dimension_semantics<parallel>, #tpu.dimension_semantics<arbitrary>], iteration_bounds = array<i64: 1, 6, 2>, scalar_prefetch = 0 : i64, scratch_operands = 1 : i64, tpu.core_type = #tpu.core_type<tc>, window_params = [{transform_indices = @transform_0, window_bounds = array<i64: 16, 384>}, {transform_indices = @transform_1, window_bounds = array<i64: 384, 512>}, {transform_indices = @transform_2, window_bounds = array<i64: 1, 512>}, {transform_indices = @transform_3, window_bounds = array<i64: 16, 512>}]} {
    %c0_i32 = arith.constant 0 : i32
    %0 = arith.cmpi eq, %arg2, %c0_i32 : i32
    %1 = arith.extui %0 : i1 to i32
    %c0_i32_0 = arith.constant 0 : i32
    %2 = arith.cmpi ne, %1, %c0_i32_0 : i32
    scf.if %2 {
      %cst_9 = arith.constant 0.000000e+00 : f32
      %12 = vector.broadcast %cst_9 : f32 to vector<16x512xf32>
      %c0_10 = arith.constant 0 : index
      %c0_11 = arith.constant 0 : index
      %13 = vector.load %arg7[%c0_10, %c0_11] : memref<16x512xf32, #tpu.memory_space<vmem>>, vector<16x512xf32>
      tpu.vector_store %arg7[%c0_10, %c0_11], %12 {strides = array<i32>} : memref<16x512xf32, #tpu.memory_space<vmem>>, vector<16x512xf32>,
    } else {
    }
    %c0 = arith.constant 0 : index
    %c0_1 = arith.constant 0 : index
    %3 = vector.load %arg7[%c0, %c0_1] : memref<16x512xf32, #tpu.memory_space<vmem>>, vector<16x512xf32>
    %c0_2 = arith.constant 0 : index
    %c0_3 = arith.constant 0 : index
    %4 = vector.load %arg3[%c0_2, %c0_3] : memref<16x384xbf16, #tpu.memory_space<vmem>>, vector<16x384xbf16>
    %c0_4 = arith.constant 0 : index
    %c0_5 = arith.constant 0 : index
    %5 = vector.load %arg4[%c0_4, %c0_5] : memref<384x512xbf16, #tpu.memory_space<vmem>>, vector<384x512xbf16>
    %cst = arith.constant dense<0.000000e+00> : vector<16x512xf32>
    %6 = tpu.matmul %4, %5, %cst {dimension_numbers = #tpu.dot_dimension_numbers<[1], [0], [0], [1], [0, 0, 1, 1], [], []>} : vector<16x384xbf16>, vector<384x512xbf16>, vector<16x512xf32> -> vector<16x512xf32>
    %7 = arith.addf %3, %6 : vector<16x512xf32>
    %c0_6 = arith.constant 0 : index
    %c0_7 = arith.constant 0 : index
    %8 = vector.load %arg7[%c0_6, %c0_7] : memref<16x512xf32, #tpu.memory_space<vmem>>, vector<16x512xf32>
    tpu.vector_store %arg7[%c0_6, %c0_7], %7 {strides = array<i32>} : memref<16x512xf32, #tpu.memory_space<vmem>>, vector<16x512xf32>,
    %c1_i32 = arith.constant 1 : i32
    %9 = arith.cmpi eq, %arg2, %c1_i32 : i32
    %10 = arith.extui %9 : i1 to i32
    %c0_i32_8 = arith.constant 0 : i32
    %11 = arith.cmpi ne, %10, %c0_i32_8 : i32
    scf.if %11 {
      %c0_9 = arith.constant 0 : index
      %c0_10 = arith.constant 0 : index
      %12 = vector.load %arg7[%c0_9, %c0_10] : memref<16x512xf32, #tpu.memory_space<vmem>>, vector<16x512xf32>
      %c0_11 = arith.constant 0 : index
      %c0_12 = arith.constant 0 : index
      %13 = vector.load %arg5[%c0_11, %c0_12] : memref<1x512xf32, #tpu.memory_space<vmem>>, vector<1x512xf32>
      %14 = vector.broadcast %13 : vector<1x512xf32> to vector<16x512xf32>
      %15 = arith.addf %12, %14 : vector<16x512xf32>
      %16 = arith.mulf %15, %15 : vector<16x512xf32>
      %17 = arith.mulf %15, %16 : vector<16x512xf32>
      %cst_13 = arith.constant 4.471500e-02 : f32
      %18 = vector.broadcast %cst_13 : f32 to vector<16x512xf32>
      %19 = arith.mulf %18, %17 : vector<16x512xf32>
      %20 = arith.addf %15, %19 : vector<16x512xf32>
      %cst_14 = arith.constant 0.797884583 : f32
      %21 = vector.broadcast %cst_14 : f32 to vector<16x512xf32>
      %22 = arith.mulf %21, %20 : vector<16x512xf32>
      %23 = math.tanh %22 : vector<16x512xf32>
      %cst_15 = arith.constant 1.000000e+00 : f32
      %24 = vector.broadcast %cst_15 : f32 to vector<16x512xf32>
      %25 = arith.addf %24, %23 : vector<16x512xf32>
      %cst_16 = arith.constant 5.000000e-01 : f32
      %26 = vector.broadcast %cst_16 : f32 to vector<16x512xf32>
      %27 = arith.mulf %26, %25 : vector<16x512xf32>
      %28 = arith.mulf %15, %27 : vector<16x512xf32>
      %29 = arith.truncf %28 : vector<16x512xf32> to vector<16x512xbf16>
      %c0_17 = arith.constant 0 : index
      %c0_18 = arith.constant 0 : index
      %30 = vector.load %arg6[%c0_17, %c0_18] : memref<16x512xbf16, #tpu.memory_space<vmem>>, vector<16x512xbf16>
      tpu.vector_store %arg6[%c0_17, %c0_18], %29 {strides = array<i32>} : memref<16x512xbf16, #tpu.memory_space<vmem>>, vector<16x512xbf16>,
    } else {
    }
    return
  }
  func.func @transform_0(%arg0: i32, %arg1: i32, %arg2: i32) -> (i32, i32) {
    %c0_i32 = arith.constant 0 : i32
    return %arg0, %arg2 : i32, i32
  }
  func.func @transform_1(%arg0: i32, %arg1: i32, %arg2: i32) -> (i32, i32) {
    %c0_i32 = arith.constant 0 : i32
    return %arg2, %arg1 : i32, i32
  }
  func.func @transform_2(%arg0: i32, %arg1: i32, %arg2: i32) -> (i32, i32) {
    %c0_i32 = arith.constant 0 : i32
    %c0_i32_0 = arith.constant 0 : i32
    return %c0_i32, %arg1 : i32, i32
  }
  func.func @transform_3(%arg0: i32, %arg1: i32, %arg2: i32) -> (i32, i32) {
    %c0_i32 = arith.constant 0 : i32
    return %arg0, %arg1 : i32, i32
  }
}

module attributes {stable_mosaic.version = 11 : i64} {
  func.func @_matmul_kernel(%arg0: i32, %arg1: i32, %arg2: i32, %arg3: memref<16x384xbf16, #tpu.memory_space<vmem>>, %arg4: memref<384x384xbf16, #tpu.memory_space<vmem>>, %arg5: memref<1x384xf32, #tpu.memory_space<vmem>>, %arg6: memref<16x384xbf16, #tpu.memory_space<vmem>>, %arg7: memref<16x384xf32, #tpu.memory_space<vmem>>) attributes {dimension_semantics = [#tpu.dimension_semantics<parallel>, #tpu.dimension_semantics<parallel>, #tpu.dimension_semantics<arbitrary>], iteration_bounds = array<i64: 1, 6, 2>, scalar_prefetch = 0 : i64, scratch_operands = 1 : i64, tpu.core_type = #tpu.core_type<tc>, window_params = [{transform_indices = @transform_0, window_bounds = array<i64: 16, 384>}, {transform_indices = @transform_1, window_bounds = array<i64: 384, 384>}, {transform_indices = @transform_2, window_bounds = array<i64: 1, 384>}, {transform_indices = @transform_3, window_bounds = array<i64: 16, 384>}]} {
    %c0_i32 = arith.constant 0 : i32
    %0 = arith.cmpi eq, %arg2, %c0_i32 : i32
    %1 = arith.extui %0 : i1 to i32
    %c0_i32_0 = arith.constant 0 : i32
    %2 = arith.cmpi ne, %1, %c0_i32_0 : i32
    scf.if %2 {
      %cst_9 = arith.constant 0.000000e+00 : f32
      %12 = vector.broadcast %cst_9 : f32 to vector<16x384xf32>
      %c0_10 = arith.constant 0 : index
      %c0_11 = arith.constant 0 : index
      %13 = vector.load %arg7[%c0_10, %c0_11] : memref<16x384xf32, #tpu.memory_space<vmem>>, vector<16x384xf32>
      tpu.vector_store %arg7[%c0_10, %c0_11], %12 {strides = array<i32>} : memref<16x384xf32, #tpu.memory_space<vmem>>, vector<16x384xf32>,
    } else {
    }
    %c0 = arith.constant 0 : index
    %c0_1 = arith.constant 0 : index
    %3 = vector.load %arg7[%c0, %c0_1] : memref<16x384xf32, #tpu.memory_space<vmem>>, vector<16x384xf32>
    %c0_2 = arith.constant 0 : index
    %c0_3 = arith.constant 0 : index
    %4 = vector.load %arg3[%c0_2, %c0_3] : memref<16x384xbf16, #tpu.memory_space<vmem>>, vector<16x384xbf16>
    %c0_4 = arith.constant 0 : index
    %c0_5 = arith.constant 0 : index
    %5 = vector.load %arg4[%c0_4, %c0_5] : memref<384x384xbf16, #tpu.memory_space<vmem>>, vector<384x384xbf16>
    %cst = arith.constant dense<0.000000e+00> : vector<16x384xf32>
    %6 = tpu.matmul %4, %5, %cst {dimension_numbers = #tpu.dot_dimension_numbers<[1], [0], [0], [1], [0, 0, 1, 1], [], []>} : vector<16x384xbf16>, vector<384x384xbf16>, vector<16x384xf32> -> vector<16x384xf32>
    %7 = arith.addf %3, %6 : vector<16x384xf32>
    %c0_6 = arith.constant 0 : index
    %c0_7 = arith.constant 0 : index
    %8 = vector.load %arg7[%c0_6, %c0_7] : memref<16x384xf32, #tpu.memory_space<vmem>>, vector<16x384xf32>
    tpu.vector_store %arg7[%c0_6, %c0_7], %7 {strides = array<i32>} : memref<16x384xf32, #tpu.memory_space<vmem>>, vector<16x384xf32>,
    %c1_i32 = arith.constant 1 : i32
    %9 = arith.cmpi eq, %arg2, %c1_i32 : i32
    %10 = arith.extui %9 : i1 to i32
    %c0_i32_8 = arith.constant 0 : i32
    %11 = arith.cmpi ne, %10, %c0_i32_8 : i32
    scf.if %11 {
      %c0_9 = arith.constant 0 : index
      %c0_10 = arith.constant 0 : index
      %12 = vector.load %arg7[%c0_9, %c0_10] : memref<16x384xf32, #tpu.memory_space<vmem>>, vector<16x384xf32>
      %c0_11 = arith.constant 0 : index
      %c0_12 = arith.constant 0 : index
      %13 = vector.load %arg5[%c0_11, %c0_12] : memref<1x384xf32, #tpu.memory_space<vmem>>, vector<1x384xf32>
      %14 = vector.broadcast %13 : vector<1x384xf32> to vector<16x384xf32>
      %15 = arith.addf %12, %14 : vector<16x384xf32>
      %16 = arith.truncf %15 : vector<16x384xf32> to vector<16x384xbf16>
      %c0_13 = arith.constant 0 : index
      %c0_14 = arith.constant 0 : index
      %17 = vector.load %arg6[%c0_13, %c0_14] : memref<16x384xbf16, #tpu.memory_space<vmem>>, vector<16x384xbf16>
      tpu.vector_store %arg6[%c0_13, %c0_14], %16 {strides = array<i32>} : memref<16x384xbf16, #tpu.memory_space<vmem>>, vector<16x384xbf16>,
    } else {
    }
    return
  }
  func.func @transform_0(%arg0: i32, %arg1: i32, %arg2: i32) -> (i32, i32) {
    %c0_i32 = arith.constant 0 : i32
    return %arg0, %arg2 : i32, i32
  }
  func.func @transform_1(%arg0: i32, %arg1: i32, %arg2: i32) -> (i32, i32) {
    %c0_i32 = arith.constant 0 : i32
    return %arg2, %arg1 : i32, i32
  }
  func.func @transform_2(%arg0: i32, %arg1: i32, %arg2: i32) -> (i32, i32) {
    %c0_i32 = arith.constant 0 : i32
    %c0_i32_0 = arith.constant 0 : i32
    return %c0_i32, %arg1 : i32, i32
  }
  func.func @transform_3(%arg0: i32, %arg1: i32, %arg2: i32) -> (i32, i32) {
    %c0_i32 = arith.constant 0 : i32
    return %arg0, %arg1 : i32, i32
  }
}

module attributes {stable_mosaic.version = 11 : i64} {
  func.func @_matmul_res_ln_kernel(%arg0: i32, %arg1: i32, %arg2: memref<16x512xbf16, #tpu.memory_space<vmem>>, %arg3: memref<512x768xbf16, #tpu.memory_space<vmem>>, %arg4: memref<1x768xf32, #tpu.memory_space<vmem>>, %arg5: memref<16x768xbf16, #tpu.memory_space<vmem>>, %arg6: memref<1x768xf32, #tpu.memory_space<vmem>>, %arg7: memref<1x768xf32, #tpu.memory_space<vmem>>, %arg8: memref<16x768xbf16, #tpu.memory_space<vmem>>, %arg9: memref<16x768xf32, #tpu.memory_space<vmem>>) attributes {dimension_semantics = [#tpu.dimension_semantics<parallel>, #tpu.dimension_semantics<arbitrary>], iteration_bounds = array<i64: 1, 6>, scalar_prefetch = 0 : i64, scratch_operands = 1 : i64, tpu.core_type = #tpu.core_type<tc>, window_params = [{transform_indices = @transform_0, window_bounds = array<i64: 16, 512>}, {transform_indices = @transform_1, window_bounds = array<i64: 512, 768>}, {pipeline_mode = #tpu.pipeline_mode<synchronous>, transform_indices = @transform_2, window_bounds = array<i64: 1, 768>}, {transform_indices = @transform_3, window_bounds = array<i64: 16, 768>}, {pipeline_mode = #tpu.pipeline_mode<synchronous>, transform_indices = @transform_4, window_bounds = array<i64: 1, 768>}, {pipeline_mode = #tpu.pipeline_mode<synchronous>, transform_indices = @transform_5, window_bounds = array<i64: 1, 768>}, {transform_indices = @transform_6, window_bounds = array<i64: 16, 768>}]} {
    %c0_i32 = arith.constant 0 : i32
    %0 = arith.cmpi eq, %arg1, %c0_i32 : i32
    %1 = arith.extui %0 : i1 to i32
    %c0_i32_0 = arith.constant 0 : i32
    %2 = arith.cmpi ne, %1, %c0_i32_0 : i32
    scf.if %2 {
      %cst_9 = arith.constant 0.000000e+00 : f32
      %12 = vector.broadcast %cst_9 : f32 to vector<16x768xf32>
      %c0_10 = arith.constant 0 : index
      %c0_11 = arith.constant 0 : index
      %13 = vector.load %arg9[%c0_10, %c0_11] : memref<16x768xf32, #tpu.memory_space<vmem>>, vector<16x768xf32>
      tpu.vector_store %arg9[%c0_10, %c0_11], %12 {strides = array<i32>} : memref<16x768xf32, #tpu.memory_space<vmem>>, vector<16x768xf32>,
    } else {
    }
    %c0 = arith.constant 0 : index
    %c0_1 = arith.constant 0 : index
    %3 = vector.load %arg9[%c0, %c0_1] : memref<16x768xf32, #tpu.memory_space<vmem>>, vector<16x768xf32>
    %c0_2 = arith.constant 0 : index
    %c0_3 = arith.constant 0 : index
    %4 = vector.load %arg2[%c0_2, %c0_3] : memref<16x512xbf16, #tpu.memory_space<vmem>>, vector<16x512xbf16>
    %c0_4 = arith.constant 0 : index
    %c0_5 = arith.constant 0 : index
    %5 = vector.load %arg3[%c0_4, %c0_5] : memref<512x768xbf16, #tpu.memory_space<vmem>>, vector<512x768xbf16>
    %cst = arith.constant dense<0.000000e+00> : vector<16x768xf32>
    %6 = tpu.matmul %4, %5, %cst {dimension_numbers = #tpu.dot_dimension_numbers<[1], [0], [0], [1], [0, 0, 1, 1], [], []>} : vector<16x512xbf16>, vector<512x768xbf16>, vector<16x768xf32> -> vector<16x768xf32>
    %7 = arith.addf %3, %6 : vector<16x768xf32>
    %c0_6 = arith.constant 0 : index
    %c0_7 = arith.constant 0 : index
    %8 = vector.load %arg9[%c0_6, %c0_7] : memref<16x768xf32, #tpu.memory_space<vmem>>, vector<16x768xf32>
    tpu.vector_store %arg9[%c0_6, %c0_7], %7 {strides = array<i32>} : memref<16x768xf32, #tpu.memory_space<vmem>>, vector<16x768xf32>,
    %c5_i32 = arith.constant 5 : i32
    %9 = arith.cmpi eq, %arg1, %c5_i32 : i32
    %10 = arith.extui %9 : i1 to i32
    %c0_i32_8 = arith.constant 0 : i32
    %11 = arith.cmpi ne, %10, %c0_i32_8 : i32
    scf.if %11 {
      %c0_9 = arith.constant 0 : index
      %c0_10 = arith.constant 0 : index
      %12 = vector.load %arg9[%c0_9, %c0_10] : memref<16x768xf32, #tpu.memory_space<vmem>>, vector<16x768xf32>
      %c0_11 = arith.constant 0 : index
      %c0_12 = arith.constant 0 : index
      %13 = vector.load %arg4[%c0_11, %c0_12] : memref<1x768xf32, #tpu.memory_space<vmem>>, vector<1x768xf32>
      %14 = vector.broadcast %13 : vector<1x768xf32> to vector<16x768xf32>
      %15 = arith.addf %12, %14 : vector<16x768xf32>
      %c0_13 = arith.constant 0 : index
      %c0_14 = arith.constant 0 : index
      %16 = vector.load %arg5[%c0_13, %c0_14] : memref<16x768xbf16, #tpu.memory_space<vmem>>, vector<16x768xbf16>
      %17 = arith.extf %16 : vector<16x768xbf16> to vector<16x768xf32>
      %18 = arith.addf %15, %17 : vector<16x768xf32>
      %cst_15 = arith.constant dense<0.000000e+00> : vector<16xf32>
      %19 = vector.multi_reduction <add>, %18, %cst_15 [1] : vector<16x768xf32> to vector<16xf32>
      %20 = vector.shape_cast %19 : vector<16xf32> to vector<16x1xf32>
      %cst_16 = arith.constant 7.680000e+02 : f32
      %21 = vector.broadcast %cst_16 : f32 to vector<16x1xf32>
      %22 = arith.divf %20, %21 : vector<16x1xf32>
      %23 = vector.broadcast %22 : vector<16x1xf32> to vector<16x768xf32>
      %24 = arith.subf %18, %23 : vector<16x768xf32>
      %25 = arith.mulf %24, %24 : vector<16x768xf32>
      %cst_17 = arith.constant dense<0.000000e+00> : vector<16xf32>
      %26 = vector.multi_reduction <add>, %25, %cst_17 [1] : vector<16x768xf32> to vector<16xf32>
      %27 = vector.shape_cast %26 : vector<16xf32> to vector<16x1xf32>
      %cst_18 = arith.constant 7.680000e+02 : f32
      %28 = vector.broadcast %cst_18 : f32 to vector<16x1xf32>
      %29 = arith.divf %27, %28 : vector<16x1xf32>
      %30 = vector.broadcast %22 : vector<16x1xf32> to vector<16x768xf32>
      %31 = arith.subf %18, %30 : vector<16x768xf32>
      %cst_19 = arith.constant 9.99999996E-13 : f32
      %32 = vector.broadcast %cst_19 : f32 to vector<16x1xf32>
      %33 = arith.addf %29, %32 : vector<16x1xf32>
      %34 = math.rsqrt %33 : vector<16x1xf32>
      %35 = vector.broadcast %34 : vector<16x1xf32> to vector<16x768xf32>
      %36 = arith.mulf %31, %35 : vector<16x768xf32>
      %c0_20 = arith.constant 0 : index
      %c0_21 = arith.constant 0 : index
      %37 = vector.load %arg6[%c0_20, %c0_21] : memref<1x768xf32, #tpu.memory_space<vmem>>, vector<1x768xf32>
      %38 = vector.broadcast %37 : vector<1x768xf32> to vector<16x768xf32>
      %39 = arith.mulf %36, %38 : vector<16x768xf32>
      %c0_22 = arith.constant 0 : index
      %c0_23 = arith.constant 0 : index
      %40 = vector.load %arg7[%c0_22, %c0_23] : memref<1x768xf32, #tpu.memory_space<vmem>>, vector<1x768xf32>
      %41 = vector.broadcast %40 : vector<1x768xf32> to vector<16x768xf32>
      %42 = arith.addf %39, %41 : vector<16x768xf32>
      %43 = arith.truncf %42 : vector<16x768xf32> to vector<16x768xbf16>
      %c0_24 = arith.constant 0 : index
      %c0_25 = arith.constant 0 : index
      %44 = vector.load %arg8[%c0_24, %c0_25] : memref<16x768xbf16, #tpu.memory_space<vmem>>, vector<16x768xbf16>
      tpu.vector_store %arg8[%c0_24, %c0_25], %43 {strides = array<i32>} : memref<16x768xbf16, #tpu.memory_space<vmem>>, vector<16x768xbf16>,
    } else {
    }
    return
  }
  func.func @transform_0(%arg0: i32, %arg1: i32) -> (i32, i32) {
    %c0_i32 = arith.constant 0 : i32
    return %arg0, %arg1 : i32, i32
  }
  func.func @transform_1(%arg0: i32, %arg1: i32) -> (i32, i32) {
    %c0_i32 = arith.constant 0 : i32
    %c0_i32_0 = arith.constant 0 : i32
    return %arg1, %c0_i32 : i32, i32
  }
  func.func @transform_2(%arg0: i32, %arg1: i32) -> (i32, i32) {
    %c0_i32 = arith.constant 0 : i32
    %c0_i32_0 = arith.constant 0 : i32
    %c0_i32_1 = arith.constant 0 : i32
    return %c0_i32, %c0_i32_0 : i32, i32
  }
  func.func @transform_3(%arg0: i32, %arg1: i32) -> (i32, i32) {
    %c0_i32 = arith.constant 0 : i32
    %c0_i32_0 = arith.constant 0 : i32
    return %arg0, %c0_i32 : i32, i32
  }
  func.func @transform_4(%arg0: i32, %arg1: i32) -> (i32, i32) {
    %c0_i32 = arith.constant 0 : i32
    %c0_i32_0 = arith.constant 0 : i32
    %c0_i32_1 = arith.constant 0 : i32
    return %c0_i32, %c0_i32_0 : i32, i32
  }
  func.func @transform_5(%arg0: i32, %arg1: i32) -> (i32, i32) {
    %c0_i32 = arith.constant 0 : i32
    %c0_i32_0 = arith.constant 0 : i32
    %c0_i32_1 = arith.constant 0 : i32
    return %c0_i32, %c0_i32_0 : i32, i32
  }
  func.func @transform_6(%arg0: i32, %arg1: i32) -> (i32, i32) {
    %c0_i32 = arith.constant 0 : i32
    %c0_i32_0 = arith.constant 0 : i32
    return %arg0, %c0_i32 : i32, i32
  }
}

module attributes {stable_mosaic.version = 11 : i64} {
  func.func @_flash_attn_kernel(%arg0: i32, %arg1: i32, %arg2: i32, %arg3: i32, %arg4: memref<1x8x128xbf16, #tpu.memory_space<vmem>>, %arg5: memref<1x8x128xbf16, #tpu.memory_space<vmem>>, %arg6: memref<1x8x128xbf16, #tpu.memory_space<vmem>>, %arg7: memref<1x1x8xf32, #tpu.memory_space<vmem>>, %arg8: memref<1x8x128xbf16, #tpu.memory_space<vmem>>, %arg9: memref<2x8x1xf32, #tpu.memory_space<vmem>>, %arg10: memref<2x8x1xf32, #tpu.memory_space<vmem>>, %arg11: memref<2x8x64xf32, #tpu.memory_space<vmem>>) attributes {dimension_semantics = [#tpu.dimension_semantics<parallel>, #tpu.dimension_semantics<parallel>, #tpu.dimension_semantics<parallel>, #tpu.dimension_semantics<arbitrary>], iteration_bounds = array<i64: 2, 6, 1, 1>, scalar_prefetch = 0 : i64, scratch_operands = 3 : i64, tpu.core_type = #tpu.core_type<tc>, window_params = [{transform_indices = @transform_0, window_bounds = array<i64: 1, 8, 128>}, {transform_indices = @transform_1, window_bounds = array<i64: 1, 8, 128>}, {transform_indices = @transform_2, window_bounds = array<i64: 1, 8, 128>}, {transform_indices = @transform_3, window_bounds = array<i64: 1, 1, 8>}, {transform_indices = @transform_4, window_bounds = array<i64: 1, 8, 128>}]} {
    %c0_i32 = arith.constant 0 : i32
    %0 = arith.cmpi eq, %arg3, %c0_i32 : i32
    %1 = arith.extui %0 : i1 to i32
    %c0_i32_0 = arith.constant 0 : i32
    %2 = arith.cmpi ne, %1, %c0_i32_0 : i32
    scf.if %2 {
      %cst_60 = arith.constant -1.000000e+30 : f32
      %98 = vector.broadcast %cst_60 : f32 to vector<2x8x1xf32>
      %c0_61 = arith.constant 0 : index
      %c0_62 = arith.constant 0 : index
      %c0_63 = arith.constant 0 : index
      %99 = vector.load %arg9[%c0_61, %c0_62, %c0_63] : memref<2x8x1xf32, #tpu.memory_space<vmem>>, vector<2x8x1xf32>
      tpu.vector_store %arg9[%c0_61, %c0_62, %c0_63], %98 {strides = array<i32>} : memref<2x8x1xf32, #tpu.memory_space<vmem>>, vector<2x8x1xf32>,
      %cst_64 = arith.constant 0.000000e+00 : f32
      %100 = vector.broadcast %cst_64 : f32 to vector<2x8x1xf32>
      %c0_65 = arith.constant 0 : index
      %c0_66 = arith.constant 0 : index
      %c0_67 = arith.constant 0 : index
      %101 = vector.load %arg10[%c0_65, %c0_66, %c0_67] : memref<2x8x1xf32, #tpu.memory_space<vmem>>, vector<2x8x1xf32>
      tpu.vector_store %arg10[%c0_65, %c0_66, %c0_67], %100 {strides = array<i32>} : memref<2x8x1xf32, #tpu.memory_space<vmem>>, vector<2x8x1xf32>,
      %cst_68 = arith.constant 0.000000e+00 : f32
      %102 = vector.broadcast %cst_68 : f32 to vector<2x8x64xf32>
      %c0_69 = arith.constant 0 : index
      %c0_70 = arith.constant 0 : index
      %c0_71 = arith.constant 0 : index
      %103 = vector.load %arg11[%c0_69, %c0_70, %c0_71] : memref<2x8x64xf32, #tpu.memory_space<vmem>>, vector<2x8x64xf32>
      tpu.vector_store %arg11[%c0_69, %c0_70, %c0_71], %102 {strides = array<i32>} : memref<2x8x64xf32, #tpu.memory_space<vmem>>, vector<2x8x64xf32>,
    } else {
    }
    %c0 = arith.constant 0 : index
    %c0_1 = arith.constant 0 : index
    %c0_2 = arith.constant 0 : index
    %3 = vector.load %arg4[%c0, %c0_1, %c0_2] : memref<1x8x128xbf16, #tpu.memory_space<vmem>>, vector<1x8x128xbf16>
    %4 = vector.shape_cast %3 : vector<1x8x128xbf16> to vector<8x128xbf16>
    %c0_3 = arith.constant 0 : index
    %c0_4 = arith.constant 0 : index
    %c0_5 = arith.constant 0 : index
    %5 = vector.load %arg5[%c0_3, %c0_4, %c0_5] : memref<1x8x128xbf16, #tpu.memory_space<vmem>>, vector<1x8x128xbf16>
    %6 = vector.shape_cast %5 : vector<1x8x128xbf16> to vector<8x128xbf16>
    %c0_6 = arith.constant 0 : index
    %c0_7 = arith.constant 0 : index
    %c0_8 = arith.constant 0 : index
    %7 = vector.load %arg6[%c0_6, %c0_7, %c0_8] : memref<1x8x128xbf16, #tpu.memory_space<vmem>>, vector<1x8x128xbf16>
    %8 = vector.shape_cast %7 : vector<1x8x128xbf16> to vector<8x128xbf16>
    %c0_9 = arith.constant 0 : index
    %c0_10 = arith.constant 0 : index
    %c0_11 = arith.constant 0 : index
    %9 = vector.load %arg7[%c0_9, %c0_10, %c0_11] : memref<1x1x8xf32, #tpu.memory_space<vmem>>, vector<1x1x8xf32>
    %10 = vector.shape_cast %9 : vector<1x1x8xf32> to vector<1x8xf32>
    %cst = arith.constant 1.000000e+00 : f32
    %11 = vector.broadcast %cst : f32 to vector<1x8xf32>
    %12 = arith.subf %10, %11 : vector<1x8xf32>
    %cst_12 = arith.constant 1.000000e+09 : f32
    %13 = vector.broadcast %cst_12 : f32 to vector<1x8xf32>
    %14 = arith.mulf %12, %13 : vector<1x8xf32>
    %15 = vector.extract_strided_slice %4 {offsets = [0, 0], sizes = [8, 64], strides = [1, 1]} : vector<8x128xbf16> to vector<8x64xbf16>
    %16 = vector.extract_strided_slice %6 {offsets = [0, 0], sizes = [8, 64], strides = [1, 1]} : vector<8x128xbf16> to vector<8x64xbf16>
    %cst_13 = arith.constant dense<0.000000e+00> : vector<8x8xf32>
    %17 = tpu.matmul %15, %16, %cst_13 {dimension_numbers = #tpu.dot_dimension_numbers<[1], [1], [0], [0], [0, 0, 1, 0], [], []>} : vector<8x64xbf16>, vector<8x64xbf16>, vector<8x8xf32> -> vector<8x8xf32>
    %cst_14 = arith.constant 1.250000e-01 : f32
    %18 = vector.broadcast %cst_14 : f32 to vector<8x8xf32>
    %19 = arith.mulf %17, %18 : vector<8x8xf32>
    %20 = vector.broadcast %14 : vector<1x8xf32> to vector<8x8xf32>
    %21 = arith.addf %19, %20 : vector<8x8xf32>
    %c0_15 = arith.constant 0 : index
    %c0_16 = arith.constant 0 : index
    %c0_17 = arith.constant 0 : index
    %22 = vector.load %arg9[%c0_15, %c0_16, %c0_17] : memref<2x8x1xf32, #tpu.memory_space<vmem>>, vector<1x8x1xf32>
    %23 = vector.shape_cast %22 : vector<1x8x1xf32> to vector<8x1xf32>
    %cst_18 = arith.constant dense<0xFF800000> : vector<8xf32>
    %24 = vector.multi_reduction <maximumf>, %21, %cst_18 [1] : vector<8x8xf32> to vector<8xf32>
    %25 = vector.shape_cast %24 : vector<8xf32> to vector<8x1xf32>
    %26 = arith.maximumf %23, %25 : vector<8x1xf32>
    %27 = arith.subf %23, %26 : vector<8x1xf32>
    %28 = math.exp %27 : vector<8x1xf32>
    %29 = vector.broadcast %26 : vector<8x1xf32> to vector<8x8xf32>
    %30 = arith.subf %21, %29 : vector<8x8xf32>
    %31 = math.exp %30 : vector<8x8xf32>
    %c0_19 = arith.constant 0 : index
    %c0_20 = arith.constant 0 : index
    %c0_21 = arith.constant 0 : index
    %32 = vector.load %arg10[%c0_19, %c0_20, %c0_21] : memref<2x8x1xf32, #tpu.memory_space<vmem>>, vector<1x8x1xf32>
    %33 = vector.shape_cast %32 : vector<1x8x1xf32> to vector<8x1xf32>
    %34 = arith.mulf %28, %33 : vector<8x1xf32>
    %cst_22 = arith.constant dense<0.000000e+00> : vector<8xf32>
    %35 = vector.multi_reduction <add>, %31, %cst_22 [1] : vector<8x8xf32> to vector<8xf32>
    %36 = vector.shape_cast %35 : vector<8xf32> to vector<8x1xf32>
    %37 = arith.addf %34, %36 : vector<8x1xf32>
    %c0_23 = arith.constant 0 : index
    %c0_24 = arith.constant 0 : index
    %c0_25 = arith.constant 0 : index
    %38 = vector.load %arg10[%c0_23, %c0_24, %c0_25] : memref<2x8x1xf32, #tpu.memory_space<vmem>>, vector<1x8x1xf32>
    %39 = vector.shape_cast %38 : vector<1x8x1xf32> to vector<8x1xf32>
    %40 = vector.shape_cast %37 : vector<8x1xf32> to vector<1x8x1xf32>
    tpu.vector_store %arg10[%c0_23, %c0_24, %c0_25], %40 {strides = array<i32>} : memref<2x8x1xf32, #tpu.memory_space<vmem>>, vector<1x8x1xf32>,
    %c0_26 = arith.constant 0 : index
    %c0_27 = arith.constant 0 : index
    %c0_28 = arith.constant 0 : index
    %41 = vector.load %arg11[%c0_26, %c0_27, %c0_28] : memref<2x8x64xf32, #tpu.memory_space<vmem>>, vector<1x8x64xf32>
    %42 = vector.shape_cast %41 : vector<1x8x64xf32> to vector<8x64xf32>
    %43 = vector.broadcast %28 : vector<8x1xf32> to vector<8x64xf32>
    %44 = arith.mulf %43, %42 : vector<8x64xf32>
    %45 = arith.truncf %31 : vector<8x8xf32> to vector<8x8xbf16>
    %46 = vector.extract_strided_slice %8 {offsets = [0, 0], sizes = [8, 64], strides = [1, 1]} : vector<8x128xbf16> to vector<8x64xbf16>
    %cst_29 = arith.constant dense<0.000000e+00> : vector<8x64xf32>
    %47 = tpu.matmul %45, %46, %cst_29 {dimension_numbers = #tpu.dot_dimension_numbers<[1], [0], [0], [1], [0, 0, 1, 1], [], []>} : vector<8x8xbf16>, vector<8x64xbf16>, vector<8x64xf32> -> vector<8x64xf32>
    %48 = arith.addf %44, %47 : vector<8x64xf32>
    %c0_30 = arith.constant 0 : index
    %c0_31 = arith.constant 0 : index
    %c0_32 = arith.constant 0 : index
    %49 = vector.load %arg11[%c0_30, %c0_31, %c0_32] : memref<2x8x64xf32, #tpu.memory_space<vmem>>, vector<1x8x64xf32>
    %50 = vector.shape_cast %49 : vector<1x8x64xf32> to vector<8x64xf32>
    %51 = vector.shape_cast %48 : vector<8x64xf32> to vector<1x8x64xf32>
    tpu.vector_store %arg11[%c0_30, %c0_31, %c0_32], %51 {strides = array<i32>} : memref<2x8x64xf32, #tpu.memory_space<vmem>>, vector<1x8x64xf32>,
    %c0_33 = arith.constant 0 : index
    %c0_34 = arith.constant 0 : index
    %c0_35 = arith.constant 0 : index
    %52 = vector.load %arg9[%c0_33, %c0_34, %c0_35] : memref<2x8x1xf32, #tpu.memory_space<vmem>>, vector<1x8x1xf32>
    %53 = vector.shape_cast %52 : vector<1x8x1xf32> to vector<8x1xf32>
    %54 = vector.shape_cast %26 : vector<8x1xf32> to vector<1x8x1xf32>
    tpu.vector_store %arg9[%c0_33, %c0_34, %c0_35], %54 {strides = array<i32>} : memref<2x8x1xf32, #tpu.memory_space<vmem>>, vector<1x8x1xf32>,
    %55 = vector.extract_strided_slice %4 {offsets = [0, 64], sizes = [8, 64], strides = [1, 1]} : vector<8x128xbf16> to vector<8x64xbf16>
    %56 = vector.extract_strided_slice %6 {offsets = [0, 64], sizes = [8, 64], strides = [1, 1]} : vector<8x128xbf16> to vector<8x64xbf16>
    %cst_36 = arith.constant dense<0.000000e+00> : vector<8x8xf32>
    %57 = tpu.matmul %55, %56, %cst_36 {dimension_numbers = #tpu.dot_dimension_numbers<[1], [1], [0], [0], [0, 0, 1, 0], [], []>} : vector<8x64xbf16>, vector<8x64xbf16>, vector<8x8xf32> -> vector<8x8xf32>
    %cst_37 = arith.constant 1.250000e-01 : f32
    %58 = vector.broadcast %cst_37 : f32 to vector<8x8xf32>
    %59 = arith.mulf %57, %58 : vector<8x8xf32>
    %60 = vector.broadcast %14 : vector<1x8xf32> to vector<8x8xf32>
    %61 = arith.addf %59, %60 : vector<8x8xf32>
    %c1 = arith.constant 1 : index
    %c0_38 = arith.constant 0 : index
    %c0_39 = arith.constant 0 : index
    %62 = vector.load %arg9[%c1, %c0_38, %c0_39] : memref<2x8x1xf32, #tpu.memory_space<vmem>>, vector<1x8x1xf32>
    %63 = vector.shape_cast %62 : vector<1x8x1xf32> to vector<8x1xf32>
    %cst_40 = arith.constant dense<0xFF800000> : vector<8xf32>
    %64 = vector.multi_reduction <maximumf>, %61, %cst_40 [1] : vector<8x8xf32> to vector<8xf32>
    %65 = vector.shape_cast %64 : vector<8xf32> to vector<8x1xf32>
    %66 = arith.maximumf %63, %65 : vector<8x1xf32>
    %67 = arith.subf %63, %66 : vector<8x1xf32>
    %68 = math.exp %67 : vector<8x1xf32>
    %69 = vector.broadcast %66 : vector<8x1xf32> to vector<8x8xf32>
    %70 = arith.subf %61, %69 : vector<8x8xf32>
    %71 = math.exp %70 : vector<8x8xf32>
    %c1_41 = arith.constant 1 : index
    %c0_42 = arith.constant 0 : index
    %c0_43 = arith.constant 0 : index
    %72 = vector.load %arg10[%c1_41, %c0_42, %c0_43] : memref<2x8x1xf32, #tpu.memory_space<vmem>>, vector<1x8x1xf32>
    %73 = vector.shape_cast %72 : vector<1x8x1xf32> to vector<8x1xf32>
    %74 = arith.mulf %68, %73 : vector<8x1xf32>
    %cst_44 = arith.constant dense<0.000000e+00> : vector<8xf32>
    %75 = vector.multi_reduction <add>, %71, %cst_44 [1] : vector<8x8xf32> to vector<8xf32>
    %76 = vector.shape_cast %75 : vector<8xf32> to vector<8x1xf32>
    %77 = arith.addf %74, %76 : vector<8x1xf32>
    %c1_45 = arith.constant 1 : index
    %c0_46 = arith.constant 0 : index
    %c0_47 = arith.constant 0 : index
    %78 = vector.load %arg10[%c1_45, %c0_46, %c0_47] : memref<2x8x1xf32, #tpu.memory_space<vmem>>, vector<1x8x1xf32>
    %79 = vector.shape_cast %78 : vector<1x8x1xf32> to vector<8x1xf32>
    %80 = vector.shape_cast %77 : vector<8x1xf32> to vector<1x8x1xf32>
    tpu.vector_store %arg10[%c1_45, %c0_46, %c0_47], %80 {strides = array<i32>} : memref<2x8x1xf32, #tpu.memory_space<vmem>>, vector<1x8x1xf32>,
    %c1_48 = arith.constant 1 : index
    %c0_49 = arith.constant 0 : index
    %c0_50 = arith.constant 0 : index
    %81 = vector.load %arg11[%c1_48, %c0_49, %c0_50] : memref<2x8x64xf32, #tpu.memory_space<vmem>>, vector<1x8x64xf32>
    %82 = vector.shape_cast %81 : vector<1x8x64xf32> to vector<8x64xf32>
    %83 = vector.broadcast %68 : vector<8x1xf32> to vector<8x64xf32>
    %84 = arith.mulf %83, %82 : vector<8x64xf32>
    %85 = arith.truncf %71 : vector<8x8xf32> to vector<8x8xbf16>
    %86 = vector.extract_strided_slice %8 {offsets = [0, 64], sizes = [8, 64], strides = [1, 1]} : vector<8x128xbf16> to vector<8x64xbf16>
    %cst_51 = arith.constant dense<0.000000e+00> : vector<8x64xf32>
    %87 = tpu.matmul %85, %86, %cst_51 {dimension_numbers = #tpu.dot_dimension_numbers<[1], [0], [0], [1], [0, 0, 1, 1], [], []>} : vector<8x8xbf16>, vector<8x64xbf16>, vector<8x64xf32> -> vector<8x64xf32>
    %88 = arith.addf %84, %87 : vector<8x64xf32>
    %c1_52 = arith.constant 1 : index
    %c0_53 = arith.constant 0 : index
    %c0_54 = arith.constant 0 : index
    %89 = vector.load %arg11[%c1_52, %c0_53, %c0_54] : memref<2x8x64xf32, #tpu.memory_space<vmem>>, vector<1x8x64xf32>
    %90 = vector.shape_cast %89 : vector<1x8x64xf32> to vector<8x64xf32>
    %91 = vector.shape_cast %88 : vector<8x64xf32> to vector<1x8x64xf32>
    tpu.vector_store %arg11[%c1_52, %c0_53, %c0_54], %91 {strides = array<i32>} : memref<2x8x64xf32, #tpu.memory_space<vmem>>, vector<1x8x64xf32>,
    %c1_55 = arith.constant 1 : index
    %c0_56 = arith.constant 0 : index
    %c0_57 = arith.constant 0 : index
    %92 = vector.load %arg9[%c1_55, %c0_56, %c0_57] : memref<2x8x1xf32, #tpu.memory_space<vmem>>, vector<1x8x1xf32>
    %93 = vector.shape_cast %92 : vector<1x8x1xf32> to vector<8x1xf32>
    %94 = vector.shape_cast %66 : vector<8x1xf32> to vector<1x8x1xf32>
    tpu.vector_store %arg9[%c1_55, %c0_56, %c0_57], %94 {strides = array<i32>} : memref<2x8x1xf32, #tpu.memory_space<vmem>>, vector<1x8x1xf32>,
    %c0_i32_58 = arith.constant 0 : i32
    %95 = arith.cmpi eq, %arg3, %c0_i32_58 : i32
    %96 = arith.extui %95 : i1 to i32
    %c0_i32_59 = arith.constant 0 : i32
    %97 = arith.cmpi ne, %96, %c0_i32_59 : i32
    scf.if %97 {
      %c0_60 = arith.constant 0 : index
      %c0_61 = arith.constant 0 : index
      %c0_62 = arith.constant 0 : index
      %98 = vector.load %arg11[%c0_60, %c0_61, %c0_62] : memref<2x8x64xf32, #tpu.memory_space<vmem>>, vector<1x8x64xf32>
      %99 = vector.shape_cast %98 : vector<1x8x64xf32> to vector<8x64xf32>
      %c0_63 = arith.constant 0 : index
      %c0_64 = arith.constant 0 : index
      %c0_65 = arith.constant 0 : index
      %100 = vector.load %arg10[%c0_63, %c0_64, %c0_65] : memref<2x8x1xf32, #tpu.memory_space<vmem>>, vector<1x8x1xf32>
      %101 = vector.shape_cast %100 : vector<1x8x1xf32> to vector<8x1xf32>
      %102 = tpu.reciprocal %101 {approx = true} : vector<8x1xf32> -> vector<8x1xf32>
      %103 = vector.broadcast %102 : vector<8x1xf32> to vector<8x64xf32>
      %104 = arith.mulf %99, %103 : vector<8x64xf32>
      %c1_66 = arith.constant 1 : index
      %c0_67 = arith.constant 0 : index
      %c0_68 = arith.constant 0 : index
      %105 = vector.load %arg11[%c1_66, %c0_67, %c0_68] : memref<2x8x64xf32, #tpu.memory_space<vmem>>, vector<1x8x64xf32>
      %106 = vector.shape_cast %105 : vector<1x8x64xf32> to vector<8x64xf32>
      %c1_69 = arith.constant 1 : index
      %c0_70 = arith.constant 0 : index
      %c0_71 = arith.constant 0 : index
      %107 = vector.load %arg10[%c1_69, %c0_70, %c0_71] : memref<2x8x1xf32, #tpu.memory_space<vmem>>, vector<1x8x1xf32>
      %108 = vector.shape_cast %107 : vector<1x8x1xf32> to vector<8x1xf32>
      %109 = tpu.reciprocal %108 {approx = true} : vector<8x1xf32> -> vector<8x1xf32>
      %110 = vector.broadcast %109 : vector<8x1xf32> to vector<8x64xf32>
      %111 = arith.mulf %106, %110 : vector<8x64xf32>
      %112 = tpu.concatenate %104, %111 in 1 : vector<8x64xf32>, vector<8x64xf32> -> vector<8x128xf32>
      %113 = arith.truncf %112 : vector<8x128xf32> to vector<8x128xbf16>
      %c0_72 = arith.constant 0 : index
      %c0_73 = arith.constant 0 : index
      %c0_74 = arith.constant 0 : index
      %114 = vector.load %arg8[%c0_72, %c0_73, %c0_74] : memref<1x8x128xbf16, #tpu.memory_space<vmem>>, vector<1x8x128xbf16>
      %115 = vector.shape_cast %114 : vector<1x8x128xbf16> to vector<8x128xbf16>
      %116 = vector.shape_cast %113 : vector<8x128xbf16> to vector<1x8x128xbf16>
      tpu.vector_store %arg8[%c0_72, %c0_73, %c0_74], %116 {strides = array<i32>} : memref<1x8x128xbf16, #tpu.memory_space<vmem>>, vector<1x8x128xbf16>,
    } else {
    }
    return
  }
  func.func @transform_0(%arg0: i32, %arg1: i32, %arg2: i32, %arg3: i32) -> (i32, i32, i32) {
    %c0_i32 = arith.constant 0 : i32
    return %arg0, %arg2, %arg1 : i32, i32, i32
  }
  func.func @transform_1(%arg0: i32, %arg1: i32, %arg2: i32, %arg3: i32) -> (i32, i32, i32) {
    %c6_i32 = arith.constant 6 : i32
    %0 = arith.addi %c6_i32, %arg1 : i32
    %c0_i32 = arith.constant 0 : i32
    return %arg0, %arg3, %0 : i32, i32, i32
  }
  func.func @transform_2(%arg0: i32, %arg1: i32, %arg2: i32, %arg3: i32) -> (i32, i32, i32) {
    %c12_i32 = arith.constant 12 : i32
    %0 = arith.addi %c12_i32, %arg1 : i32
    %c0_i32 = arith.constant 0 : i32
    return %arg0, %arg3, %0 : i32, i32, i32
  }
  func.func @transform_3(%arg0: i32, %arg1: i32, %arg2: i32, %arg3: i32) -> (i32, i32, i32) {
    %c0_i32 = arith.constant 0 : i32
    %c0_i32_0 = arith.constant 0 : i32
    return %arg0, %c0_i32, %arg3 : i32, i32, i32
  }
  func.func @transform_4(%arg0: i32, %arg1: i32, %arg2: i32, %arg3: i32) -> (i32, i32, i32) {
    %c0_i32 = arith.constant 0 : i32
    return %arg0, %arg2, %arg1 : i32, i32, i32
  }
}

module attributes {stable_mosaic.version = 11 : i64} {
  func.func @_matmul_res_ln_kernel(%arg0: i32, %arg1: i32, %arg2: memref<16x384xbf16, #tpu.memory_space<vmem>>, %arg3: memref<384x768xbf16, #tpu.memory_space<vmem>>, %arg4: memref<1x768xf32, #tpu.memory_space<vmem>>, %arg5: memref<16x768xbf16, #tpu.memory_space<vmem>>, %arg6: memref<1x768xf32, #tpu.memory_space<vmem>>, %arg7: memref<1x768xf32, #tpu.memory_space<vmem>>, %arg8: memref<16x768xbf16, #tpu.memory_space<vmem>>, %arg9: memref<16x768xf32, #tpu.memory_space<vmem>>) attributes {dimension_semantics = [#tpu.dimension_semantics<parallel>, #tpu.dimension_semantics<arbitrary>], iteration_bounds = array<i64: 1, 2>, scalar_prefetch = 0 : i64, scratch_operands = 1 : i64, tpu.core_type = #tpu.core_type<tc>, window_params = [{transform_indices = @transform_0, window_bounds = array<i64: 16, 384>}, {transform_indices = @transform_1, window_bounds = array<i64: 384, 768>}, {pipeline_mode = #tpu.pipeline_mode<synchronous>, transform_indices = @transform_2, window_bounds = array<i64: 1, 768>}, {transform_indices = @transform_3, window_bounds = array<i64: 16, 768>}, {pipeline_mode = #tpu.pipeline_mode<synchronous>, transform_indices = @transform_4, window_bounds = array<i64: 1, 768>}, {pipeline_mode = #tpu.pipeline_mode<synchronous>, transform_indices = @transform_5, window_bounds = array<i64: 1, 768>}, {transform_indices = @transform_6, window_bounds = array<i64: 16, 768>}]} {
    %c0_i32 = arith.constant 0 : i32
    %0 = arith.cmpi eq, %arg1, %c0_i32 : i32
    %1 = arith.extui %0 : i1 to i32
    %c0_i32_0 = arith.constant 0 : i32
    %2 = arith.cmpi ne, %1, %c0_i32_0 : i32
    scf.if %2 {
      %cst_9 = arith.constant 0.000000e+00 : f32
      %12 = vector.broadcast %cst_9 : f32 to vector<16x768xf32>
      %c0_10 = arith.constant 0 : index
      %c0_11 = arith.constant 0 : index
      %13 = vector.load %arg9[%c0_10, %c0_11] : memref<16x768xf32, #tpu.memory_space<vmem>>, vector<16x768xf32>
      tpu.vector_store %arg9[%c0_10, %c0_11], %12 {strides = array<i32>} : memref<16x768xf32, #tpu.memory_space<vmem>>, vector<16x768xf32>,
    } else {
    }
    %c0 = arith.constant 0 : index
    %c0_1 = arith.constant 0 : index
    %3 = vector.load %arg9[%c0, %c0_1] : memref<16x768xf32, #tpu.memory_space<vmem>>, vector<16x768xf32>
    %c0_2 = arith.constant 0 : index
    %c0_3 = arith.constant 0 : index
    %4 = vector.load %arg2[%c0_2, %c0_3] : memref<16x384xbf16, #tpu.memory_space<vmem>>, vector<16x384xbf16>
    %c0_4 = arith.constant 0 : index
    %c0_5 = arith.constant 0 : index
    %5 = vector.load %arg3[%c0_4, %c0_5] : memref<384x768xbf16, #tpu.memory_space<vmem>>, vector<384x768xbf16>
    %cst = arith.constant dense<0.000000e+00> : vector<16x768xf32>
    %6 = tpu.matmul %4, %5, %cst {dimension_numbers = #tpu.dot_dimension_numbers<[1], [0], [0], [1], [0, 0, 1, 1], [], []>} : vector<16x384xbf16>, vector<384x768xbf16>, vector<16x768xf32> -> vector<16x768xf32>
    %7 = arith.addf %3, %6 : vector<16x768xf32>
    %c0_6 = arith.constant 0 : index
    %c0_7 = arith.constant 0 : index
    %8 = vector.load %arg9[%c0_6, %c0_7] : memref<16x768xf32, #tpu.memory_space<vmem>>, vector<16x768xf32>
    tpu.vector_store %arg9[%c0_6, %c0_7], %7 {strides = array<i32>} : memref<16x768xf32, #tpu.memory_space<vmem>>, vector<16x768xf32>,
    %c1_i32 = arith.constant 1 : i32
    %9 = arith.cmpi eq, %arg1, %c1_i32 : i32
    %10 = arith.extui %9 : i1 to i32
    %c0_i32_8 = arith.constant 0 : i32
    %11 = arith.cmpi ne, %10, %c0_i32_8 : i32
    scf.if %11 {
      %c0_9 = arith.constant 0 : index
      %c0_10 = arith.constant 0 : index
      %12 = vector.load %arg9[%c0_9, %c0_10] : memref<16x768xf32, #tpu.memory_space<vmem>>, vector<16x768xf32>
      %c0_11 = arith.constant 0 : index
      %c0_12 = arith.constant 0 : index
      %13 = vector.load %arg4[%c0_11, %c0_12] : memref<1x768xf32, #tpu.memory_space<vmem>>, vector<1x768xf32>
      %14 = vector.broadcast %13 : vector<1x768xf32> to vector<16x768xf32>
      %15 = arith.addf %12, %14 : vector<16x768xf32>
      %c0_13 = arith.constant 0 : index
      %c0_14 = arith.constant 0 : index
      %16 = vector.load %arg5[%c0_13, %c0_14] : memref<16x768xbf16, #tpu.memory_space<vmem>>, vector<16x768xbf16>
      %17 = arith.extf %16 : vector<16x768xbf16> to vector<16x768xf32>
      %18 = arith.addf %15, %17 : vector<16x768xf32>
      %cst_15 = arith.constant dense<0.000000e+00> : vector<16xf32>
      %19 = vector.multi_reduction <add>, %18, %cst_15 [1] : vector<16x768xf32> to vector<16xf32>
      %20 = vector.shape_cast %19 : vector<16xf32> to vector<16x1xf32>
      %cst_16 = arith.constant 7.680000e+02 : f32
      %21 = vector.broadcast %cst_16 : f32 to vector<16x1xf32>
      %22 = arith.divf %20, %21 : vector<16x1xf32>
      %23 = vector.broadcast %22 : vector<16x1xf32> to vector<16x768xf32>
      %24 = arith.subf %18, %23 : vector<16x768xf32>
      %25 = arith.mulf %24, %24 : vector<16x768xf32>
      %cst_17 = arith.constant dense<0.000000e+00> : vector<16xf32>
      %26 = vector.multi_reduction <add>, %25, %cst_17 [1] : vector<16x768xf32> to vector<16xf32>
      %27 = vector.shape_cast %26 : vector<16xf32> to vector<16x1xf32>
      %cst_18 = arith.constant 7.680000e+02 : f32
      %28 = vector.broadcast %cst_18 : f32 to vector<16x1xf32>
      %29 = arith.divf %27, %28 : vector<16x1xf32>
      %30 = vector.broadcast %22 : vector<16x1xf32> to vector<16x768xf32>
      %31 = arith.subf %18, %30 : vector<16x768xf32>
      %cst_19 = arith.constant 9.99999996E-13 : f32
      %32 = vector.broadcast %cst_19 : f32 to vector<16x1xf32>
      %33 = arith.addf %29, %32 : vector<16x1xf32>
      %34 = math.rsqrt %33 : vector<16x1xf32>
      %35 = vector.broadcast %34 : vector<16x1xf32> to vector<16x768xf32>
      %36 = arith.mulf %31, %35 : vector<16x768xf32>
      %c0_20 = arith.constant 0 : index
      %c0_21 = arith.constant 0 : index
      %37 = vector.load %arg6[%c0_20, %c0_21] : memref<1x768xf32, #tpu.memory_space<vmem>>, vector<1x768xf32>
      %38 = vector.broadcast %37 : vector<1x768xf32> to vector<16x768xf32>
      %39 = arith.mulf %36, %38 : vector<16x768xf32>
      %c0_22 = arith.constant 0 : index
      %c0_23 = arith.constant 0 : index
      %40 = vector.load %arg7[%c0_22, %c0_23] : memref<1x768xf32, #tpu.memory_space<vmem>>, vector<1x768xf32>
      %41 = vector.broadcast %40 : vector<1x768xf32> to vector<16x768xf32>
      %42 = arith.addf %39, %41 : vector<16x768xf32>
      %43 = arith.truncf %42 : vector<16x768xf32> to vector<16x768xbf16>
      %c0_24 = arith.constant 0 : index
      %c0_25 = arith.constant 0 : index
      %44 = vector.load %arg8[%c0_24, %c0_25] : memref<16x768xbf16, #tpu.memory_space<vmem>>, vector<16x768xbf16>
      tpu.vector_store %arg8[%c0_24, %c0_25], %43 {strides = array<i32>} : memref<16x768xbf16, #tpu.memory_space<vmem>>, vector<16x768xbf16>,
    } else {
    }
    return
  }
  func.func @transform_0(%arg0: i32, %arg1: i32) -> (i32, i32) {
    %c0_i32 = arith.constant 0 : i32
    return %arg0, %arg1 : i32, i32
  }
  func.func @transform_1(%arg0: i32, %arg1: i32) -> (i32, i32) {
    %c0_i32 = arith.constant 0 : i32
    %c0_i32_0 = arith.constant 0 : i32
    return %arg1, %c0_i32 : i32, i32
  }
  func.func @transform_2(%arg0: i32, %arg1: i32) -> (i32, i32) {
    %c0_i32 = arith.constant 0 : i32
    %c0_i32_0 = arith.constant 0 : i32
    %c0_i32_1 = arith.constant 0 : i32
    return %c0_i32, %c0_i32_0 : i32, i32
  }
  func.func @transform_3(%arg0: i32, %arg1: i32) -> (i32, i32) {
    %c0_i32 = arith.constant 0 : i32
    %c0_i32_0 = arith.constant 0 : i32
    return %arg0, %c0_i32 : i32, i32
  }
  func.func @transform_4(%arg0: i32, %arg1: i32) -> (i32, i32) {
    %c0_i32 = arith.constant 0 : i32
    %c0_i32_0 = arith.constant 0 : i32
    %c0_i32_1 = arith.constant 0 : i32
    return %c0_i32, %c0_i32_0 : i32, i32
  }
  func.func @transform_5(%arg0: i32, %arg1: i32) -> (i32, i32) {
    %c0_i32 = arith.constant 0 : i32
    %c0_i32_0 = arith.constant 0 : i32
    %c0_i32_1 = arith.constant 0 : i32
    return %c0_i32, %c0_i32_0 : i32, i32
  }
  func.func @transform_6(%arg0: i32, %arg1: i32) -> (i32, i32) {
    %c0_i32 = arith.constant 0 : i32
    %c0_i32_0 = arith.constant 0 : i32
    return %arg0, %c0_i32 : i32, i32
  }
}

module attributes {stable_mosaic.version = 11 : i64} {
  func.func @_head_kernel(%arg0: memref<2x8x768xbf16, #tpu.memory_space<vmem>>, %arg1: memref<768x32xf32, #tpu.memory_space<vmem>>, %arg2: memref<1x32xf32, #tpu.memory_space<vmem>>, %arg3: memref<32x128xf32, #tpu.memory_space<vmem>>, %arg4: memref<1x128xf32, #tpu.memory_space<vmem>>, %arg5: memref<32x128xf32, #tpu.memory_space<vmem>>, %arg6: memref<1x128xf32, #tpu.memory_space<vmem>>, %arg7: memref<2x128xf32, #tpu.memory_space<vmem>>) attributes {dimension_semantics = [], scalar_prefetch = 0 : i64, scratch_operands = 0 : i64, tpu.core_type = #tpu.core_type<tc>} {
    %c0 = arith.constant 0 : index
    %c0_0 = arith.constant 0 : index
    %c0_1 = arith.constant 0 : index
    %0 = vector.load %arg0[%c0, %c0_0, %c0_1] : memref<2x8x768xbf16, #tpu.memory_space<vmem>>, vector<2x8x768xbf16>
    %1 = arith.extf %0 : vector<2x8x768xbf16> to vector<2x8x768xf32>
    %cst = arith.constant dense<0.000000e+00> : vector<2x768xf32>
    %2 = vector.multi_reduction <add>, %1, %cst [1] : vector<2x8x768xf32> to vector<2x768xf32>
    %cst_2 = arith.constant 8.000000e+00 : f32
    %3 = vector.broadcast %cst_2 : f32 to vector<2x768xf32>
    %4 = arith.divf %2, %3 : vector<2x768xf32>
    %c0_3 = arith.constant 0 : index
    %c0_4 = arith.constant 0 : index
    %5 = vector.load %arg1[%c0_3, %c0_4] : memref<768x32xf32, #tpu.memory_space<vmem>>, vector<768x32xf32>
    %cst_5 = arith.constant dense<0.000000e+00> : vector<2x32xf32>
    %6 = tpu.matmul %4, %5, %cst_5 {dimension_numbers = #tpu.dot_dimension_numbers<[1], [0], [0], [1], [0, 0, 1, 1], [], []>} : vector<2x768xf32>, vector<768x32xf32>, vector<2x32xf32> -> vector<2x32xf32>
    %c0_6 = arith.constant 0 : index
    %c0_7 = arith.constant 0 : index
    %7 = vector.load %arg2[%c0_6, %c0_7] : memref<1x32xf32, #tpu.memory_space<vmem>>, vector<1x32xf32>
    %8 = vector.broadcast %7 : vector<1x32xf32> to vector<2x32xf32>
    %9 = arith.addf %6, %8 : vector<2x32xf32>
    %cst_8 = arith.constant 0.000000e+00 : f32
    %10 = vector.broadcast %cst_8 : f32 to vector<2x32xf32>
    %11 = arith.cmpf ogt, %9, %10 : vector<2x32xf32>
    %cst_9 = arith.constant 0.00999999977 : f32
    %12 = vector.broadcast %cst_9 : f32 to vector<2x32xf32>
    %13 = arith.mulf %12, %9 : vector<2x32xf32>
    %14 = arith.select %11, %9, %13 : vector<2x32xi1>, vector<2x32xf32>
    %c0_10 = arith.constant 0 : index
    %c0_11 = arith.constant 0 : index
    %15 = vector.load %arg3[%c0_10, %c0_11] : memref<32x128xf32, #tpu.memory_space<vmem>>, vector<32x128xf32>
    %cst_12 = arith.constant dense<0.000000e+00> : vector<2x128xf32>
    %16 = tpu.matmul %14, %15, %cst_12 {dimension_numbers = #tpu.dot_dimension_numbers<[1], [0], [0], [1], [0, 0, 1, 1], [], []>} : vector<2x32xf32>, vector<32x128xf32>, vector<2x128xf32> -> vector<2x128xf32>
    %c0_13 = arith.constant 0 : index
    %c0_14 = arith.constant 0 : index
    %17 = vector.load %arg4[%c0_13, %c0_14] : memref<1x128xf32, #tpu.memory_space<vmem>>, vector<1x128xf32>
    %18 = vector.broadcast %17 : vector<1x128xf32> to vector<2x128xf32>
    %19 = arith.addf %16, %18 : vector<2x128xf32>
    %c0_15 = arith.constant 0 : index
    %c0_16 = arith.constant 0 : index
    %20 = vector.load %arg5[%c0_15, %c0_16] : memref<32x128xf32, #tpu.memory_space<vmem>>, vector<32x128xf32>
    %cst_17 = arith.constant dense<0.000000e+00> : vector<2x128xf32>
    %21 = tpu.matmul %9, %20, %cst_17 {dimension_numbers = #tpu.dot_dimension_numbers<[1], [0], [0], [1], [0, 0, 1, 1], [], []>} : vector<2x32xf32>, vector<32x128xf32>, vector<2x128xf32> -> vector<2x128xf32>
    %22 = arith.addf %19, %21 : vector<2x128xf32>
    %c0_18 = arith.constant 0 : index
    %c0_19 = arith.constant 0 : index
    %23 = vector.load %arg6[%c0_18, %c0_19] : memref<1x128xf32, #tpu.memory_space<vmem>>, vector<1x128xf32>
    %24 = vector.broadcast %23 : vector<1x128xf32> to vector<2x128xf32>
    %25 = arith.addf %22, %24 : vector<2x128xf32>
    %c0_20 = arith.constant 0 : index
    %c0_21 = arith.constant 0 : index
    %26 = vector.load %arg7[%c0_20, %c0_21] : memref<2x128xf32, #tpu.memory_space<vmem>>, vector<2x128xf32>
    tpu.vector_store %arg7[%c0_20, %c0_21], %25 {strides = array<i32>} : memref<2x128xf32, #tpu.memory_space<vmem>>, vector<2x128xf32>,
    return
  }
}

</mosaic_0001>

<bundles_post_ra>
// kernel: multitask_forward.12
= control target key start
LH: loop header
LB: loop body
LE: loop exit
PB: predicated region body
PF: predicated region fallthrough
CT: control target
= control target key end

     0   :  { %9 = vsyncpa [#allocation6], 0  ;;  %s1423_s0 = inlined_call_operand.vmem [shape: bf16[2,8,2304], index: 0, kind: input, shape index: {}, may-alias: {0,1,2}]   ;;  %s1424_s1 = inlined_call_operand.vmem [shape: bf16[2,8,2304], index: 1, kind: input, shape index: {}, may-alias: {0,1,2}]   ;;  %s1425_s2 = inlined_call_operand.vmem [shape: bf16[2,8,2304], index: 2, kind: input, shape index: {}, may-alias: {0,1,2}]   ;;  %s1426_s3 = inlined_call_operand.hbm [shape: f32[2,1,8], index: 3, kind: input, shape index: {}]   ;;  %s1427_s4 = inlined_call_operand.vmem [shape: bf16[2,8,768], index: 4, kind: output, shape index: {}]  }
   0x1   :  { %11 = vsyncpa [#allocation6 + $0x1], 0  ;;  %s1197_s15 = smov 0   ;;  %s1199_s16 = smov 0  }
   0x2   :  { %s1201_s17 = smov 0   ;;  %s1203_s18 = smov 0  }
   0x3   :  { %s1205_s19 = smov 0   ;;  %s1207_s20 = smov 0  }
   0x4   :  { %s1209_s21 = smov 0   ;;  %s1211_s22 = smov 0  }
   0x5 LB: > { %s923_s23 = sadd.s32 4294967295, %s1164_s22   ;;  %s39_s24 = sadd.s32 1, %s1156_s20  ;;  %s1164_s22 = sphi %s1211_s22, %s17_s22   ;;  %s1160_s21 = sphi %s1209_s21, %s1439_s21   ;;  %s1156_s20 = sphi %s1207_s20, %s1438_s20   ;;  %s1152_s19 = sphi %s1205_s19, %s1437_s19   ;;  %s1148_s18 = sphi %s1203_s18, %s1436_s18   ;;  %s1144_s17 = sphi %s1201_s17, %s1435_s17   ;;  %s1140_s16 = sphi %s1199_s16, %s1434_s16   ;;  %s1136_s15 = sphi %s1197_s15, %s1433_s15  }
   0x6   : > { %p41_p0 = scmp.ge.s32.totalorder %s39_s24, 6  ;;  %s43_s25 = sadd.s32 1, %s1160_s21 }
   0x7   : > { %s146_s26 = sadd.s32 1, %s1144_s17  ;;  %p153_p1 = scmp.ne.s32.totalorder %s1144_s17, %s1140_s16 }
   0x8   : > { %s1441_s24 = smov (%p41_p0, %s39_s24), 0  ;;  %s1443_s25 = smov (!%p41_p0, %s43_s25), %s1160_s21 }
   0x9   : > { %p154_p2 = scmp.eq.s32.totalorder %s1164_s22, 0  ;;  %p159_p3 = scmp.ne.s32.totalorder %s1140_s16, %s1136_s15 }
   0xa   : > { %p45_p4 = scmp.ge.s32.totalorder %s1443_s25, 2  ;;  %p160_p5 = scmp.eq.s32.totalorder %s923_s23, 0 }
   0xb   : > { %p1246_p6 = por %p154_p2, %p153_p1  ;;  %p983_p8 = scmp.lt.s32.totalorder %s1164_s22, 12 }
   0xc   : > { %s1445_s25 = smov (%p45_p4, %s1443_s25), 0  ;;  %p1252_p7 = por %p160_p5, %p159_p3 }
   0xd   : > { %s141_s29 = ssub.s32 %s1160_s21, %s1445_s25  ;;  %s262_s30 = sand.u32 1, %s1144_s17  }
   0xe   : > { %p144_p9 = scmp.eq.s32.totalorder %s141_s29, 0  ;;  %s927_s5 = sshll.u32 %s1160_s21, 4 }
   0xf   : > { %s1267_s9 = scalar_lea.hbm %s1426_s3, %s927_s5  ;;  %s265_s10 = scalar_lea.vmem [#allocation5], %s262_s30 }
  0x10   : > { %s1262_s6 = scalar_select %p144_p9, %s1144_s17, %s146_s26  }
  0x11   : > { %s273_s11 = sshll.u32 %s265_s10, 4  ;;  %p1273_p10 = pnand %p983_p8, %p1246_p6  ;;  %s1269_s11 = int_to_ptr.vmem [resolvable:$true] %s273_s11 }
  0x12   : > { %s263_s13 = scalar_lea.sflag [#allocation6], %s262_s30  ;;  %s1068_s14 = scalar_lea.hbm %s1267_s9, 16 }
  0x13   : > { %p1069_p13 = scmp.ne.s32.totalorder %s1267_s9, %s1068_s14  ;;  %p1070_p0 = pneg %p1273_p10 }
  0x14   : > { %s1073_s26 = scalar_lea.hbm %s1426_s3, 32  ;;  %p1074_p3 = scmp.lt.u32.totalorder %s1267_s9, %s1426_s3 }
  0x15   : > { %p1071_p1 = pnand %p1070_p0, %p1069_p13  ;;  %p1075_p4 = scmp.lt.u32.totalorder %s1073_s26, %s1068_s14 }
  0x16   : > { %p1077_p6 = scmp.lt.u32.totalorder %s1068_s14, %s1267_s9 }
  0x17   : > { %p1072_p2 = pneg %p1071_p1  ;;  %p1076_p5 = por %p1075_p4, %p1074_p3 }
  0x19   : > { %p1078_p8 = por %p1077_p6, %p1076_p5 }
  0x1b   : > { %p1079_p9 = pnand %p1078_p8, %p1072_p2 }
  0x1d   : > { %1082 = shalt.err (!%p1079_p9)
}
  0x1e   : > { %s1083_s30 = scalar_lea.vmem %s1269_s11, 16  ;;  %s1166_s5 = smov [#allocation5]  }
  0x1f   : > { %p1084_p13 = scmp.ne.s32.totalorder %s1269_s11, %s1083_s30  ;;  %s1088_s7 = sshll.u32 %s1166_s5, 4  ;;  %s1089_s7 = int_to_ptr.vmem [resolvable:$false] %s1088_s7 }
  0x20   : > { %s1090_s8 = scalar_lea.vmem %s1089_s7, 32  ;;  %p1091_p12 = scmp.lt.s32.totalorder %s1269_s11, %s1089_s7 }
  0x21   : > { %p1086_p1 = pnand %p1084_p13, %p1070_p0  ;;  %p1092_p3 = scmp.lt.s32.totalorder %s1090_s8, %s1083_s30 }
  0x23   : > { %p1087_p11 = pneg %p1086_p1  ;;  %p1093_p4 = por %p1092_p3, %p1091_p12 }
  0x25   : > { %p1094_p5 = pnand %p1093_p4, %p1087_p11 }
  0x27   : > { %1097 = shalt.err (!%p1094_p5)
}
  0x28   : > { %982 = dma.hbm_to_vmem [thread:$0]  (!%p1273_p10), %s1267_s9, 16, %s1269_s11, %s263_s13  }
  0x29   : > { %p1431_p2 = scmp.lt.s32.totalorder %s1164_s22, 13  ;;  %p1432_p6 = scmp.ge.s32.totalorder %s1164_s22, 1 }
  0x2b   : > { %p279_p0 = pnand %p1432_p6, %p1431_p2 }
  0x2c   : > { %s284_s10 = sand.u32 (!%p279_p0), 1, %s1140_s16  }
  0x2d   : > { %282 = sbr.rel (%p279_p0) target bundleno = 1501 (0x5dd), region = 36  ;;  %s285_s14 = scalar_lea.sflag (!%p279_p0), [#allocation6], %s284_s10 }
  0x2e   : > { %s1309_s15 = scalar_lea.vmem (!%p279_p0), [#allocation5], %s284_s10 }
  0x34   : > { %1131 = dma.done.wait (%p1252_p7), %s285_s14, 16  }
  0x35   : > { %1133 = vsyncadd (%p1252_p7), %s285_s14, 4294967280  ;;  %p356_p10 = scmp.lt.s32.totalorder %s1152_s19, 1  ;;  %s368_s9 = sadd.s32 6, %s1148_s18  ;;  %vm418_vm0 = vcmask 523264   ;;  %v1167_v0 = vmov 0.0   ;;  %vm1168_vm1 = vmmov 0   ;;  %v476_v5 = vlaneseq }
  0x36   : > { %951 = vmatprep.subr.bf16.mxu0 %v1167_v0  ;;  %p373_p11 = scmp.lt.s32.totalorder %s368_s9, 17  ;;  %419 = vst.msk [vmem:[#allocation4] sm:$0xff] %vm418_vm0, %v1167_v0  ;;  %420 = vst.msk [vmem:[#allocation4 + $0x8] sm:$0xff] %vm418_vm0, %v1167_v0  ;;  %953 = vmatprep.mubr.msk.bf16.mxu0 %vm1168_vm1, %v1167_v0  ;;  %p360_p7 = scmp.lt.s32.totalorder %s1148_s18, 17  ;;  %vm413_vm2 = vcmask 7168   ;;  %vm483_vm3 = vcmask 64512  }
  0x37   : > { %s1447_s19 = smov (!%p356_p10, %s1152_s19), 1  ;;  %957 = vmatprep.subr.bf16.mxu1 %v1167_v0  ;;  %959 = vmatprep.mubr.msk.bf16.mxu1 %vm1168_vm1, %v1167_v0  ;;  %v1169_v4 = vmov -1e+30   ;;  %416 = vst.msk [vmem:[#allocation3] sm:$0xff] %vm413_vm2, %v1167_v0  ;;  %417 = vst.msk [vmem:[#allocation3 + $0x8] sm:$0xff] %vm413_vm2, %v1167_v0  ;;  %v477_v8 = vshrl.u32 %v476_v5, 7 }
  0x38   : > { %s1449_s9 = smov (!%p373_p11, %s368_s9), 17  ;;  %s1332_s28 = smul.u32 18, %s1447_s19  ;;  %414 = vst.msk [vmem:[#allocation2] sm:$0xff] %vm413_vm2, %v1169_v4  ;;  %415 = vst.msk [vmem:[#allocation2 + $0x8] sm:$0xff] %vm413_vm2, %v1169_v4  ;;  %v424_v6 = vld [vmem:[%s1309_s15] sm:$0x1] }
  0x39   : > { %s361_s11 = scalar_select %p360_p7, %s1148_s18, 17  ;;  %v933_v7 = vadd.f32 -1.0, %v424_v6  ;;  %v478_v10 = vsub.s32 0, %v477_v8  ;;  %v1170_v19 = vmov 0   ;;  %vm518_vm4 = vcmask 1043456  }
  0x3a   : > { %s378_s12 = sadd.s32 %s1332_s28, %s1449_s9  ;;  %1053 = vset.pattern.permute.xlu0 %v1170_v19  ;;  %1054 = vset.pattern.permute.xlu1 %v1170_v19  ;;  %s1171_s10 = smov 64  }
  0x3b   : > { %s930_s13 = sshll.u32 %s378_s12, 2  ;;  %s365_s23 = sadd.s32 %s1332_s28, %s361_s11  ;;  %v426_v9 = vmul.f32 1e+09, %v933_v7 }
  0x3c   : > { %s380_s29 = scalar_lea.vmem %s1424_s1, %s930_s13  ;;  %s929_s30 = sshll.u32 %s365_s23, 2 }
  0x3d   : > { %v422_v1 = vld [vmem:[%s380_s29] sm:$0xf]  ;;  %s367_s8 = scalar_lea.vmem %s1423_s0, %s929_s30  ;;  %v479_v11 = vrot.slane %v426_v9, %v478_v10  ;;  %s382_s14 = sadd.s32 12, %s1148_s18 }
  0x3e   : > { %v432_v2 = vsel %vm418_vm0, %v422_v1, 0  ;;  %v421_v3 = vld [vmem:[%s367_s8] sm:$0xf]  ;;  %v937_v20 = vcombine.low %v422_v1, %v422_v1  ;;  %p387_p12 = scmp.lt.s32.totalorder %s382_s14, 17  ;;  %v499_v1 = vld [vmem:[#allocation3] sm:$0xff]  ;;  %v641_v7 = vld [vmem:[#allocation3 + $0x8] sm:$0xff] }
  0x3f   : > { %952 = vmatpush3.bf16.xpose.msra.mxu0 %v432_v2  ;;  %v936_v21 = vcombine.low %v421_v3, %v421_v3  ;;  %v1358_v22 = vld [vmem:[#allocation2] sm:$0xff]  ;;  %v624_v48 = vld [vmem:[#allocation2 + $0x8] sm:$0xff]  ;;  %p400_p8 = scmp.lt.s32.totalorder %s1148_s18, 5 }
  0x40   : > { %969 = vmatprep.subr.bf16.mxu0 %v1167_v0  ;;  %573 = vrot.lane.b32.xlu1 %v937_v20, %s1171_s10  ;;  %s1451_s14 = smov (!%p387_p12, %s382_s14), 17 }
  0x41   : > { %s392_s15 = sadd.s32 %s1332_s28, %s1451_s14  ;;  %s976_s28 = smul.u32 6, %s1447_s19 }
  0x42   : > { %s931_s9 = sshll.u32 %s392_s15, 2  ;;  %s1453_s18 = smov (!%p400_p8, %s1148_s18), 5 }
  0x43   : > { %s394_s13 = scalar_lea.vmem %s1425_s2, %s931_s9  ;;  %s405_s23 = sadd.s32 %s976_s28, %s1453_s18 }
  0x44   : > { %568 = vrot.lane.b32.xlu1 %v936_v21, %s1171_s10  ;;  %v423_v26 = vld [vmem:[%s394_s13] sm:$0xf]  ;;  %s932_s26 = sshll.u32 %s405_s23, 2 }
  0x45   : > { %v520_v27 = vsel %vm518_vm4, %v423_v26, 0  ;;  %v939_v28 = vcombine.low %v423_v26, %v423_v26  ;;  %s407_s30 = scalar_lea.vmem %s1427_s4, %s932_s26 }
  0x46   : > { %954 = vmatmul.mubr.msk.bf16.vlgmr.msra.gmra.mrb[0].mxu0 %vm418_vm0, %v421_v3  ;;  %958 = vmatpush3.bf16.msra.mxu1 %v520_v27 }
  0x47   : > { %971 = vmatprep.mubr.msk.bf16.mxu0 %vm1168_vm1, %v1167_v0  ;;  %963 = vmatprep.subr.bf16.mxu1 %v1167_v0 }
  0xb2   : > { %v574_v32 = vpop.permute.xlu1 %573 }
  0xb3   : > { %v579_v34 = vsel %vm418_vm0, %v574_v32, 0 }
  0xb6   : > { %v569_v36 = vpop.permute.xlu1 %568 }
 0x119   : > { %v468_v12 = vpop.f32.mrb[0].mxu0 }
 0x11a   : > { %v474_v13 = vmul.f32 0.125, %v468_v12  ;;  %v955_v14 = vpop.f32.mrb[1].mxu0  ;;  %v507_v12 = vld [vmem:[#allocation4] sm:$0xff] }
 0x11b   : > { %v471_v15 = vpop.f32.mrb[2].mxu0 }
 0x11c   : > { %v956_v16 = vpop.f32.mrb[3].mxu0  ;;  %v481_v17 = vadd.f32 %v479_v11, %v474_v13 }
 0x11e   : > { %v484_v18 = vsel %vm483_vm3, %v481_v17, -inf }
 0x11f   : > { %485 = vmax.xlane.f32.xlu0 %v484_v18  ;;  %v649_v18 = vld [vmem:[#allocation4 + $0x8] sm:$0xff] }
 0x1ac   : > { %v486_v23 = vpop.xlane.xlu0 %485 }
 0x1ad   : > { %v1361_v24 = vmax.f32 %v1358_v22, %v486_v23 }
 0x1af   : > { %v488_v25 = vsub.f32 %v1358_v22, %v1361_v24  ;;  %564 = vst.msk [vmem:[#allocation2] sm:$0xff] %vm413_vm2, %v1361_v24  ;;  %493 = vperm.xlu0 %1053, %v1361_v24  }
 0x1b1   : > { %v489_v62 = vmul.f32 1.442695, %v488_v25 }
 0x1b3   : > { %660 = vrot.lane.b32.xlu0 %v939_v28, %s1171_s10 }
 0x22e   : > { %v494_v29 = vpop.permute.xlu0 %493 }
 0x22f   : > { %v496_v30 = vsub.f32 %v481_v17, %v494_v29 }
 0x231   : > { %v497_v31 = vmul.f32 1.442695, %v496_v30 }
 0x232   : > { %v661_v52 = vpop.permute.xlu0 %660 }
 0x233   : > { %1056 = vpow2.f32 %v497_v31  ;;  %v666_v53 = vsel %vm518_vm4, %v661_v52, 0 }
 0x234   : > { %970 = vmatpush3.bf16.msra.mxu0 %v666_v53 }
 0x23d   : > { %v1057_v33 = vpop.eup %1056 }
 0x23e   : > { %v514_v35 = vpack.c.bf16 %v1057_v33, %v1057_v33  ;;  %v501_v54 = vsel %vm483_vm3, %v1057_v33, 0.0 }
 0x240   : > { %960 = vmatmul.mubr.msk.bf16.vlgmr.msra.gmra.mrb[0].mxu1 %vm483_vm3, %v514_v35 }
 0x241   : > { %964 = vmatpush3.bf16.xpose.msra.mxu1 %v579_v34  ;;  %965 = vmatprep.mubr.msk.bf16.mxu1 %vm1168_vm1, %v1167_v0 }
 0x248   : > { %966 = vmatmul.mubr.msk.bf16.vlgmr.msra.gmra.mrb[4].mxu1 %vm418_vm0, %v569_v36 }
 0x313   : > { %v556_v37 = vpop.f32.mrb[0].mxu1 }
 0x314   : > { %v961_v38 = vpop.f32.mrb[1].mxu1 }
 0x315   : > { %v559_v39 = vpop.f32.mrb[2].mxu1 }
 0x316   : > { %v962_v40 = vpop.f32.mrb[3].mxu1 }
 0x31b   : > { %v615_v41 = vpop.f32.mrb[4].mxu1 }
 0x31c   : > { %v621_v42 = vmul.f32 0.125, %v615_v41  ;;  %v967_v43 = vpop.f32.mrb[5].mxu1 }
 0x31d   : > { %v618_v44 = vpop.f32.mrb[6].mxu1 }
 0x31e   : > { %v968_v45 = vpop.f32.mrb[7].mxu1  ;;  %v622_v46 = vadd.f32 %v621_v42, %v479_v11 }
 0x320   : > { %v625_v47 = vsel %vm483_vm3, %v622_v46, -inf }
 0x321   : > { %626 = vmax.xlane.f32.xlu1 %v625_v47 }
 0x3ae   : > { %v627_v49 = vpop.xlane.xlu1 %626 }
 0x3af   : > { %v628_v50 = vmax.f32 %v624_v48, %v627_v49 }
 0x3b1   : > { %v629_v51 = vsub.f32 %v624_v48, %v628_v50  ;;  %710 = vst.msk [vmem:[#allocation2 + $0x8] sm:$0xff] %vm413_vm2, %v628_v50  ;;  %634 = vperm.xlu1 %1054, %v628_v50  }
 0x3b3   : > { %v630_v61 = vmul.f32 1.442695, %v629_v51 }
 0x3d5   : > { %502 = vadd.xlane.f32.xlu1 %v501_v54 }
 0x430   : > { %v635_v55 = vpop.permute.xlu1 %634 }
 0x431   : > { %v637_v56 = vsub.f32 %v622_v46, %v635_v55 }
 0x433   : > { %v638_v57 = vmul.f32 1.442695, %v637_v56 }
 0x435   : > { %1058 = vpow2.f32 %v638_v57 }
 0x436   : > { %1060 = vpow2.f32 %v630_v61 }
 0x437   : > { %1062 = vpow2.f32 %v489_v62 }
 0x43f   : > { %v1059_v58 = vpop.eup %1058 }
 0x440   : > { %v643_v59 = vsel %vm483_vm3, %v1059_v58, 0.0  ;;  %v656_v60 = vpack.c.bf16 %v1059_v58, %v1059_v58  ;;  %v1061_v63 = vpop.eup %1060 }
 0x441   : > { %644 = vadd.xlane.f32.xlu0 %v643_v59  ;;  %v1063_v0 = vpop.eup %1062  ;;  %v642_v8 = vmul.f32 %v1061_v63, %v641_v7 }
 0x442   : > { %972 = vmatmul.mubr.msk.bf16.vlgmr.msra.gmra.mrb[4].mxu0 %vm483_vm3, %v656_v60  ;;  %v500_v2 = vmul.f32 %v1063_v0, %v499_v1 }
 0x457   : > { %652 = vperm.xlu0 %1053, %v1061_v63  }
 0x45b   : > { %510 = vperm.xlu0 %1053, %v1063_v0  }
 0x462   : > { %v503_v3 = vpop.xlane.xlu1 %502 }
 0x463   : > { %v504_v4 = vadd.f32 %v503_v3, %v500_v2 }
 0x465   : > { %506 = vst.msk [vmem:[#allocation3] sm:$0xff] %vm413_vm2, %v504_v4 }
 0x46c   : > { %v715_v5 = vld [vmem:[#allocation3] sm:$0xff] }
 0x46d   : > { %1064 = vrcp.f32 %v715_v5 }
 0x477   : > { %v1065_v6 = vpop.eup %1064 }
 0x478   : > { %719 = vperm.xlu0 %1053, %v1065_v6  }
 0x4ce   : > { %v645_v9 = vpop.xlane.xlu0 %644 }
 0x4cf   : > { %v646_v10 = vadd.f32 %v645_v9, %v642_v8 }
 0x4d1   : > { %647 = vst.msk [vmem:[#allocation3 + $0x8] sm:$0xff] %vm413_vm2, %v646_v10 }
 0x4d6   : > { %v653_v11 = vpop.permute.xlu0 %652 }
 0x4d7   : > { %v655_v19 = vmul.f32 %v653_v11, %v649_v18 }
 0x4d8   : > { %v724_v13 = vld [vmem:[#allocation3 + $0x8] sm:$0xff] }
 0x4d9   : > { %1066 = vrcp.f32 %v724_v13 }
 0x4da   : > { %v511_v14 = vpop.permute.xlu0 %510 }
 0x4db   : > { %v513_v15 = vmul.f32 %v511_v14, %v507_v12 }
 0x4dd   : > { %v562_v16 = vadd.f32 %v556_v37, %v513_v15 }
 0x4df   : > { %563 = vst.msk [vmem:[#allocation4] sm:$0xff] %vm418_vm0, %v562_v16 }
 0x4e3   : > { %v1067_v17 = vpop.eup %1066 }
 0x4e4   : > { %728 = vperm.xlu1 %1054, %v1067_v17  }
 0x4e6   : > { %v714_v29 = vld [vmem:[#allocation4] sm:$0xff] }
 0x4f7   : > { %v720_v28 = vpop.permute.xlu0 %719 }
 0x4f8   : > { %v722_v30 = vmul.f32 %v720_v28, %v714_v29 }
 0x515   : > { %v702_v20 = vpop.f32.mrb[4].mxu0 }
 0x516   : > { %v708_v21 = vadd.f32 %v702_v20, %v655_v19  ;;  %v973_v22 = vpop.f32.mrb[5].mxu0 }
 0x517   : > { %v705_v23 = vpop.f32.mrb[6].mxu0 }
 0x518   : > { %709 = vst.msk [vmem:[#allocation4 + $0x8] sm:$0xff] %vm418_vm0, %v708_v21  ;;  %v974_v24 = vpop.f32.mrb[7].mxu0 }
 0x51f   : > { %v723_v26 = vld [vmem:[#allocation4 + $0x8] sm:$0xff] }
 0x563   : > { %v729_v25 = vpop.permute.xlu1 %728 }
 0x564   : > { %v731_v27 = vmul.f32 %v729_v25, %v723_v26 }
 0x566   : > { %733 = vrot.lane.b32.xlu0 %v731_v27, %s1171_s10 }
 0x5d8   : > { %v734_v31 = vpop.permute.xlu0 %733 }
 0x5d9   : > { %v736_v32 = vsel %vm418_vm0, %v722_v30, %v734_v31 }
 0x5da   : > { %v737_v33 = vpack.c.bf16 %v736_v32, %v736_v32 }
 0x5dc   : > { %738 = vst [vmem:[%s407_s30] sm:$0xf] %v737_v33 }
 0x5dd PF: > { %s17_s22 = sadd.s32 1, %s1164_s22   ;;  %s1433_s15 = smov %s1140_s16 }
 0x5de   : > { %p14_p9 = scmp.ge.s32.totalorder %s17_s22, 14   ;;  %s1434_s16 = smov %s1144_s17 }
 0x5df   : > { %s1435_s17 = smov %s1262_s6  ;;  %s1436_s18 = smov %s1156_s20 }
 0x5e0   : > { %s1437_s19 = smov %s1160_s21  ;;  %s1438_s20 = smov %s1441_s24 }
 0x5e1   : > { %s1439_s21 = smov %s1445_s25  ;;  %16 = sbr.rel (!%p14_p9) target bundleno = 5 (0x5), region = 96 }
 0x5e8   :  { %774 = vsyncpa [#allocation6], 1 }
 0x5e9   :  { %776 = vsyncpa [#allocation6 + $0x1], 1 }

// kernel: multitask_forward.11
= control target key start
LH: loop header
LB: loop body
LE: loop exit
PB: predicated region body
PF: predicated region fallthrough
CT: control target
= control target key end

     0   :  { %s2056_s0 = inlined_call_operand.vmem [shape: bf16[16,768], index: 0, kind: input, shape index: {}]   ;;  %s2057_s1 = inlined_call_operand.hbm [shape: bf16[768,2304], index: 1, kind: input, shape index: {}]   ;;  %s2058_s2 = inlined_call_operand.vmem [shape: f32[1,2304], index: 2, kind: input, shape index: {}]   ;;  %s2059_s3 = inlined_call_operand.vmem [shape: bf16[16,2304], index: 3, kind: output, shape index: {}]  }
   0x1   :  { %2063 = sst [smem:[#allocation12_spill]] %s2056_s0 }
   0x2   :  { %8 = vsyncpa [#allocation5], 0 }
   0x3   :  { %10 = vsyncpa [#allocation5 + $0x1], 0  ;;  %s1743_s12 = smov 0   ;;  %s1745_s13 = smov 0  }
   0x4   :  { %s1747_s14 = smov 0   ;;  %s1749_s15 = smov 0  }
   0x5   :  { %s1751_s16 = smov 0   ;;  %s1753_s17 = smov 0  }
   0x6   :  { %s1755_s18 = smov 0   ;;  %s1757_s19 = smov 0  }
   0x7   :  { %s1759_s20 = smov 0   ;;  %s1761_s21 = smov 0  }
   0x8   :  { %s1763_s22 = smov 0   ;;  %s1765_s23 = smov 0  }
   0x9 LB: > { %2064 = sst [smem:[#allocation8_spill]] %s1693_s18  ;;  %s1215_s24 = sadd.s32 4294967295, %s1713_s23   ;;  %s1713_s23 = sphi %s1765_s23, %s16_s23   ;;  %s1709_s22 = sphi %s1763_s22, %s2086_s22   ;;  %s1705_s21 = sphi %s1761_s21, %s2085_s21   ;;  %s1701_s20 = sphi %s1759_s20, %s2084_s20   ;;  %s1697_s19 = sphi %s1757_s19, %s2083_s19   ;;  %s1693_s18 = sphi %s1755_s18, %s2075_s18   ;;  %s1689_s17 = sphi %s1753_s17, %s2074_s17   ;;  %s1685_s16 = sphi %s1751_s16, %s2082_s16   ;;  %s1681_s15 = sphi %s1749_s15, %s2081_s15   ;;  %s1677_s14 = sphi %s1747_s14, %s2080_s14   ;;  %s1673_s13 = sphi %s1745_s13, %s2079_s13   ;;  %s1669_s12 = sphi %s1743_s12, %s2078_s12  }
   0xa   : > { %s28_s25 = sadd.s32 1, %s1705_s21  ;;  %s31_s26 = sadd.s32 1, %s1709_s22 }
   0xb   : > { %p29_p0 = scmp.ge.s32.totalorder %s28_s25, 2  ;;  %s44_s27 = sadd.s32 1, %s1693_s18 }
   0xc   : > { %p51_p1 = scmp.ne.s32.totalorder %s1693_s18, %s1689_s17  ;;  %p52_p2 = scmp.eq.s32.totalorder %s1713_s23, 0 }
   0xd   : > { %s2088_s25 = smov (%p29_p0, %s28_s25), 0  ;;  %s2090_s26 = smov (!%p29_p0, %s31_s26), %s1709_s22 }
   0xe   : > { %2065 = sst [smem:[#allocation9_spill]] %s2088_s25  ;;  %s40_s28 = ssub.s32 %s1705_s21, %s2088_s25 }
   0xf   : > { %p33_p3 = scmp.ge.s32.totalorder %s2090_s26, 6  ;;  %p42_p4 = scmp.eq.s32.totalorder %s40_s28, 0 }
  0x10   : > { %p1815_p5 = por %p52_p2, %p51_p1  ;;  %s72_s30 = sadd.s32 1, %s1685_s16 }
  0x11   : > { %s2092_s26 = smov (%p33_p3, %s2090_s26), 0  ;;  %p79_p6 = scmp.ne.s32.totalorder %s1685_s16, %s1681_s15 }
  0x12   : > { %2067 = sst [smem:[#allocation10_spill]] %s2092_s26  ;;  %s68_s5 = ssub.s32 %s1709_s22, %s2092_s26 }
  0x13   : > { %s1823_s4 = scalar_select %p42_p4, %s1693_s18, %s44_s27  }
  0x14   : > { %s69_s6 = sor.u32 %s68_s5, %s40_s28  ;;  %p85_p7 = scmp.ne.s32.totalorder %s1681_s15, %s1677_s14 }
  0x15   : > { %2068 = sst [smem:[#allocation11_spill]] %s1823_s4  ;;  %p70_p8 = scmp.eq.s32.totalorder %s69_s6, 0 }
  0x16   : > { %p1831_p9 = por %p79_p6, %p52_p2  ;;  %p86_p10 = scmp.eq.s32.totalorder %s1215_s24, 0 }
  0x17   : > { %p124_p11 = scmp.eq.s32.totalorder %s68_s5, 0  ;;  %s126_s10 = sadd.s32 1, %s1673_s13 }
  0x18   : > { %s1838_s8 = scalar_select %p70_p8, %s1685_s16, %s72_s30  }
  0x19   : > { %p1840_p12 = por %p86_p10, %p85_p7  ;;  %p136_p13 = scmp.ne.s32.totalorder %s1673_s13, %s1669_s12 }
  0x1a   : > { %s1846_s11 = scalar_select %p124_p11, %s1673_s13, %s126_s10  }
  0x1b   : > { %p137_p0 = scmp.eq.s32.totalorder %s1215_s24, 11  ;;  %p1218_p2 = scmp.ge.s32.totalorder %s1713_s23, 12 }
  0x1d   : > { %p1852_p1 = por %p137_p0, %p136_p13  ;;  %159 = sbr.rel (%p1218_p2) target bundleno = 77 (0x4d), region = 16 }
  0x1f   : > { %s2071_s14 = scalar_select %p1852_p1, 1, 0 }
  0x24   : > { %162 = sbr.rel (!%p1815_p5) target bundleno = 47 (0x2f), region = 20  ;;  %s164_s27 = sand.u32 (%p1815_p5), 1, %s1693_s18  }
  0x25   : > { %s1314_s28 = smul.u32 (%p1815_p5), 12, %s1705_s21  ;;  %s2072_s0 = sld [smem:[#allocation12_spill]] (%p1815_p5) }
  0x26   : > { %s1375_s30 = smul.u32 (%p1815_p5), 24, %s164_s27 }
  0x28   : > { %s166_s24 = scalar_lea.vmem (%p1815_p5), [#allocation3], %s1375_s30 }
  0x2b   : > { %s172_s10 = scalar_lea.vmem %s2072_s0, %s1314_s28 }
  0x2c   : > { %v187_v0 = vld [vmem:[%s172_s10] sm:$0xff]  ;;  %v189_v1 = vld [vmem:[%s172_s10 + $0x18] sm:$0xff]  ;;  %v1220_v2 = vld [vmem:[%s172_s10 + $0x8] sm:$0xf] }
  0x2d   : > { %188 = vst [vmem:[%s166_s24] sm:$0xff] %v187_v0  ;;  %190 = vst [vmem:[%s166_s24 + $0xc] sm:$0xff] %v189_v1  ;;  %v1222_v3 = vld [vmem:[%s172_s10 + $0x20] sm:$0xf] }
  0x2e   : > { %1221 = vst [vmem:[%s166_s24 + $0x8] sm:$0xf] %v1220_v2  ;;  %1223 = vst [vmem:[%s166_s24 + $0x14] sm:$0xf] %v1222_v3 }
  0x2f PF: > { %s208_s29 = sand.u32 1, %s1685_s16   ;;  %s214_s26 = smul.u32 3, %s1709_s22 }
  0x30   : > { %s1376_s27 = smul.u32 576, %s208_s29  ;;  %s1874_s24 = scalar_lea.sflag [#allocation5], %s208_s29 }
  0x31   : > { %s1383_s25 = smul.u32 864, %s1705_s21 }
  0x32   : > { %s212_s5 = scalar_lea.vmem [#allocation4], %s1376_s27  ;;  %s1591_s27 = scalar_lea.hbm %s2057_s1, 110592 }
  0x33   : > { %s222_s28 = sshll.u32 %s212_s5, 4  ;;  %s219_s6 = sadd.s32 %s1383_s25, %s214_s26  ;;  %s1867_s28 = int_to_ptr.vmem [resolvable:$true] %s222_s28 }
  0x34   : > { %s1224_s30 = sshll.u32 %s219_s6, 6 }
  0x35   : > { %s1872_s10 = scalar_lea.hbm %s2057_s1, %s1224_s30 }
  0x36   : > { %s1587_s18 = scalar_lea.hbm %s1872_s10, 9216  ;;  %p1592_p6 = scmp.lt.u32.totalorder %s1872_s10, %s2057_s1 }
  0x37   : > { %p1588_p3 = scmp.ne.s32.totalorder %s1872_s10, %s1587_s18  ;;  %p1593_p7 = scmp.lt.u32.totalorder %s1591_s27, %s1587_s18 }
  0x38   : > { %p1595_p10 = scmp.lt.u32.totalorder %s1587_s18, %s1872_s10 }
  0x39   : > { %p1589_p4 = pnand %p1588_p3, %p1831_p9  ;;  %p1594_p8 = por %p1593_p7, %p1592_p6 }
  0x3b   : > { %p1590_p5 = pneg %p1589_p4  ;;  %p1596_p11 = por %p1595_p10, %p1594_p8 }
  0x3d   : > { %p1597_p13 = pnand %p1596_p11, %p1590_p5 }
  0x3f   : > { %1600 = shalt.err (!%p1597_p13)
}
  0x40   : > { %s1601_s0 = scalar_lea.vmem %s1867_s28, 9216  ;;  %s1715_s4 = smov [#allocation4]  }
  0x41   : > { %p1602_p0 = scmp.ne.s32.totalorder %s1867_s28, %s1601_s0  ;;  %s1605_s29 = sshll.u32 %s1715_s4, 4  ;;  %s1606_s29 = int_to_ptr.vmem [resolvable:$false] %s1605_s29 }
  0x42   : > { %s1607_s30 = scalar_lea.vmem %s1606_s29, 18432  ;;  %p1608_p4 = scmp.lt.s32.totalorder %s1867_s28, %s1606_s29 }
  0x43   : > { %p1603_p2 = pnand %p1602_p0, %p1831_p9  ;;  %p1609_p1 = scmp.lt.s32.totalorder %s1607_s30, %s1601_s0 }
  0x45   : > { %p1604_p3 = pneg %p1603_p2  ;;  %p1610_p6 = por %p1609_p1, %p1608_p4 }
  0x47   : > { %p1611_p7 = pnand %p1610_p6, %p1604_p3 }
  0x49   : > { %1614 = shalt.err (!%p1611_p7)
}
  0x4a   : > { %s1716_s18 = smov 1152   ;;  %s1717_s25 = smov 192  }
  0x4b   : > { %s1718_s26 = smov 12  }
  0x4c   : > { %1381 = dma.hbm_to_vmem [thread:$0]  (%p1831_p9), %s1872_s10, 9216, %s1867_s28, %s1874_s24, %s1716_s18, %s1717_s25, %s1718_s26  }
  0x4d PF: > { %p1225_p5 = scmp.ge.s32.totalorder %s1713_s23, 1  ;;  %p238_p8 = scmp.lt.s32.totalorder %s1713_s23, 13 }
  0x4f   : > { %p239_p10 = pnand %p1225_p5, %p238_p8 }
  0x50   : > { %s245_s27 = sand.u32 (!%p239_p10), 1, %s1689_s17   ;;  %s251_s5 = sand.u32 (!%p239_p10), 1, %s1681_s15  }
  0x51   : > { %242 = sbr.rel (%p239_p10) target bundleno = 435 (0x1b3), region = 54  ;;  %s252_s29 = scalar_lea.sflag (!%p239_p10), [#allocation5], %s251_s5 }
  0x52   : > { %s1378_s6 = smul.u32 (!%p239_p10), 24, %s245_s27 }
  0x53   : > { %s1379_s0 = smul.u32 (!%p239_p10), 576, %s251_s5 }
  0x54   : > { %s1902_s4 = scalar_lea.vmem (!%p239_p10), [#allocation3], %s1378_s6 }
  0x55   : > { %s1904_s30 = scalar_lea.vmem (!%p239_p10), [#allocation4], %s1379_s0 }
  0x58   : > { %1664 = dma.done.wait (%p1840_p12), %s252_s29, 9216  }
  0x59   : > { %1666 = vsyncadd (%p1840_p12), %s252_s29, 4294958080  ;;  %s282_s7 = sand.u32 1, %s1669_s12   ;;  %s289_s28 = smul.u32 3, %s1701_s20 }
  0x5a   : > { %s1380_s10 = smul.u32 24, %s282_s7  ;;  %p1226_p1 = scmp.ne.s32.totalorder %s1697_s19, 0 }
  0x5b   : > { %p290_p9 = scmp.lt.s32.totalorder %s289_s28, 17  ;;  %v1719_v4 = vmov (!%p1226_p1), 0.0  }
  0x5c   : > { %s1918_s25 = scalar_lea.vmem [#allocation6], %s1380_s10  ;;  %300 = sbr.rel (%p1226_p1) target bundleno = 99 (0x63), region = 66  ;;  %301 = vst [vmem:[#allocation2] sm:$0xff] (!%p1226_p1), %v1719_v4  ;;  %302 = vst [vmem:[#allocation2 + $0x8] sm:$0xff] (!%p1226_p1), %v1719_v4 }
  0x5d   : > { %s2094_s28 = smov (!%p290_p9, %s289_s28), 17  ;;  %303 = vst [vmem:[#allocation2 + $0x10] sm:$0xff] (!%p1226_p1), %v1719_v4  ;;  %304 = vst [vmem:[#allocation2 + $0x18] sm:$0xff] (!%p1226_p1), %v1719_v4 }
  0x5e   : > { %s292_s18 = scalar_lea.vmem %s2058_s2, %s2094_s28  ;;  %305 = vst [vmem:[#allocation2 + $0x20] sm:$0xff] (!%p1226_p1), %v1719_v4  ;;  %306 = vst [vmem:[#allocation2 + $0x28] sm:$0xff] (!%p1226_p1), %v1719_v4 }
  0x63 PF: > { %v1487_v5 = vld [vmem:[%s1904_s30 + $0x4] ss:$12 sps:$4 sm:$0xff]   ;;  %v1489_v6 = vld [vmem:[%s1904_s30 + $0xc8] ss:$12 sps:$4 sm:$0xff]   ;;  %v1490_v7 = vld [vmem:[%s1904_s30] ss:$12 sps:$4 sm:$0xff]  }
  0x64   : > { %813 = vmatprep.subr.bf16.mxu0 %v1487_v5  ;;  %1320 = vmatprep.subr.bf16.mxu1 %v1489_v6  ;;  %v1491_v8 = vld [vmem:[%s1904_s30 + $0x8] ss:$12 sps:$4 sm:$0xff]   ;;  %v1494_v10 = vld [vmem:[%s1904_s30 + $0xe0] ss:$12 sps:$4 sm:$0xff]   ;;  %v1495_v11 = vld [vmem:[%s1904_s30 + $0x18] ss:$12 sps:$4 sm:$0xff]  }
  0x65   : > { %814 = vmatpush1.bf16.msra.mxu0 %v1490_v7  ;;  %v1492_v9 = vld [vmem:[%s1904_s30 + $0x1c] ss:$12 sps:$4 sm:$0xff]   ;;  %1321 = vmatpush3.bf16.msra.mxu1 %v1491_v8  ;;  %v1496_v12 = vld [vmem:[%s1904_s30 + $0x20] ss:$12 sps:$4 sm:$0xff]   ;;  %v1499_v14 = vld [vmem:[%s1904_s30 + $0xf8] ss:$12 sps:$4 sm:$0xff]  }
  0x66   : > { %815 = vmatprep.subr.bf16.mxu0 %v1492_v9  ;;  %1322 = vmatprep.subr.bf16.mxu1 %v1494_v10  ;;  %v1497_v13 = vld [vmem:[%s1904_s30 + $0x34] ss:$12 sps:$4 sm:$0xff]   ;;  %v1500_v15 = vld [vmem:[%s1904_s30 + $0x30] ss:$12 sps:$4 sm:$0xff]   ;;  %v1501_v16 = vld [vmem:[%s1904_s30 + $0x38] ss:$12 sps:$4 sm:$0xff]  }
  0x67   : > { %v1502_v17 = vld [vmem:[%s1904_s30 + $0x4c] ss:$12 sps:$4 sm:$0xff]   ;;  %v1504_v18 = vld [vmem:[%s1904_s30 + $0x110] ss:$12 sps:$4 sm:$0xff]   ;;  %v1505_v19 = vld [vmem:[%s1904_s30 + $0x48] ss:$12 sps:$4 sm:$0xff]  }
  0x68   : > { %v1506_v20 = vld [vmem:[%s1904_s30 + $0x50] ss:$12 sps:$4 sm:$0xff]   ;;  %v1509_v22 = vld [vmem:[%s1904_s30 + $0x128] ss:$12 sps:$4 sm:$0xff]   ;;  %v1510_v23 = vld [vmem:[%s1904_s30 + $0x60] ss:$12 sps:$4 sm:$0xff]  }
  0x69   : > { %816 = vmatpush1.bf16.msra.mxu0 %v1495_v11  ;;  %1323 = vmatpush3.bf16.msra.mxu1 %v1496_v12  ;;  %v1507_v21 = vld [vmem:[%s1904_s30 + $0x64] ss:$12 sps:$4 sm:$0xff]   ;;  %v1511_v24 = vld [vmem:[%s1904_s30 + $0x68] ss:$12 sps:$4 sm:$0xff]   ;;  %v1514_v26 = vld [vmem:[%s1904_s30 + $0x140] ss:$12 sps:$4 sm:$0xff]  }
  0x6a   : > { %817 = vmatprep.subr.bf16.mxu0 %v1497_v13  ;;  %1324 = vmatprep.subr.bf16.mxu1 %v1499_v14  ;;  %v1512_v25 = vld [vmem:[%s1904_s30 + $0x7c] ss:$12 sps:$4 sm:$0xff]   ;;  %v1515_v27 = vld [vmem:[%s1904_s30 + $0x78] ss:$12 sps:$4 sm:$0xff]   ;;  %v1516_v28 = vld [vmem:[%s1904_s30 + $0x80] ss:$12 sps:$4 sm:$0xff]  }
  0x6b   : > { %v1517_v29 = vld [vmem:[%s1904_s30 + $0x94] ss:$12 sps:$4 sm:$0xff]   ;;  %v1519_v30 = vld [vmem:[%s1904_s30 + $0x158] ss:$12 sps:$4 sm:$0xff]   ;;  %v1520_v31 = vld [vmem:[%s1904_s30 + $0x90] ss:$12 sps:$4 sm:$0xff]  }
  0x6c   : > { %v1521_v32 = vld [vmem:[%s1904_s30 + $0x98] ss:$12 sps:$4 sm:$0xff]   ;;  %v1524_v34 = vld [vmem:[%s1904_s30 + $0x170] ss:$12 sps:$4 sm:$0xff]   ;;  %v1525_v35 = vld [vmem:[%s1904_s30 + $0xa8] ss:$12 sps:$4 sm:$0xff]  }
  0x6d   : > { %818 = vmatpush1.bf16.msra.mxu0 %v1500_v15  ;;  %1325 = vmatpush3.bf16.msra.mxu1 %v1501_v16  ;;  %v1522_v33 = vld [vmem:[%s1904_s30 + $0xac] ss:$12 sps:$4 sm:$0xff]   ;;  %v1526_v36 = vld [vmem:[%s1904_s30 + $0xb0] ss:$12 sps:$4 sm:$0xff]   ;;  %v1533_v41 = vld [vmem:[%s1904_s30 + $0x188] ss:$12 sps:$4 sm:$0xff]  }
  0x6e   : > { %819 = vmatprep.subr.bf16.mxu0 %v1502_v17  ;;  %1326 = vmatprep.subr.bf16.mxu1 %v1504_v18  ;;  %v1531_v37 = vld [vmem:[%s1902_s4 + $0x4] ss:$12 sps:$4 sm:$0xff]   ;;  %v1527_v38 = vld [vmem:[%s1904_s30 + $0xc4] ss:$12 sps:$4 sm:$0xff]   ;;  %v1534_v42 = vld [vmem:[%s1904_s30 + $0xdc] ss:$12 sps:$4 sm:$0xff]  }
  0x6f   : > { %931 = vmatprep.mubr.bf16.mxu1 %v1531_v37  ;;  %v1956_v39 = vld [vmem:[%s1902_s4] ss:$12 sps:$4 sm:$0xff]   ;;  %845 = vmatprep.mubr.bf16.mxu0 %v1531_v37  ;;  %v1532_v40 = vld [vmem:[%s1904_s30 + $0xc0] ss:$12 sps:$4 sm:$0xff]   ;;  %v1720_v43 = vmov 0.0   ;;  %vm1721_vm0 = vmmov 0  }
  0x70   : > { %v1536_v44 = vld [vmem:[%s1904_s30 + $0xd8] ss:$12 sps:$4 sm:$0xff]   ;;  %v1537_v45 = vld [vmem:[%s1904_s30 + $0x1a0] ss:$12 sps:$4 sm:$0xff]   ;;  %v1540_v47 = vld [vmem:[%s1904_s30 + $0xf0] ss:$12 sps:$4 sm:$0xff]  }
  0x71   : > { %820 = vmatpush1.bf16.msra.mxu0 %v1505_v19  ;;  %1327 = vmatpush3.bf16.msra.mxu1 %v1506_v20  ;;  %v1538_v46 = vld [vmem:[%s1904_s30 + $0xf4] ss:$12 sps:$4 sm:$0xff]   ;;  %v1541_v48 = vld [vmem:[%s1904_s30 + $0x1b8] ss:$12 sps:$4 sm:$0xff]   ;;  %v1545_v51 = vld [vmem:[%s1904_s30 + $0x1d0] ss:$12 sps:$4 sm:$0xff]  }
  0x72   : > { %821 = vmatprep.subr.bf16.mxu0 %v1507_v21  ;;  %1328 = vmatprep.subr.bf16.mxu1 %v1509_v22  ;;  %v1542_v49 = vld [vmem:[%s1904_s30 + $0x10c] ss:$12 sps:$4 sm:$0xff]   ;;  %v1544_v50 = vld [vmem:[%s1904_s30 + $0x108] ss:$12 sps:$4 sm:$0xff]   ;;  %v1546_v52 = vld [vmem:[%s1904_s30 + $0x124] ss:$12 sps:$4 sm:$0xff]  }
  0x73   : > { %v1548_v53 = vld [vmem:[%s1904_s30 + $0x120] ss:$12 sps:$4 sm:$0xff]   ;;  %v1549_v54 = vld [vmem:[%s1904_s30 + $0x1e8] ss:$12 sps:$4 sm:$0xff]   ;;  %v1552_v56 = vld [vmem:[%s1904_s30 + $0x138] ss:$12 sps:$4 sm:$0xff]  }
  0x74   : > { %v1550_v55 = vld [vmem:[%s1904_s30 + $0x13c] ss:$12 sps:$4 sm:$0xff]   ;;  %v1553_v57 = vld [vmem:[%s1904_s30 + $0x200] ss:$12 sps:$4 sm:$0xff]   ;;  %v1557_v60 = vld [vmem:[%s1904_s30 + $0x218] ss:$12 sps:$4 sm:$0xff]  }
  0x75   : > { %822 = vmatpush1.bf16.msra.mxu0 %v1510_v23  ;;  %1329 = vmatpush3.bf16.msra.mxu1 %v1511_v24  ;;  %v1554_v58 = vld [vmem:[%s1904_s30 + $0x154] ss:$12 sps:$4 sm:$0xff]   ;;  %v1556_v59 = vld [vmem:[%s1904_s30 + $0x150] ss:$12 sps:$4 sm:$0xff]   ;;  %v1558_v61 = vld [vmem:[%s1904_s30 + $0x16c] ss:$12 sps:$4 sm:$0xff]  }
  0x76   : > { %823 = vmatprep.subr.bf16.mxu0 %v1512_v25  ;;  %1330 = vmatprep.subr.bf16.mxu1 %v1514_v26  ;;  %v1560_v62 = vld [vmem:[%s1904_s30 + $0x168] ss:$12 sps:$4 sm:$0xff]   ;;  %v1561_v63 = vld [vmem:[%s1904_s30 + $0x230] ss:$12 sps:$4 sm:$0xff]   ;;  %v1562_v1 = vld [vmem:[%s1904_s30 + $0x180] ss:$12 sps:$4 sm:$0xff]  }
  0x77   : > { %v1564_v0 = vld [vmem:[%s1904_s30 + $0x184] ss:$12 sps:$4 sm:$0xff]   ;;  %v1568_v3 = vld [vmem:[%s1904_s30 + $0x19c] ss:$12 sps:$4 sm:$0xff]   ;;  %v1571_v5 = vld [vmem:[%s1904_s30 + $0x1b4] ss:$12 sps:$4 sm:$0xff]  }
  0x78   : > { %v1565_v2 = vld [vmem:[%s1902_s4 + $0x8] ss:$12 sps:$4 sm:$0xff]   ;;  %v1722_v6 = vmov 0   ;;  %v1572_v9 = vld [vmem:[%s1904_s30 + $0x1c8] ss:$12 sps:$4 sm:$0xff]   ;;  %p1302_p12 = scmp.ne.s32.totalorder %s1697_s19, 1 }
  0x79   : > { %824 = vmatpush1.bf16.msra.mxu0 %v1515_v27  ;;  %1331 = vmatpush3.bf16.msra.mxu1 %v1516_v28  ;;  %v1566_v4 = vld [vmem:[%s1904_s30 + $0x198] ss:$12 sps:$4 sm:$0xff]   ;;  %v1569_v7 = vld [vmem:[%s1904_s30 + $0x1b0] ss:$12 sps:$4 sm:$0xff]   ;;  %v1575_v11 = vld [vmem:[%s1904_s30 + $0x1e0] ss:$12 sps:$4 sm:$0xff]  }
  0x7a   : > { %825 = vmatprep.subr.bf16.mxu0 %v1517_v29  ;;  %1332 = vmatprep.subr.bf16.mxu1 %v1519_v30  ;;  %v1574_v8 = vld [vmem:[%s1904_s30 + $0x1cc] ss:$12 sps:$4 sm:$0xff]   ;;  %v1577_v10 = vld [vmem:[%s1904_s30 + $0x1e4] ss:$12 sps:$4 sm:$0xff]   ;;  %v1580_v12 = vld [vmem:[%s1904_s30 + $0x1fc] ss:$12 sps:$4 sm:$0xff]  }
  0x7b   : > { %v1578_v13 = vld [vmem:[%s1904_s30 + $0x1f8] ss:$12 sps:$4 sm:$0xff]   ;;  %v1583_v14 = vld [vmem:[%s1904_s30 + $0x214] ss:$12 sps:$4 sm:$0xff]   ;;  %v1581_v15 = vld [vmem:[%s1904_s30 + $0x210] ss:$12 sps:$4 sm:$0xff]  }
  0x7c   : > { %v1586_v16 = vld [vmem:[%s1904_s30 + $0x22c] ss:$12 sps:$4 sm:$0xff]   ;;  %v1584_v17 = vld [vmem:[%s1904_s30 + $0x228] ss:$12 sps:$4 sm:$0xff]  }
  0x7d   : > { %826 = vmatpush1.bf16.msra.mxu0 %v1520_v31  ;;  %1333 = vmatpush3.bf16.msra.mxu1 %v1521_v32  ;;  %v309_v24 = vld [vmem:[#allocation2 + $0x10] sm:$0xff]  ;;  %v312_v28 = vld [vmem:[#allocation2 + $0x28] sm:$0xff]  ;;  %v310_v37 = vld [vmem:[#allocation2 + $0x18] sm:$0xff] }
  0x7e   : > { %827 = vmatprep.subr.bf16.mxu0 %v1522_v33  ;;  %1334 = vmatprep.subr.bf16.mxu1 %v1524_v34  ;;  %v307_v34 = vld [vmem:[#allocation2] sm:$0xff] }
  0x81   : > { %828 = vmatpush1.bf16.msra.mxu0 %v1525_v35  ;;  %1335 = vmatpush3.bf16.msra.mxu1 %v1526_v36  ;;  %v308_v35 = vld [vmem:[#allocation2 + $0x8] sm:$0xff] }
  0x82   : > { %829 = vmatprep.subr.bf16.mxu0 %v1527_v38  ;;  %1351 = vmatprep.subr.bf16.mxu1 %v1720_v43 }
  0x84   : > { %932 = vmatmul.mubr.bf16.vlgmr.msra.gmra.mrb[0].mxu1 %v1956_v39 }
  0x85   : > { %830 = vmatpush1.bf16.msra.mxu0 %v1532_v40  ;;  %1352 = vmatpush3.bf16.msra.mxu1 %v1533_v41  ;;  %v311_v40 = vld [vmem:[#allocation2 + $0x20] sm:$0xff] }
  0x86   : > { %831 = vmatprep.subr.bf16.mxu0 %v1534_v42  ;;  %1353 = vmatprep.subr.bf16.mxu1 %v1720_v43 }
  0x87   : > { %1367 = vmatprep.mubr.msk.bf16.mxu1 %vm1721_vm0, %v1720_v43 }
  0x89   : > { %832 = vmatpush1.bf16.msra.mxu0 %v1536_v44  ;;  %1354 = vmatpush3.bf16.msra.mxu1 %v1537_v45 }
  0x8a   : > { %833 = vmatprep.subr.bf16.mxu0 %v1538_v46  ;;  %1355 = vmatprep.subr.bf16.mxu1 %v1720_v43  ;;  %v1005_v46 = vlaneseq (!%p1302_p12) }
  0x8d   : > { %834 = vmatpush1.bf16.msra.mxu0 %v1540_v47  ;;  %1356 = vmatpush3.bf16.msra.mxu1 %v1541_v48  ;;  %v1006_v47 = vshrl.u32 (!%p1302_p12), %v1005_v46, 7  ;;  %v1003_v48 = vld [vmem:[%s292_s18] sm:$0x7] (!%p1302_p12) }
  0x8e   : > { %835 = vmatprep.subr.bf16.mxu0 %v1542_v49  ;;  %1357 = vmatprep.subr.bf16.mxu1 %v1720_v43 }
  0x91   : > { %836 = vmatpush1.bf16.msra.mxu0 %v1544_v50  ;;  %1358 = vmatpush3.bf16.msra.mxu1 %v1545_v51  ;;  %v1007_v50 = vsub.s32 (!%p1302_p12), 0, %v1006_v47  ;;  %v1011_v51 = vsub.s32 (!%p1302_p12), 1, %v1006_v47 }
  0x92   : > { %837 = vmatprep.subr.bf16.mxu0 %v1546_v52  ;;  %1359 = vmatprep.subr.bf16.mxu1 %v1720_v43  ;;  %v1015_v52 = vsub.s32 (!%p1302_p12), 2, %v1006_v47 }
  0x95   : > { %838 = vmatpush1.bf16.msra.mxu0 %v1548_v53  ;;  %1360 = vmatpush3.bf16.msra.mxu1 %v1549_v54 }
  0x96   : > { %839 = vmatprep.subr.bf16.mxu0 %v1550_v55  ;;  %1361 = vmatprep.subr.bf16.mxu1 %v1720_v43 }
  0x99   : > { %840 = vmatpush1.bf16.msra.mxu0 %v1552_v56  ;;  %1362 = vmatpush3.bf16.msra.mxu1 %v1553_v57  ;;  %v1008_v56 = vrot.slane (!%p1302_p12), %v1003_v48, %v1007_v50  ;;  %v1012_v57 = vrot.slane (!%p1302_p12), %v1003_v48, %v1011_v51 }
  0x9a   : > { %841 = vmatprep.subr.bf16.mxu0 %v1554_v58  ;;  %1363 = vmatprep.subr.bf16.mxu1 %v1720_v43  ;;  %v1016_v58 = vrot.slane (!%p1302_p12), %v1003_v48, %v1015_v52 }
  0x9d   : > { %842 = vmatpush1.bf16.msra.mxu0 %v1556_v59  ;;  %1364 = vmatpush3.bf16.msra.mxu1 %v1557_v60 }
  0x9e   : > { %843 = vmatprep.subr.bf16.mxu0 %v1558_v61  ;;  %1365 = vmatprep.subr.bf16.mxu1 %v1720_v43 }
  0xa1   : > { %844 = vmatpush1.bf16.msra.mxu0 %v1560_v62  ;;  %1366 = vmatpush3.bf16.msra.mxu1 %v1561_v63 }
  0xa2   : > { %856 = vmatprep.subr.bf16.mxu0 %v1564_v0 }
  0xa4   : > { %846 = vmatmul.mubr.bf16.vlgmr.msra.gmra.mrb[0].mxu0 %v1956_v39  ;;  %1368 = vmatmul.mubr.bf16.vlgmr.msra.gmra.mrb[4].mxu1 %v1565_v2 }
  0xa5   : > { %857 = vmatpush1.bf16.msra.mxu0 %v1562_v1  ;;  %888 = vmatprep.mubr.bf16.mxu0 %v1722_v6 }
  0xa6   : > { %858 = vmatprep.subr.bf16.mxu0 %v1568_v3 }
  0xa9   : > { %859 = vmatpush1.bf16.msra.mxu0 %v1566_v4 }
  0xaa   : > { %860 = vmatprep.subr.bf16.mxu0 %v1571_v5 }
  0xad   : > { %861 = vmatpush1.bf16.msra.mxu0 %v1569_v7 }
  0xae   : > { %862 = vmatprep.subr.bf16.mxu0 %v1574_v8 }
  0xb1   : > { %863 = vmatpush1.bf16.msra.mxu0 %v1572_v9 }
  0xb2   : > { %864 = vmatprep.subr.bf16.mxu0 %v1577_v10 }
  0xb5   : > { %865 = vmatpush1.bf16.msra.mxu0 %v1575_v11 }
  0xb6   : > { %866 = vmatprep.subr.bf16.mxu0 %v1580_v12 }
  0xb9   : > { %867 = vmatpush1.bf16.msra.mxu0 %v1578_v13 }
  0xba   : > { %868 = vmatprep.subr.bf16.mxu0 %v1583_v14 }
  0xbd   : > { %869 = vmatpush1.bf16.msra.mxu0 %v1581_v15 }
  0xbe   : > { %870 = vmatprep.subr.bf16.mxu0 %v1586_v16 }
  0xc1   : > { %871 = vmatpush1.bf16.msra.mxu0 %v1584_v17 }
  0xc4   : > { %889 = vmatmul.mubr.bf16.vlgmr.msra.gmra.mrb[0].mxu0 %v1565_v2 }
 0x157   : > { %v1336_v18 = vpop.f32.mrb[0].mxu1 }
 0x158   : > { %v1337_v19 = vpop.f32.mrb[1].mxu1 }
 0x159   : > { %v1338_v20 = vadd.f32 %v1337_v19, %v1336_v18  ;;  %v1339_v21 = vpop.f32.mrb[2].mxu1 }
 0x15a   : > { %v1340_v22 = vpop.f32.mrb[3].mxu1 }
 0x15b   : > { %v1341_v23 = vadd.f32 %v1340_v22, %v1339_v21 }
 0x177   : > { %v974_v25 = vpop.f32.mrb[4].mxu1 }
 0x178   : > { %v975_v26 = vadd.f32 %v1338_v20, %v974_v25  ;;  %v1369_v27 = vpop.f32.mrb[5].mxu1 }
 0x179   : > { %v977_v29 = vpop.f32.mrb[6].mxu1 }
 0x17a   : > { %v983_v30 = vadd.f32 %v975_v26, %v309_v24  ;;  %v978_v31 = vadd.f32 %v1341_v23, %v977_v29  ;;  %v1370_v32 = vpop.f32.mrb[7].mxu1 }
 0x17c   : > { %989 = vst [vmem:[#allocation2 + $0x10] sm:$0xff] %v983_v30  ;;  %v986_v33 = vadd.f32 %v978_v31, %v312_v28 }
 0x17e   : > { %992 = vst [vmem:[#allocation2 + $0x28] sm:$0xff] %v986_v33 }
 0x183   : > { %v999_v54 = vld [vmem:[#allocation2 + $0x10] sm:$0xff] (!%p1302_p12) }
 0x184   : > { %v1022_v63 = vadd.f32 (!%p1302_p12), %v1016_v58, %v999_v54 }
 0x185   : > { %v1002_v60 = vld [vmem:[#allocation2 + $0x28] sm:$0xff] (!%p1302_p12) }
 0x186   : > { %v1025_v2 = vadd.f32 (!%p1302_p12), %v1016_v58, %v1002_v60  ;;  %v1316_v4 = vpack.c.bf16 (!%p1302_p12), %v1022_v63, %v1022_v63 }
 0x188   : > { %v1318_v6 = vpack.c.bf16 (!%p1302_p12), %v1025_v2, %v1025_v2  ;;  %1047 = vst [vmem:[%s1918_s25 + $0x8] sm:$0xf] (!%p1302_p12), %v1316_v4 }
 0x18a   : > { %1049 = vst [vmem:[%s1918_s25 + $0x14] sm:$0xf] (!%p1302_p12), %v1318_v6 }
 0x197   : > { %v890_v36 = vpop.f32.mrb[0].mxu0  ;;  %996 = sbr.rel (%p1302_p12) target bundleno = 426 (0x1aa), region = 70 }
 0x198   : > { %v981_v38 = vadd.f32 %v890_v36, %v307_v34  ;;  %v892_v39 = vpop.f32.mrb[1].mxu0 }
 0x199   : > { %v982_v41 = vadd.f32 %v892_v39, %v308_v35  ;;  %v894_v42 = vpop.f32.mrb[2].mxu0 }
 0x19a   : > { %987 = vst [vmem:[#allocation2] sm:$0xff] %v981_v38  ;;  %v984_v43 = vadd.f32 %v894_v42, %v310_v37  ;;  %v896_v44 = vpop.f32.mrb[3].mxu0 }
 0x19b   : > { %988 = vst [vmem:[#allocation2 + $0x8] sm:$0xff] %v982_v41  ;;  %v985_v45 = vadd.f32 %v896_v44, %v311_v40 }
 0x19c   : > { %990 = vst [vmem:[#allocation2 + $0x18] sm:$0xff] %v984_v43 }
 0x19d   : > { %991 = vst [vmem:[#allocation2 + $0x20] sm:$0xff] %v985_v45 }
 0x1a1   : > { %v997_v49 = vld [vmem:[#allocation2] sm:$0xff] }
 0x1a2   : > { %v998_v53 = vld [vmem:[#allocation2 + $0x8] sm:$0xff]  ;;  %v1020_v61 = vadd.f32 %v1008_v56, %v997_v49 }
 0x1a3   : > { %v1000_v55 = vld [vmem:[#allocation2 + $0x18] sm:$0xff]  ;;  %v1021_v62 = vadd.f32 %v1012_v57, %v998_v53 }
 0x1a4   : > { %v1001_v59 = vld [vmem:[#allocation2 + $0x20] sm:$0xff]  ;;  %v1023_v0 = vadd.f32 %v1008_v56, %v1000_v55 }
 0x1a5   : > { %v1024_v1 = vadd.f32 %v1012_v57, %v1001_v59  ;;  %v1315_v3 = vpack.c.bf16 %v1021_v62, %v1020_v61 }
 0x1a7   : > { %v1317_v5 = vpack.c.bf16 %v1024_v1, %v1023_v0  ;;  %1046 = vst [vmem:[%s1918_s25] sm:$0xff] %v1315_v3 }
 0x1a9   : > { %1048 = vst [vmem:[%s1918_s25 + $0xc] sm:$0xff] %v1317_v5 }
 0x1aa PF: > { %p2073_p11 = scmp.ne.s32.totalorder %s2071_s14, 0 }
 0x1ab   : > { %s1319_s19 = smul.u32 (%p2073_p11), 12, %s1701_s20  ;;  %v1308_v9 = vld [vmem:[%s1918_s25 + $0x8] sm:$0xf] (%p2073_p11)  ;;  %v1310_v10 = vld [vmem:[%s1918_s25 + $0x14] sm:$0xf] (%p2073_p11) }
 0x1ac   : > { %1056 = sbr.rel (!%p2073_p11) target bundleno = 435 (0x1b3), region = 74 }
 0x1ad   : > { %s1062_s5 = scalar_lea.vmem (%p2073_p11), %s2059_s3, %s1319_s19 }
 0x1ae   : > { %v1077_v7 = vld [vmem:[%s1918_s25] sm:$0xff] (%p2073_p11)  ;;  %1309 = vst [vmem:[%s1062_s5 + $0x8] sm:$0xf] (%p2073_p11), %v1308_v9  ;;  %1311 = vst [vmem:[%s1062_s5 + $0x50] sm:$0xf] (%p2073_p11), %v1310_v10 }
 0x1af   : > { %1078 = vst [vmem:[%s1062_s5] sm:$0xff] (%p2073_p11), %v1077_v7 }
 0x1b0   : > { %v1079_v8 = vld [vmem:[%s1918_s25 + $0xc] sm:$0xff] (%p2073_p11) }
 0x1b1   : > { %1080 = vst [vmem:[%s1062_s5 + $0x48] sm:$0xff] (%p2073_p11), %v1079_v8 }
 0x1b3 PF: > { %s16_s23 = sadd.s32 1, %s1713_s23   ;;  %s2074_s17 = sld [smem:[#allocation8_spill]] }
 0x1b4   : > { %p13_p13 = scmp.ge.s32.totalorder %s16_s23, 14   ;;  %s2075_s18 = sld [smem:[#allocation11_spill]] }
 0x1b5   : > { %s2076_s6 = sld [smem:[#allocation9_spill]]  ;;  %s2077_s0 = sld [smem:[#allocation10_spill]] }
 0x1b6   : > { %s2078_s12 = smov %s1673_s13  ;;  %s2079_s13 = smov %s1846_s11 }
 0x1b7   : > { %s2080_s14 = smov %s1681_s15  ;;  %s2081_s15 = smov %s1685_s16 }
 0x1b8   : > { %s2082_s16 = smov %s1838_s8  ;;  %s2083_s19 = smov %s1705_s21 }
 0x1b9   : > { %s2084_s20 = smov %s1709_s22  ;;  %15 = sbr.rel (!%p13_p13) target bundleno = 9 (0x9), region = 155 }
 0x1bb   : > { %s2085_s21 = smov %s2076_s6  ;;  %s2086_s22 = smov %s2077_s0 }
 0x1c0   :  { %1107 = vsyncpa [#allocation5], 1 }
 0x1c1   :  { %1109 = vsyncpa [#allocation5 + $0x1], 1 }

// kernel: multitask_forward.13
= control target key start
LH: loop header
LB: loop body
LE: loop exit
PB: predicated region body
PF: predicated region fallthrough
CT: control target
= control target key end

     0   :  { %11 = vsyncpa [#allocation5], 0  ;;  %s2954_s0 = inlined_call_operand.vmem [shape: bf16[16,768], index: 0, kind: input, shape index: {}]   ;;  %s2955_s1 = inlined_call_operand.hbm [shape: bf16[768,768], index: 1, kind: input, shape index: {}]   ;;  %s2956_s2 = inlined_call_operand.vmem [shape: f32[1,768], index: 2, kind: input, shape index: {}]   ;;  %s2957_s3 = inlined_call_operand.vmem [shape: bf16[16,768], index: 3, kind: input, shape index: {}]   ;;  %s2958_s4 = inlined_call_operand.vmem [shape: f32[1,768], index: 4, kind: input, shape index: {}]   ;;  %s2959_s5 = inlined_call_operand.vmem [shape: f32[1,768], index: 5, kind: input, shape index: {}]   ;;  %s2960_s6 = inlined_call_operand.vmem [shape: bf16[16,768], index: 6, kind: output, shape index: {}]  }
   0x1   :  { %13 = vsyncpa [#allocation5 + $0x1], 0  ;;  %s2572_s21 = smov 0   ;;  %s2574_s22 = smov 0  }
   0x2   :  { %s2576_s23 = smov 0   ;;  %s2578_s24 = smov 0  }
   0x3   :  { %s2580_s25 = smov 0   ;;  %s2582_s26 = smov 0  }
   0x4 LB: > { %s1979_s27 = sadd.s32 4294967295, %s2530_s26   ;;  %s28_s28 = sadd.s32 1, %s2526_s25  ;;  %s2530_s26 = sphi %s2582_s26, %s19_s26   ;;  %s2526_s25 = sphi %s2580_s25, %s2967_s25   ;;  %s2522_s24 = sphi %s2578_s24, %s2966_s24   ;;  %s2518_s23 = sphi %s2576_s23, %s2965_s23   ;;  %s2514_s22 = sphi %s2574_s22, %s2964_s22   ;;  %s2510_s21 = sphi %s2572_s21, %s2963_s21  }
   0x5   : > { %p29_p0 = scmp.ge.s32.totalorder %s28_s28, 2  ;;  %s40_s29 = sadd.s32 1, %s2518_s23 }
   0x6   : > { %p47_p1 = scmp.ne.s32.totalorder %s2518_s23, %s2514_s22  ;;  %p48_p2 = scmp.eq.s32.totalorder %s2530_s26, 0 }
   0x7   : > { %s2969_s28 = smov (%p29_p0, %s28_s28), 0  ;;  %p79_p4 = scmp.ne.s32.totalorder %s2514_s22, %s2510_s21 }
   0x8   : > { %p2608_p3 = por %p48_p2, %p47_p1  ;;  %s36_s7 = ssub.s32 %s2526_s25, %s2969_s28 }
   0x9   : > { %p80_p5 = scmp.eq.s32.totalorder %s1979_s27, 0  ;;  %p38_p6 = scmp.eq.s32.totalorder %s36_s7, 0 }
   0xa   : > { %p1982_p8 = scmp.ge.s32.totalorder %s2530_s26, 2 }
   0xb   : > { %p2615_p7 = por %p80_p5, %p79_p4 }
   0xc   : > { %s2620_s9 = scalar_select %p38_p6, %s2518_s23, %s40_s29  }
   0xd   : > { %233 = sbr.rel (%p1982_p8) target bundleno = 53 (0x35), region = 32 }
  0x14   : > { %236 = sbr.rel (!%p2608_p3) target bundleno = 27 (0x1b), region = 36  ;;  %s238_s10 = sand.u32 (%p2608_p3), 1, %s2518_s23  }
  0x15   : > { %s2149_s11 = smul.u32 (%p2608_p3), 12, %s2526_s25 }
  0x16   : > { %s2168_s12 = smul.u32 (%p2608_p3), 24, %s238_s10 }
  0x17   : > { %s246_s15 = scalar_lea.vmem (%p2608_p3), %s2954_s0, %s2149_s11 }
  0x18   : > { %v261_v0 = vld [vmem:[%s246_s15] sm:$0xff] (%p2608_p3)  ;;  %v263_v1 = vld [vmem:[%s246_s15 + $0x18] sm:$0xff] (%p2608_p3)  ;;  %v1984_v2 = vld [vmem:[%s246_s15 + $0x8] sm:$0xf] (%p2608_p3)  ;;  %s240_s16 = scalar_lea.vmem (%p2608_p3), [#allocation3], %s2168_s12 }
  0x19   : > { %262 = vst [vmem:[%s240_s16] sm:$0xff] (%p2608_p3), %v261_v0  ;;  %264 = vst [vmem:[%s240_s16 + $0xc] sm:$0xff] (%p2608_p3), %v263_v1  ;;  %v1986_v3 = vld [vmem:[%s246_s15 + $0x20] sm:$0xf] (%p2608_p3) }
  0x1a   : > { %1985 = vst [vmem:[%s240_s16 + $0x8] sm:$0xf] (%p2608_p3), %v1984_v2  ;;  %1987 = vst [vmem:[%s240_s16 + $0x14] sm:$0xf] (%p2608_p3), %v1986_v3 }
  0x1b PF: > { %s282_s17 = sand.u32 1, %s2518_s23   ;;  %s2175_s19 = smul.u32 18432, %s2526_s25 }
  0x1c   : > { %s2169_s18 = smul.u32 1152, %s282_s17  ;;  %s2639_s10 = scalar_lea.sflag [#allocation5], %s282_s17 }
  0x1d   : > { %s2635_s27 = scalar_lea.hbm %s2955_s1, %s2175_s19  ;;  %s2456_s14 = scalar_lea.hbm %s2955_s1, 36864 }
  0x1e   : > { %s286_s29 = scalar_lea.vmem [#allocation4], %s2169_s18  ;;  %s2452_s11 = scalar_lea.hbm %s2635_s27, 18432 }
  0x1f   : > { %s294_s7 = sshll.u32 %s286_s29, 4  ;;  %p2453_p9 = scmp.ne.s32.totalorder %s2635_s27, %s2452_s11  ;;  %s2637_s7 = int_to_ptr.vmem [resolvable:$true] %s294_s7 }
  0x20   : > { %p2457_p12 = scmp.lt.u32.totalorder %s2635_s27, %s2955_s1  ;;  %p2458_p13 = scmp.lt.u32.totalorder %s2456_s14, %s2452_s11 }
  0x21   : > { %p2454_p10 = pnand %p2453_p9, %p2608_p3  ;;  %p2460_p1 = scmp.lt.u32.totalorder %s2452_s11, %s2635_s27 }
  0x22   : > { %p2459_p0 = por %p2458_p13, %p2457_p12 }
  0x23   : > { %p2455_p11 = pneg %p2454_p10 }
  0x24   : > { %p2461_p2 = por %p2460_p1, %p2459_p0 }
  0x26   : > { %p2462_p4 = pnand %p2461_p2, %p2455_p11 }
  0x28   : > { %2465 = shalt.err (!%p2462_p4)
}
  0x29   : > { %s2466_s17 = scalar_lea.vmem %s2637_s7, 18432  ;;  %s2532_s18 = smov [#allocation4]  }
  0x2a   : > { %p2467_p5 = scmp.ne.s32.totalorder %s2637_s7, %s2466_s17  ;;  %s2470_s19 = sshll.u32 %s2532_s18, 4  ;;  %s2471_s19 = int_to_ptr.vmem [resolvable:$false] %s2470_s19 }
  0x2b   : > { %s2472_s20 = scalar_lea.vmem %s2471_s19, 36864  ;;  %p2473_p9 = scmp.lt.s32.totalorder %s2637_s7, %s2471_s19 }
  0x2c   : > { %p2468_p6 = pnand %p2467_p5, %p2608_p3  ;;  %p2474_p10 = scmp.lt.s32.totalorder %s2472_s20, %s2466_s17 }
  0x2e   : > { %p2469_p8 = pneg %p2468_p6  ;;  %p2475_p12 = por %p2474_p10, %p2473_p9 }
  0x30   : > { %p2476_p13 = pnand %p2475_p12, %p2469_p8 }
  0x32   : > { %2479 = shalt.err (!%p2476_p13)
}
  0x33   : > { %s2533_s21 = smov 384   ;;  %s2534_s29 = smov 24  }
  0x34   : > { %2173 = dma.hbm_to_vmem [thread:$0]  (%p2608_p3), %s2635_s27, 18432, %s2637_s7, %s2639_s10, %s2533_s21, %s2533_s21, %s2534_s29  }
  0x35 PF: > { %p1989_p11 = scmp.ge.s32.totalorder %s2530_s26, 1  ;;  %p302_p0 = scmp.lt.s32.totalorder %s2530_s26, 3 }
  0x37   : > { %p303_p1 = pnand %p1989_p11, %p302_p0 }
  0x38   : > { %s309_s11 = sand.u32 (!%p303_p1), 1, %s2514_s22  }
  0x39   : > { %306 = sbr.rel (%p303_p1) target bundleno = 800 (0x320), region = 66  ;;  %s316_s15 = scalar_lea.sflag (!%p303_p1), [#allocation5], %s309_s11 }
  0x3a   : > { %s2171_s12 = smul.u32 (!%p303_p1), 24, %s309_s11 }
  0x3b   : > { %s2172_s13 = smul.u32 (!%p303_p1), 1152, %s309_s11 }
  0x3c   : > { %s2666_s14 = scalar_lea.vmem (!%p303_p1), [#allocation3], %s2171_s12 }
  0x3d   : > { %s2668_s16 = scalar_lea.vmem (!%p303_p1), [#allocation4], %s2172_s13 }
  0x40   : > { %2505 = dma.done.wait (%p2615_p7), %s316_s15, 18432  }
  0x41   : > { %2507 = vsyncadd (%p2615_p7), %s316_s15, 4294948864  ;;  %p1990_p3 = scmp.ne.s32.totalorder %s2522_s24, 0 }
  0x42   : > { %v2535_v4 = vmov (!%p1990_p3), 0.0  }
  0x43   : > { %380 = sbr.rel (%p1990_p3) target bundleno = 74 (0x4a), region = 78  ;;  %381 = vst [vmem:[#allocation2] sm:$0xff] (!%p1990_p3), %v2535_v4  ;;  %382 = vst [vmem:[#allocation2 + $0x8] sm:$0xff] (!%p1990_p3), %v2535_v4 }
  0x44   : > { %383 = vst [vmem:[#allocation2 + $0x10] sm:$0xff] (!%p1990_p3), %v2535_v4  ;;  %384 = vst [vmem:[#allocation2 + $0x18] sm:$0xff] (!%p1990_p3), %v2535_v4 }
  0x45   : > { %385 = vst [vmem:[#allocation2 + $0x20] sm:$0xff] (!%p1990_p3), %v2535_v4  ;;  %386 = vst [vmem:[#allocation2 + $0x28] sm:$0xff] (!%p1990_p3), %v2535_v4 }
  0x46   : > { %387 = vst [vmem:[#allocation2 + $0x30] sm:$0xff] (!%p1990_p3), %v2535_v4  ;;  %388 = vst [vmem:[#allocation2 + $0x38] sm:$0xff] (!%p1990_p3), %v2535_v4 }
  0x47   : > { %389 = vst [vmem:[#allocation2 + $0x40] sm:$0xff] (!%p1990_p3), %v2535_v4  ;;  %390 = vst [vmem:[#allocation2 + $0x48] sm:$0xff] (!%p1990_p3), %v2535_v4 }
  0x48   : > { %391 = vst [vmem:[#allocation2 + $0x50] sm:$0xff] (!%p1990_p3), %v2535_v4  ;;  %392 = vst [vmem:[#allocation2 + $0x58] sm:$0xff] (!%p1990_p3), %v2535_v4 }
  0x4a PF: > { %v2228_v5 = vld [vmem:[%s2668_s16 + $0x4] ss:$24 sps:$4 sm:$0xff]   ;;  %v2536_v7 = vmov 0   ;;  %v2232_v8 = vld [vmem:[%s2668_s16] ss:$24 sps:$4 sm:$0xff]   ;;  %p2138_p7 = scmp.ne.s32.totalorder %s2522_s24, 1 }
  0x4b   : > { %v2230_v6 = vld [vmem:[%s2668_s16 + $0x304] ss:$24 sps:$4 sm:$0xff]   ;;  %1364 = vmatprep.mubr.bf16.mxu0 %v2536_v7  ;;  %1289 = vmatprep.subr.bf16.mxu1 %v2228_v5  ;;  %v2233_v9 = vld [vmem:[%s2668_s16 + $0x300] ss:$24 sps:$4 sm:$0xff]   ;;  %v2234_v10 = vld [vmem:[%s2668_s16 + $0x34] ss:$24 sps:$4 sm:$0xff]  }
  0x4c   : > { %1332 = vmatprep.subr.bf16.mxu0 %v2230_v6  ;;  %1290 = vmatpush1.bf16.msra.mxu1 %v2232_v8  ;;  %v2236_v11 = vld [vmem:[%s2668_s16 + $0x334] ss:$24 sps:$4 sm:$0xff]   ;;  %v2238_v12 = vld [vmem:[%s2668_s16 + $0x30] ss:$24 sps:$4 sm:$0xff]   ;;  %v2240_v14 = vld [vmem:[%s2668_s16 + $0x64] ss:$24 sps:$4 sm:$0xff]  }
  0x4d   : > { %1333 = vmatpush1.bf16.msra.mxu0 %v2233_v9  ;;  %1291 = vmatprep.subr.bf16.mxu1 %v2234_v10  ;;  %v2239_v13 = vld [vmem:[%s2668_s16 + $0x330] ss:$24 sps:$4 sm:$0xff]   ;;  %v2242_v15 = vld [vmem:[%s2668_s16 + $0x364] ss:$24 sps:$4 sm:$0xff]   ;;  %v2244_v16 = vld [vmem:[%s2668_s16 + $0x60] ss:$24 sps:$4 sm:$0xff]  }
  0x4e   : > { %1334 = vmatprep.subr.bf16.mxu0 %v2236_v11  ;;  %v2245_v17 = vld [vmem:[%s2668_s16 + $0x360] ss:$24 sps:$4 sm:$0xff]   ;;  %v2246_v18 = vld [vmem:[%s2668_s16 + $0x94] ss:$24 sps:$4 sm:$0xff]   ;;  %v2250_v20 = vld [vmem:[%s2668_s16 + $0x90] ss:$24 sps:$4 sm:$0xff]  }
  0x4f   : > { %v2248_v19 = vld [vmem:[%s2668_s16 + $0x394] ss:$24 sps:$4 sm:$0xff]   ;;  %v2251_v21 = vld [vmem:[%s2668_s16 + $0x390] ss:$24 sps:$4 sm:$0xff]   ;;  %v2252_v22 = vld [vmem:[%s2668_s16 + $0xc4] ss:$24 sps:$4 sm:$0xff]  }
  0x50   : > { %1292 = vmatpush1.bf16.msra.mxu1 %v2238_v12  ;;  %v2254_v23 = vld [vmem:[%s2668_s16 + $0x3c4] ss:$24 sps:$4 sm:$0xff]   ;;  %v2256_v24 = vld [vmem:[%s2668_s16 + $0xc0] ss:$24 sps:$4 sm:$0xff]   ;;  %v2258_v26 = vld [vmem:[%s2668_s16 + $0xf4] ss:$24 sps:$4 sm:$0xff]  }
  0x51   : > { %1335 = vmatpush1.bf16.msra.mxu0 %v2239_v13  ;;  %1293 = vmatprep.subr.bf16.mxu1 %v2240_v14  ;;  %v2257_v25 = vld [vmem:[%s2668_s16 + $0x3c0] ss:$24 sps:$4 sm:$0xff]   ;;  %v2260_v27 = vld [vmem:[%s2668_s16 + $0x3f4] ss:$24 sps:$4 sm:$0xff]   ;;  %v2262_v28 = vld [vmem:[%s2668_s16 + $0xf0] ss:$24 sps:$4 sm:$0xff]  }
  0x52   : > { %1336 = vmatprep.subr.bf16.mxu0 %v2242_v15  ;;  %v2263_v29 = vld [vmem:[%s2668_s16 + $0x3f0] ss:$24 sps:$4 sm:$0xff]   ;;  %v2264_v30 = vld [vmem:[%s2668_s16 + $0x124] ss:$24 sps:$4 sm:$0xff]   ;;  %v2268_v32 = vld [vmem:[%s2668_s16 + $0x120] ss:$24 sps:$4 sm:$0xff]  }
  0x53   : > { %v2266_v31 = vld [vmem:[%s2668_s16 + $0x424] ss:$24 sps:$4 sm:$0xff]   ;;  %v2269_v33 = vld [vmem:[%s2668_s16 + $0x420] ss:$24 sps:$4 sm:$0xff]   ;;  %v2270_v34 = vld [vmem:[%s2668_s16 + $0x154] ss:$24 sps:$4 sm:$0xff]  }
  0x54   : > { %1294 = vmatpush1.bf16.msra.mxu1 %v2244_v16  ;;  %v2272_v35 = vld [vmem:[%s2668_s16 + $0x454] ss:$24 sps:$4 sm:$0xff]   ;;  %v2274_v36 = vld [vmem:[%s2668_s16 + $0x150] ss:$24 sps:$4 sm:$0xff]   ;;  %v2276_v38 = vld [vmem:[%s2668_s16 + $0x184] ss:$24 sps:$4 sm:$0xff]  }
  0x55   : > { %1337 = vmatpush1.bf16.msra.mxu0 %v2245_v17  ;;  %1295 = vmatprep.subr.bf16.mxu1 %v2246_v18  ;;  %v2275_v37 = vld [vmem:[%s2668_s16 + $0x450] ss:$24 sps:$4 sm:$0xff]   ;;  %v2280_v39 = vld [vmem:[%s2668_s16 + $0x14] ss:$24 sps:$4 sm:$0xff]   ;;  %v2281_v42 = vld [vmem:[%s2668_s16 + $0x180] ss:$24 sps:$4 sm:$0xff]  }
  0x56   : > { %1338 = vmatprep.subr.bf16.mxu0 %v2248_v19  ;;  %v2711_v40 = vld [vmem:[%s2666_s14 + $0x8] ss:$12 sps:$4 sm:$0xff]   ;;  %v2283_v43 = vld [vmem:[%s2668_s16 + $0x1b4] ss:$24 sps:$4 sm:$0xff]   ;;  %v2328_v12 = vld [vmem:[%s2668_s16 + $0x8] ss:$24 sps:$4 sm:$0xff]  }
  0x57   : > { %v2278_v41 = vld [vmem:[%s2668_s16 + $0x10] ss:$24 sps:$4 sm:$0xff]   ;;  %v2287_v44 = vld [vmem:[%s2668_s16 + $0x44] ss:$24 sps:$4 sm:$0xff]   ;;  %v2285_v45 = vld [vmem:[%s2668_s16 + $0x40] ss:$24 sps:$4 sm:$0xff]  }
  0x58   : > { %1296 = vmatpush1.bf16.msra.mxu1 %v2250_v20  ;;  %v2288_v46 = vld [vmem:[%s2668_s16 + $0x1b0] ss:$24 sps:$4 sm:$0xff]   ;;  %v2289_v47 = vld [vmem:[%s2668_s16 + $0x1e4] ss:$24 sps:$4 sm:$0xff]   ;;  %v2293_v48 = vld [vmem:[%s2668_s16 + $0x74] ss:$24 sps:$4 sm:$0xff]  }
  0x59   : > { %1339 = vmatpush1.bf16.msra.mxu0 %v2251_v21  ;;  %1297 = vmatprep.subr.bf16.mxu1 %v2252_v22  ;;  %v2291_v49 = vld [vmem:[%s2668_s16 + $0x70] ss:$24 sps:$4 sm:$0xff]   ;;  %v2294_v50 = vld [vmem:[%s2668_s16 + $0x1e0] ss:$24 sps:$4 sm:$0xff]   ;;  %v2295_v51 = vld [vmem:[%s2668_s16 + $0x214] ss:$24 sps:$4 sm:$0xff]  }
  0x5a   : > { %1340 = vmatprep.subr.bf16.mxu0 %v2254_v23  ;;  %v2299_v52 = vld [vmem:[%s2668_s16 + $0xa4] ss:$24 sps:$4 sm:$0xff]   ;;  %v2297_v53 = vld [vmem:[%s2668_s16 + $0xa0] ss:$24 sps:$4 sm:$0xff]   ;;  %v2300_v54 = vld [vmem:[%s2668_s16 + $0x210] ss:$24 sps:$4 sm:$0xff]  }
  0x5b   : > { %v2301_v55 = vld [vmem:[%s2668_s16 + $0x244] ss:$24 sps:$4 sm:$0xff]   ;;  %v2325_v56 = vld [vmem:[%s2666_s14 + $0x4] ss:$12 sps:$4 sm:$0xff]   ;;  %v2303_v58 = vld [vmem:[%s2668_s16 + $0xd0] ss:$24 sps:$4 sm:$0xff]  }
  0x5c   : > { %1298 = vmatpush1.bf16.msra.mxu1 %v2256_v24  ;;  %v2305_v57 = vld [vmem:[%s2668_s16 + $0xd4] ss:$24 sps:$4 sm:$0xff]   ;;  %1321 = vmatprep.mubr.bf16.mxu1 %v2325_v56  ;;  %v2306_v59 = vld [vmem:[%s2668_s16 + $0x240] ss:$24 sps:$4 sm:$0xff]   ;;  %v2311_v61 = vld [vmem:[%s2668_s16 + $0x104] ss:$24 sps:$4 sm:$0xff]  }
  0x5d   : > { %1341 = vmatpush1.bf16.msra.mxu0 %v2257_v25  ;;  %1299 = vmatprep.subr.bf16.mxu1 %v2258_v26  ;;  %v2307_v60 = vld [vmem:[%s2668_s16 + $0x274] ss:$24 sps:$4 sm:$0xff]   ;;  %v2309_v62 = vld [vmem:[%s2668_s16 + $0x100] ss:$24 sps:$4 sm:$0xff]   ;;  %v2312_v63 = vld [vmem:[%s2668_s16 + $0x270] ss:$24 sps:$4 sm:$0xff]  }
  0x5e   : > { %1342 = vmatprep.subr.bf16.mxu0 %v2260_v27  ;;  %v2313_v0 = vld [vmem:[%s2668_s16 + $0x2a4] ss:$24 sps:$4 sm:$0xff]   ;;  %v2317_v1 = vld [vmem:[%s2668_s16 + $0x134] ss:$24 sps:$4 sm:$0xff]   ;;  %v2315_v2 = vld [vmem:[%s2668_s16 + $0x130] ss:$24 sps:$4 sm:$0xff]  }
  0x5f   : > { %v2318_v3 = vld [vmem:[%s2668_s16 + $0x2a0] ss:$24 sps:$4 sm:$0xff]   ;;  %v2319_v4 = vld [vmem:[%s2668_s16 + $0x2d4] ss:$24 sps:$4 sm:$0xff]   ;;  %v2323_v5 = vld [vmem:[%s2668_s16 + $0x164] ss:$24 sps:$4 sm:$0xff]  }
  0x60   : > { %1300 = vmatpush1.bf16.msra.mxu1 %v2262_v28  ;;  %v2321_v6 = vld [vmem:[%s2668_s16 + $0x160] ss:$24 sps:$4 sm:$0xff]   ;;  %v2324_v8 = vld [vmem:[%s2668_s16 + $0x2d0] ss:$24 sps:$4 sm:$0xff]   ;;  %v2330_v9 = vld [vmem:[%s2668_s16 + $0xc] ss:$24 sps:$4 sm:$0xff]  }
  0x61   : > { %1343 = vmatpush1.bf16.msra.mxu0 %v2263_v29  ;;  %1301 = vmatprep.subr.bf16.mxu1 %v2264_v30  ;;  %v2333_v10 = vld [vmem:[%s2668_s16 + $0x194] ss:$24 sps:$4 sm:$0xff]   ;;  %v2331_v13 = vld [vmem:[%s2668_s16 + $0x190] ss:$24 sps:$4 sm:$0xff]   ;;  %v2339_v15 = vld [vmem:[%s2668_s16 + $0x1c4] ss:$24 sps:$4 sm:$0xff]  }
  0x62   : > { %1344 = vmatprep.subr.bf16.mxu0 %v2266_v31  ;;  %v2748_v11 = vld [vmem:[%s2666_s14] ss:$12 sps:$4 sm:$0xff]   ;;  %v2337_v17 = vld [vmem:[%s2668_s16 + $0x1c0] ss:$24 sps:$4 sm:$0xff]   ;;  %v2342_v18 = vld [vmem:[%s2668_s16 + $0x6c] ss:$24 sps:$4 sm:$0xff]  }
  0x63   : > { %v2336_v14 = vld [vmem:[%s2668_s16 + $0x3c] ss:$24 sps:$4 sm:$0xff]   ;;  %v2334_v16 = vld [vmem:[%s2668_s16 + $0x38] ss:$24 sps:$4 sm:$0xff]   ;;  %v2340_v20 = vld [vmem:[%s2668_s16 + $0x68] ss:$24 sps:$4 sm:$0xff]  }
  0x64   : > { %1302 = vmatpush1.bf16.msra.mxu1 %v2268_v32  ;;  %v2345_v19 = vld [vmem:[%s2668_s16 + $0x1f4] ss:$24 sps:$4 sm:$0xff]   ;;  %v2343_v21 = vld [vmem:[%s2668_s16 + $0x1f0] ss:$24 sps:$4 sm:$0xff]   ;;  %v2351_v23 = vld [vmem:[%s2668_s16 + $0x224] ss:$24 sps:$4 sm:$0xff]  }
  0x65   : > { %1345 = vmatpush1.bf16.msra.mxu0 %v2269_v33  ;;  %1303 = vmatprep.subr.bf16.mxu1 %v2270_v34  ;;  %v2348_v22 = vld [vmem:[%s2668_s16 + $0x9c] ss:$24 sps:$4 sm:$0xff]   ;;  %v2346_v24 = vld [vmem:[%s2668_s16 + $0x98] ss:$24 sps:$4 sm:$0xff]   ;;  %v2354_v26 = vld [vmem:[%s2668_s16 + $0xcc] ss:$24 sps:$4 sm:$0xff]  }
  0x66   : > { %1346 = vmatprep.subr.bf16.mxu0 %v2272_v35  ;;  %v2349_v25 = vld [vmem:[%s2668_s16 + $0x220] ss:$24 sps:$4 sm:$0xff]   ;;  %v2357_v27 = vld [vmem:[%s2668_s16 + $0x254] ss:$24 sps:$4 sm:$0xff]   ;;  %v2355_v29 = vld [vmem:[%s2668_s16 + $0x250] ss:$24 sps:$4 sm:$0xff]  }
  0x67   : > { %v2352_v28 = vld [vmem:[%s2668_s16 + $0xc8] ss:$24 sps:$4 sm:$0xff]   ;;  %v2360_v30 = vld [vmem:[%s2668_s16 + $0xfc] ss:$24 sps:$4 sm:$0xff]   ;;  %v2358_v32 = vld [vmem:[%s2668_s16 + $0xf8] ss:$24 sps:$4 sm:$0xff]  }
  0x68   : > { %1304 = vmatpush1.bf16.msra.mxu1 %v2274_v36  ;;  %v2363_v31 = vld [vmem:[%s2668_s16 + $0x284] ss:$24 sps:$4 sm:$0xff]   ;;  %v2361_v33 = vld [vmem:[%s2668_s16 + $0x280] ss:$24 sps:$4 sm:$0xff]   ;;  %v2369_v35 = vld [vmem:[%s2668_s16 + $0x2b4] ss:$24 sps:$4 sm:$0xff]  }
  0x69   : > { %1347 = vmatpush1.bf16.msra.mxu0 %v2275_v37  ;;  %1305 = vmatprep.subr.bf16.mxu1 %v2276_v38  ;;  %v2366_v34 = vld [vmem:[%s2668_s16 + $0x12c] ss:$24 sps:$4 sm:$0xff]   ;;  %v2364_v36 = vld [vmem:[%s2668_s16 + $0x128] ss:$24 sps:$4 sm:$0xff]   ;;  %v2372_v38 = vld [vmem:[%s2668_s16 + $0x15c] ss:$24 sps:$4 sm:$0xff]  }
  0x6a   : > { %1461 = vmatprep.subr.bf16.mxu0 %v2280_v39  ;;  %v2367_v37 = vld [vmem:[%s2668_s16 + $0x2b0] ss:$24 sps:$4 sm:$0xff]   ;;  %v2375_v39 = vld [vmem:[%s2668_s16 + $0x2e4] ss:$24 sps:$4 sm:$0xff]  }
  0x6c   : > { %1365 = vmatmul.mubr.bf16.vlgmr.msra.gmra.mrb[0].mxu0 %v2711_v40  ;;  %1306 = vmatpush1.bf16.msra.mxu1 %v2281_v42  ;;  %v2373_v42 = vld [vmem:[%s2668_s16 + $0x2e0] ss:$24 sps:$4 sm:$0xff]  }
  0x6d   : > { %1462 = vmatpush1.bf16.msra.mxu0 %v2278_v41  ;;  %1307 = vmatprep.subr.bf16.mxu1 %v2283_v43  ;;  %v2370_v41 = vld [vmem:[%s2668_s16 + $0x158] ss:$24 sps:$4 sm:$0xff]   ;;  %v2378_v43 = vld [vmem:[%s2668_s16 + $0x18c] ss:$24 sps:$4 sm:$0xff]  }
  0x6e   : > { %1463 = vmatprep.subr.bf16.mxu0 %v2287_v44  ;;  %1493 = vmatprep.mubr.bf16.mxu0 %v2325_v56  ;;  %v2381_v44 = vld [vmem:[%s2668_s16 + $0x314] ss:$24 sps:$4 sm:$0xff]  }
  0x70   : > { %1308 = vmatpush1.bf16.msra.mxu1 %v2288_v46  ;;  %v2379_v46 = vld [vmem:[%s2668_s16 + $0x310] ss:$24 sps:$4 sm:$0xff]  }
  0x71   : > { %1464 = vmatpush1.bf16.msra.mxu0 %v2285_v45  ;;  %1309 = vmatprep.subr.bf16.mxu1 %v2289_v47  ;;  %v2376_v45 = vld [vmem:[%s2668_s16 + $0x188] ss:$24 sps:$4 sm:$0xff]   ;;  %v2384_v47 = vld [vmem:[%s2668_s16 + $0x1bc] ss:$24 sps:$4 sm:$0xff]  }
  0x72   : > { %1465 = vmatprep.subr.bf16.mxu0 %v2293_v48  ;;  %v2387_v48 = vld [vmem:[%s2668_s16 + $0x344] ss:$24 sps:$4 sm:$0xff]  }
  0x74   : > { %1310 = vmatpush1.bf16.msra.mxu1 %v2294_v50  ;;  %v2385_v50 = vld [vmem:[%s2668_s16 + $0x340] ss:$24 sps:$4 sm:$0xff]  }
  0x75   : > { %1466 = vmatpush1.bf16.msra.mxu0 %v2291_v49  ;;  %1311 = vmatprep.subr.bf16.mxu1 %v2295_v51  ;;  %v2382_v49 = vld [vmem:[%s2668_s16 + $0x1b8] ss:$24 sps:$4 sm:$0xff]   ;;  %v2390_v51 = vld [vmem:[%s2668_s16 + $0x1ec] ss:$24 sps:$4 sm:$0xff]  }
  0x76   : > { %1467 = vmatprep.subr.bf16.mxu0 %v2299_v52  ;;  %v2393_v52 = vld [vmem:[%s2668_s16 + $0x374] ss:$24 sps:$4 sm:$0xff]  }
  0x78   : > { %1312 = vmatpush1.bf16.msra.mxu1 %v2300_v54  ;;  %v2391_v54 = vld [vmem:[%s2668_s16 + $0x370] ss:$24 sps:$4 sm:$0xff]  }
  0x79   : > { %1468 = vmatpush1.bf16.msra.mxu0 %v2297_v53  ;;  %1313 = vmatprep.subr.bf16.mxu1 %v2301_v55  ;;  %v2388_v53 = vld [vmem:[%s2668_s16 + $0x1e8] ss:$24 sps:$4 sm:$0xff]   ;;  %v2396_v55 = vld [vmem:[%s2668_s16 + $0x21c] ss:$24 sps:$4 sm:$0xff]  }
  0x7a   : > { %1469 = vmatprep.subr.bf16.mxu0 %v2305_v57  ;;  %v2394_v57 = vld [vmem:[%s2668_s16 + $0x218] ss:$24 sps:$4 sm:$0xff]  }
  0x7c   : > { %1314 = vmatpush1.bf16.msra.mxu1 %v2306_v59  ;;  %v2402_v59 = vld [vmem:[%s2668_s16 + $0x24c] ss:$24 sps:$4 sm:$0xff]  }
  0x7d   : > { %1470 = vmatpush1.bf16.msra.mxu0 %v2303_v58  ;;  %1315 = vmatprep.subr.bf16.mxu1 %v2307_v60  ;;  %v2397_v58 = vld [vmem:[%s2668_s16 + $0x3a0] ss:$24 sps:$4 sm:$0xff]   ;;  %v2405_v60 = vld [vmem:[%s2668_s16 + $0x3d4] ss:$24 sps:$4 sm:$0xff]  }
  0x7e   : > { %1471 = vmatprep.subr.bf16.mxu0 %v2311_v61  ;;  %v2400_v61 = vld [vmem:[%s2668_s16 + $0x248] ss:$24 sps:$4 sm:$0xff]  }
  0x80   : > { %1316 = vmatpush1.bf16.msra.mxu1 %v2312_v63  ;;  %v2408_v63 = vld [vmem:[%s2668_s16 + $0x27c] ss:$24 sps:$4 sm:$0xff]  }
  0x81   : > { %1472 = vmatpush1.bf16.msra.mxu0 %v2309_v62  ;;  %1317 = vmatprep.subr.bf16.mxu1 %v2313_v0  ;;  %v2403_v62 = vld [vmem:[%s2668_s16 + $0x3d0] ss:$24 sps:$4 sm:$0xff]   ;;  %v2411_v0 = vld [vmem:[%s2668_s16 + $0x404] ss:$24 sps:$4 sm:$0xff]  }
  0x82   : > { %1473 = vmatprep.subr.bf16.mxu0 %v2317_v1  ;;  %v2406_v1 = vld [vmem:[%s2668_s16 + $0x278] ss:$24 sps:$4 sm:$0xff]  }
  0x84   : > { %1318 = vmatpush1.bf16.msra.mxu1 %v2318_v3  ;;  %v2414_v3 = vld [vmem:[%s2668_s16 + $0x2ac] ss:$24 sps:$4 sm:$0xff]  }
  0x85   : > { %1474 = vmatpush1.bf16.msra.mxu0 %v2315_v2  ;;  %1319 = vmatprep.subr.bf16.mxu1 %v2319_v4  ;;  %v2409_v2 = vld [vmem:[%s2668_s16 + $0x400] ss:$24 sps:$4 sm:$0xff]   ;;  %v2417_v4 = vld [vmem:[%s2668_s16 + $0x434] ss:$24 sps:$4 sm:$0xff]  }
  0x86   : > { %1475 = vmatprep.subr.bf16.mxu0 %v2323_v5  ;;  %v2412_v5 = vld [vmem:[%s2668_s16 + $0x2a8] ss:$24 sps:$4 sm:$0xff]  }
  0x88   : > { %1320 = vmatpush1.bf16.msra.mxu1 %v2324_v8  ;;  %v2420_v8 = vld [vmem:[%s2668_s16 + $0x2dc] ss:$24 sps:$4 sm:$0xff]  }
  0x89   : > { %1476 = vmatpush1.bf16.msra.mxu0 %v2321_v6  ;;  %1375 = vmatprep.subr.bf16.mxu1 %v2330_v9  ;;  %v2415_v6 = vld [vmem:[%s2668_s16 + $0x430] ss:$24 sps:$4 sm:$0xff]   ;;  %v2423_v9 = vld [vmem:[%s2668_s16 + $0x464] ss:$24 sps:$4 sm:$0xff]  }
  0x8a   : > { %1477 = vmatprep.subr.bf16.mxu0 %v2333_v10  ;;  %v2418_v10 = vld [vmem:[%s2668_s16 + $0x2d8] ss:$24 sps:$4 sm:$0xff]  }
  0x8b   : > { %1322 = vmatmul.mubr.bf16.vlgmr.msra.gmra.mrb[0].mxu1 %v2748_v11 }
  0x8c   : > { %1376 = vmatpush1.bf16.msra.mxu1 %v2328_v12  ;;  %1407 = vmatprep.mubr.bf16.mxu1 %v2325_v56  ;;  %v2399_v56 = vld [vmem:[%s2668_s16 + $0x3a4] ss:$24 sps:$4 sm:$0xff]   ;;  %v2421_v12 = vld [vmem:[%s2668_s16 + $0x460] ss:$24 sps:$4 sm:$0xff]  }
  0x8d   : > { %1478 = vmatpush1.bf16.msra.mxu0 %v2331_v13  ;;  %1377 = vmatprep.subr.bf16.mxu1 %v2336_v14  ;;  %v2426_v13 = vld [vmem:[%s2668_s16 + $0x30c] ss:$24 sps:$4 sm:$0xff]   ;;  %v2424_v14 = vld [vmem:[%s2668_s16 + $0x308] ss:$24 sps:$4 sm:$0xff]  }
  0x8e   : > { %1479 = vmatprep.subr.bf16.mxu0 %v2339_v15  ;;  %v2429_v15 = vld [vmem:[%s2668_s16 + $0x33c] ss:$24 sps:$4 sm:$0xff]  }
  0x90   : > { %1378 = vmatpush1.bf16.msra.mxu1 %v2334_v16  ;;  %v2427_v16 = vld [vmem:[%s2668_s16 + $0x338] ss:$24 sps:$4 sm:$0xff]  }
  0x91   : > { %1480 = vmatpush1.bf16.msra.mxu0 %v2337_v17  ;;  %1379 = vmatprep.subr.bf16.mxu1 %v2342_v18  ;;  %v2432_v17 = vld [vmem:[%s2668_s16 + $0x36c] ss:$24 sps:$4 sm:$0xff]   ;;  %v2430_v18 = vld [vmem:[%s2668_s16 + $0x368] ss:$24 sps:$4 sm:$0xff]  }
  0x92   : > { %1481 = vmatprep.subr.bf16.mxu0 %v2345_v19  ;;  %v2435_v19 = vld [vmem:[%s2668_s16 + $0x39c] ss:$24 sps:$4 sm:$0xff]  }
  0x94   : > { %1380 = vmatpush1.bf16.msra.mxu1 %v2340_v20  ;;  %v2433_v20 = vld [vmem:[%s2668_s16 + $0x398] ss:$24 sps:$4 sm:$0xff]  }
  0x95   : > { %1482 = vmatpush1.bf16.msra.mxu0 %v2343_v21  ;;  %1381 = vmatprep.subr.bf16.mxu1 %v2348_v22  ;;  %v2436_v21 = vld [vmem:[%s2668_s16 + $0x3c8] ss:$24 sps:$4 sm:$0xff]   ;;  %v2441_v22 = vld [vmem:[%s2668_s16 + $0x3fc] ss:$24 sps:$4 sm:$0xff]  }
  0x96   : > { %1483 = vmatprep.subr.bf16.mxu0 %v2351_v23  ;;  %v2444_v23 = vld [vmem:[%s2668_s16 + $0x42c] ss:$24 sps:$4 sm:$0xff]  }
  0x98   : > { %1382 = vmatpush1.bf16.msra.mxu1 %v2346_v24  ;;  %v2442_v24 = vld [vmem:[%s2668_s16 + $0x428] ss:$24 sps:$4 sm:$0xff]  }
  0x99   : > { %1484 = vmatpush1.bf16.msra.mxu0 %v2349_v25  ;;  %1383 = vmatprep.subr.bf16.mxu1 %v2354_v26  ;;  %v2447_v25 = vld [vmem:[%s2668_s16 + $0x45c] ss:$24 sps:$4 sm:$0xff]   ;;  %v2445_v26 = vld [vmem:[%s2668_s16 + $0x458] ss:$24 sps:$4 sm:$0xff]  }
  0x9a   : > { %1485 = vmatprep.subr.bf16.mxu0 %v2357_v27 }
  0x9c   : > { %1384 = vmatpush1.bf16.msra.mxu1 %v2352_v28 }
  0x9d   : > { %1486 = vmatpush1.bf16.msra.mxu0 %v2355_v29  ;;  %1385 = vmatprep.subr.bf16.mxu1 %v2360_v30 }
  0x9e   : > { %1487 = vmatprep.subr.bf16.mxu0 %v2363_v31  ;;  %v393_v31 = vld [vmem:[#allocation2] sm:$0xff] }
  0xa0   : > { %1386 = vmatpush1.bf16.msra.mxu1 %v2358_v32 }
  0xa1   : > { %1488 = vmatpush1.bf16.msra.mxu0 %v2361_v33  ;;  %1387 = vmatprep.subr.bf16.mxu1 %v2366_v34  ;;  %v394_v34 = vld [vmem:[#allocation2 + $0x8] sm:$0xff] }
  0xa2   : > { %1489 = vmatprep.subr.bf16.mxu0 %v2369_v35 }
  0xa4   : > { %1388 = vmatpush1.bf16.msra.mxu1 %v2364_v36 }
  0xa5   : > { %1490 = vmatpush1.bf16.msra.mxu0 %v2367_v37  ;;  %1389 = vmatprep.subr.bf16.mxu1 %v2372_v38  ;;  %v399_v37 = vld [vmem:[#allocation2 + $0x30] sm:$0xff] }
  0xa6   : > { %1491 = vmatprep.subr.bf16.mxu0 %v2375_v39 }
  0xa8   : > { %1390 = vmatpush1.bf16.msra.mxu1 %v2370_v41 }
  0xa9   : > { %1492 = vmatpush1.bf16.msra.mxu0 %v2373_v42  ;;  %1391 = vmatprep.subr.bf16.mxu1 %v2378_v43  ;;  %v400_v42 = vld [vmem:[#allocation2 + $0x38] sm:$0xff] }
  0xaa   : > { %1504 = vmatprep.subr.bf16.mxu0 %v2381_v44 }
  0xac   : > { %1494 = vmatmul.mubr.bf16.vlgmr.msra.gmra.mrb[4].mxu0 %v2748_v11  ;;  %1392 = vmatpush1.bf16.msra.mxu1 %v2376_v45 }
  0xad   : > { %1505 = vmatpush1.bf16.msra.mxu0 %v2379_v46  ;;  %1393 = vmatprep.subr.bf16.mxu1 %v2384_v47  ;;  %v397_v47 = vld [vmem:[#allocation2 + $0x20] sm:$0xff] }
  0xae   : > { %1506 = vmatprep.subr.bf16.mxu0 %v2387_v48  ;;  %1536 = vmatprep.mubr.bf16.mxu0 %v2536_v7  ;;  %v398_v48 = vld [vmem:[#allocation2 + $0x28] sm:$0xff] }
  0xb0   : > { %1394 = vmatpush1.bf16.msra.mxu1 %v2382_v49 }
  0xb1   : > { %1507 = vmatpush1.bf16.msra.mxu0 %v2385_v50  ;;  %1395 = vmatprep.subr.bf16.mxu1 %v2390_v51  ;;  %v403_v50 = vld [vmem:[#allocation2 + $0x50] sm:$0xff] }
  0xb2   : > { %1508 = vmatprep.subr.bf16.mxu0 %v2393_v52 }
  0xb4   : > { %1396 = vmatpush1.bf16.msra.mxu1 %v2388_v53  ;;  %v404_v53 = vld [vmem:[#allocation2 + $0x58] sm:$0xff] }
  0xb5   : > { %1509 = vmatpush1.bf16.msra.mxu0 %v2391_v54  ;;  %1397 = vmatprep.subr.bf16.mxu1 %v2396_v55 }
  0xb6   : > { %1510 = vmatprep.subr.bf16.mxu0 %v2399_v56 }
  0xb8   : > { %1398 = vmatpush1.bf16.msra.mxu1 %v2394_v57 }
  0xb9   : > { %1511 = vmatpush1.bf16.msra.mxu0 %v2397_v58  ;;  %1399 = vmatprep.subr.bf16.mxu1 %v2402_v59  ;;  %v395_v59 = vld [vmem:[#allocation2 + $0x10] sm:$0xff] }
  0xba   : > { %1512 = vmatprep.subr.bf16.mxu0 %v2405_v60  ;;  %v396_v60 = vld [vmem:[#allocation2 + $0x18] sm:$0xff] }
  0xbc   : > { %1400 = vmatpush1.bf16.msra.mxu1 %v2400_v61 }
  0xbd   : > { %1513 = vmatpush1.bf16.msra.mxu0 %v2403_v62  ;;  %1401 = vmatprep.subr.bf16.mxu1 %v2408_v63  ;;  %v401_v62 = vld [vmem:[#allocation2 + $0x40] sm:$0xff] }
  0xbe   : > { %1514 = vmatprep.subr.bf16.mxu0 %v2411_v0 }
  0xc0   : > { %1402 = vmatpush1.bf16.msra.mxu1 %v2406_v1  ;;  %v402_v1 = vld [vmem:[#allocation2 + $0x48] sm:$0xff] }
  0xc1   : > { %1515 = vmatpush1.bf16.msra.mxu0 %v2409_v2  ;;  %1403 = vmatprep.subr.bf16.mxu1 %v2414_v3 }
  0xc2   : > { %1516 = vmatprep.subr.bf16.mxu0 %v2417_v4 }
  0xc4   : > { %1404 = vmatpush1.bf16.msra.mxu1 %v2412_v5 }
  0xc5   : > { %1517 = vmatpush1.bf16.msra.mxu0 %v2415_v6  ;;  %1405 = vmatprep.subr.bf16.mxu1 %v2420_v8  ;;  %v1589_v8 = vlaneseq (!%p2138_p7) }
  0xc6   : > { %1518 = vmatprep.subr.bf16.mxu0 %v2423_v9 }
  0xc7   : > { %v1590_v9 = vshrl.u32 (!%p2138_p7), %v1589_v8, 7 }
  0xc8   : > { %1406 = vmatpush1.bf16.msra.mxu1 %v2418_v10  ;;  %v1631_v10 = vld [vmem:[%s2957_s3] sm:$0xff] (!%p2138_p7) }
  0xc9   : > { %1519 = vmatpush1.bf16.msra.mxu0 %v2421_v12  ;;  %1418 = vmatprep.subr.bf16.mxu1 %v2426_v13  ;;  %v1632_v12 = vld [vmem:[%s2957_s3 + $0x8] sm:$0xff] (!%p2138_p7)  ;;  %v1587_v13 = vld [vmem:[%s2956_s2] sm:$0x3f] (!%p2138_p7) }
  0xcb   : > { %1408 = vmatmul.mubr.bf16.vlgmr.msra.gmra.mrb[4].mxu1 %v2748_v11  ;;  %v2438_v11 = vld [vmem:[%s2668_s16 + $0x3cc] ss:$24 sps:$4 sm:$0xff]  }
  0xcc   : > { %1537 = vmatmul.mubr.bf16.vlgmr.msra.gmra.mrb[4].mxu0 %v2711_v40  ;;  %1419 = vmatpush1.bf16.msra.mxu1 %v2424_v14  ;;  %v1637_v14 = vunpack.c.l.bf16 (!%p2138_p7), %v1631_v10 }
  0xcd   : > { %1450 = vmatprep.mubr.bf16.mxu1 %v2536_v7  ;;  %1420 = vmatprep.subr.bf16.mxu1 %v2429_v15  ;;  %v2439_v7 = vld [vmem:[%s2668_s16 + $0x3f8] ss:$24 sps:$4 sm:$0xff]  }
  0xd0   : > { %1421 = vmatpush1.bf16.msra.mxu1 %v2427_v16  ;;  %v2845_v16 = vsub.s32 (!%p2138_p7), 0, %v1590_v9 }
  0xd1   : > { %1422 = vmatprep.subr.bf16.mxu1 %v2432_v17  ;;  %v2847_v17 = vsub.s32 (!%p2138_p7), 1, %v1590_v9 }
  0xd4   : > { %1423 = vmatpush1.bf16.msra.mxu1 %v2430_v18  ;;  %v2849_v18 = vsub.s32 (!%p2138_p7), 2, %v1590_v9 }
  0xd5   : > { %1424 = vmatprep.subr.bf16.mxu1 %v2435_v19  ;;  %v2851_v19 = vsub.s32 (!%p2138_p7), 3, %v1590_v9 }
  0xd8   : > { %1425 = vmatpush1.bf16.msra.mxu1 %v2433_v20 }
  0xd9   : > { %1426 = vmatprep.subr.bf16.mxu1 %v2438_v11 }
  0xdc   : > { %1427 = vmatpush1.bf16.msra.mxu1 %v2436_v21 }
  0xdd   : > { %1428 = vmatprep.subr.bf16.mxu1 %v2441_v22  ;;  %v2853_v22 = vsub.s32 (!%p2138_p7), 4, %v1590_v9 }
  0xe0   : > { %1429 = vmatpush1.bf16.msra.mxu1 %v2439_v7  ;;  %v2855_v7 = vsub.s32 (!%p2138_p7), 5, %v1590_v9 }
  0xe1   : > { %1430 = vmatprep.subr.bf16.mxu1 %v2444_v23  ;;  %v1638_v23 = vunpack.c.h.bf16 (!%p2138_p7), %v1631_v10 }
  0xe4   : > { %1431 = vmatpush1.bf16.msra.mxu1 %v2442_v24  ;;  %v1639_v24 = vunpack.c.l.bf16 (!%p2138_p7), %v1632_v12 }
  0xe5   : > { %1432 = vmatprep.subr.bf16.mxu1 %v2447_v25  ;;  %v1592_v25 = vrot.slane (!%p2138_p7), %v1587_v13, %v2845_v16 }
  0xe8   : > { %1433 = vmatpush1.bf16.msra.mxu1 %v2445_v26  ;;  %v1596_v26 = vrot.slane (!%p2138_p7), %v1587_v13, %v2847_v17 }
  0xeb   : > { %1451 = vmatmul.mubr.bf16.vlgmr.msra.gmra.mrb[4].mxu1 %v2711_v40 }
 0x13f   : > { %v1366_v27 = vpop.f32.mrb[0].mxu0 }
 0x140   : > { %v1368_v28 = vpop.f32.mrb[1].mxu0 }
 0x141   : > { %v1370_v29 = vpop.f32.mrb[2].mxu0 }
 0x142   : > { %v1372_v30 = vpop.f32.mrb[3].mxu0 }
 0x15e   : > { %v1323_v32 = vpop.f32.mrb[0].mxu1 }
 0x15f   : > { %v1367_v33 = vadd.f32 %v1366_v27, %v1323_v32  ;;  %v1325_v35 = vpop.f32.mrb[1].mxu1  ;;  %v1600_v27 = vrot.slane (!%p2138_p7), %v1587_v13, %v2849_v18  ;;  %v1612_v32 = vrot.slane (!%p2138_p7), %v1587_v13, %v2855_v7 }
 0x160   : > { %v1369_v36 = vadd.f32 %v1368_v28, %v1325_v35  ;;  %v1327_v38 = vpop.f32.mrb[2].mxu1  ;;  %v1604_v28 = vrot.slane (!%p2138_p7), %v1587_v13, %v2851_v19 }
 0x161   : > { %v1547_v39 = vadd.f32 %v1367_v33, %v393_v31  ;;  %v1371_v41 = vadd.f32 %v1370_v29, %v1327_v38  ;;  %v1329_v43 = vpop.f32.mrb[3].mxu1  ;;  %v1633_v29 = vld [vmem:[%s2957_s3 + $0x10] sm:$0xff] (!%p2138_p7)  ;;  %v1608_v31 = vrot.slane (!%p2138_p7), %v1587_v13, %v2853_v22  ;;  %v1640_v33 = vunpack.c.h.bf16 (!%p2138_p7), %v1632_v12 }
 0x162   : > { %v1548_v44 = vadd.f32 %v1369_v36, %v394_v34  ;;  %v1373_v45 = vadd.f32 %v1372_v30, %v1329_v43 }
 0x163   : > { %1559 = vst [vmem:[#allocation2] sm:$0xff] %v1547_v39  ;;  %v1553_v40 = vadd.f32 %v1371_v41, %v399_v37  ;;  %v1641_v39 = vunpack.c.l.bf16 (!%p2138_p7), %v1633_v29 }
 0x164   : > { %1560 = vst [vmem:[#allocation2 + $0x8] sm:$0xff] %v1548_v44  ;;  %v1554_v46 = vadd.f32 %v1373_v45, %v400_v42 }
 0x165   : > { %1565 = vst [vmem:[#allocation2 + $0x30] sm:$0xff] %v1553_v40 }
 0x166   : > { %1566 = vst [vmem:[#allocation2 + $0x38] sm:$0xff] %v1554_v46 }
 0x16a   : > { %v1575_v15 = vld [vmem:[#allocation2] sm:$0xff] (!%p2138_p7) }
 0x16b   : > { %v1576_v20 = vld [vmem:[#allocation2 + $0x8] sm:$0xff] (!%p2138_p7)  ;;  %v1619_v34 = vadd.f32 (!%p2138_p7), %v1592_v25, %v1575_v15 }
 0x16c   : > { %v1620_v35 = vadd.f32 (!%p2138_p7), %v1596_v26, %v1576_v20  ;;  %v1581_v45 = vld [vmem:[#allocation2 + $0x30] sm:$0xff] (!%p2138_p7) }
 0x16d   : > { %v1649_v42 = vadd.f32 (!%p2138_p7), %v1637_v14, %v1619_v34  ;;  %v1582_v40 = vld [vmem:[#allocation2 + $0x38] sm:$0xff] (!%p2138_p7) }
 0x16e   : > { %v1650_v43 = vadd.f32 (!%p2138_p7), %v1638_v23, %v1620_v35 }
 0x19f   : > { %v1538_v49 = vpop.f32.mrb[4].mxu0 }
 0x1a0   : > { %v1551_v51 = vadd.f32 %v1538_v49, %v397_v47  ;;  %v1540_v52 = vpop.f32.mrb[5].mxu0 }
 0x1a1   : > { %v1552_v54 = vadd.f32 %v1540_v52, %v398_v48  ;;  %v1542_v55 = vpop.f32.mrb[6].mxu0  ;;  %v1642_v48 = vunpack.c.h.bf16 (!%p2138_p7), %v1633_v29  ;;  %v1634_v52 = vld [vmem:[%s2957_s3 + $0x18] sm:$0xff] (!%p2138_p7) }
 0x1a2   : > { %1563 = vst [vmem:[#allocation2 + $0x20] sm:$0xff] %v1551_v51  ;;  %v1557_v56 = vadd.f32 %v1542_v55, %v403_v50  ;;  %v1544_v57 = vpop.f32.mrb[7].mxu0  ;;  %v1661_v50 = vadd.f32 (!%p2138_p7), %v1650_v43, %v1649_v42 }
 0x1a3   : > { %1564 = vst [vmem:[#allocation2 + $0x28] sm:$0xff] %v1552_v54  ;;  %v1558_v58 = vadd.f32 %v1544_v57, %v404_v53  ;;  %v1625_v53 = vadd.f32 (!%p2138_p7), %v1592_v25, %v1581_v45  ;;  %v1635_v54 = vld [vmem:[%s2957_s3 + $0x20] sm:$0xff] (!%p2138_p7) }
 0x1a4   : > { %1569 = vst [vmem:[#allocation2 + $0x50] sm:$0xff] %v1557_v56 }
 0x1a5   : > { %1570 = vst [vmem:[#allocation2 + $0x58] sm:$0xff] %v1558_v58  ;;  %v1626_v58 = vadd.f32 (!%p2138_p7), %v1596_v26, %v1582_v40 }
 0x1a9   : > { %v1579_v30 = vld [vmem:[#allocation2 + $0x20] sm:$0xff] (!%p2138_p7) }
 0x1aa   : > { %v1580_v38 = vld [vmem:[#allocation2 + $0x28] sm:$0xff] (!%p2138_p7)  ;;  %v1623_v41 = vadd.f32 (!%p2138_p7), %v1608_v31, %v1579_v30 }
 0x1ab   : > { %v1624_v47 = vadd.f32 (!%p2138_p7), %v1612_v32, %v1580_v38  ;;  %v1585_v57 = vld [vmem:[#allocation2 + $0x50] sm:$0xff] (!%p2138_p7) }
 0x1ac   : > { %v1653_v55 = vadd.f32 (!%p2138_p7), %v1641_v39, %v1623_v41 }
 0x1be   : > { %v1452_v61 = vpop.f32.mrb[4].mxu1  ;;  %1574 = sbr.rel (%p2138_p7) target bundleno = 800 (0x320), region = 82 }
 0x1bf   : > { %v1549_v63 = vadd.f32 %v1452_v61, %v395_v59  ;;  %v1454_v0 = vpop.f32.mrb[5].mxu1 }
 0x1c0   : > { %v1550_v2 = vadd.f32 %v1454_v0, %v396_v60  ;;  %v1456_v3 = vpop.f32.mrb[6].mxu1  ;;  %v1636_v60 = vld [vmem:[%s2957_s3 + $0x28] sm:$0xff] (!%p2138_p7)  ;;  %v1654_v0 = vadd.f32 (!%p2138_p7), %v1642_v48, %v1624_v47 }
 0x1c1   : > { %1561 = vst [vmem:[#allocation2 + $0x10] sm:$0xff] %v1549_v63  ;;  %v1555_v4 = vadd.f32 %v1456_v3, %v401_v62  ;;  %v1458_v5 = vpop.f32.mrb[7].mxu1  ;;  %v1643_v62 = vunpack.c.l.bf16 (!%p2138_p7), %v1634_v52  ;;  %v1644_v63 = vunpack.c.h.bf16 (!%p2138_p7), %v1634_v52  ;;  %v1645_v3 = vunpack.c.l.bf16 (!%p2138_p7), %v1635_v54 }
 0x1c2   : > { %1562 = vst [vmem:[#allocation2 + $0x18] sm:$0xff] %v1550_v2  ;;  %v1556_v6 = vadd.f32 %v1458_v5, %v402_v1  ;;  %v1586_v2 = vld [vmem:[#allocation2 + $0x58] sm:$0xff] (!%p2138_p7)  ;;  %v1629_v5 = vadd.f32 (!%p2138_p7), %v1608_v31, %v1585_v57  ;;  %v1648_v14 = vunpack.c.h.bf16 (!%p2138_p7), %v1636_v60 }
 0x1c3   : > { %1567 = vst [vmem:[#allocation2 + $0x40] sm:$0xff] %v1555_v4  ;;  %v1646_v4 = vunpack.c.h.bf16 (!%p2138_p7), %v1635_v54  ;;  %v1655_v8 = vadd.f32 (!%p2138_p7), %v1643_v62, %v1625_v53  ;;  %v1656_v9 = vadd.f32 (!%p2138_p7), %v1644_v63, %v1626_v58  ;;  %v1630_v13 = vadd.f32 (!%p2138_p7), %v1612_v32, %v1586_v2 }
 0x1c4   : > { %1568 = vst [vmem:[#allocation2 + $0x48] sm:$0xff] %v1556_v6  ;;  %v1647_v6 = vunpack.c.l.bf16 (!%p2138_p7), %v1636_v60 }
 0x1c5   : > { %v1668_v20 = vadd.f32 %v1656_v9, %v1655_v8 }
 0x1c8   : > { %v1577_v11 = vld [vmem:[#allocation2 + $0x10] sm:$0xff] }
 0x1c9   : > { %v1578_v21 = vld [vmem:[#allocation2 + $0x18] sm:$0xff]  ;;  %v1621_v36 = vadd.f32 %v1600_v27, %v1577_v11 }
 0x1ca   : > { %v1622_v37 = vadd.f32 %v1604_v28, %v1578_v21  ;;  %v1583_v46 = vld [vmem:[#allocation2 + $0x40] sm:$0xff]  ;;  %v1659_v21 = vadd.f32 %v1647_v6, %v1629_v5 }
 0x1cb   : > { %v1651_v44 = vadd.f32 %v1639_v24, %v1621_v36  ;;  %v1584_v51 = vld [vmem:[#allocation2 + $0x48] sm:$0xff]  ;;  %v1627_v59 = vadd.f32 %v1600_v27, %v1583_v46  ;;  %v1660_v24 = vadd.f32 %v1648_v14, %v1630_v13 }
 0x1cc   : > { %v1652_v49 = vadd.f32 %v1640_v33, %v1622_v37  ;;  %v1628_v61 = vadd.f32 %v1604_v28, %v1584_v51 }
 0x1cd   : > { %v1662_v56 = vadd.f32 %v1661_v50, %v1651_v44  ;;  %v1657_v12 = vadd.f32 %v1645_v3, %v1627_v59 }
 0x1ce   : > { %v1658_v15 = vadd.f32 %v1646_v4, %v1628_v61 }
 0x1cf   : > { %v1663_v1 = vadd.f32 %v1662_v56, %v1652_v49  ;;  %v1669_v23 = vadd.f32 %v1668_v20, %v1657_v12 }
 0x1d1   : > { %v1664_v10 = vadd.f32 %v1663_v1, %v1653_v55  ;;  %v1670_v25 = vadd.f32 %v1669_v23, %v1658_v15 }
 0x1d3   : > { %v1665_v11 = vadd.f32 %v1664_v10, %v1654_v0  ;;  %v1671_v26 = vadd.f32 %v1670_v25, %v1659_v21  ;;  %v1778_v10 = vld [vmem:[%s2959_s5] sm:$0x3f] }
 0x1d4   : > { %v1783_v23 = vrot.slane %v1778_v10, %v2845_v16  ;;  %v1791_v25 = vrot.slane %v1778_v10, %v2849_v18 }
 0x1d5   : > { %1666 = vadd.xlane.f32.xlu0 %v1665_v11  ;;  %v1672_v27 = vadd.f32 %v1671_v26, %v1660_v24  ;;  %v1795_v26 = vrot.slane %v1778_v10, %v2851_v19 }
 0x1d9   : > { %1673 = vadd.xlane.f32.xlu0 %v1672_v27 }
 0x262   : > { %v1667_v28 = vpop.xlane.xlu0 %1666 }
 0x263   : > { %v1676_v29 = vmul.f32 0.0013020834, %v1667_v28 }
 0x265   : > { %v1678_v30 = vsub.f32 %v1649_v42, %v1676_v29  ;;  %v1679_v31 = vsub.f32 %v1650_v43, %v1676_v29  ;;  %v1680_v33 = vsub.f32 %v1651_v44, %v1676_v29  ;;  %v1681_v34 = vsub.f32 %v1652_v49, %v1676_v29 }
 0x266   : > { %v1674_v36 = vpop.xlane.xlu0 %1673  ;;  %v1682_v37 = vsub.f32 %v1653_v55, %v1676_v29  ;;  %v1683_v45 = vsub.f32 %v1654_v0, %v1676_v29 }
 0x267   : > { %v1690_v35 = vmul.f32 %v1678_v30, %v1678_v30  ;;  %v1691_v32 = vmul.f32 %v1679_v31, %v1679_v31  ;;  %v1692_v38 = vmul.f32 %v1680_v33, %v1680_v33  ;;  %v1677_v41 = vmul.f32 0.0013020834, %v1674_v36 }
 0x268   : > { %v1693_v40 = vmul.f32 %v1681_v34, %v1681_v34  ;;  %v1694_v42 = vmul.f32 %v1682_v37, %v1682_v37  ;;  %v1695_v52 = vmul.f32 %v1683_v45, %v1683_v45  ;;  %v1803_v36 = vrot.slane %v1778_v10, %v2855_v7 }
 0x269   : > { %v1702_v39 = vadd.f32 %v1691_v32, %v1690_v35  ;;  %v2875_v47 = vsub.f32 %v1655_v8, %v1677_v41  ;;  %v2877_v48 = vsub.f32 %v1656_v9, %v1677_v41  ;;  %v2879_v50 = vsub.f32 %v1657_v12, %v1677_v41  ;;  %v1734_v8 = vld [vmem:[%s2958_s4] sm:$0x3f] }
 0x26a   : > { %v2881_v44 = vsub.f32 %v1658_v15, %v1677_v41  ;;  %v2887_v54 = vsub.f32 %v1659_v21, %v1677_v41  ;;  %v1689_v58 = vsub.f32 %v1660_v24, %v1677_v41  ;;  %v1739_v12 = vrot.slane %v1734_v8, %v2845_v16 }
 0x26b   : > { %v1703_v46 = vadd.f32 %v1702_v39, %v1692_v38  ;;  %v1696_v49 = vmul.f32 %v2875_v47, %v2875_v47  ;;  %v1697_v51 = vmul.f32 %v2877_v48, %v2877_v48  ;;  %v1698_v55 = vmul.f32 %v2879_v50, %v2879_v50 }
 0x26c   : > { %v1699_v59 = vmul.f32 %v2881_v44, %v2881_v44  ;;  %v1700_v61 = vmul.f32 %v2887_v54, %v2887_v54  ;;  %v1701_v63 = vmul.f32 %v1689_v58, %v1689_v58  ;;  %v1743_v13 = vrot.slane %v1734_v8, %v2847_v17 }
 0x26d   : > { %v1704_v43 = vadd.f32 %v1703_v46, %v1693_v40  ;;  %v1709_v56 = vadd.f32 %v1697_v51, %v1696_v49  ;;  %v1747_v14 = vrot.slane %v1734_v8, %v2849_v18  ;;  %v1751_v15 = vrot.slane %v1734_v8, %v2851_v19 }
 0x26e   : > { %v1755_v20 = vrot.slane %v1734_v8, %v2853_v22  ;;  %v1759_v11 = vrot.slane %v1734_v8, %v2855_v7  ;;  %v1787_v24 = vrot.slane %v1778_v10, %v2847_v17  ;;  %v1799_v32 = vrot.slane %v1778_v10, %v2853_v22 }
 0x26f   : > { %v1705_v53 = vadd.f32 %v1704_v43, %v1694_v42  ;;  %v1710_v60 = vadd.f32 %v1709_v56, %v1698_v55 }
 0x271   : > { %v1706_v57 = vadd.f32 %v1705_v53, %v1695_v52  ;;  %v1711_v62 = vadd.f32 %v1710_v60, %v1699_v59 }
 0x273   : > { %1707 = vadd.xlane.f32.xlu1 %v1706_v57  ;;  %v1712_v0 = vadd.f32 %v1711_v62, %v1700_v61 }
 0x275   : > { %v1713_v1 = vadd.f32 %v1712_v0, %v1701_v63 }
 0x277   : > { %1714 = vadd.xlane.f32.xlu1 %v1713_v1 }
 0x300   : > { %v1708_v2 = vpop.xlane.xlu1 %1707 }
 0x301   : > { %v1716_v3 = vmul.f32 0.0013020834, %v1708_v2 }
 0x303   : > { %v1718_v4 = vadd.f32 1e-12, %v1716_v3 }
 0x304   : > { %v1715_v5 = vpop.xlane.xlu1 %1714 }
 0x305   : > { %2448 = vrsqrt.f32 %v1718_v4  ;;  %v1717_v6 = vmul.f32 0.0013020834, %v1715_v5 }
 0x307   : > { %v1719_v9 = vadd.f32 1e-12, %v1717_v6 }
 0x309   : > { %2450 = vrsqrt.f32 %v1719_v9 }
 0x30f   : > { %v2449_v21 = vpop.eup %2448 }
 0x310   : > { %v1722_v27 = vmul.f32 %v2449_v21, %v1678_v30  ;;  %v1723_v28 = vmul.f32 %v2449_v21, %v1679_v31  ;;  %v1724_v29 = vmul.f32 %v2449_v21, %v1680_v33  ;;  %v1725_v35 = vmul.f32 %v2449_v21, %v1681_v34 }
 0x311   : > { %v1726_v38 = vmul.f32 %v2449_v21, %v1682_v37  ;;  %v1727_v39 = vmul.f32 %v2449_v21, %v1683_v45 }
 0x312   : > { %v1766_v41 = vmul.f32 %v1739_v12, %v1722_v27  ;;  %v1767_v40 = vmul.f32 %v1743_v13, %v1723_v28  ;;  %v1768_v46 = vmul.f32 %v1747_v14, %v1724_v29  ;;  %v1769_v16 = vmul.f32 %v1751_v15, %v1725_v35 }
 0x313   : > { %v1770_v42 = vmul.f32 %v1755_v20, %v1726_v38  ;;  %v1771_v17 = vmul.f32 %v1759_v11, %v1727_v39  ;;  %v2451_v33 = vpop.eup %2450 }
 0x314   : > { %v1810_v43 = vadd.f32 %v1783_v23, %v1766_v41  ;;  %v1811_v18 = vadd.f32 %v1787_v24, %v1767_v40  ;;  %v1812_v49 = vadd.f32 %v1791_v25, %v1768_v46  ;;  %v1813_v19 = vadd.f32 %v1795_v26, %v1769_v16 }
 0x315   : > { %v1814_v30 = vadd.f32 %v1799_v32, %v1770_v42  ;;  %v1815_v31 = vadd.f32 %v1803_v36, %v1771_v17  ;;  %v1728_v7 = vmul.f32 %v2451_v33, %v2875_v47  ;;  %v1729_v37 = vmul.f32 %v2451_v33, %v2877_v48 }
 0x316   : > { %v2150_v34 = vpack.c.bf16 %v1811_v18, %v1810_v43  ;;  %v2151_v51 = vpack.c.bf16 %v1813_v19, %v1812_v49  ;;  %v1730_v45 = vmul.f32 %v2451_v33, %v2879_v50  ;;  %v1731_v52 = vmul.f32 %v2451_v33, %v2881_v44 }
 0x317   : > { %v2152_v22 = vpack.c.bf16 %v1815_v31, %v1814_v30  ;;  %v1732_v53 = vmul.f32 %v2451_v33, %v2887_v54  ;;  %v1733_v55 = vmul.f32 %v2451_v33, %v1689_v58  ;;  %v1772_v47 = vmul.f32 %v1739_v12, %v1728_v7 }
 0x318   : > { %1858 = vst [vmem:[%s2960_s6] sm:$0xff] %v2150_v34  ;;  %1859 = vst [vmem:[%s2960_s6 + $0x8] sm:$0xff] %v2151_v51  ;;  %v1773_v48 = vmul.f32 %v1743_v13, %v1729_v37  ;;  %v1774_v50 = vmul.f32 %v1747_v14, %v1730_v45  ;;  %v1775_v56 = vmul.f32 %v1751_v15, %v1731_v52 }
 0x319   : > { %1860 = vst [vmem:[%s2960_s6 + $0x10] sm:$0xff] %v2152_v22  ;;  %v1776_v57 = vmul.f32 %v1755_v20, %v1732_v53  ;;  %v1777_v59 = vmul.f32 %v1759_v11, %v1733_v55  ;;  %v1816_v60 = vadd.f32 %v1783_v23, %v1772_v47 }
 0x31a   : > { %v1817_v61 = vadd.f32 %v1787_v24, %v1773_v48  ;;  %v1818_v62 = vadd.f32 %v1791_v25, %v1774_v50  ;;  %v1819_v63 = vadd.f32 %v1795_v26, %v1775_v56 }
 0x31b   : > { %v1820_v0 = vadd.f32 %v1799_v32, %v1776_v57  ;;  %v1821_v1 = vadd.f32 %v1803_v36, %v1777_v59 }
 0x31c   : > { %v2153_v44 = vpack.c.bf16 %v1817_v61, %v1816_v60  ;;  %v2154_v2 = vpack.c.bf16 %v1819_v63, %v1818_v62 }
 0x31d   : > { %v2155_v54 = vpack.c.bf16 %v1821_v1, %v1820_v0 }
 0x31e   : > { %1861 = vst [vmem:[%s2960_s6 + $0x18] sm:$0xff] %v2153_v44  ;;  %1862 = vst [vmem:[%s2960_s6 + $0x20] sm:$0xff] %v2154_v2 }
 0x31f   : > { %1863 = vst [vmem:[%s2960_s6 + $0x28] sm:$0xff] %v2155_v54 }
 0x320 PF: > { %s19_s26 = sadd.s32 1, %s2530_s26   ;;  %s2963_s21 = smov %s2514_s22 }
 0x321   : > { %p16_p2 = scmp.ge.s32.totalorder %s19_s26, 4   ;;  %s2964_s22 = smov %s2518_s23 }
 0x322   : > { %s2965_s23 = smov %s2620_s9  ;;  %s2966_s24 = smov %s2526_s25 }
 0x323   : > { %s2967_s25 = smov %s2969_s28  ;;  %18 = sbr.rel (!%p16_p2) target bundleno = 4 (0x4), region = 135 }
 0x32a   :  { %1888 = vsyncpa [#allocation5], 1 }
 0x32b   :  { %1890 = vsyncpa [#allocation5 + $0x1], 1 }

// kernel: multitask_forward.14
= control target key start
LH: loop header
LB: loop body
LE: loop exit
PB: predicated region body
PF: predicated region fallthrough
CT: control target
= control target key end

     0   :  { %s2625_s0 = inlined_call_operand.vmem [shape: bf16[16,768], index: 0, kind: input, shape index: {}]   ;;  %s2626_s1 = inlined_call_operand.vmem [shape: bf16[768,3072], index: 1, kind: input, shape index: {}]   ;;  %s2627_s2 = inlined_call_operand.vmem [shape: f32[1,3072], index: 2, kind: input, shape index: {}]   ;;  %s2628_s3 = inlined_call_operand.vmem [shape: bf16[16,3072], index: 3, kind: output, shape index: {}]  }
   0x1   :  { %2630 = sst [smem:[#allocation7_spill]] %s2625_s0 }
   0x2   :  { %2631 = sst [smem:[#allocation8_spill]] %s2626_s1 }
   0x3   :  { %s2088_s12 = smov 0   ;;  %s2090_s13 = smov 0  }
   0x4   :  { %s2092_s14 = smov 0   ;;  %s2094_s15 = smov 0  }
   0x5   :  { %s2096_s16 = smov 0   ;;  %s2098_s17 = smov 0  }
   0x6   :  { %s2100_s18 = smov 0   ;;  %s2102_s19 = smov 0  }
   0x7   :  { %s2104_s20 = smov 0   ;;  %s2106_s21 = smov 0  }
   0x8   :  { %s2108_s22 = smov 0  }
   0x9 LB: > { %s1580_s23 = sadd.s32 4294967295, %s2064_s22   ;;  %s25_s24 = sadd.s32 1, %s2056_s20  ;;  %s2064_s22 = sphi %s2108_s22, %s13_s22   ;;  %s2060_s21 = sphi %s2106_s21, %s2648_s21   ;;  %s2056_s20 = sphi %s2104_s20, %s2647_s20   ;;  %s2052_s19 = sphi %s2102_s19, %s2646_s19   ;;  %s2048_s18 = sphi %s2100_s18, %s2645_s18   ;;  %s2044_s17 = sphi %s2098_s17, %s2644_s17   ;;  %s2040_s16 = sphi %s2096_s16, %s2643_s16   ;;  %s2036_s15 = sphi %s2094_s15, %s2642_s15   ;;  %s2032_s14 = sphi %s2092_s14, %s2641_s14   ;;  %s2028_s13 = sphi %s2090_s13, %s2640_s13   ;;  %s2024_s12 = sphi %s2088_s12, %s2639_s12  }
   0xa   : > { %p26_p0 = scmp.ge.s32.totalorder %s25_s24, 2  ;;  %s28_s25 = sadd.s32 1, %s2060_s21 }
   0xb   : > { %s41_s26 = sadd.s32 1, %s2044_s17  ;;  %p48_p1 = scmp.ne.s32.totalorder %s2044_s17, %s2040_s16 }
   0xc   : > { %s2650_s24 = smov (%p26_p0, %s25_s24), 0  ;;  %s2652_s25 = smov (!%p26_p0, %s28_s25), %s2060_s21 }
   0xd   : > { %s37_s27 = ssub.s32 %s2056_s20, %s2650_s24  ;;  %p49_p2 = scmp.eq.s32.totalorder %s2064_s22, 0 }
   0xe   : > { %p30_p3 = scmp.ge.s32.totalorder %s2652_s25, 6  ;;  %p39_p4 = scmp.eq.s32.totalorder %s37_s27, 0 }
   0xf   : > { %p2155_p5 = por %p49_p2, %p48_p1  ;;  %s69_s29 = sadd.s32 1, %s2036_s15 }
  0x10   : > { %s2654_s25 = smov (%p30_p3, %s2652_s25), 0  ;;  %p76_p6 = scmp.ne.s32.totalorder %s2036_s15, %s2032_s14 }
  0x11   : > { %2633 = sst [smem:[#allocation6_spill]] %s2654_s25  ;;  %s65_s4 = ssub.s32 %s2060_s21, %s2654_s25 }
  0x12   : > { %s2163_s30 = scalar_select %p39_p4, %s2044_s17, %s41_s26  }
  0x13   : > { %s66_s5 = sor.u32 %s65_s4, %s37_s27  ;;  %p121_p7 = scmp.eq.s32.totalorder %s65_s4, 0 }
  0x14   : > { %p67_p8 = scmp.eq.s32.totalorder %s66_s5, 0  ;;  %p2169_p9 = por %p76_p6, %p49_p2 }
  0x15   : > { %s123_s7 = sadd.s32 1, %s2028_s13  ;;  %p133_p10 = scmp.ne.s32.totalorder %s2028_s13, %s2024_s12 }
  0x16   : > { %s2177_s8 = scalar_select %p67_p8, %s2036_s15, %s69_s29  }
  0x17   : > { %s2180_s9 = scalar_select %p121_p7, %s2028_s13, %s123_s7  }
  0x18   : > { %p134_p11 = scmp.eq.s32.totalorder %s1580_s23, 11  ;;  %p1583_p13 = scmp.ge.s32.totalorder %s2064_s22, 12 }
  0x1a   : > { %p2182_p12 = por %p134_p11, %p133_p10  ;;  %156 = sbr.rel (%p1583_p13) target bundleno = 102 (0x66), region = 16 }
  0x21   : > { %159 = sbr.rel (!%p2155_p5) target bundleno = 44 (0x2c), region = 20  ;;  %s161_s11 = sand.u32 (%p2155_p5), 1, %s2044_s17  }
  0x22   : > { %s1704_s26 = smul.u32 (%p2155_p5), 12, %s2056_s20  ;;  %s2636_s0 = sld [smem:[#allocation7_spill]] (%p2155_p5) }
  0x23   : > { %s1718_s27 = smul.u32 (%p2155_p5), 24, %s161_s11 }
  0x25   : > { %s163_s23 = scalar_lea.vmem (%p2155_p5), [#allocation3], %s1718_s27 }
  0x28   : > { %s169_s5 = scalar_lea.vmem %s2636_s0, %s1704_s26 }
  0x29   : > { %v184_v0 = vld [vmem:[%s169_s5] sm:$0xff]  ;;  %v186_v1 = vld [vmem:[%s169_s5 + $0x18] sm:$0xff]  ;;  %v1585_v2 = vld [vmem:[%s169_s5 + $0x8] sm:$0xf] }
  0x2a   : > { %185 = vst [vmem:[%s163_s23] sm:$0xff] %v184_v0  ;;  %187 = vst [vmem:[%s163_s23 + $0xc] sm:$0xff] %v186_v1  ;;  %v1587_v3 = vld [vmem:[%s169_s5 + $0x20] sm:$0xf] }
  0x2b   : > { %1586 = vst [vmem:[%s163_s23 + $0x8] sm:$0xf] %v1585_v2  ;;  %1588 = vst [vmem:[%s163_s23 + $0x14] sm:$0xf] %v1587_v3 }
  0x2c PF: > { %204 = sbr.rel (!%p2169_p9) target bundleno = 102 (0x66), region = 46  ;;  %s206_s28 = sand.u32 (%p2169_p9), 1, %s2036_s15  }
  0x2d   : > { %s1719_s7 = smul.u32 (%p2169_p9), 768, %s206_s28  ;;  %s1589_s11 = sshll.u32 (%p2169_p9), %s2060_s21, 2 }
  0x2e   : > { %s1723_s26 = smul.u32 (%p2169_p9), 1152, %s2056_s20  ;;  %s2637_s1 = sld [smem:[#allocation8_spill]] (%p2169_p9) }
  0x2f   : > { %s2207_s6 = scalar_lea.vmem (%p2169_p9), [#allocation4], %s1719_s7 }
  0x30   : > { %s212_s29 = sadd.s32 (%p2169_p9), %s1723_s26, %s1589_s11 }
  0x31   : > { %s1590_s4 = sshll.u32 (%p2169_p9), %s212_s29, 2 }
  0x34   : > { %s2202_s25 = scalar_lea.vmem %s2637_s1, %s1590_s4 }
  0x35   : > { %v227_v4 = vld [vmem:[%s2202_s25] sm:$0xff]  ;;  %v229_v5 = vld [vmem:[%s2202_s25 + $0x8] sm:$0xff] }
  0x36   : > { %v231_v6 = vld [vmem:[%s2202_s25 + $0x60] sm:$0xff]  ;;  %228 = vst [vmem:[%s2207_s6] sm:$0xff] %v227_v4  ;;  %230 = vst [vmem:[%s2207_s6 + $0x8] sm:$0xff] %v229_v5  ;;  %v233_v7 = vld [vmem:[%s2202_s25 + $0x68] sm:$0xff] }
  0x37   : > { %232 = vst [vmem:[%s2207_s6 + $0x10] sm:$0xff] %v231_v6  ;;  %v235_v8 = vld [vmem:[%s2202_s25 + $0xc0] sm:$0xff]  ;;  %v237_v9 = vld [vmem:[%s2202_s25 + $0xc8] sm:$0xff]  ;;  %234 = vst [vmem:[%s2207_s6 + $0x18] sm:$0xff] %v233_v7 }
  0x38   : > { %236 = vst [vmem:[%s2207_s6 + $0x20] sm:$0xff] %v235_v8  ;;  %238 = vst [vmem:[%s2207_s6 + $0x28] sm:$0xff] %v237_v9  ;;  %v239_v10 = vld [vmem:[%s2202_s25 + $0x120] sm:$0xff]  ;;  %v241_v11 = vld [vmem:[%s2202_s25 + $0x128] sm:$0xff] }
  0x39   : > { %v243_v12 = vld [vmem:[%s2202_s25 + $0x180] sm:$0xff]  ;;  %240 = vst [vmem:[%s2207_s6 + $0x30] sm:$0xff] %v239_v10  ;;  %242 = vst [vmem:[%s2207_s6 + $0x38] sm:$0xff] %v241_v11  ;;  %v245_v13 = vld [vmem:[%s2202_s25 + $0x188] sm:$0xff] }
  0x3a   : > { %244 = vst [vmem:[%s2207_s6 + $0x40] sm:$0xff] %v243_v12  ;;  %v247_v14 = vld [vmem:[%s2202_s25 + $0x1e0] sm:$0xff]  ;;  %v249_v15 = vld [vmem:[%s2202_s25 + $0x1e8] sm:$0xff]  ;;  %246 = vst [vmem:[%s2207_s6 + $0x48] sm:$0xff] %v245_v13 }
  0x3b   : > { %248 = vst [vmem:[%s2207_s6 + $0x50] sm:$0xff] %v247_v14  ;;  %250 = vst [vmem:[%s2207_s6 + $0x58] sm:$0xff] %v249_v15  ;;  %v251_v16 = vld [vmem:[%s2202_s25 + $0x240] sm:$0xff]  ;;  %v253_v17 = vld [vmem:[%s2202_s25 + $0x248] sm:$0xff] }
  0x3c   : > { %v255_v18 = vld [vmem:[%s2202_s25 + $0x2a0] sm:$0xff]  ;;  %252 = vst [vmem:[%s2207_s6 + $0x60] sm:$0xff] %v251_v16  ;;  %254 = vst [vmem:[%s2207_s6 + $0x68] sm:$0xff] %v253_v17  ;;  %v257_v19 = vld [vmem:[%s2202_s25 + $0x2a8] sm:$0xff] }
  0x3d   : > { %256 = vst [vmem:[%s2207_s6 + $0x70] sm:$0xff] %v255_v18  ;;  %v259_v20 = vld [vmem:[%s2202_s25 + $0x300] sm:$0xff]  ;;  %v261_v21 = vld [vmem:[%s2202_s25 + $0x308] sm:$0xff]  ;;  %258 = vst [vmem:[%s2207_s6 + $0x78] sm:$0xff] %v257_v19 }
  0x3e   : > { %260 = vst [vmem:[%s2207_s6 + $0x80] sm:$0xff] %v259_v20  ;;  %262 = vst [vmem:[%s2207_s6 + $0x88] sm:$0xff] %v261_v21  ;;  %v263_v22 = vld [vmem:[%s2202_s25 + $0x360] sm:$0xff]  ;;  %v265_v23 = vld [vmem:[%s2202_s25 + $0x368] sm:$0xff] }
  0x3f   : > { %v267_v24 = vld [vmem:[%s2202_s25 + $0x3c0] sm:$0xff]  ;;  %264 = vst [vmem:[%s2207_s6 + $0x90] sm:$0xff] %v263_v22  ;;  %266 = vst [vmem:[%s2207_s6 + $0x98] sm:$0xff] %v265_v23  ;;  %v269_v25 = vld [vmem:[%s2202_s25 + $0x3c8] sm:$0xff] }
  0x40   : > { %268 = vst [vmem:[%s2207_s6 + $0xa0] sm:$0xff] %v267_v24  ;;  %v271_v26 = vld [vmem:[%s2202_s25 + $0x420] sm:$0xff]  ;;  %v273_v27 = vld [vmem:[%s2202_s25 + $0x428] sm:$0xff]  ;;  %270 = vst [vmem:[%s2207_s6 + $0xa8] sm:$0xff] %v269_v25 }
  0x41   : > { %272 = vst [vmem:[%s2207_s6 + $0xb0] sm:$0xff] %v271_v26  ;;  %274 = vst [vmem:[%s2207_s6 + $0xb8] sm:$0xff] %v273_v27  ;;  %v275_v28 = vld [vmem:[%s2202_s25 + $0x480] sm:$0xff]  ;;  %v277_v29 = vld [vmem:[%s2202_s25 + $0x488] sm:$0xff] }
  0x42   : > { %v279_v30 = vld [vmem:[%s2202_s25 + $0x4e0] sm:$0xff]  ;;  %276 = vst [vmem:[%s2207_s6 + $0xc0] sm:$0xff] %v275_v28  ;;  %278 = vst [vmem:[%s2207_s6 + $0xc8] sm:$0xff] %v277_v29  ;;  %v281_v31 = vld [vmem:[%s2202_s25 + $0x4e8] sm:$0xff] }
  0x43   : > { %280 = vst [vmem:[%s2207_s6 + $0xd0] sm:$0xff] %v279_v30  ;;  %v283_v32 = vld [vmem:[%s2202_s25 + $0x540] sm:$0xff]  ;;  %v285_v33 = vld [vmem:[%s2202_s25 + $0x548] sm:$0xff]  ;;  %282 = vst [vmem:[%s2207_s6 + $0xd8] sm:$0xff] %v281_v31 }
  0x44   : > { %284 = vst [vmem:[%s2207_s6 + $0xe0] sm:$0xff] %v283_v32  ;;  %286 = vst [vmem:[%s2207_s6 + $0xe8] sm:$0xff] %v285_v33  ;;  %v287_v34 = vld [vmem:[%s2202_s25 + $0x5a0] sm:$0xff]  ;;  %v289_v35 = vld [vmem:[%s2202_s25 + $0x5a8] sm:$0xff] }
  0x45   : > { %v291_v36 = vld [vmem:[%s2202_s25 + $0x600] sm:$0xff]  ;;  %288 = vst [vmem:[%s2207_s6 + $0xf0] sm:$0xff] %v287_v34  ;;  %290 = vst [vmem:[%s2207_s6 + $0xf8] sm:$0xff] %v289_v35  ;;  %v293_v37 = vld [vmem:[%s2202_s25 + $0x608] sm:$0xff] }
  0x46   : > { %292 = vst [vmem:[%s2207_s6 + $0x100] sm:$0xff] %v291_v36  ;;  %v295_v38 = vld [vmem:[%s2202_s25 + $0x660] sm:$0xff]  ;;  %v297_v39 = vld [vmem:[%s2202_s25 + $0x668] sm:$0xff]  ;;  %294 = vst [vmem:[%s2207_s6 + $0x108] sm:$0xff] %v293_v37 }
  0x47   : > { %296 = vst [vmem:[%s2207_s6 + $0x110] sm:$0xff] %v295_v38  ;;  %298 = vst [vmem:[%s2207_s6 + $0x118] sm:$0xff] %v297_v39  ;;  %v299_v40 = vld [vmem:[%s2202_s25 + $0x6c0] sm:$0xff]  ;;  %v301_v41 = vld [vmem:[%s2202_s25 + $0x6c8] sm:$0xff] }
  0x48   : > { %v303_v42 = vld [vmem:[%s2202_s25 + $0x720] sm:$0xff]  ;;  %300 = vst [vmem:[%s2207_s6 + $0x120] sm:$0xff] %v299_v40  ;;  %302 = vst [vmem:[%s2207_s6 + $0x128] sm:$0xff] %v301_v41  ;;  %v305_v43 = vld [vmem:[%s2202_s25 + $0x728] sm:$0xff] }
  0x49   : > { %304 = vst [vmem:[%s2207_s6 + $0x130] sm:$0xff] %v303_v42  ;;  %v307_v44 = vld [vmem:[%s2202_s25 + $0x780] sm:$0xff]  ;;  %v309_v45 = vld [vmem:[%s2202_s25 + $0x788] sm:$0xff]  ;;  %306 = vst [vmem:[%s2207_s6 + $0x138] sm:$0xff] %v305_v43 }
  0x4a   : > { %308 = vst [vmem:[%s2207_s6 + $0x140] sm:$0xff] %v307_v44  ;;  %310 = vst [vmem:[%s2207_s6 + $0x148] sm:$0xff] %v309_v45  ;;  %v311_v46 = vld [vmem:[%s2202_s25 + $0x7e0] sm:$0xff]  ;;  %v313_v47 = vld [vmem:[%s2202_s25 + $0x7e8] sm:$0xff] }
  0x4b   : > { %v315_v48 = vld [vmem:[%s2202_s25 + $0x840] sm:$0xff]  ;;  %312 = vst [vmem:[%s2207_s6 + $0x150] sm:$0xff] %v311_v46  ;;  %314 = vst [vmem:[%s2207_s6 + $0x158] sm:$0xff] %v313_v47  ;;  %v317_v49 = vld [vmem:[%s2202_s25 + $0x848] sm:$0xff] }
  0x4c   : > { %316 = vst [vmem:[%s2207_s6 + $0x160] sm:$0xff] %v315_v48  ;;  %v319_v50 = vld [vmem:[%s2202_s25 + $0x8a0] sm:$0xff]  ;;  %v321_v51 = vld [vmem:[%s2202_s25 + $0x8a8] sm:$0xff]  ;;  %318 = vst [vmem:[%s2207_s6 + $0x168] sm:$0xff] %v317_v49 }
  0x4d   : > { %320 = vst [vmem:[%s2207_s6 + $0x170] sm:$0xff] %v319_v50  ;;  %322 = vst [vmem:[%s2207_s6 + $0x178] sm:$0xff] %v321_v51  ;;  %v323_v52 = vld [vmem:[%s2202_s25 + $0x900] sm:$0xff]  ;;  %v325_v53 = vld [vmem:[%s2202_s25 + $0x908] sm:$0xff] }
  0x4e   : > { %v327_v54 = vld [vmem:[%s2202_s25 + $0x960] sm:$0xff]  ;;  %324 = vst [vmem:[%s2207_s6 + $0x180] sm:$0xff] %v323_v52  ;;  %326 = vst [vmem:[%s2207_s6 + $0x188] sm:$0xff] %v325_v53  ;;  %v329_v55 = vld [vmem:[%s2202_s25 + $0x968] sm:$0xff] }
  0x4f   : > { %328 = vst [vmem:[%s2207_s6 + $0x190] sm:$0xff] %v327_v54  ;;  %v331_v56 = vld [vmem:[%s2202_s25 + $0x9c0] sm:$0xff]  ;;  %v333_v57 = vld [vmem:[%s2202_s25 + $0x9c8] sm:$0xff]  ;;  %330 = vst [vmem:[%s2207_s6 + $0x198] sm:$0xff] %v329_v55 }
  0x50   : > { %332 = vst [vmem:[%s2207_s6 + $0x1a0] sm:$0xff] %v331_v56  ;;  %334 = vst [vmem:[%s2207_s6 + $0x1a8] sm:$0xff] %v333_v57  ;;  %v335_v58 = vld [vmem:[%s2202_s25 + $0xa20] sm:$0xff]  ;;  %v337_v59 = vld [vmem:[%s2202_s25 + $0xa28] sm:$0xff] }
  0x51   : > { %v339_v60 = vld [vmem:[%s2202_s25 + $0xa80] sm:$0xff]  ;;  %336 = vst [vmem:[%s2207_s6 + $0x1b0] sm:$0xff] %v335_v58  ;;  %338 = vst [vmem:[%s2207_s6 + $0x1b8] sm:$0xff] %v337_v59  ;;  %v341_v61 = vld [vmem:[%s2202_s25 + $0xa88] sm:$0xff] }
  0x52   : > { %340 = vst [vmem:[%s2207_s6 + $0x1c0] sm:$0xff] %v339_v60  ;;  %v343_v62 = vld [vmem:[%s2202_s25 + $0xae0] sm:$0xff]  ;;  %v345_v63 = vld [vmem:[%s2202_s25 + $0xae8] sm:$0xff]  ;;  %342 = vst [vmem:[%s2207_s6 + $0x1c8] sm:$0xff] %v341_v61 }
  0x53   : > { %344 = vst [vmem:[%s2207_s6 + $0x1d0] sm:$0xff] %v343_v62  ;;  %346 = vst [vmem:[%s2207_s6 + $0x1d8] sm:$0xff] %v345_v63  ;;  %v347_v0 = vld [vmem:[%s2202_s25 + $0xb40] sm:$0xff]  ;;  %v349_v1 = vld [vmem:[%s2202_s25 + $0xb48] sm:$0xff] }
  0x54   : > { %v351_v2 = vld [vmem:[%s2202_s25 + $0xba0] sm:$0xff]  ;;  %348 = vst [vmem:[%s2207_s6 + $0x1e0] sm:$0xff] %v347_v0  ;;  %350 = vst [vmem:[%s2207_s6 + $0x1e8] sm:$0xff] %v349_v1  ;;  %v353_v3 = vld [vmem:[%s2202_s25 + $0xba8] sm:$0xff] }
  0x55   : > { %352 = vst [vmem:[%s2207_s6 + $0x1f0] sm:$0xff] %v351_v2  ;;  %v355_v4 = vld [vmem:[%s2202_s25 + $0xc00] sm:$0xff]  ;;  %v357_v5 = vld [vmem:[%s2202_s25 + $0xc08] sm:$0xff]  ;;  %354 = vst [vmem:[%s2207_s6 + $0x1f8] sm:$0xff] %v353_v3 }
  0x56   : > { %356 = vst [vmem:[%s2207_s6 + $0x200] sm:$0xff] %v355_v4  ;;  %358 = vst [vmem:[%s2207_s6 + $0x208] sm:$0xff] %v357_v5  ;;  %v359_v6 = vld [vmem:[%s2202_s25 + $0xc60] sm:$0xff]  ;;  %v361_v7 = vld [vmem:[%s2202_s25 + $0xc68] sm:$0xff] }
  0x57   : > { %v363_v8 = vld [vmem:[%s2202_s25 + $0xcc0] sm:$0xff]  ;;  %360 = vst [vmem:[%s2207_s6 + $0x210] sm:$0xff] %v359_v6  ;;  %362 = vst [vmem:[%s2207_s6 + $0x218] sm:$0xff] %v361_v7  ;;  %v365_v9 = vld [vmem:[%s2202_s25 + $0xcc8] sm:$0xff] }
  0x58   : > { %364 = vst [vmem:[%s2207_s6 + $0x220] sm:$0xff] %v363_v8  ;;  %v367_v10 = vld [vmem:[%s2202_s25 + $0xd20] sm:$0xff]  ;;  %v369_v11 = vld [vmem:[%s2202_s25 + $0xd28] sm:$0xff]  ;;  %366 = vst [vmem:[%s2207_s6 + $0x228] sm:$0xff] %v365_v9 }
  0x59   : > { %368 = vst [vmem:[%s2207_s6 + $0x230] sm:$0xff] %v367_v10  ;;  %370 = vst [vmem:[%s2207_s6 + $0x238] sm:$0xff] %v369_v11  ;;  %v371_v12 = vld [vmem:[%s2202_s25 + $0xd80] sm:$0xff]  ;;  %v373_v13 = vld [vmem:[%s2202_s25 + $0xd88] sm:$0xff] }
  0x5a   : > { %v375_v14 = vld [vmem:[%s2202_s25 + $0xde0] sm:$0xff]  ;;  %372 = vst [vmem:[%s2207_s6 + $0x240] sm:$0xff] %v371_v12  ;;  %374 = vst [vmem:[%s2207_s6 + $0x248] sm:$0xff] %v373_v13  ;;  %v377_v15 = vld [vmem:[%s2202_s25 + $0xde8] sm:$0xff] }
  0x5b   : > { %376 = vst [vmem:[%s2207_s6 + $0x250] sm:$0xff] %v375_v14  ;;  %v379_v16 = vld [vmem:[%s2202_s25 + $0xe40] sm:$0xff]  ;;  %v381_v17 = vld [vmem:[%s2202_s25 + $0xe48] sm:$0xff]  ;;  %378 = vst [vmem:[%s2207_s6 + $0x258] sm:$0xff] %v377_v15 }
  0x5c   : > { %380 = vst [vmem:[%s2207_s6 + $0x260] sm:$0xff] %v379_v16  ;;  %382 = vst [vmem:[%s2207_s6 + $0x268] sm:$0xff] %v381_v17  ;;  %v383_v18 = vld [vmem:[%s2202_s25 + $0xea0] sm:$0xff]  ;;  %v385_v19 = vld [vmem:[%s2202_s25 + $0xea8] sm:$0xff] }
  0x5d   : > { %v387_v20 = vld [vmem:[%s2202_s25 + $0xf00] sm:$0xff]  ;;  %384 = vst [vmem:[%s2207_s6 + $0x270] sm:$0xff] %v383_v18  ;;  %386 = vst [vmem:[%s2207_s6 + $0x278] sm:$0xff] %v385_v19  ;;  %v389_v21 = vld [vmem:[%s2202_s25 + $0xf08] sm:$0xff] }
  0x5e   : > { %388 = vst [vmem:[%s2207_s6 + $0x280] sm:$0xff] %v387_v20  ;;  %v391_v22 = vld [vmem:[%s2202_s25 + $0xf60] sm:$0xff]  ;;  %v393_v23 = vld [vmem:[%s2202_s25 + $0xf68] sm:$0xff]  ;;  %390 = vst [vmem:[%s2207_s6 + $0x288] sm:$0xff] %v389_v21 }
  0x5f   : > { %392 = vst [vmem:[%s2207_s6 + $0x290] sm:$0xff] %v391_v22  ;;  %394 = vst [vmem:[%s2207_s6 + $0x298] sm:$0xff] %v393_v23  ;;  %v395_v24 = vld [vmem:[%s2202_s25 + $0xfc0] sm:$0xff]  ;;  %v397_v25 = vld [vmem:[%s2202_s25 + $0xfc8] sm:$0xff] }
  0x60   : > { %v399_v26 = vld [vmem:[%s2202_s25 + $0x1020] sm:$0xff]  ;;  %396 = vst [vmem:[%s2207_s6 + $0x2a0] sm:$0xff] %v395_v24  ;;  %398 = vst [vmem:[%s2207_s6 + $0x2a8] sm:$0xff] %v397_v25  ;;  %v401_v27 = vld [vmem:[%s2202_s25 + $0x1028] sm:$0xff] }
  0x61   : > { %400 = vst [vmem:[%s2207_s6 + $0x2b0] sm:$0xff] %v399_v26  ;;  %v403_v28 = vld [vmem:[%s2202_s25 + $0x1080] sm:$0xff]  ;;  %v405_v29 = vld [vmem:[%s2202_s25 + $0x1088] sm:$0xff]  ;;  %402 = vst [vmem:[%s2207_s6 + $0x2b8] sm:$0xff] %v401_v27 }
  0x62   : > { %404 = vst [vmem:[%s2207_s6 + $0x2c0] sm:$0xff] %v403_v28  ;;  %406 = vst [vmem:[%s2207_s6 + $0x2c8] sm:$0xff] %v405_v29  ;;  %v407_v30 = vld [vmem:[%s2202_s25 + $0x10e0] sm:$0xff]  ;;  %v409_v31 = vld [vmem:[%s2202_s25 + $0x10e8] sm:$0xff] }
  0x63   : > { %v411_v32 = vld [vmem:[%s2202_s25 + $0x1140] sm:$0xff]  ;;  %408 = vst [vmem:[%s2207_s6 + $0x2d0] sm:$0xff] %v407_v30  ;;  %410 = vst [vmem:[%s2207_s6 + $0x2d8] sm:$0xff] %v409_v31  ;;  %v413_v33 = vld [vmem:[%s2202_s25 + $0x1148] sm:$0xff] }
  0x64   : > { %412 = vst [vmem:[%s2207_s6 + $0x2e0] sm:$0xff] %v411_v32  ;;  %v415_v34 = vld [vmem:[%s2202_s25 + $0x11a0] sm:$0xff]  ;;  %v417_v35 = vld [vmem:[%s2202_s25 + $0x11a8] sm:$0xff]  ;;  %414 = vst [vmem:[%s2207_s6 + $0x2e8] sm:$0xff] %v413_v33 }
  0x65   : > { %416 = vst [vmem:[%s2207_s6 + $0x2f0] sm:$0xff] %v415_v34  ;;  %418 = vst [vmem:[%s2207_s6 + $0x2f8] sm:$0xff] %v417_v35 }
  0x66 PF: > { %p1591_p0 = scmp.ge.s32.totalorder %s2064_s22, 1  ;;  %p431_p1 = scmp.lt.s32.totalorder %s2064_s22, 13 }
  0x68   : > { %p432_p2 = pnand %p1591_p0, %p431_p1 }
  0x69   : > { %s438_s0 = sand.u32 (!%p432_p2), 1, %s2040_s16   ;;  %s445_s5 = sand.u32 (!%p432_p2), 1, %s2032_s14  }
  0x6a   : > { %435 = sbr.rel (%p432_p2) target bundleno = 486 (0x1e6), region = 73  ;;  %s472_s28 = sand.u32 (!%p432_p2), 1, %s2024_s12  }
  0x6b   : > { %s1721_s23 = smul.u32 (!%p432_p2), 24, %s438_s0  ;;  %s1592_s7 = sshll.u32 (!%p432_p2), %s472_s28, 5 }
  0x6c   : > { %s1722_s25 = smul.u32 (!%p432_p2), 768, %s445_s5  ;;  %s1593_s11 = sshll.u32 (!%p432_p2), %s2052_s19, 2 }
  0x6d   : > { %p480_p3 = scmp.lt.s32.totalorder (!%p432_p2), %s1593_s11, 23  ;;  %s2410_s27 = scalar_lea.vmem (!%p432_p2), [#allocation3], %s1721_s23 }
  0x6e   : > { %s2412_s6 = scalar_lea.vmem (!%p432_p2), [#allocation4], %s1722_s25  ;;  %s2414_s1 = scalar_lea.vmem (!%p432_p2), [#allocation5], %s1592_s7 }
  0x6f   : > { %p1594_p4 = scmp.ne.s32.totalorder (!%p432_p2), %s2048_s18, 0 }
  0x71   : > { %s2656_s11 = smov (!%p480_p3, %s1593_s11), 23  ;;  %490 = sbr.rel (%p1594_p4) target bundleno = 120 (0x78), region = 85 }
  0x72   : > { %s482_s4 = scalar_lea.vmem %s2627_s2, %s2656_s11  ;;  %v2066_v36 = vmov (!%p1594_p4), 0.0  }
  0x73   : > { %491 = vst [vmem:[#allocation2] sm:$0xff] (!%p1594_p4), %v2066_v36  ;;  %492 = vst [vmem:[#allocation2 + $0x8] sm:$0xff] (!%p1594_p4), %v2066_v36 }
  0x74   : > { %493 = vst [vmem:[#allocation2 + $0x10] sm:$0xff] (!%p1594_p4), %v2066_v36  ;;  %494 = vst [vmem:[#allocation2 + $0x18] sm:$0xff] (!%p1594_p4), %v2066_v36 }
  0x75   : > { %495 = vst [vmem:[#allocation2 + $0x20] sm:$0xff] (!%p1594_p4), %v2066_v36  ;;  %496 = vst [vmem:[#allocation2 + $0x28] sm:$0xff] (!%p1594_p4), %v2066_v36 }
  0x76   : > { %497 = vst [vmem:[#allocation2 + $0x30] sm:$0xff] (!%p1594_p4), %v2066_v36  ;;  %498 = vst [vmem:[#allocation2 + $0x38] sm:$0xff] (!%p1594_p4), %v2066_v36 }
  0x78 PF: > { %v1814_v37 = vld [vmem:[%s2412_s6 + $0x4] ss:$16 sps:$4 sm:$0xff]   ;;  %v1816_v38 = vld [vmem:[%s2412_s6 + $0xc] ss:$16 sps:$4 sm:$0xff]   ;;  %v1818_v39 = vld [vmem:[%s2412_s6] ss:$16 sps:$4 sm:$0xff]  }
  0x79   : > { %1103 = vmatprep.subr.bf16.mxu0 %v1814_v37  ;;  %v1819_v40 = vld [vmem:[%s2412_s6 + $0x8] ss:$16 sps:$4 sm:$0xff]   ;;  %1189 = vmatprep.subr.bf16.mxu1 %v1816_v38  ;;  %v1820_v41 = vld [vmem:[%s2412_s6 + $0x24] ss:$16 sps:$4 sm:$0xff]   ;;  %v1822_v42 = vld [vmem:[%s2412_s6 + $0x2c] ss:$16 sps:$4 sm:$0xff]  }
  0x7a   : > { %1104 = vmatpush1.bf16.msra.mxu0 %v1818_v39  ;;  %1190 = vmatpush1.bf16.msra.mxu1 %v1819_v40  ;;  %v1824_v43 = vld [vmem:[%s2412_s6 + $0x20] ss:$16 sps:$4 sm:$0xff]   ;;  %v1825_v44 = vld [vmem:[%s2412_s6 + $0x28] ss:$16 sps:$4 sm:$0xff]   ;;  %v1826_v45 = vld [vmem:[%s2412_s6 + $0x44] ss:$16 sps:$4 sm:$0xff]  }
  0x7b   : > { %1105 = vmatprep.subr.bf16.mxu0 %v1820_v41  ;;  %1191 = vmatprep.subr.bf16.mxu1 %v1822_v42  ;;  %v1828_v46 = vld [vmem:[%s2412_s6 + $0x4c] ss:$16 sps:$4 sm:$0xff]   ;;  %v1830_v47 = vld [vmem:[%s2412_s6 + $0x40] ss:$16 sps:$4 sm:$0xff]   ;;  %v1831_v48 = vld [vmem:[%s2412_s6 + $0x48] ss:$16 sps:$4 sm:$0xff]  }
  0x7c   : > { %v1832_v49 = vld [vmem:[%s2412_s6 + $0x64] ss:$16 sps:$4 sm:$0xff]   ;;  %v1834_v50 = vld [vmem:[%s2412_s6 + $0x6c] ss:$16 sps:$4 sm:$0xff]   ;;  %v1836_v51 = vld [vmem:[%s2412_s6 + $0x60] ss:$16 sps:$4 sm:$0xff]  }
  0x7d   : > { %v1837_v52 = vld [vmem:[%s2412_s6 + $0x68] ss:$16 sps:$4 sm:$0xff]   ;;  %v1838_v53 = vld [vmem:[%s2412_s6 + $0x84] ss:$16 sps:$4 sm:$0xff]   ;;  %v1840_v54 = vld [vmem:[%s2412_s6 + $0x8c] ss:$16 sps:$4 sm:$0xff]  }
  0x7e   : > { %1106 = vmatpush1.bf16.msra.mxu0 %v1824_v43  ;;  %1192 = vmatpush1.bf16.msra.mxu1 %v1825_v44  ;;  %v1842_v55 = vld [vmem:[%s2412_s6 + $0x80] ss:$16 sps:$4 sm:$0xff]   ;;  %v1843_v56 = vld [vmem:[%s2412_s6 + $0x88] ss:$16 sps:$4 sm:$0xff]   ;;  %v1844_v57 = vld [vmem:[%s2412_s6 + $0xa4] ss:$16 sps:$4 sm:$0xff]  }
  0x7f   : > { %1107 = vmatprep.subr.bf16.mxu0 %v1826_v45  ;;  %1193 = vmatprep.subr.bf16.mxu1 %v1828_v46  ;;  %v1846_v58 = vld [vmem:[%s2412_s6 + $0xac] ss:$16 sps:$4 sm:$0xff]   ;;  %v1848_v59 = vld [vmem:[%s2412_s6 + $0xa0] ss:$16 sps:$4 sm:$0xff]   ;;  %v1849_v60 = vld [vmem:[%s2412_s6 + $0xa8] ss:$16 sps:$4 sm:$0xff]  }
  0x80   : > { %v1850_v61 = vld [vmem:[%s2412_s6 + $0xc4] ss:$16 sps:$4 sm:$0xff]   ;;  %v1852_v62 = vld [vmem:[%s2412_s6 + $0xcc] ss:$16 sps:$4 sm:$0xff]   ;;  %v1854_v63 = vld [vmem:[%s2412_s6 + $0xc0] ss:$16 sps:$4 sm:$0xff]  }
  0x81   : > { %v1855_v0 = vld [vmem:[%s2412_s6 + $0xc8] ss:$16 sps:$4 sm:$0xff]   ;;  %v1856_v1 = vld [vmem:[%s2412_s6 + $0xe4] ss:$16 sps:$4 sm:$0xff]   ;;  %v1858_v2 = vld [vmem:[%s2412_s6 + $0xec] ss:$16 sps:$4 sm:$0xff]  }
  0x82   : > { %1108 = vmatpush1.bf16.msra.mxu0 %v1830_v47  ;;  %1194 = vmatpush1.bf16.msra.mxu1 %v1831_v48  ;;  %v1860_v3 = vld [vmem:[%s2412_s6 + $0xe0] ss:$16 sps:$4 sm:$0xff]   ;;  %v1861_v4 = vld [vmem:[%s2412_s6 + $0xe8] ss:$16 sps:$4 sm:$0xff]   ;;  %v1862_v5 = vld [vmem:[%s2412_s6 + $0x104] ss:$16 sps:$4 sm:$0xff]  }
  0x83   : > { %1109 = vmatprep.subr.bf16.mxu0 %v1832_v49  ;;  %1195 = vmatprep.subr.bf16.mxu1 %v1834_v50  ;;  %v1864_v6 = vld [vmem:[%s2412_s6 + $0x10c] ss:$16 sps:$4 sm:$0xff]   ;;  %v1866_v7 = vld [vmem:[%s2412_s6 + $0x100] ss:$16 sps:$4 sm:$0xff]   ;;  %v1867_v8 = vld [vmem:[%s2412_s6 + $0x108] ss:$16 sps:$4 sm:$0xff]  }
  0x84   : > { %v1868_v9 = vld [vmem:[%s2412_s6 + $0x124] ss:$16 sps:$4 sm:$0xff]   ;;  %v1870_v10 = vld [vmem:[%s2412_s6 + $0x12c] ss:$16 sps:$4 sm:$0xff]   ;;  %v1872_v11 = vld [vmem:[%s2412_s6 + $0x120] ss:$16 sps:$4 sm:$0xff]  }
  0x85   : > { %v1873_v12 = vld [vmem:[%s2412_s6 + $0x128] ss:$16 sps:$4 sm:$0xff]   ;;  %v1874_v13 = vld [vmem:[%s2412_s6 + $0x144] ss:$16 sps:$4 sm:$0xff]   ;;  %v1876_v14 = vld [vmem:[%s2412_s6 + $0x14c] ss:$16 sps:$4 sm:$0xff]  }
  0x86   : > { %1110 = vmatpush1.bf16.msra.mxu0 %v1836_v51  ;;  %1196 = vmatpush1.bf16.msra.mxu1 %v1837_v52  ;;  %v1878_v15 = vld [vmem:[%s2412_s6 + $0x140] ss:$16 sps:$4 sm:$0xff]   ;;  %v1879_v16 = vld [vmem:[%s2412_s6 + $0x148] ss:$16 sps:$4 sm:$0xff]   ;;  %v1880_v17 = vld [vmem:[%s2412_s6 + $0x164] ss:$16 sps:$4 sm:$0xff]  }
  0x87   : > { %1111 = vmatprep.subr.bf16.mxu0 %v1838_v53  ;;  %1197 = vmatprep.subr.bf16.mxu1 %v1840_v54  ;;  %v1882_v18 = vld [vmem:[%s2412_s6 + $0x16c] ss:$16 sps:$4 sm:$0xff]   ;;  %v1884_v19 = vld [vmem:[%s2412_s6 + $0x160] ss:$16 sps:$4 sm:$0xff]   ;;  %v1885_v20 = vld [vmem:[%s2412_s6 + $0x168] ss:$16 sps:$4 sm:$0xff]  }
  0x88   : > { %v1912_v21 = vld [vmem:[%s2410_s27 + $0x4] ss:$12 sps:$4 sm:$0xff]   ;;  %v1910_v40 = vld [vmem:[%s2410_s27] ss:$12 sps:$4 sm:$0xff]   ;;  %v2067_v49 = vmov 0   ;;  %p1694_p5 = scmp.ne.s32.totalorder %s2048_s18, 1 }
  0x89   : > { %v1886_v22 = vld [vmem:[%s2412_s6 + $0x184] ss:$16 sps:$4 sm:$0xff]   ;;  %v1888_v23 = vld [vmem:[%s2412_s6 + $0x18c] ss:$16 sps:$4 sm:$0xff]   ;;  %1135 = vmatprep.mubr.bf16.mxu0 %v1912_v21  ;;  %1221 = vmatprep.mubr.bf16.mxu1 %v1912_v21  ;;  %v1890_v24 = vld [vmem:[%s2412_s6 + $0x180] ss:$16 sps:$4 sm:$0xff]  }
  0x8a   : > { %1112 = vmatpush1.bf16.msra.mxu0 %v1842_v55  ;;  %1198 = vmatpush1.bf16.msra.mxu1 %v1843_v56  ;;  %v1891_v25 = vld [vmem:[%s2412_s6 + $0x188] ss:$16 sps:$4 sm:$0xff]   ;;  %v1892_v26 = vld [vmem:[%s2412_s6 + $0x1a4] ss:$16 sps:$4 sm:$0xff]   ;;  %v1894_v27 = vld [vmem:[%s2412_s6 + $0x1ac] ss:$16 sps:$4 sm:$0xff]  }
  0x8b   : > { %1113 = vmatprep.subr.bf16.mxu0 %v1844_v57  ;;  %1199 = vmatprep.subr.bf16.mxu1 %v1846_v58  ;;  %v1896_v28 = vld [vmem:[%s2412_s6 + $0x1a0] ss:$16 sps:$4 sm:$0xff]   ;;  %v1897_v29 = vld [vmem:[%s2412_s6 + $0x1a8] ss:$16 sps:$4 sm:$0xff]   ;;  %v1898_v30 = vld [vmem:[%s2412_s6 + $0x1c4] ss:$16 sps:$4 sm:$0xff]  }
  0x8c   : > { %v1900_v31 = vld [vmem:[%s2412_s6 + $0x1cc] ss:$16 sps:$4 sm:$0xff]   ;;  %v1902_v32 = vld [vmem:[%s2412_s6 + $0x1c0] ss:$16 sps:$4 sm:$0xff]   ;;  %v1903_v33 = vld [vmem:[%s2412_s6 + $0x1c8] ss:$16 sps:$4 sm:$0xff]  }
  0x8d   : > { %v1904_v34 = vld [vmem:[%s2412_s6 + $0x1e4] ss:$16 sps:$4 sm:$0xff]   ;;  %v1906_v35 = vld [vmem:[%s2412_s6 + $0x1ec] ss:$16 sps:$4 sm:$0xff]   ;;  %v1908_v36 = vld [vmem:[%s2412_s6 + $0x1e0] ss:$16 sps:$4 sm:$0xff]  }
  0x8e   : > { %1114 = vmatpush1.bf16.msra.mxu0 %v1848_v59  ;;  %1200 = vmatpush1.bf16.msra.mxu1 %v1849_v60  ;;  %v1909_v37 = vld [vmem:[%s2412_s6 + $0x1e8] ss:$16 sps:$4 sm:$0xff]   ;;  %v1915_v38 = vld [vmem:[%s2412_s6 + $0x204] ss:$16 sps:$4 sm:$0xff]   ;;  %v1918_v39 = vld [vmem:[%s2412_s6 + $0x20c] ss:$16 sps:$4 sm:$0xff]  }
  0x8f   : > { %1115 = vmatprep.subr.bf16.mxu0 %v1850_v61  ;;  %1201 = vmatprep.subr.bf16.mxu1 %v1852_v62  ;;  %v1913_v41 = vld [vmem:[%s2412_s6 + $0x200] ss:$16 sps:$4 sm:$0xff]   ;;  %v1916_v42 = vld [vmem:[%s2412_s6 + $0x208] ss:$16 sps:$4 sm:$0xff]   ;;  %v1921_v43 = vld [vmem:[%s2412_s6 + $0x224] ss:$16 sps:$4 sm:$0xff]  }
  0x90   : > { %v1924_v44 = vld [vmem:[%s2412_s6 + $0x22c] ss:$16 sps:$4 sm:$0xff]   ;;  %v1919_v45 = vld [vmem:[%s2412_s6 + $0x220] ss:$16 sps:$4 sm:$0xff]   ;;  %v1922_v46 = vld [vmem:[%s2412_s6 + $0x228] ss:$16 sps:$4 sm:$0xff]  }
  0x91   : > { %v1927_v47 = vld [vmem:[%s2412_s6 + $0x244] ss:$16 sps:$4 sm:$0xff]   ;;  %v1930_v48 = vld [vmem:[%s2412_s6 + $0x24c] ss:$16 sps:$4 sm:$0xff]   ;;  %v1925_v50 = vld [vmem:[%s2412_s6 + $0x240] ss:$16 sps:$4 sm:$0xff]  }
  0x92   : > { %1116 = vmatpush1.bf16.msra.mxu0 %v1854_v63  ;;  %1202 = vmatpush1.bf16.msra.mxu1 %v1855_v0  ;;  %v1928_v51 = vld [vmem:[%s2412_s6 + $0x248] ss:$16 sps:$4 sm:$0xff]   ;;  %v1933_v52 = vld [vmem:[%s2412_s6 + $0x264] ss:$16 sps:$4 sm:$0xff]   ;;  %v1936_v53 = vld [vmem:[%s2412_s6 + $0x26c] ss:$16 sps:$4 sm:$0xff]  }
  0x93   : > { %1117 = vmatprep.subr.bf16.mxu0 %v1856_v1  ;;  %1203 = vmatprep.subr.bf16.mxu1 %v1858_v2  ;;  %v1931_v54 = vld [vmem:[%s2412_s6 + $0x260] ss:$16 sps:$4 sm:$0xff]   ;;  %v1934_v55 = vld [vmem:[%s2412_s6 + $0x268] ss:$16 sps:$4 sm:$0xff]   ;;  %v1939_v56 = vld [vmem:[%s2412_s6 + $0x284] ss:$16 sps:$4 sm:$0xff]  }
  0x94   : > { %v1942_v57 = vld [vmem:[%s2412_s6 + $0x28c] ss:$16 sps:$4 sm:$0xff]   ;;  %v1937_v58 = vld [vmem:[%s2412_s6 + $0x280] ss:$16 sps:$4 sm:$0xff]   ;;  %v1940_v59 = vld [vmem:[%s2412_s6 + $0x288] ss:$16 sps:$4 sm:$0xff]  }
  0x95   : > { %v1945_v60 = vld [vmem:[%s2412_s6 + $0x2a4] ss:$16 sps:$4 sm:$0xff]   ;;  %v1948_v61 = vld [vmem:[%s2412_s6 + $0x2ac] ss:$16 sps:$4 sm:$0xff]   ;;  %v1943_v62 = vld [vmem:[%s2412_s6 + $0x2a0] ss:$16 sps:$4 sm:$0xff]  }
  0x96   : > { %1118 = vmatpush1.bf16.msra.mxu0 %v1860_v3  ;;  %1204 = vmatpush1.bf16.msra.mxu1 %v1861_v4  ;;  %v1946_v63 = vld [vmem:[%s2412_s6 + $0x2a8] ss:$16 sps:$4 sm:$0xff]   ;;  %v1951_v0 = vld [vmem:[%s2412_s6 + $0x2c4] ss:$16 sps:$4 sm:$0xff]   ;;  %v1954_v1 = vld [vmem:[%s2412_s6 + $0x2cc] ss:$16 sps:$4 sm:$0xff]  }
  0x97   : > { %1119 = vmatprep.subr.bf16.mxu0 %v1862_v5  ;;  %1205 = vmatprep.subr.bf16.mxu1 %v1864_v6  ;;  %v1949_v2 = vld [vmem:[%s2412_s6 + $0x2c0] ss:$16 sps:$4 sm:$0xff]   ;;  %v1952_v3 = vld [vmem:[%s2412_s6 + $0x2c8] ss:$16 sps:$4 sm:$0xff]   ;;  %v1957_v4 = vld [vmem:[%s2412_s6 + $0x2e4] ss:$16 sps:$4 sm:$0xff]  }
  0x98   : > { %v1960_v5 = vld [vmem:[%s2412_s6 + $0x2ec] ss:$16 sps:$4 sm:$0xff]   ;;  %v1955_v6 = vld [vmem:[%s2412_s6 + $0x2e0] ss:$16 sps:$4 sm:$0xff]  }
  0x99   : > { %v504_v21 = vld [vmem:[#allocation2 + $0x28] sm:$0xff] }
  0x9a   : > { %1120 = vmatpush1.bf16.msra.mxu0 %v1866_v7  ;;  %1206 = vmatpush1.bf16.msra.mxu1 %v1867_v8  ;;  %v1958_v7 = vld [vmem:[%s2412_s6 + $0x2e8] ss:$16 sps:$4 sm:$0xff]  }
  0x9b   : > { %1121 = vmatprep.subr.bf16.mxu0 %v1868_v9  ;;  %1207 = vmatprep.subr.bf16.mxu1 %v1870_v10  ;;  %v1961_v8 = vld [vmem:[%s2410_s27 + $0x8] ss:$12 sps:$4 sm:$0xff]  }
  0x9c   : > { %v499_v9 = vld [vmem:[#allocation2] sm:$0xff]  ;;  %v501_v10 = vld [vmem:[#allocation2 + $0x10] sm:$0xff] }
  0x9e   : > { %1122 = vmatpush1.bf16.msra.mxu0 %v1872_v11  ;;  %1208 = vmatpush1.bf16.msra.mxu1 %v1873_v12  ;;  %v500_v11 = vld [vmem:[#allocation2 + $0x8] sm:$0xff]  ;;  %v502_v12 = vld [vmem:[#allocation2 + $0x18] sm:$0xff] }
  0x9f   : > { %1123 = vmatprep.subr.bf16.mxu0 %v1874_v13  ;;  %1209 = vmatprep.subr.bf16.mxu1 %v1876_v14 }
  0xa2   : > { %1124 = vmatpush1.bf16.msra.mxu0 %v1878_v15  ;;  %1210 = vmatpush1.bf16.msra.mxu1 %v1879_v16  ;;  %v503_v15 = vld [vmem:[#allocation2 + $0x20] sm:$0xff]  ;;  %v505_v16 = vld [vmem:[#allocation2 + $0x30] sm:$0xff] }
  0xa3   : > { %1125 = vmatprep.subr.bf16.mxu0 %v1880_v17  ;;  %1211 = vmatprep.subr.bf16.mxu1 %v1882_v18 }
  0xa6   : > { %1126 = vmatpush1.bf16.msra.mxu0 %v1884_v19  ;;  %1212 = vmatpush1.bf16.msra.mxu1 %v1885_v20 }
  0xa7   : > { %1127 = vmatprep.subr.bf16.mxu0 %v1886_v22  ;;  %1213 = vmatprep.subr.bf16.mxu1 %v1888_v23  ;;  %v506_v22 = vld [vmem:[#allocation2 + $0x38] sm:$0xff] }
  0xaa   : > { %1128 = vmatpush1.bf16.msra.mxu0 %v1890_v24  ;;  %1214 = vmatpush1.bf16.msra.mxu1 %v1891_v25 }
  0xab   : > { %1129 = vmatprep.subr.bf16.mxu0 %v1892_v26  ;;  %1215 = vmatprep.subr.bf16.mxu1 %v1894_v27 }
  0xae   : > { %1130 = vmatpush1.bf16.msra.mxu0 %v1896_v28  ;;  %1216 = vmatpush1.bf16.msra.mxu1 %v1897_v29 }
  0xaf   : > { %1131 = vmatprep.subr.bf16.mxu0 %v1898_v30  ;;  %1217 = vmatprep.subr.bf16.mxu1 %v1900_v31 }
  0xb2   : > { %1132 = vmatpush1.bf16.msra.mxu0 %v1902_v32  ;;  %1218 = vmatpush1.bf16.msra.mxu1 %v1903_v33  ;;  %v1305_v33 = vlaneseq (!%p1694_p5) }
  0xb3   : > { %1133 = vmatprep.subr.bf16.mxu0 %v1904_v34  ;;  %1219 = vmatprep.subr.bf16.mxu1 %v1906_v35  ;;  %v1303_v35 = vld [vmem:[%s482_s4] sm:$0xf] (!%p1694_p5) }
  0xb4   : > { %v1306_v34 = vshrl.u32 (!%p1694_p5), %v1305_v33, 7 }
  0xb6   : > { %1134 = vmatpush1.bf16.msra.mxu0 %v1908_v36  ;;  %1220 = vmatpush1.bf16.msra.mxu1 %v1909_v37 }
  0xb7   : > { %1146 = vmatprep.subr.bf16.mxu0 %v1915_v38  ;;  %1232 = vmatprep.subr.bf16.mxu1 %v1918_v39  ;;  %v1307_v38 = vsub.s32 (!%p1694_p5), 0, %v1306_v34  ;;  %v1311_v39 = vsub.s32 (!%p1694_p5), 1, %v1306_v34 }
  0xb9   : > { %1136 = vmatmul.mubr.bf16.vlgmr.msra.gmra.mrb[0].mxu0 %v1910_v40  ;;  %1222 = vmatmul.mubr.bf16.vlgmr.msra.gmra.mrb[0].mxu1 %v1910_v40  ;;  %v1315_v40 = vsub.s32 (!%p1694_p5), 2, %v1306_v34 }
  0xba   : > { %1147 = vmatpush1.bf16.msra.mxu0 %v1913_v41  ;;  %1233 = vmatpush1.bf16.msra.mxu1 %v1916_v42  ;;  %v1319_v41 = vsub.s32 (!%p1694_p5), 3, %v1306_v34 }
  0xbb   : > { %1148 = vmatprep.subr.bf16.mxu0 %v1921_v43  ;;  %1234 = vmatprep.subr.bf16.mxu1 %v1924_v44 }
  0xbc   : > { %1178 = vmatprep.mubr.bf16.mxu0 %v2067_v49  ;;  %1264 = vmatprep.mubr.bf16.mxu1 %v2067_v49 }
  0xbe   : > { %1149 = vmatpush1.bf16.msra.mxu0 %v1919_v45  ;;  %1235 = vmatpush1.bf16.msra.mxu1 %v1922_v46  ;;  %v1308_v45 = vrot.slane (!%p1694_p5), %v1303_v35, %v1307_v38  ;;  %v1312_v46 = vrot.slane (!%p1694_p5), %v1303_v35, %v1311_v39 }
  0xbf   : > { %1150 = vmatprep.subr.bf16.mxu0 %v1927_v47  ;;  %1236 = vmatprep.subr.bf16.mxu1 %v1930_v48  ;;  %v1316_v47 = vrot.slane (!%p1694_p5), %v1303_v35, %v1315_v40  ;;  %v1320_v48 = vrot.slane (!%p1694_p5), %v1303_v35, %v1319_v41 }
  0xc2   : > { %1151 = vmatpush1.bf16.msra.mxu0 %v1925_v50  ;;  %1237 = vmatpush1.bf16.msra.mxu1 %v1928_v51 }
  0xc3   : > { %1152 = vmatprep.subr.bf16.mxu0 %v1933_v52  ;;  %1238 = vmatprep.subr.bf16.mxu1 %v1936_v53 }
  0xc6   : > { %1153 = vmatpush1.bf16.msra.mxu0 %v1931_v54  ;;  %1239 = vmatpush1.bf16.msra.mxu1 %v1934_v55 }
  0xc7   : > { %1154 = vmatprep.subr.bf16.mxu0 %v1939_v56  ;;  %1240 = vmatprep.subr.bf16.mxu1 %v1942_v57 }
  0xca   : > { %1155 = vmatpush1.bf16.msra.mxu0 %v1937_v58  ;;  %1241 = vmatpush1.bf16.msra.mxu1 %v1940_v59 }
  0xcb   : > { %1156 = vmatprep.subr.bf16.mxu0 %v1945_v60  ;;  %1242 = vmatprep.subr.bf16.mxu1 %v1948_v61 }
  0xce   : > { %1157 = vmatpush1.bf16.msra.mxu0 %v1943_v62  ;;  %1243 = vmatpush1.bf16.msra.mxu1 %v1946_v63 }
  0xcf   : > { %1158 = vmatprep.subr.bf16.mxu0 %v1951_v0  ;;  %1244 = vmatprep.subr.bf16.mxu1 %v1954_v1 }
  0xd2   : > { %1159 = vmatpush1.bf16.msra.mxu0 %v1949_v2  ;;  %1245 = vmatpush1.bf16.msra.mxu1 %v1952_v3 }
  0xd3   : > { %1160 = vmatprep.subr.bf16.mxu0 %v1957_v4  ;;  %1246 = vmatprep.subr.bf16.mxu1 %v1960_v5 }
  0xd6   : > { %1161 = vmatpush1.bf16.msra.mxu0 %v1955_v6  ;;  %1247 = vmatpush1.bf16.msra.mxu1 %v1958_v7 }
  0xd9   : > { %1179 = vmatmul.mubr.bf16.vlgmr.msra.gmra.mrb[0].mxu0 %v1961_v8  ;;  %1265 = vmatmul.mubr.bf16.vlgmr.msra.gmra.mrb[0].mxu1 %v1961_v8 }
 0x1ac   : > { %v1180_v13 = vpop.f32.mrb[0].mxu0  ;;  %v1266_v14 = vpop.f32.mrb[0].mxu1  ;;  %1294 = sbr.rel (%p1694_p5) target bundleno = 478 (0x1de), region = 89 }
 0x1ad   : > { %v1275_v17 = vadd.f32 %v1180_v13, %v499_v9  ;;  %v1277_v18 = vadd.f32 %v1266_v14, %v501_v10  ;;  %v1182_v19 = vpop.f32.mrb[1].mxu0  ;;  %v1268_v20 = vpop.f32.mrb[1].mxu1 }
 0x1ae   : > { %v1276_v23 = vadd.f32 %v1182_v19, %v500_v11  ;;  %v1278_v24 = vadd.f32 %v1268_v20, %v502_v12  ;;  %v1184_v25 = vpop.f32.mrb[2].mxu0  ;;  %v1270_v26 = vpop.f32.mrb[2].mxu1 }
 0x1af   : > { %1283 = vst [vmem:[#allocation2] sm:$0xff] %v1275_v17  ;;  %1285 = vst [vmem:[#allocation2 + $0x10] sm:$0xff] %v1277_v18  ;;  %v1279_v27 = vadd.f32 %v1184_v25, %v503_v15  ;;  %v1281_v28 = vadd.f32 %v1270_v26, %v505_v16  ;;  %v1186_v29 = vpop.f32.mrb[3].mxu0  ;;  %v1272_v30 = vpop.f32.mrb[3].mxu1 }
 0x1b0   : > { %1284 = vst [vmem:[#allocation2 + $0x8] sm:$0xff] %v1276_v23  ;;  %1286 = vst [vmem:[#allocation2 + $0x18] sm:$0xff] %v1278_v24  ;;  %v1280_v31 = vadd.f32 %v1186_v29, %v504_v21  ;;  %v1282_v32 = vadd.f32 %v1272_v30, %v506_v22 }
 0x1b1   : > { %1287 = vst [vmem:[#allocation2 + $0x20] sm:$0xff] %v1279_v27  ;;  %1289 = vst [vmem:[#allocation2 + $0x30] sm:$0xff] %v1281_v28 }
 0x1b2   : > { %1288 = vst [vmem:[#allocation2 + $0x28] sm:$0xff] %v1280_v31  ;;  %1290 = vst [vmem:[#allocation2 + $0x38] sm:$0xff] %v1282_v32 }
 0x1b6   : > { %v1295_v36 = vld [vmem:[#allocation2] sm:$0xff]  ;;  %v1297_v42 = vld [vmem:[#allocation2 + $0x10] sm:$0xff] }
 0x1b7   : > { %v1296_v37 = vld [vmem:[#allocation2 + $0x8] sm:$0xff]  ;;  %v1298_v43 = vld [vmem:[#allocation2 + $0x18] sm:$0xff]  ;;  %v2522_v52 = vadd.f32 %v1308_v45, %v1295_v36  ;;  %v2526_v54 = vadd.f32 %v1316_v47, %v1297_v42 }
 0x1b8   : > { %v1299_v44 = vld [vmem:[#allocation2 + $0x20] sm:$0xff]  ;;  %v1301_v50 = vld [vmem:[#allocation2 + $0x30] sm:$0xff]  ;;  %v2524_v53 = vadd.f32 %v1312_v46, %v1296_v37  ;;  %v2528_v55 = vadd.f32 %v1320_v48, %v1298_v43 }
 0x1b9   : > { %v1300_v49 = vld [vmem:[#allocation2 + $0x28] sm:$0xff]  ;;  %v1302_v51 = vld [vmem:[#allocation2 + $0x38] sm:$0xff]  ;;  %v2530_v56 = vadd.f32 %v1308_v45, %v1299_v44  ;;  %v2534_v58 = vadd.f32 %v1316_v47, %v1301_v50  ;;  %v1333_v60 = vmul.f32 %v2522_v52, %v2522_v52  ;;  %v1335_v62 = vmul.f32 %v2526_v54, %v2526_v54 }
 0x1ba   : > { %v2532_v57 = vadd.f32 %v1312_v46, %v1300_v49  ;;  %v2536_v59 = vadd.f32 %v1320_v48, %v1302_v51  ;;  %v1334_v61 = vmul.f32 %v2524_v53, %v2524_v53  ;;  %v1336_v63 = vmul.f32 %v2528_v55, %v2528_v55 }
 0x1bb   : > { %v1337_v0 = vmul.f32 %v2530_v56, %v2530_v56  ;;  %v1339_v2 = vmul.f32 %v2534_v58, %v2534_v58  ;;  %v1341_v4 = vmul.f32 %v1333_v60, %v2522_v52  ;;  %v1343_v6 = vmul.f32 %v1335_v62, %v2526_v54 }
 0x1bc   : > { %v1338_v1 = vmul.f32 %v2532_v57, %v2532_v57  ;;  %v1340_v3 = vmul.f32 %v2536_v59, %v2536_v59  ;;  %v1342_v5 = vmul.f32 %v1334_v61, %v2524_v53  ;;  %v1344_v7 = vmul.f32 %v1336_v63, %v2528_v55 }
 0x1bd   : > { %v1345_v8 = vmul.f32 %v1337_v0, %v2530_v56  ;;  %v1347_v10 = vmul.f32 %v1339_v2, %v2534_v58  ;;  %v1349_v12 = vmul.f32 0.044715, %v1341_v4  ;;  %v1351_v14 = vmul.f32 0.044715, %v1343_v6 }
 0x1be   : > { %v1346_v9 = vmul.f32 %v1338_v1, %v2532_v57  ;;  %v1348_v11 = vmul.f32 %v1340_v3, %v2536_v59  ;;  %v1350_v13 = vmul.f32 0.044715, %v1342_v5  ;;  %v1352_v15 = vmul.f32 0.044715, %v1344_v7 }
 0x1bf   : > { %v1353_v16 = vmul.f32 0.044715, %v1345_v8  ;;  %v1357_v18 = vadd.f32 %v1349_v12, %v2522_v52  ;;  %v1359_v20 = vadd.f32 %v1351_v14, %v2526_v54  ;;  %v1355_v21 = vmul.f32 0.044715, %v1347_v10 }
 0x1c0   : > { %v1354_v17 = vmul.f32 0.044715, %v1346_v9  ;;  %v1358_v19 = vadd.f32 %v1350_v13, %v2524_v53  ;;  %v1360_v22 = vadd.f32 %v1352_v15, %v2528_v55  ;;  %v1356_v25 = vmul.f32 0.044715, %v1348_v11 }
 0x1c1   : > { %v1361_v23 = vadd.f32 %v1353_v16, %v2530_v56  ;;  %v1365_v26 = vmul.f32 0.7978846, %v1357_v18  ;;  %v1367_v28 = vmul.f32 0.7978846, %v1359_v20  ;;  %v1363_v29 = vadd.f32 %v1355_v21, %v2534_v58 }
 0x1c2   : > { %v1362_v24 = vadd.f32 %v1354_v17, %v2532_v57  ;;  %v1366_v27 = vmul.f32 0.7978846, %v1358_v19  ;;  %v1368_v30 = vmul.f32 0.7978846, %v1360_v22  ;;  %v1364_v31 = vadd.f32 %v1356_v25, %v2536_v59 }
 0x1c3   : > { %1962 = vtanh.f32 %v1365_v26  ;;  %v1369_v32 = vmul.f32 0.7978846, %v1361_v23  ;;  %v1371_v34 = vmul.f32 0.7978846, %v1363_v29 }
 0x1c4   : > { %1964 = vtanh.f32 %v1366_v27  ;;  %v1370_v33 = vmul.f32 0.7978846, %v1362_v24  ;;  %v1372_v35 = vmul.f32 0.7978846, %v1364_v31 }
 0x1c5   : > { %1966 = vtanh.f32 %v1367_v28 }
 0x1c6   : > { %1968 = vtanh.f32 %v1368_v30 }
 0x1c7   : > { %1970 = vtanh.f32 %v1369_v32 }
 0x1c8   : > { %1972 = vtanh.f32 %v1370_v33 }
 0x1c9   : > { %1974 = vtanh.f32 %v1371_v34 }
 0x1ca   : > { %1976 = vtanh.f32 %v1372_v35 }
 0x1cd   : > { %v1963_v36 = vpop.eup %1962 }
 0x1ce   : > { %v1965_v37 = vpop.eup %1964  ;;  %v1381_v38 = vadd.f32 1.0, %v1963_v36 }
 0x1cf   : > { %v1967_v39 = vpop.eup %1966  ;;  %v1382_v40 = vadd.f32 1.0, %v1965_v37 }
 0x1d0   : > { %v1969_v41 = vpop.eup %1968  ;;  %v1389_v42 = vmul.f32 0.5, %v1381_v38  ;;  %v1383_v43 = vadd.f32 1.0, %v1967_v39 }
 0x1d1   : > { %v1971_v44 = vpop.eup %1970  ;;  %v1390_v45 = vmul.f32 0.5, %v1382_v40  ;;  %v1384_v46 = vadd.f32 1.0, %v1969_v41 }
 0x1d2   : > { %v1973_v47 = vpop.eup %1972  ;;  %v1397_v48 = vmul.f32 %v1389_v42, %v2522_v52  ;;  %v1391_v49 = vmul.f32 0.5, %v1383_v43  ;;  %v1385_v50 = vadd.f32 1.0, %v1971_v44 }
 0x1d3   : > { %v1975_v51 = vpop.eup %1974  ;;  %v1398_v60 = vmul.f32 %v1390_v45, %v2524_v53  ;;  %v1392_v61 = vmul.f32 0.5, %v1384_v46  ;;  %v1386_v62 = vadd.f32 1.0, %v1973_v47 }
 0x1d4   : > { %v1977_v63 = vpop.eup %1976  ;;  %v1399_v0 = vmul.f32 %v1391_v49, %v2526_v54  ;;  %v1393_v1 = vmul.f32 0.5, %v1385_v50  ;;  %v1387_v2 = vadd.f32 1.0, %v1975_v51 }
 0x1d5   : > { %v1705_v3 = vpack.c.bf16 %v1398_v60, %v1397_v48  ;;  %v1400_v4 = vmul.f32 %v1392_v61, %v2528_v55  ;;  %v1394_v52 = vmul.f32 0.5, %v1386_v62  ;;  %v1388_v5 = vadd.f32 1.0, %v1977_v63 }
 0x1d6   : > { %v1401_v6 = vmul.f32 %v1393_v1, %v2530_v56  ;;  %v1395_v7 = vmul.f32 0.5, %v1387_v2 }
 0x1d7   : > { %1429 = vst [vmem:[%s2414_s1] sm:$0xff] %v1705_v3  ;;  %v1706_v53 = vpack.c.bf16 %v1400_v4, %v1399_v0  ;;  %v1402_v8 = vmul.f32 %v1394_v52, %v2532_v57  ;;  %v1396_v9 = vmul.f32 0.5, %v1388_v5 }
 0x1d8   : > { %v1403_v10 = vmul.f32 %v1395_v7, %v2534_v58 }
 0x1d9   : > { %1430 = vst [vmem:[%s2414_s1 + $0x8] sm:$0xff] %v1706_v53  ;;  %v1707_v54 = vpack.c.bf16 %v1402_v8, %v1401_v6  ;;  %v1404_v11 = vmul.f32 %v1396_v9, %v2536_v59 }
 0x1db   : > { %1431 = vst [vmem:[%s2414_s1 + $0x10] sm:$0xff] %v1707_v54  ;;  %v1708_v12 = vpack.c.bf16 %v1404_v11, %v1403_v10 }
 0x1dd   : > { %1432 = vst [vmem:[%s2414_s1 + $0x18] sm:$0xff] %v1708_v12 }
 0x1de PF: > { %1439 = sbr.rel (!%p2182_p12) target bundleno = 486 (0x1e6), region = 93  ;;  %s1709_s16 = sshll.u32 (%p2182_p12), %s2052_s19, 4  ;;  %v1458_v55 = vld [vmem:[%s2414_s1] sm:$0xff] (%p2182_p12) }
 0x1df   : > { %s1445_s5 = scalar_lea.vmem (%p2182_p12), %s2628_s3, %s1709_s16 }
 0x1e0   : > { %v1460_v56 = vld [vmem:[%s2414_s1 + $0x8] sm:$0xff] (%p2182_p12)  ;;  %1459 = vst [vmem:[%s1445_s5] sm:$0xff] (%p2182_p12), %v1458_v55 }
 0x1e1   : > { %1461 = vst [vmem:[%s1445_s5 + $0x8] sm:$0xff] (%p2182_p12), %v1460_v56 }
 0x1e2   : > { %v1462_v57 = vld [vmem:[%s2414_s1 + $0x10] sm:$0xff] (%p2182_p12) }
 0x1e3   : > { %1463 = vst [vmem:[%s1445_s5 + $0x60] sm:$0xff] (%p2182_p12), %v1462_v57 }
 0x1e4   : > { %v1464_v58 = vld [vmem:[%s2414_s1 + $0x18] sm:$0xff] (%p2182_p12) }
 0x1e5   : > { %1465 = vst [vmem:[%s1445_s5 + $0x68] sm:$0xff] %v1464_v58 }
 0x1e6 PF: > { %s13_s22 = sadd.s32 1, %s2064_s22   ;;  %s2638_s10 = sld [smem:[#allocation6_spill]] }
 0x1e7   : > { %p10_p6 = scmp.ge.s32.totalorder %s13_s22, 14   ;;  %s2639_s12 = smov %s2028_s13 }
 0x1e8   : > { %s2640_s13 = smov %s2180_s9  ;;  %s2641_s14 = smov %s2036_s15 }
 0x1e9   : > { %s2642_s15 = smov %s2177_s8  ;;  %s2643_s16 = smov %s2044_s17 }
 0x1ea   : > { %s2644_s17 = smov %s2163_s30  ;;  %s2645_s18 = smov %s2056_s20 }
 0x1eb   : > { %s2646_s19 = smov %s2060_s21  ;;  %s2647_s20 = smov %s2650_s24 }
 0x1ec   : > { %s2648_s21 = smov %s2638_s10  ;;  %12 = sbr.rel (!%p10_p6) target bundleno = 9 (0x9), region = 164 }

// kernel: multitask_forward.16
= control target key start
LH: loop header
LB: loop body
LE: loop exit
PB: predicated region body
PF: predicated region fallthrough
CT: control target
= control target key end

     0   :  { %s2441_s0 = inlined_call_operand.vmem [shape: bf16[16,768], index: 0, kind: input, shape index: {}]   ;;  %s2442_s1 = inlined_call_operand.vmem [shape: bf16[768,2304], index: 1, kind: input, shape index: {}]   ;;  %s2443_s2 = inlined_call_operand.vmem [shape: f32[1,2304], index: 2, kind: input, shape index: {}]   ;;  %s2444_s3 = inlined_call_operand.vmem [shape: bf16[16,2304], index: 3, kind: output, shape index: {}]  }
   0x1   :  { %2446 = sst [smem:[#allocation7_spill]] %s2441_s0 }
   0x2   :  { %2447 = sst [smem:[#allocation8_spill]] %s2442_s1 }
   0x3   :  { %s1980_s12 = smov 0   ;;  %s1982_s13 = smov 0  }
   0x4   :  { %s1984_s14 = smov 0   ;;  %s1986_s15 = smov 0  }
   0x5   :  { %s1988_s16 = smov 0   ;;  %s1990_s17 = smov 0  }
   0x6   :  { %s1992_s18 = smov 0   ;;  %s1994_s19 = smov 0  }
   0x7   :  { %s1996_s20 = smov 0   ;;  %s1998_s21 = smov 0  }
   0x8   :  { %s2000_s22 = smov 0  }
   0x9 LB: > { %s1413_s23 = sadd.s32 4294967295, %s1954_s22   ;;  %s25_s24 = sadd.s32 1, %s1946_s20  ;;  %s1954_s22 = sphi %s2000_s22, %s13_s22   ;;  %s1950_s21 = sphi %s1998_s21, %s2464_s21   ;;  %s1946_s20 = sphi %s1996_s20, %s2463_s20   ;;  %s1942_s19 = sphi %s1994_s19, %s2462_s19   ;;  %s1938_s18 = sphi %s1992_s18, %s2461_s18   ;;  %s1934_s17 = sphi %s1990_s17, %s2460_s17   ;;  %s1930_s16 = sphi %s1988_s16, %s2459_s16   ;;  %s1926_s15 = sphi %s1986_s15, %s2458_s15   ;;  %s1922_s14 = sphi %s1984_s14, %s2457_s14   ;;  %s1918_s13 = sphi %s1982_s13, %s2456_s13   ;;  %s1914_s12 = sphi %s1980_s12, %s2455_s12  }
   0xa   : > { %p26_p0 = scmp.ge.s32.totalorder %s25_s24, 2  ;;  %s28_s25 = sadd.s32 1, %s1950_s21 }
   0xb   : > { %s41_s26 = sadd.s32 1, %s1934_s17  ;;  %p48_p1 = scmp.ne.s32.totalorder %s1934_s17, %s1930_s16 }
   0xc   : > { %s2466_s24 = smov (%p26_p0, %s25_s24), 0  ;;  %s2468_s25 = smov (!%p26_p0, %s28_s25), %s1950_s21 }
   0xd   : > { %s37_s27 = ssub.s32 %s1946_s20, %s2466_s24  ;;  %p49_p2 = scmp.eq.s32.totalorder %s1954_s22, 0 }
   0xe   : > { %p30_p3 = scmp.ge.s32.totalorder %s2468_s25, 6  ;;  %p39_p4 = scmp.eq.s32.totalorder %s37_s27, 0 }
   0xf   : > { %p2047_p5 = por %p49_p2, %p48_p1  ;;  %s69_s29 = sadd.s32 1, %s1926_s15 }
  0x10   : > { %s2470_s25 = smov (%p30_p3, %s2468_s25), 0  ;;  %p76_p6 = scmp.ne.s32.totalorder %s1926_s15, %s1922_s14 }
  0x11   : > { %2449 = sst [smem:[#allocation6_spill]] %s2470_s25  ;;  %s65_s4 = ssub.s32 %s1950_s21, %s2470_s25 }
  0x12   : > { %s2055_s30 = scalar_select %p39_p4, %s1934_s17, %s41_s26  }
  0x13   : > { %s66_s5 = sor.u32 %s65_s4, %s37_s27  ;;  %p121_p7 = scmp.eq.s32.totalorder %s65_s4, 0 }
  0x14   : > { %p67_p8 = scmp.eq.s32.totalorder %s66_s5, 0  ;;  %p2061_p9 = por %p76_p6, %p49_p2 }
  0x15   : > { %s123_s7 = sadd.s32 1, %s1918_s13  ;;  %p133_p10 = scmp.ne.s32.totalorder %s1918_s13, %s1914_s12 }
  0x16   : > { %s2069_s8 = scalar_select %p67_p8, %s1926_s15, %s69_s29  }
  0x17   : > { %s2072_s9 = scalar_select %p121_p7, %s1918_s13, %s123_s7  }
  0x18   : > { %p134_p11 = scmp.eq.s32.totalorder %s1413_s23, 11  ;;  %p1416_p13 = scmp.ge.s32.totalorder %s1954_s22, 12 }
  0x1a   : > { %p2074_p12 = por %p134_p11, %p133_p10  ;;  %156 = sbr.rel (%p1416_p13) target bundleno = 109 (0x6d), region = 16 }
  0x21   : > { %159 = sbr.rel (!%p2047_p5) target bundleno = 44 (0x2c), region = 20  ;;  %s161_s11 = sand.u32 (%p2047_p5), 1, %s1934_s17  }
  0x22   : > { %s1608_s26 = smul.u32 (%p2047_p5), 12, %s1946_s20  ;;  %s2452_s0 = sld [smem:[#allocation7_spill]] (%p2047_p5) }
  0x23   : > { %s1669_s27 = smul.u32 (%p2047_p5), 24, %s161_s11 }
  0x25   : > { %s163_s23 = scalar_lea.vmem (%p2047_p5), [#allocation3], %s1669_s27 }
  0x28   : > { %s169_s5 = scalar_lea.vmem %s2452_s0, %s1608_s26 }
  0x29   : > { %v184_v0 = vld [vmem:[%s169_s5] sm:$0xff]  ;;  %v186_v1 = vld [vmem:[%s169_s5 + $0x18] sm:$0xff]  ;;  %v1418_v2 = vld [vmem:[%s169_s5 + $0x8] sm:$0xf] }
  0x2a   : > { %185 = vst [vmem:[%s163_s23] sm:$0xff] %v184_v0  ;;  %187 = vst [vmem:[%s163_s23 + $0xc] sm:$0xff] %v186_v1  ;;  %v1420_v3 = vld [vmem:[%s169_s5 + $0x20] sm:$0xf] }
  0x2b   : > { %1419 = vst [vmem:[%s163_s23 + $0x8] sm:$0xf] %v1418_v2  ;;  %1421 = vst [vmem:[%s163_s23 + $0x14] sm:$0xf] %v1420_v3 }
  0x2c PF: > { %204 = sbr.rel (!%p2061_p9) target bundleno = 109 (0x6d), region = 46  ;;  %s206_s28 = sand.u32 (%p2061_p9), 1, %s1926_s15  }
  0x2d   : > { %s1670_s7 = smul.u32 (%p2061_p9), 576, %s206_s28  ;;  %s2453_s1 = sld [smem:[#allocation8_spill]] (%p2061_p9) }
  0x2e   : > { %s210_s11 = smul.u32 (%p2061_p9), 3, %s1950_s21 }
  0x2f   : > { %s1675_s26 = smul.u32 (%p2061_p9), 864, %s1946_s20  ;;  %s2099_s6 = scalar_lea.vmem (%p2061_p9), [#allocation4], %s1670_s7 }
  0x31   : > { %s212_s29 = sadd.s32 (%p2061_p9), %s1675_s26, %s210_s11 }
  0x32   : > { %s1422_s4 = sshll.u32 (%p2061_p9), %s212_s29, 2 }
  0x33   : > { %s2094_s25 = scalar_lea.vmem %s2453_s1, %s1422_s4 }
  0x34   : > { %v229_v4 = vld [vmem:[%s2094_s25] sm:$0xff]  ;;  %v231_v5 = vld [vmem:[%s2094_s25 + $0x48] sm:$0xff]  ;;  %v233_v6 = vld [vmem:[%s2094_s25 + $0x90] sm:$0xff] }
  0x35   : > { %230 = vst [vmem:[%s2099_s6] sm:$0xff] %v229_v4  ;;  %232 = vst [vmem:[%s2099_s6 + $0xc] sm:$0xff] %v231_v5  ;;  %v235_v7 = vld [vmem:[%s2094_s25 + $0xd8] sm:$0xff]  ;;  %v237_v8 = vld [vmem:[%s2094_s25 + $0x120] sm:$0xff] }
  0x36   : > { %234 = vst [vmem:[%s2099_s6 + $0x18] sm:$0xff] %v233_v6  ;;  %v239_v9 = vld [vmem:[%s2094_s25 + $0x168] sm:$0xff]  ;;  %236 = vst [vmem:[%s2099_s6 + $0x24] sm:$0xff] %v235_v7  ;;  %v241_v10 = vld [vmem:[%s2094_s25 + $0x1b0] sm:$0xff] }
  0x37   : > { %238 = vst [vmem:[%s2099_s6 + $0x30] sm:$0xff] %v237_v8  ;;  %240 = vst [vmem:[%s2099_s6 + $0x3c] sm:$0xff] %v239_v9  ;;  %v243_v11 = vld [vmem:[%s2094_s25 + $0x1f8] sm:$0xff]  ;;  %v245_v12 = vld [vmem:[%s2094_s25 + $0x240] sm:$0xff] }
  0x38   : > { %242 = vst [vmem:[%s2099_s6 + $0x48] sm:$0xff] %v241_v10  ;;  %244 = vst [vmem:[%s2099_s6 + $0x54] sm:$0xff] %v243_v11  ;;  %v247_v13 = vld [vmem:[%s2094_s25 + $0x288] sm:$0xff]  ;;  %v249_v14 = vld [vmem:[%s2094_s25 + $0x2d0] sm:$0xff] }
  0x39   : > { %246 = vst [vmem:[%s2099_s6 + $0x60] sm:$0xff] %v245_v12  ;;  %v251_v15 = vld [vmem:[%s2094_s25 + $0x318] sm:$0xff]  ;;  %248 = vst [vmem:[%s2099_s6 + $0x6c] sm:$0xff] %v247_v13  ;;  %v253_v16 = vld [vmem:[%s2094_s25 + $0x360] sm:$0xff] }
  0x3a   : > { %250 = vst [vmem:[%s2099_s6 + $0x78] sm:$0xff] %v249_v14  ;;  %252 = vst [vmem:[%s2099_s6 + $0x84] sm:$0xff] %v251_v15  ;;  %v255_v17 = vld [vmem:[%s2094_s25 + $0x3a8] sm:$0xff]  ;;  %v257_v18 = vld [vmem:[%s2094_s25 + $0x3f0] sm:$0xff] }
  0x3b   : > { %254 = vst [vmem:[%s2099_s6 + $0x90] sm:$0xff] %v253_v16  ;;  %256 = vst [vmem:[%s2099_s6 + $0x9c] sm:$0xff] %v255_v17  ;;  %v259_v19 = vld [vmem:[%s2094_s25 + $0x438] sm:$0xff]  ;;  %v261_v20 = vld [vmem:[%s2094_s25 + $0x480] sm:$0xff] }
  0x3c   : > { %258 = vst [vmem:[%s2099_s6 + $0xa8] sm:$0xff] %v257_v18  ;;  %v263_v21 = vld [vmem:[%s2094_s25 + $0x4c8] sm:$0xff]  ;;  %260 = vst [vmem:[%s2099_s6 + $0xb4] sm:$0xff] %v259_v19  ;;  %v265_v22 = vld [vmem:[%s2094_s25 + $0x510] sm:$0xff] }
  0x3d   : > { %262 = vst [vmem:[%s2099_s6 + $0xc0] sm:$0xff] %v261_v20  ;;  %264 = vst [vmem:[%s2099_s6 + $0xcc] sm:$0xff] %v263_v21  ;;  %v267_v23 = vld [vmem:[%s2094_s25 + $0x558] sm:$0xff]  ;;  %v269_v24 = vld [vmem:[%s2094_s25 + $0x5a0] sm:$0xff] }
  0x3e   : > { %266 = vst [vmem:[%s2099_s6 + $0xd8] sm:$0xff] %v265_v22  ;;  %268 = vst [vmem:[%s2099_s6 + $0xe4] sm:$0xff] %v267_v23  ;;  %v271_v25 = vld [vmem:[%s2094_s25 + $0x5e8] sm:$0xff]  ;;  %v273_v26 = vld [vmem:[%s2094_s25 + $0x630] sm:$0xff] }
  0x3f   : > { %270 = vst [vmem:[%s2099_s6 + $0xf0] sm:$0xff] %v269_v24  ;;  %v275_v27 = vld [vmem:[%s2094_s25 + $0x678] sm:$0xff]  ;;  %272 = vst [vmem:[%s2099_s6 + $0xfc] sm:$0xff] %v271_v25  ;;  %v277_v28 = vld [vmem:[%s2094_s25 + $0x6c0] sm:$0xff] }
  0x40   : > { %274 = vst [vmem:[%s2099_s6 + $0x108] sm:$0xff] %v273_v26  ;;  %276 = vst [vmem:[%s2099_s6 + $0x114] sm:$0xff] %v275_v27  ;;  %v279_v29 = vld [vmem:[%s2094_s25 + $0x708] sm:$0xff]  ;;  %v281_v30 = vld [vmem:[%s2094_s25 + $0x750] sm:$0xff] }
  0x41   : > { %278 = vst [vmem:[%s2099_s6 + $0x120] sm:$0xff] %v277_v28  ;;  %280 = vst [vmem:[%s2099_s6 + $0x12c] sm:$0xff] %v279_v29  ;;  %v283_v31 = vld [vmem:[%s2094_s25 + $0x798] sm:$0xff]  ;;  %v285_v32 = vld [vmem:[%s2094_s25 + $0x7e0] sm:$0xff] }
  0x42   : > { %282 = vst [vmem:[%s2099_s6 + $0x138] sm:$0xff] %v281_v30  ;;  %v287_v33 = vld [vmem:[%s2094_s25 + $0x828] sm:$0xff]  ;;  %284 = vst [vmem:[%s2099_s6 + $0x144] sm:$0xff] %v283_v31  ;;  %v289_v34 = vld [vmem:[%s2094_s25 + $0x870] sm:$0xff] }
  0x43   : > { %286 = vst [vmem:[%s2099_s6 + $0x150] sm:$0xff] %v285_v32  ;;  %288 = vst [vmem:[%s2099_s6 + $0x15c] sm:$0xff] %v287_v33  ;;  %v291_v35 = vld [vmem:[%s2094_s25 + $0x8b8] sm:$0xff]  ;;  %v293_v36 = vld [vmem:[%s2094_s25 + $0x900] sm:$0xff] }
  0x44   : > { %290 = vst [vmem:[%s2099_s6 + $0x168] sm:$0xff] %v289_v34  ;;  %292 = vst [vmem:[%s2099_s6 + $0x174] sm:$0xff] %v291_v35  ;;  %v295_v37 = vld [vmem:[%s2094_s25 + $0x948] sm:$0xff]  ;;  %v297_v38 = vld [vmem:[%s2094_s25 + $0x990] sm:$0xff] }
  0x45   : > { %294 = vst [vmem:[%s2099_s6 + $0x180] sm:$0xff] %v293_v36  ;;  %v299_v39 = vld [vmem:[%s2094_s25 + $0x9d8] sm:$0xff]  ;;  %296 = vst [vmem:[%s2099_s6 + $0x18c] sm:$0xff] %v295_v37  ;;  %v301_v40 = vld [vmem:[%s2094_s25 + $0xa20] sm:$0xff] }
  0x46   : > { %298 = vst [vmem:[%s2099_s6 + $0x198] sm:$0xff] %v297_v38  ;;  %300 = vst [vmem:[%s2099_s6 + $0x1a4] sm:$0xff] %v299_v39  ;;  %v303_v41 = vld [vmem:[%s2094_s25 + $0xa68] sm:$0xff]  ;;  %v305_v42 = vld [vmem:[%s2094_s25 + $0xab0] sm:$0xff] }
  0x47   : > { %302 = vst [vmem:[%s2099_s6 + $0x1b0] sm:$0xff] %v301_v40  ;;  %304 = vst [vmem:[%s2099_s6 + $0x1bc] sm:$0xff] %v303_v41  ;;  %v307_v43 = vld [vmem:[%s2094_s25 + $0xaf8] sm:$0xff]  ;;  %v309_v44 = vld [vmem:[%s2094_s25 + $0xb40] sm:$0xff] }
  0x48   : > { %306 = vst [vmem:[%s2099_s6 + $0x1c8] sm:$0xff] %v305_v42  ;;  %v311_v45 = vld [vmem:[%s2094_s25 + $0xb88] sm:$0xff]  ;;  %308 = vst [vmem:[%s2099_s6 + $0x1d4] sm:$0xff] %v307_v43  ;;  %v313_v46 = vld [vmem:[%s2094_s25 + $0xbd0] sm:$0xff] }
  0x49   : > { %310 = vst [vmem:[%s2099_s6 + $0x1e0] sm:$0xff] %v309_v44  ;;  %312 = vst [vmem:[%s2099_s6 + $0x1ec] sm:$0xff] %v311_v45  ;;  %v315_v47 = vld [vmem:[%s2094_s25 + $0xc18] sm:$0xff]  ;;  %v317_v48 = vld [vmem:[%s2094_s25 + $0xc60] sm:$0xff] }
  0x4a   : > { %314 = vst [vmem:[%s2099_s6 + $0x1f8] sm:$0xff] %v313_v46  ;;  %316 = vst [vmem:[%s2099_s6 + $0x204] sm:$0xff] %v315_v47  ;;  %v319_v49 = vld [vmem:[%s2094_s25 + $0xca8] sm:$0xff]  ;;  %v321_v50 = vld [vmem:[%s2094_s25 + $0xcf0] sm:$0xff] }
  0x4b   : > { %318 = vst [vmem:[%s2099_s6 + $0x210] sm:$0xff] %v317_v48  ;;  %v323_v51 = vld [vmem:[%s2094_s25 + $0xd38] sm:$0xff]  ;;  %320 = vst [vmem:[%s2099_s6 + $0x21c] sm:$0xff] %v319_v49  ;;  %v1423_v52 = vld [vmem:[%s2094_s25 + $0x8] sm:$0xf] }
  0x4c   : > { %322 = vst [vmem:[%s2099_s6 + $0x228] sm:$0xff] %v321_v50  ;;  %324 = vst [vmem:[%s2099_s6 + $0x234] sm:$0xff] %v323_v51  ;;  %v1425_v53 = vld [vmem:[%s2094_s25 + $0x50] sm:$0xf]  ;;  %v1427_v54 = vld [vmem:[%s2094_s25 + $0x98] sm:$0xf] }
  0x4d   : > { %1424 = vst [vmem:[%s2099_s6 + $0x8] sm:$0xf] %v1423_v52  ;;  %1426 = vst [vmem:[%s2099_s6 + $0x14] sm:$0xf] %v1425_v53  ;;  %v1429_v55 = vld [vmem:[%s2094_s25 + $0xe0] sm:$0xf] }
  0x4e   : > { %1428 = vst [vmem:[%s2099_s6 + $0x20] sm:$0xf] %v1427_v54  ;;  %v1431_v56 = vld [vmem:[%s2094_s25 + $0x128] sm:$0xf]  ;;  %v1433_v57 = vld [vmem:[%s2094_s25 + $0x170] sm:$0xf] }
  0x4f   : > { %1430 = vst [vmem:[%s2099_s6 + $0x2c] sm:$0xf] %v1429_v55  ;;  %1432 = vst [vmem:[%s2099_s6 + $0x38] sm:$0xf] %v1431_v56  ;;  %v1435_v58 = vld [vmem:[%s2094_s25 + $0x1b8] sm:$0xf] }
  0x50   : > { %1434 = vst [vmem:[%s2099_s6 + $0x44] sm:$0xf] %v1433_v57  ;;  %v1437_v59 = vld [vmem:[%s2094_s25 + $0x200] sm:$0xf]  ;;  %v1439_v60 = vld [vmem:[%s2094_s25 + $0x248] sm:$0xf] }
  0x51   : > { %1436 = vst [vmem:[%s2099_s6 + $0x50] sm:$0xf] %v1435_v58  ;;  %1438 = vst [vmem:[%s2099_s6 + $0x5c] sm:$0xf] %v1437_v59  ;;  %v1441_v61 = vld [vmem:[%s2094_s25 + $0x290] sm:$0xf] }
  0x52   : > { %1440 = vst [vmem:[%s2099_s6 + $0x68] sm:$0xf] %v1439_v60  ;;  %v1443_v62 = vld [vmem:[%s2094_s25 + $0x2d8] sm:$0xf]  ;;  %v1445_v63 = vld [vmem:[%s2094_s25 + $0x320] sm:$0xf] }
  0x53   : > { %1442 = vst [vmem:[%s2099_s6 + $0x74] sm:$0xf] %v1441_v61  ;;  %1444 = vst [vmem:[%s2099_s6 + $0x80] sm:$0xf] %v1443_v62  ;;  %v1447_v0 = vld [vmem:[%s2094_s25 + $0x368] sm:$0xf] }
  0x54   : > { %1446 = vst [vmem:[%s2099_s6 + $0x8c] sm:$0xf] %v1445_v63  ;;  %v1449_v1 = vld [vmem:[%s2094_s25 + $0x3b0] sm:$0xf]  ;;  %v1451_v2 = vld [vmem:[%s2094_s25 + $0x3f8] sm:$0xf] }
  0x55   : > { %1448 = vst [vmem:[%s2099_s6 + $0x98] sm:$0xf] %v1447_v0  ;;  %1450 = vst [vmem:[%s2099_s6 + $0xa4] sm:$0xf] %v1449_v1  ;;  %v1453_v3 = vld [vmem:[%s2094_s25 + $0x440] sm:$0xf] }
  0x56   : > { %1452 = vst [vmem:[%s2099_s6 + $0xb0] sm:$0xf] %v1451_v2  ;;  %v1455_v4 = vld [vmem:[%s2094_s25 + $0x488] sm:$0xf]  ;;  %v1457_v5 = vld [vmem:[%s2094_s25 + $0x4d0] sm:$0xf] }
  0x57   : > { %1454 = vst [vmem:[%s2099_s6 + $0xbc] sm:$0xf] %v1453_v3  ;;  %1456 = vst [vmem:[%s2099_s6 + $0xc8] sm:$0xf] %v1455_v4  ;;  %v1459_v6 = vld [vmem:[%s2094_s25 + $0x518] sm:$0xf] }
  0x58   : > { %1458 = vst [vmem:[%s2099_s6 + $0xd4] sm:$0xf] %v1457_v5  ;;  %v1461_v7 = vld [vmem:[%s2094_s25 + $0x560] sm:$0xf]  ;;  %v1463_v8 = vld [vmem:[%s2094_s25 + $0x5a8] sm:$0xf] }
  0x59   : > { %1460 = vst [vmem:[%s2099_s6 + $0xe0] sm:$0xf] %v1459_v6  ;;  %1462 = vst [vmem:[%s2099_s6 + $0xec] sm:$0xf] %v1461_v7  ;;  %v1465_v9 = vld [vmem:[%s2094_s25 + $0x5f0] sm:$0xf] }
  0x5a   : > { %1464 = vst [vmem:[%s2099_s6 + $0xf8] sm:$0xf] %v1463_v8  ;;  %v1467_v10 = vld [vmem:[%s2094_s25 + $0x638] sm:$0xf]  ;;  %v1469_v11 = vld [vmem:[%s2094_s25 + $0x680] sm:$0xf] }
  0x5b   : > { %1466 = vst [vmem:[%s2099_s6 + $0x104] sm:$0xf] %v1465_v9  ;;  %1468 = vst [vmem:[%s2099_s6 + $0x110] sm:$0xf] %v1467_v10  ;;  %v1471_v12 = vld [vmem:[%s2094_s25 + $0x6c8] sm:$0xf] }
  0x5c   : > { %1470 = vst [vmem:[%s2099_s6 + $0x11c] sm:$0xf] %v1469_v11  ;;  %v1473_v13 = vld [vmem:[%s2094_s25 + $0x710] sm:$0xf]  ;;  %v1475_v14 = vld [vmem:[%s2094_s25 + $0x758] sm:$0xf] }
  0x5d   : > { %1472 = vst [vmem:[%s2099_s6 + $0x128] sm:$0xf] %v1471_v12  ;;  %1474 = vst [vmem:[%s2099_s6 + $0x134] sm:$0xf] %v1473_v13  ;;  %v1477_v15 = vld [vmem:[%s2094_s25 + $0x7a0] sm:$0xf] }
  0x5e   : > { %1476 = vst [vmem:[%s2099_s6 + $0x140] sm:$0xf] %v1475_v14  ;;  %v1479_v16 = vld [vmem:[%s2094_s25 + $0x7e8] sm:$0xf]  ;;  %v1481_v17 = vld [vmem:[%s2094_s25 + $0x830] sm:$0xf] }
  0x5f   : > { %1478 = vst [vmem:[%s2099_s6 + $0x14c] sm:$0xf] %v1477_v15  ;;  %1480 = vst [vmem:[%s2099_s6 + $0x158] sm:$0xf] %v1479_v16  ;;  %v1483_v18 = vld [vmem:[%s2094_s25 + $0x878] sm:$0xf] }
  0x60   : > { %1482 = vst [vmem:[%s2099_s6 + $0x164] sm:$0xf] %v1481_v17  ;;  %v1485_v19 = vld [vmem:[%s2094_s25 + $0x8c0] sm:$0xf]  ;;  %v1487_v20 = vld [vmem:[%s2094_s25 + $0x908] sm:$0xf] }
  0x61   : > { %1484 = vst [vmem:[%s2099_s6 + $0x170] sm:$0xf] %v1483_v18  ;;  %1486 = vst [vmem:[%s2099_s6 + $0x17c] sm:$0xf] %v1485_v19  ;;  %v1489_v21 = vld [vmem:[%s2094_s25 + $0x950] sm:$0xf] }
  0x62   : > { %1488 = vst [vmem:[%s2099_s6 + $0x188] sm:$0xf] %v1487_v20  ;;  %v1491_v22 = vld [vmem:[%s2094_s25 + $0x998] sm:$0xf]  ;;  %v1493_v23 = vld [vmem:[%s2094_s25 + $0x9e0] sm:$0xf] }
  0x63   : > { %1490 = vst [vmem:[%s2099_s6 + $0x194] sm:$0xf] %v1489_v21  ;;  %1492 = vst [vmem:[%s2099_s6 + $0x1a0] sm:$0xf] %v1491_v22  ;;  %v1495_v24 = vld [vmem:[%s2094_s25 + $0xa28] sm:$0xf] }
  0x64   : > { %1494 = vst [vmem:[%s2099_s6 + $0x1ac] sm:$0xf] %v1493_v23  ;;  %v1497_v25 = vld [vmem:[%s2094_s25 + $0xa70] sm:$0xf]  ;;  %v1499_v26 = vld [vmem:[%s2094_s25 + $0xab8] sm:$0xf] }
  0x65   : > { %1496 = vst [vmem:[%s2099_s6 + $0x1b8] sm:$0xf] %v1495_v24  ;;  %1498 = vst [vmem:[%s2099_s6 + $0x1c4] sm:$0xf] %v1497_v25  ;;  %v1501_v27 = vld [vmem:[%s2094_s25 + $0xb00] sm:$0xf] }
  0x66   : > { %1500 = vst [vmem:[%s2099_s6 + $0x1d0] sm:$0xf] %v1499_v26  ;;  %v1503_v28 = vld [vmem:[%s2094_s25 + $0xb48] sm:$0xf]  ;;  %v1505_v29 = vld [vmem:[%s2094_s25 + $0xb90] sm:$0xf] }
  0x67   : > { %1502 = vst [vmem:[%s2099_s6 + $0x1dc] sm:$0xf] %v1501_v27  ;;  %1504 = vst [vmem:[%s2099_s6 + $0x1e8] sm:$0xf] %v1503_v28  ;;  %v1507_v30 = vld [vmem:[%s2094_s25 + $0xbd8] sm:$0xf] }
  0x68   : > { %1506 = vst [vmem:[%s2099_s6 + $0x1f4] sm:$0xf] %v1505_v29  ;;  %v1509_v31 = vld [vmem:[%s2094_s25 + $0xc20] sm:$0xf]  ;;  %v1511_v32 = vld [vmem:[%s2094_s25 + $0xc68] sm:$0xf] }
  0x69   : > { %1508 = vst [vmem:[%s2099_s6 + $0x200] sm:$0xf] %v1507_v30  ;;  %1510 = vst [vmem:[%s2099_s6 + $0x20c] sm:$0xf] %v1509_v31  ;;  %v1513_v33 = vld [vmem:[%s2094_s25 + $0xcb0] sm:$0xf] }
  0x6a   : > { %1512 = vst [vmem:[%s2099_s6 + $0x218] sm:$0xf] %v1511_v32  ;;  %v1515_v34 = vld [vmem:[%s2094_s25 + $0xcf8] sm:$0xf]  ;;  %v1517_v35 = vld [vmem:[%s2094_s25 + $0xd40] sm:$0xf] }
  0x6b   : > { %1514 = vst [vmem:[%s2099_s6 + $0x224] sm:$0xf] %v1513_v33  ;;  %1516 = vst [vmem:[%s2099_s6 + $0x230] sm:$0xf] %v1515_v34 }
  0x6c   : > { %1518 = vst [vmem:[%s2099_s6 + $0x23c] sm:$0xf] %v1517_v35 }
  0x6d PF: > { %p1519_p0 = scmp.ge.s32.totalorder %s1954_s22, 1  ;;  %p440_p1 = scmp.lt.s32.totalorder %s1954_s22, 13 }
  0x6f   : > { %p441_p2 = pnand %p1519_p0, %p440_p1 }
  0x70   : > { %s447_s0 = sand.u32 (!%p441_p2), 1, %s1930_s16   ;;  %s454_s5 = sand.u32 (!%p441_p2), 1, %s1922_s14  }
  0x71   : > { %444 = sbr.rel (%p441_p2) target bundleno = 462 (0x1ce), region = 76  ;;  %s481_s28 = sand.u32 (!%p441_p2), 1, %s1914_s12  }
  0x72   : > { %s1672_s23 = smul.u32 (!%p441_p2), 24, %s447_s0  ;;  %p1520_p4 = scmp.ne.s32.totalorder (!%p441_p2), %s1938_s18, 0 }
  0x73   : > { %s1673_s25 = smul.u32 (!%p441_p2), 576, %s454_s5 }
  0x74   : > { %s1674_s7 = smul.u32 (!%p441_p2), 24, %s481_s28  ;;  %s2302_s27 = scalar_lea.vmem (!%p441_p2), [#allocation3], %s1672_s23 }
  0x75   : > { %s488_s11 = smul.u32 (!%p441_p2), 3, %s1942_s19  ;;  %s2304_s6 = scalar_lea.vmem (!%p441_p2), [#allocation4], %s1673_s25 }
  0x76   : > { %s2306_s1 = scalar_lea.vmem (!%p441_p2), [#allocation5], %s1674_s7 }
  0x77   : > { %p489_p3 = scmp.lt.s32.totalorder (!%p441_p2), %s488_s11, 17 }
  0x78   : > { %499 = sbr.rel (%p1520_p4) target bundleno = 127 (0x7f), region = 88  ;;  %v1956_v36 = vmov (!%p1520_p4), 0.0  }
  0x79   : > { %s2472_s11 = smov (!%p489_p3, %s488_s11), 17  ;;  %500 = vst [vmem:[#allocation2] sm:$0xff] (!%p1520_p4), %v1956_v36  ;;  %501 = vst [vmem:[#allocation2 + $0x8] sm:$0xff] (!%p1520_p4), %v1956_v36 }
  0x7a   : > { %s491_s4 = scalar_lea.vmem %s2443_s2, %s2472_s11  ;;  %502 = vst [vmem:[#allocation2 + $0x10] sm:$0xff] (!%p1520_p4), %v1956_v36  ;;  %503 = vst [vmem:[#allocation2 + $0x18] sm:$0xff] (!%p1520_p4), %v1956_v36 }
  0x7b   : > { %504 = vst [vmem:[#allocation2 + $0x20] sm:$0xff] (!%p1520_p4), %v1956_v36  ;;  %505 = vst [vmem:[#allocation2 + $0x28] sm:$0xff] (!%p1520_p4), %v1956_v36 }
  0x7f PF: > { %v1768_v37 = vld [vmem:[%s2304_s6 + $0x4] ss:$12 sps:$4 sm:$0xff]   ;;  %v1770_v38 = vld [vmem:[%s2304_s6 + $0xc8] ss:$12 sps:$4 sm:$0xff]   ;;  %v1771_v39 = vld [vmem:[%s2304_s6] ss:$12 sps:$4 sm:$0xff]  }
  0x80   : > { %1012 = vmatprep.subr.bf16.mxu0 %v1768_v37  ;;  %1614 = vmatprep.subr.bf16.mxu1 %v1770_v38  ;;  %v1772_v40 = vld [vmem:[%s2304_s6 + $0x8] ss:$12 sps:$4 sm:$0xff]   ;;  %v1775_v42 = vld [vmem:[%s2304_s6 + $0xe0] ss:$12 sps:$4 sm:$0xff]   ;;  %v1776_v43 = vld [vmem:[%s2304_s6 + $0x18] ss:$12 sps:$4 sm:$0xff]  }
  0x81   : > { %1013 = vmatpush1.bf16.msra.mxu0 %v1771_v39  ;;  %v1773_v41 = vld [vmem:[%s2304_s6 + $0x1c] ss:$12 sps:$4 sm:$0xff]   ;;  %1615 = vmatpush3.bf16.msra.mxu1 %v1772_v40  ;;  %v1777_v44 = vld [vmem:[%s2304_s6 + $0x20] ss:$12 sps:$4 sm:$0xff]   ;;  %v1780_v46 = vld [vmem:[%s2304_s6 + $0xf8] ss:$12 sps:$4 sm:$0xff]  }
  0x82   : > { %1014 = vmatprep.subr.bf16.mxu0 %v1773_v41  ;;  %1616 = vmatprep.subr.bf16.mxu1 %v1775_v42  ;;  %v1778_v45 = vld [vmem:[%s2304_s6 + $0x34] ss:$12 sps:$4 sm:$0xff]   ;;  %v1781_v47 = vld [vmem:[%s2304_s6 + $0x30] ss:$12 sps:$4 sm:$0xff]   ;;  %v1782_v48 = vld [vmem:[%s2304_s6 + $0x38] ss:$12 sps:$4 sm:$0xff]  }
  0x83   : > { %v1783_v49 = vld [vmem:[%s2304_s6 + $0x4c] ss:$12 sps:$4 sm:$0xff]   ;;  %v1785_v50 = vld [vmem:[%s2304_s6 + $0x110] ss:$12 sps:$4 sm:$0xff]   ;;  %v1786_v51 = vld [vmem:[%s2304_s6 + $0x48] ss:$12 sps:$4 sm:$0xff]  }
  0x84   : > { %v1787_v52 = vld [vmem:[%s2304_s6 + $0x50] ss:$12 sps:$4 sm:$0xff]   ;;  %v1790_v54 = vld [vmem:[%s2304_s6 + $0x128] ss:$12 sps:$4 sm:$0xff]   ;;  %v1791_v55 = vld [vmem:[%s2304_s6 + $0x60] ss:$12 sps:$4 sm:$0xff]  }
  0x85   : > { %1015 = vmatpush1.bf16.msra.mxu0 %v1776_v43  ;;  %1617 = vmatpush3.bf16.msra.mxu1 %v1777_v44  ;;  %v1788_v53 = vld [vmem:[%s2304_s6 + $0x64] ss:$12 sps:$4 sm:$0xff]   ;;  %v1792_v56 = vld [vmem:[%s2304_s6 + $0x68] ss:$12 sps:$4 sm:$0xff]   ;;  %v1795_v58 = vld [vmem:[%s2304_s6 + $0x140] ss:$12 sps:$4 sm:$0xff]  }
  0x86   : > { %1016 = vmatprep.subr.bf16.mxu0 %v1778_v45  ;;  %1618 = vmatprep.subr.bf16.mxu1 %v1780_v46  ;;  %v1793_v57 = vld [vmem:[%s2304_s6 + $0x7c] ss:$12 sps:$4 sm:$0xff]   ;;  %v1796_v59 = vld [vmem:[%s2304_s6 + $0x78] ss:$12 sps:$4 sm:$0xff]   ;;  %v1797_v60 = vld [vmem:[%s2304_s6 + $0x80] ss:$12 sps:$4 sm:$0xff]  }
  0x87   : > { %v1798_v61 = vld [vmem:[%s2304_s6 + $0x94] ss:$12 sps:$4 sm:$0xff]   ;;  %v1800_v62 = vld [vmem:[%s2304_s6 + $0x158] ss:$12 sps:$4 sm:$0xff]   ;;  %v1801_v63 = vld [vmem:[%s2304_s6 + $0x90] ss:$12 sps:$4 sm:$0xff]  }
  0x88   : > { %v1802_v0 = vld [vmem:[%s2304_s6 + $0x98] ss:$12 sps:$4 sm:$0xff]   ;;  %v1805_v2 = vld [vmem:[%s2304_s6 + $0x170] ss:$12 sps:$4 sm:$0xff]   ;;  %v1806_v3 = vld [vmem:[%s2304_s6 + $0xa8] ss:$12 sps:$4 sm:$0xff]  }
  0x89   : > { %1017 = vmatpush1.bf16.msra.mxu0 %v1781_v47  ;;  %1619 = vmatpush3.bf16.msra.mxu1 %v1782_v48  ;;  %v1803_v1 = vld [vmem:[%s2304_s6 + $0xac] ss:$12 sps:$4 sm:$0xff]   ;;  %v1807_v4 = vld [vmem:[%s2304_s6 + $0xb0] ss:$12 sps:$4 sm:$0xff]   ;;  %v1814_v9 = vld [vmem:[%s2304_s6 + $0x188] ss:$12 sps:$4 sm:$0xff]  }
  0x8a   : > { %1018 = vmatprep.subr.bf16.mxu0 %v1783_v49  ;;  %1620 = vmatprep.subr.bf16.mxu1 %v1785_v50  ;;  %v1812_v5 = vld [vmem:[%s2302_s27 + $0x4] ss:$12 sps:$4 sm:$0xff]   ;;  %v1808_v6 = vld [vmem:[%s2304_s6 + $0xc4] ss:$12 sps:$4 sm:$0xff]   ;;  %v1815_v10 = vld [vmem:[%s2304_s6 + $0xdc] ss:$12 sps:$4 sm:$0xff]  }
  0x8b   : > { %1130 = vmatprep.mubr.bf16.mxu1 %v1812_v5  ;;  %v2344_v7 = vld [vmem:[%s2302_s27] ss:$12 sps:$4 sm:$0xff]   ;;  %1044 = vmatprep.mubr.bf16.mxu0 %v1812_v5  ;;  %v1813_v8 = vld [vmem:[%s2304_s6 + $0xc0] ss:$12 sps:$4 sm:$0xff]   ;;  %v1957_v11 = vmov 0.0   ;;  %vm1958_vm0 = vmmov 0  }
  0x8c   : > { %v1817_v12 = vld [vmem:[%s2304_s6 + $0xd8] ss:$12 sps:$4 sm:$0xff]   ;;  %v1818_v13 = vld [vmem:[%s2304_s6 + $0x1a0] ss:$12 sps:$4 sm:$0xff]   ;;  %v1821_v15 = vld [vmem:[%s2304_s6 + $0xf0] ss:$12 sps:$4 sm:$0xff]  }
  0x8d   : > { %1019 = vmatpush1.bf16.msra.mxu0 %v1786_v51  ;;  %1621 = vmatpush3.bf16.msra.mxu1 %v1787_v52  ;;  %v1819_v14 = vld [vmem:[%s2304_s6 + $0xf4] ss:$12 sps:$4 sm:$0xff]   ;;  %v1822_v16 = vld [vmem:[%s2304_s6 + $0x1b8] ss:$12 sps:$4 sm:$0xff]   ;;  %v1826_v19 = vld [vmem:[%s2304_s6 + $0x1d0] ss:$12 sps:$4 sm:$0xff]  }
  0x8e   : > { %1020 = vmatprep.subr.bf16.mxu0 %v1788_v53  ;;  %1622 = vmatprep.subr.bf16.mxu1 %v1790_v54  ;;  %v1823_v17 = vld [vmem:[%s2304_s6 + $0x10c] ss:$12 sps:$4 sm:$0xff]   ;;  %v1825_v18 = vld [vmem:[%s2304_s6 + $0x108] ss:$12 sps:$4 sm:$0xff]   ;;  %v1827_v20 = vld [vmem:[%s2304_s6 + $0x124] ss:$12 sps:$4 sm:$0xff]  }
  0x8f   : > { %v1829_v21 = vld [vmem:[%s2304_s6 + $0x120] ss:$12 sps:$4 sm:$0xff]   ;;  %v1830_v22 = vld [vmem:[%s2304_s6 + $0x1e8] ss:$12 sps:$4 sm:$0xff]   ;;  %v1833_v24 = vld [vmem:[%s2304_s6 + $0x138] ss:$12 sps:$4 sm:$0xff]  }
  0x90   : > { %v1831_v23 = vld [vmem:[%s2304_s6 + $0x13c] ss:$12 sps:$4 sm:$0xff]   ;;  %v1834_v25 = vld [vmem:[%s2304_s6 + $0x200] ss:$12 sps:$4 sm:$0xff]   ;;  %v1838_v28 = vld [vmem:[%s2304_s6 + $0x218] ss:$12 sps:$4 sm:$0xff]  }
  0x91   : > { %1021 = vmatpush1.bf16.msra.mxu0 %v1791_v55  ;;  %1623 = vmatpush3.bf16.msra.mxu1 %v1792_v56  ;;  %v1835_v26 = vld [vmem:[%s2304_s6 + $0x154] ss:$12 sps:$4 sm:$0xff]   ;;  %v1837_v27 = vld [vmem:[%s2304_s6 + $0x150] ss:$12 sps:$4 sm:$0xff]   ;;  %v1839_v29 = vld [vmem:[%s2304_s6 + $0x16c] ss:$12 sps:$4 sm:$0xff]  }
  0x92   : > { %1022 = vmatprep.subr.bf16.mxu0 %v1793_v57  ;;  %1624 = vmatprep.subr.bf16.mxu1 %v1795_v58  ;;  %v1841_v30 = vld [vmem:[%s2304_s6 + $0x168] ss:$12 sps:$4 sm:$0xff]   ;;  %v1842_v31 = vld [vmem:[%s2304_s6 + $0x230] ss:$12 sps:$4 sm:$0xff]   ;;  %v1843_v33 = vld [vmem:[%s2304_s6 + $0x180] ss:$12 sps:$4 sm:$0xff]  }
  0x93   : > { %v1845_v32 = vld [vmem:[%s2304_s6 + $0x184] ss:$12 sps:$4 sm:$0xff]   ;;  %v1849_v35 = vld [vmem:[%s2304_s6 + $0x19c] ss:$12 sps:$4 sm:$0xff]   ;;  %v1852_v37 = vld [vmem:[%s2304_s6 + $0x1b4] ss:$12 sps:$4 sm:$0xff]  }
  0x94   : > { %v1846_v34 = vld [vmem:[%s2302_s27 + $0x8] ss:$12 sps:$4 sm:$0xff]   ;;  %v1959_v38 = vmov 0   ;;  %v1853_v41 = vld [vmem:[%s2304_s6 + $0x1c8] ss:$12 sps:$4 sm:$0xff]   ;;  %p1596_p5 = scmp.ne.s32.totalorder %s1938_s18, 1 }
  0x95   : > { %1023 = vmatpush1.bf16.msra.mxu0 %v1796_v59  ;;  %1625 = vmatpush3.bf16.msra.mxu1 %v1797_v60  ;;  %v1847_v36 = vld [vmem:[%s2304_s6 + $0x198] ss:$12 sps:$4 sm:$0xff]   ;;  %v1850_v39 = vld [vmem:[%s2304_s6 + $0x1b0] ss:$12 sps:$4 sm:$0xff]   ;;  %v1856_v43 = vld [vmem:[%s2304_s6 + $0x1e0] ss:$12 sps:$4 sm:$0xff]  }
  0x96   : > { %1024 = vmatprep.subr.bf16.mxu0 %v1798_v61  ;;  %1626 = vmatprep.subr.bf16.mxu1 %v1800_v62  ;;  %v1855_v40 = vld [vmem:[%s2304_s6 + $0x1cc] ss:$12 sps:$4 sm:$0xff]   ;;  %v1858_v42 = vld [vmem:[%s2304_s6 + $0x1e4] ss:$12 sps:$4 sm:$0xff]   ;;  %v1861_v44 = vld [vmem:[%s2304_s6 + $0x1fc] ss:$12 sps:$4 sm:$0xff]  }
  0x97   : > { %v1859_v45 = vld [vmem:[%s2304_s6 + $0x1f8] ss:$12 sps:$4 sm:$0xff]   ;;  %v1864_v46 = vld [vmem:[%s2304_s6 + $0x214] ss:$12 sps:$4 sm:$0xff]   ;;  %v1862_v47 = vld [vmem:[%s2304_s6 + $0x210] ss:$12 sps:$4 sm:$0xff]  }
  0x98   : > { %v1867_v48 = vld [vmem:[%s2304_s6 + $0x22c] ss:$12 sps:$4 sm:$0xff]   ;;  %v1865_v49 = vld [vmem:[%s2304_s6 + $0x228] ss:$12 sps:$4 sm:$0xff]  }
  0x99   : > { %1025 = vmatpush1.bf16.msra.mxu0 %v1801_v63  ;;  %1627 = vmatpush3.bf16.msra.mxu1 %v1802_v0  ;;  %v508_v56 = vld [vmem:[#allocation2 + $0x10] sm:$0xff]  ;;  %v511_v60 = vld [vmem:[#allocation2 + $0x28] sm:$0xff]  ;;  %v509_v5 = vld [vmem:[#allocation2 + $0x18] sm:$0xff] }
  0x9a   : > { %1026 = vmatprep.subr.bf16.mxu0 %v1803_v1  ;;  %1628 = vmatprep.subr.bf16.mxu1 %v1805_v2  ;;  %v506_v2 = vld [vmem:[#allocation2] sm:$0xff] }
  0x9d   : > { %1027 = vmatpush1.bf16.msra.mxu0 %v1806_v3  ;;  %1629 = vmatpush3.bf16.msra.mxu1 %v1807_v4  ;;  %v507_v3 = vld [vmem:[#allocation2 + $0x8] sm:$0xff] }
  0x9e   : > { %1028 = vmatprep.subr.bf16.mxu0 %v1808_v6  ;;  %1645 = vmatprep.subr.bf16.mxu1 %v1957_v11 }
  0xa0   : > { %1131 = vmatmul.mubr.bf16.vlgmr.msra.gmra.mrb[0].mxu1 %v2344_v7 }
  0xa1   : > { %1029 = vmatpush1.bf16.msra.mxu0 %v1813_v8  ;;  %1646 = vmatpush3.bf16.msra.mxu1 %v1814_v9  ;;  %v510_v8 = vld [vmem:[#allocation2 + $0x20] sm:$0xff] }
  0xa2   : > { %1030 = vmatprep.subr.bf16.mxu0 %v1815_v10  ;;  %1647 = vmatprep.subr.bf16.mxu1 %v1957_v11 }
  0xa3   : > { %1661 = vmatprep.mubr.msk.bf16.mxu1 %vm1958_vm0, %v1957_v11 }
  0xa5   : > { %1031 = vmatpush1.bf16.msra.mxu0 %v1817_v12  ;;  %1648 = vmatpush3.bf16.msra.mxu1 %v1818_v13 }
  0xa6   : > { %1032 = vmatprep.subr.bf16.mxu0 %v1819_v14  ;;  %1649 = vmatprep.subr.bf16.mxu1 %v1957_v11  ;;  %v1204_v14 = vlaneseq (!%p1596_p5) }
  0xa9   : > { %1033 = vmatpush1.bf16.msra.mxu0 %v1821_v15  ;;  %1650 = vmatpush3.bf16.msra.mxu1 %v1822_v16  ;;  %v1205_v15 = vshrl.u32 (!%p1596_p5), %v1204_v14, 7  ;;  %v1202_v16 = vld [vmem:[%s491_s4] sm:$0x7] (!%p1596_p5) }
  0xaa   : > { %1034 = vmatprep.subr.bf16.mxu0 %v1823_v17  ;;  %1651 = vmatprep.subr.bf16.mxu1 %v1957_v11 }
  0xad   : > { %1035 = vmatpush1.bf16.msra.mxu0 %v1825_v18  ;;  %1652 = vmatpush3.bf16.msra.mxu1 %v1826_v19  ;;  %v1206_v18 = vsub.s32 (!%p1596_p5), 0, %v1205_v15  ;;  %v1210_v19 = vsub.s32 (!%p1596_p5), 1, %v1205_v15 }
  0xae   : > { %1036 = vmatprep.subr.bf16.mxu0 %v1827_v20  ;;  %1653 = vmatprep.subr.bf16.mxu1 %v1957_v11  ;;  %v1214_v20 = vsub.s32 (!%p1596_p5), 2, %v1205_v15 }
  0xb1   : > { %1037 = vmatpush1.bf16.msra.mxu0 %v1829_v21  ;;  %1654 = vmatpush3.bf16.msra.mxu1 %v1830_v22 }
  0xb2   : > { %1038 = vmatprep.subr.bf16.mxu0 %v1831_v23  ;;  %1655 = vmatprep.subr.bf16.mxu1 %v1957_v11 }
  0xb5   : > { %1039 = vmatpush1.bf16.msra.mxu0 %v1833_v24  ;;  %1656 = vmatpush3.bf16.msra.mxu1 %v1834_v25  ;;  %v1207_v24 = vrot.slane (!%p1596_p5), %v1202_v16, %v1206_v18  ;;  %v1211_v25 = vrot.slane (!%p1596_p5), %v1202_v16, %v1210_v19 }
  0xb6   : > { %1040 = vmatprep.subr.bf16.mxu0 %v1835_v26  ;;  %1657 = vmatprep.subr.bf16.mxu1 %v1957_v11  ;;  %v1215_v26 = vrot.slane (!%p1596_p5), %v1202_v16, %v1214_v20 }
  0xb9   : > { %1041 = vmatpush1.bf16.msra.mxu0 %v1837_v27  ;;  %1658 = vmatpush3.bf16.msra.mxu1 %v1838_v28 }
  0xba   : > { %1042 = vmatprep.subr.bf16.mxu0 %v1839_v29  ;;  %1659 = vmatprep.subr.bf16.mxu1 %v1957_v11 }
  0xbd   : > { %1043 = vmatpush1.bf16.msra.mxu0 %v1841_v30  ;;  %1660 = vmatpush3.bf16.msra.mxu1 %v1842_v31 }
  0xbe   : > { %1055 = vmatprep.subr.bf16.mxu0 %v1845_v32 }
  0xc0   : > { %1045 = vmatmul.mubr.bf16.vlgmr.msra.gmra.mrb[0].mxu0 %v2344_v7  ;;  %1662 = vmatmul.mubr.bf16.vlgmr.msra.gmra.mrb[4].mxu1 %v1846_v34 }
  0xc1   : > { %1056 = vmatpush1.bf16.msra.mxu0 %v1843_v33  ;;  %1087 = vmatprep.mubr.bf16.mxu0 %v1959_v38 }
  0xc2   : > { %1057 = vmatprep.subr.bf16.mxu0 %v1849_v35 }
  0xc5   : > { %1058 = vmatpush1.bf16.msra.mxu0 %v1847_v36 }
  0xc6   : > { %1059 = vmatprep.subr.bf16.mxu0 %v1852_v37 }
  0xc9   : > { %1060 = vmatpush1.bf16.msra.mxu0 %v1850_v39 }
  0xca   : > { %1061 = vmatprep.subr.bf16.mxu0 %v1855_v40 }
  0xcd   : > { %1062 = vmatpush1.bf16.msra.mxu0 %v1853_v41 }
  0xce   : > { %1063 = vmatprep.subr.bf16.mxu0 %v1858_v42 }
  0xd1   : > { %1064 = vmatpush1.bf16.msra.mxu0 %v1856_v43 }
  0xd2   : > { %1065 = vmatprep.subr.bf16.mxu0 %v1861_v44 }
  0xd5   : > { %1066 = vmatpush1.bf16.msra.mxu0 %v1859_v45 }
  0xd6   : > { %1067 = vmatprep.subr.bf16.mxu0 %v1864_v46 }
  0xd9   : > { %1068 = vmatpush1.bf16.msra.mxu0 %v1862_v47 }
  0xda   : > { %1069 = vmatprep.subr.bf16.mxu0 %v1867_v48 }
  0xdd   : > { %1070 = vmatpush1.bf16.msra.mxu0 %v1865_v49 }
  0xe0   : > { %1088 = vmatmul.mubr.bf16.vlgmr.msra.gmra.mrb[0].mxu0 %v1846_v34 }
 0x173   : > { %v1630_v50 = vpop.f32.mrb[0].mxu1 }
 0x174   : > { %v1631_v51 = vpop.f32.mrb[1].mxu1 }
 0x175   : > { %v1632_v52 = vadd.f32 %v1631_v51, %v1630_v50  ;;  %v1633_v53 = vpop.f32.mrb[2].mxu1 }
 0x176   : > { %v1634_v54 = vpop.f32.mrb[3].mxu1 }
 0x177   : > { %v1635_v55 = vadd.f32 %v1634_v54, %v1633_v53 }
 0x193   : > { %v1173_v57 = vpop.f32.mrb[4].mxu1 }
 0x194   : > { %v1174_v58 = vadd.f32 %v1632_v52, %v1173_v57  ;;  %v1663_v59 = vpop.f32.mrb[5].mxu1 }
 0x195   : > { %v1176_v61 = vpop.f32.mrb[6].mxu1 }
 0x196   : > { %v1182_v62 = vadd.f32 %v1174_v58, %v508_v56  ;;  %v1177_v63 = vadd.f32 %v1635_v55, %v1176_v61  ;;  %v1664_v0 = vpop.f32.mrb[7].mxu1 }
 0x198   : > { %1188 = vst [vmem:[#allocation2 + $0x10] sm:$0xff] %v1182_v62  ;;  %v1185_v1 = vadd.f32 %v1177_v63, %v511_v60 }
 0x19a   : > { %1191 = vst [vmem:[#allocation2 + $0x28] sm:$0xff] %v1185_v1 }
 0x19f   : > { %v1198_v22 = vld [vmem:[#allocation2 + $0x10] sm:$0xff] (!%p1596_p5) }
 0x1a0   : > { %v1221_v31 = vadd.f32 (!%p1596_p5), %v1215_v26, %v1198_v22 }
 0x1a1   : > { %v1201_v28 = vld [vmem:[#allocation2 + $0x28] sm:$0xff] (!%p1596_p5) }
 0x1a2   : > { %v1224_v34 = vadd.f32 (!%p1596_p5), %v1215_v26, %v1201_v28  ;;  %v1610_v36 = vpack.c.bf16 (!%p1596_p5), %v1221_v31, %v1221_v31 }
 0x1a4   : > { %v1612_v38 = vpack.c.bf16 (!%p1596_p5), %v1224_v34, %v1224_v34  ;;  %1246 = vst [vmem:[%s2306_s1 + $0x8] sm:$0xf] (!%p1596_p5), %v1610_v36 }
 0x1a6   : > { %1248 = vst [vmem:[%s2306_s1 + $0x14] sm:$0xf] (!%p1596_p5), %v1612_v38 }
 0x1b3   : > { %v1089_v4 = vpop.f32.mrb[0].mxu0  ;;  %1195 = sbr.rel (%p1596_p5) target bundleno = 454 (0x1c6), region = 92 }
 0x1b4   : > { %v1180_v6 = vadd.f32 %v1089_v4, %v506_v2  ;;  %v1091_v7 = vpop.f32.mrb[1].mxu0 }
 0x1b5   : > { %v1181_v9 = vadd.f32 %v1091_v7, %v507_v3  ;;  %v1093_v10 = vpop.f32.mrb[2].mxu0 }
 0x1b6   : > { %1186 = vst [vmem:[#allocation2] sm:$0xff] %v1180_v6  ;;  %v1183_v11 = vadd.f32 %v1093_v10, %v509_v5  ;;  %v1095_v12 = vpop.f32.mrb[3].mxu0 }
 0x1b7   : > { %1187 = vst [vmem:[#allocation2 + $0x8] sm:$0xff] %v1181_v9  ;;  %v1184_v13 = vadd.f32 %v1095_v12, %v510_v8 }
 0x1b8   : > { %1189 = vst [vmem:[#allocation2 + $0x18] sm:$0xff] %v1183_v11 }
 0x1b9   : > { %1190 = vst [vmem:[#allocation2 + $0x20] sm:$0xff] %v1184_v13 }
 0x1bd   : > { %v1196_v17 = vld [vmem:[#allocation2] sm:$0xff] }
 0x1be   : > { %v1197_v21 = vld [vmem:[#allocation2 + $0x8] sm:$0xff]  ;;  %v1219_v29 = vadd.f32 %v1207_v24, %v1196_v17 }
 0x1bf   : > { %v1199_v23 = vld [vmem:[#allocation2 + $0x18] sm:$0xff]  ;;  %v1220_v30 = vadd.f32 %v1211_v25, %v1197_v21 }
 0x1c0   : > { %v1200_v27 = vld [vmem:[#allocation2 + $0x20] sm:$0xff]  ;;  %v1222_v32 = vadd.f32 %v1207_v24, %v1199_v23 }
 0x1c1   : > { %v1223_v33 = vadd.f32 %v1211_v25, %v1200_v27  ;;  %v1609_v35 = vpack.c.bf16 %v1220_v30, %v1219_v29 }
 0x1c3   : > { %v1611_v37 = vpack.c.bf16 %v1223_v33, %v1222_v32  ;;  %1245 = vst [vmem:[%s2306_s1] sm:$0xff] %v1609_v35 }
 0x1c5   : > { %1247 = vst [vmem:[%s2306_s1 + $0xc] sm:$0xff] %v1611_v37 }
 0x1c6 PF: > { %1255 = sbr.rel (!%p2074_p12) target bundleno = 462 (0x1ce), region = 96  ;;  %v1602_v41 = vld [vmem:[%s2306_s1 + $0x8] sm:$0xf] (%p2074_p12)  ;;  %v1604_v42 = vld [vmem:[%s2306_s1 + $0x14] sm:$0xf] (%p2074_p12) }
 0x1c7   : > { %s1613_s16 = smul.u32 (%p2074_p12), 12, %s1942_s19 }
 0x1c9   : > { %s1261_s5 = scalar_lea.vmem (%p2074_p12), %s2444_s3, %s1613_s16 }
 0x1ca   : > { %v1276_v39 = vld [vmem:[%s2306_s1] sm:$0xff] (%p2074_p12)  ;;  %1603 = vst [vmem:[%s1261_s5 + $0x8] sm:$0xf] (%p2074_p12), %v1602_v41  ;;  %1605 = vst [vmem:[%s1261_s5 + $0x50] sm:$0xf] (%p2074_p12), %v1604_v42 }
 0x1cb   : > { %1277 = vst [vmem:[%s1261_s5] sm:$0xff] (%p2074_p12), %v1276_v39 }
 0x1cc   : > { %v1278_v40 = vld [vmem:[%s2306_s1 + $0xc] sm:$0xff] (%p2074_p12) }
 0x1cd   : > { %1279 = vst [vmem:[%s1261_s5 + $0x48] sm:$0xff] %v1278_v40 }
 0x1ce PF: > { %s13_s22 = sadd.s32 1, %s1954_s22   ;;  %s2454_s1 = sld [smem:[#allocation6_spill]] }
 0x1cf   : > { %p10_p6 = scmp.ge.s32.totalorder %s13_s22, 14   ;;  %s2455_s12 = smov %s1918_s13 }
 0x1d0   : > { %s2456_s13 = smov %s2072_s9  ;;  %s2457_s14 = smov %s1926_s15 }
 0x1d1   : > { %s2458_s15 = smov %s2069_s8  ;;  %s2459_s16 = smov %s1934_s17 }
 0x1d2   : > { %s2460_s17 = smov %s2055_s30  ;;  %s2461_s18 = smov %s1946_s20 }
 0x1d3   : > { %s2462_s19 = smov %s1950_s21  ;;  %s2463_s20 = smov %s2466_s24 }
 0x1d4   : > { %s2464_s21 = smov %s2454_s1  ;;  %12 = sbr.rel (!%p10_p6) target bundleno = 9 (0x9), region = 182 }

// kernel: multitask_forward.17
= control target key start
LH: loop header
LB: loop body
LE: loop exit
PB: predicated region body
PF: predicated region fallthrough
CT: control target
= control target key end

     0   :  { %s1084_s15 = smov 0   ;;  %s1086_s16 = smov 0   ;;  %s1216_s0 = inlined_call_operand.vmem [shape: bf16[2,8,2304], index: 0, kind: input, shape index: {}, may-alias: {0,1,2}]   ;;  %s1217_s1 = inlined_call_operand.vmem [shape: bf16[2,8,2304], index: 1, kind: input, shape index: {}, may-alias: {0,1,2}]   ;;  %s1218_s2 = inlined_call_operand.vmem [shape: bf16[2,8,2304], index: 2, kind: input, shape index: {}, may-alias: {0,1,2}]   ;;  %s1219_s3 = inlined_call_operand.vmem [shape: f32[2,1,8], index: 3, kind: input, shape index: {}]   ;;  %s1220_s4 = inlined_call_operand.vmem [shape: bf16[2,8,768], index: 4, kind: output, shape index: {}]  }
   0x1   :  { %s1088_s17 = smov 0   ;;  %s1090_s18 = smov 0  }
   0x2   :  { %s1092_s19 = smov 0  }
   0x3 LB: > { %s36_s20 = sadd.s32 1, %s1044_s17  ;;  %s40_s21 = sadd.s32 1, %s1048_s18  ;;  %s1052_s19 = sphi %s1092_s19, %s14_s19   ;;  %s1048_s18 = sphi %s1090_s18, %s1224_s18   ;;  %s1044_s17 = sphi %s1088_s17, %s1223_s17   ;;  %s1040_s16 = sphi %s1086_s16, %s1222_s16   ;;  %s1036_s15 = sphi %s1084_s15, %s1221_s15  }
   0x4   : > { %p38_p0 = scmp.ge.s32.totalorder %s36_s20, 6  ;;  %p905_p1 = scmp.ge.s32.totalorder %s1052_s19, 1 }
   0x5   : > { %p266_p2 = scmp.lt.s32.totalorder %s1052_s19, 13 }
   0x6   : > { %s1226_s20 = smov (%p38_p0, %s36_s20), 0  ;;  %s1228_s21 = smov (!%p38_p0, %s40_s21), %s1048_s18 }
   0x7   : > { %p267_p3 = pnand %p905_p1, %p266_p2  ;;  %p42_p4 = scmp.ge.s32.totalorder %s1228_s21, 2 }
   0x8   : > { %p338_p5 = scmp.lt.s32.totalorder (!%p267_p3), %s1040_s16, 1  ;;  %s350_s22 = sadd.s32 (!%p267_p3), 6, %s1036_s15  ;;  %vm406_vm0 = vcmask (!%p267_p3), 523264   ;;  %v1054_v0 = vmov (!%p267_p3), 0.0   ;;  %vm1055_vm1 = vmmov (!%p267_p3), 0   ;;  %vm401_vm2 = vcmask (!%p267_p3), 7168  }
   0x9   : > { %s1230_s21 = smov (%p42_p4, %s1228_s21), 0  ;;  %270 = sbr.rel (%p267_p3) target bundleno = 1462 (0x5b6), region = 36 }
   0xa   : > { %928 = vmatprep.subr.bf16.mxu0 (!%p267_p3), %v1054_v0  ;;  %p355_p6 = scmp.lt.s32.totalorder (!%p267_p3), %s350_s22, 17  ;;  %407 = vst.msk [vmem:[#allocation4] sm:$0xff] (!%p267_p3), %vm406_vm0, %v1054_v0  ;;  %408 = vst.msk [vmem:[#allocation4 + $0x8] sm:$0xff] (!%p267_p3), %vm406_vm0, %v1054_v0  ;;  %930 = vmatprep.mubr.msk.bf16.mxu0 (!%p267_p3), %vm1055_vm1, %v1054_v0  ;;  %p342_p7 = scmp.lt.s32.totalorder (!%p267_p3), %s1036_s15, 17  ;;  %v1056_v4 = vmov (!%p267_p3), -1e+30   ;;  %v464_v5 = vlaneseq (!%p267_p3) }
   0xb   : > { %934 = vmatprep.subr.bf16.mxu1 (!%p267_p3), %v1054_v0  ;;  %936 = vmatprep.mubr.msk.bf16.mxu1 (!%p267_p3), %vm1055_vm1, %v1054_v0  ;;  %402 = vst.msk [vmem:[#allocation2] sm:$0xff] (!%p267_p3), %vm401_vm2, %v1056_v4  ;;  %403 = vst.msk [vmem:[#allocation2 + $0x8] sm:$0xff] (!%p267_p3), %vm401_vm2, %v1056_v4  ;;  %vm471_vm3 = vcmask (!%p267_p3), 64512   ;;  %v1057_v19 = vmov (!%p267_p3), 0   ;;  %s1058_s12 = smov (!%p267_p3), 64   ;;  %s364_s13 = sadd.s32 (!%p267_p3), 12, %s1036_s15 }
   0xc   : > { %404 = vst.msk [vmem:[#allocation3] sm:$0xff] (!%p267_p3), %vm401_vm2, %v1054_v0  ;;  %405 = vst.msk [vmem:[#allocation3 + $0x8] sm:$0xff] (!%p267_p3), %vm401_vm2, %v1054_v0  ;;  %v465_v8 = vshrl.u32 (!%p267_p3), %v464_v5, 7  ;;  %999 = vset.pattern.permute.xlu0 (!%p267_p3), %v1057_v19  ;;  %1000 = vset.pattern.permute.xlu1 (!%p267_p3), %v1057_v19  ;;  %p369_p8 = scmp.lt.s32.totalorder (!%p267_p3), %s364_s13, 17  ;;  %vm506_vm4 = vcmask (!%p267_p3), 1043456   ;;  %p388_p9 = scmp.lt.s32.totalorder (!%p267_p3), %s1036_s15, 5 }
   0xe   : > { %v466_v10 = vsub.s32 (!%p267_p3), 0, %v465_v8 }
  0x10   : > { %s1232_s16 = smov (!%p338_p5, %s1040_s16), 1  ;;  %s1234_s22 = smov (!%p355_p6, %s350_s22), 17 }
  0x11   : > { %s1131_s23 = smul.u32 18, %s1232_s16  ;;  %s383_s11 = scalar_lea.vmem %s1219_s3, %s1232_s16 }
  0x12   : > { %s343_s24 = scalar_select %p342_p7, %s1036_s15, 17  ;;  %v412_v6 = vld [vmem:[%s383_s11] sm:$0x1]  ;;  %v612_v48 = vld [vmem:[#allocation2 + $0x8] sm:$0xff] }
  0x13   : > { %s360_s25 = sadd.s32 %s1131_s23, %s1234_s22  ;;  %v910_v7 = vadd.f32 -1.0, %v412_v6  ;;  %v1160_v22 = vld [vmem:[#allocation2] sm:$0xff]  ;;  %s1236_s13 = smov (!%p369_p8, %s364_s13), 17 }
  0x14   : > { %s907_s26 = sshll.u32 %s360_s25, 2  ;;  %s347_s27 = sadd.s32 %s1131_s23, %s343_s24 }
  0x15   : > { %s362_s30 = scalar_lea.vmem %s1217_s1, %s907_s26  ;;  %s906_s5 = sshll.u32 %s347_s27, 2  ;;  %v414_v9 = vmul.f32 1e+09, %v910_v7  ;;  %v629_v7 = vld [vmem:[#allocation3 + $0x8] sm:$0xff] }
  0x16   : > { %v410_v1 = vld [vmem:[%s362_s30] sm:$0xf]  ;;  %s349_s8 = scalar_lea.vmem %s1216_s0, %s906_s5  ;;  %s374_s14 = sadd.s32 %s1131_s23, %s1236_s13 }
  0x17   : > { %v420_v2 = vsel %vm406_vm0, %v410_v1, 0  ;;  %v409_v3 = vld [vmem:[%s349_s8] sm:$0xf]  ;;  %v467_v11 = vrot.slane %v414_v9, %v466_v10  ;;  %v914_v20 = vcombine.low %v410_v1, %v410_v1  ;;  %s908_s22 = sshll.u32 %s374_s14, 2  ;;  %v487_v1 = vld [vmem:[#allocation3] sm:$0xff]  ;;  %s953_s23 = smul.u32 6, %s1232_s16 }
  0x18   : > { %929 = vmatpush3.bf16.xpose.msra.mxu0 %v420_v2  ;;  %v913_v21 = vcombine.low %v409_v3, %v409_v3  ;;  %s376_s26 = scalar_lea.vmem %s1218_s2, %s908_s22  ;;  %s1238_s15 = smov (!%p388_p9, %s1036_s15), 5 }
  0x19   : > { %946 = vmatprep.subr.bf16.mxu0 %v1054_v0  ;;  %561 = vrot.lane.b32.xlu1 %v914_v20, %s1058_s12  ;;  %v411_v26 = vld [vmem:[%s376_s26] sm:$0xf]  ;;  %s393_s27 = sadd.s32 %s953_s23, %s1238_s15 }
  0x1a   : > { %v508_v27 = vsel %vm506_vm4, %v411_v26, 0  ;;  %v916_v28 = vcombine.low %v411_v26, %v411_v26  ;;  %s909_s28 = sshll.u32 %s393_s27, 2 }
  0x1b   : > { %935 = vmatpush3.bf16.msra.mxu1 %v508_v27  ;;  %s395_s5 = scalar_lea.vmem %s1220_s4, %s909_s28 }
  0x1c   : > { %940 = vmatprep.subr.bf16.mxu1 %v1054_v0 }
  0x1d   : > { %556 = vrot.lane.b32.xlu1 %v913_v21, %s1058_s12 }
  0x1f   : > { %931 = vmatmul.mubr.msk.bf16.vlgmr.msra.gmra.mrb[0].mxu0 %vm406_vm0, %v409_v3 }
  0x20   : > { %948 = vmatprep.mubr.msk.bf16.mxu0 %vm1055_vm1, %v1054_v0 }
  0x8b   : > { %v562_v32 = vpop.permute.xlu1 %561 }
  0x8c   : > { %v567_v34 = vsel %vm406_vm0, %v562_v32, 0 }
  0x8f   : > { %v557_v36 = vpop.permute.xlu1 %556 }
  0xf2   : > { %v456_v12 = vpop.f32.mrb[0].mxu0 }
  0xf3   : > { %v462_v13 = vmul.f32 0.125, %v456_v12  ;;  %v932_v14 = vpop.f32.mrb[1].mxu0  ;;  %v495_v12 = vld [vmem:[#allocation4] sm:$0xff] }
  0xf4   : > { %v459_v15 = vpop.f32.mrb[2].mxu0 }
  0xf5   : > { %v933_v16 = vpop.f32.mrb[3].mxu0  ;;  %v469_v17 = vadd.f32 %v467_v11, %v462_v13 }
  0xf7   : > { %v472_v18 = vsel %vm471_vm3, %v469_v17, -inf }
  0xf8   : > { %473 = vmax.xlane.f32.xlu0 %v472_v18  ;;  %v637_v18 = vld [vmem:[#allocation4 + $0x8] sm:$0xff] }
 0x185   : > { %v474_v23 = vpop.xlane.xlu0 %473 }
 0x186   : > { %v1163_v24 = vmax.f32 %v1160_v22, %v474_v23 }
 0x188   : > { %v476_v25 = vsub.f32 %v1160_v22, %v1163_v24  ;;  %552 = vst.msk [vmem:[#allocation2] sm:$0xff] %vm401_vm2, %v1163_v24  ;;  %481 = vperm.xlu0 %999, %v1163_v24  }
 0x18a   : > { %v477_v62 = vmul.f32 1.442695, %v476_v25 }
 0x18c   : > { %648 = vrot.lane.b32.xlu0 %v916_v28, %s1058_s12 }
 0x207   : > { %v482_v29 = vpop.permute.xlu0 %481 }
 0x208   : > { %v484_v30 = vsub.f32 %v469_v17, %v482_v29 }
 0x20a   : > { %v485_v31 = vmul.f32 1.442695, %v484_v30 }
 0x20b   : > { %v649_v52 = vpop.permute.xlu0 %648 }
 0x20c   : > { %1002 = vpow2.f32 %v485_v31  ;;  %v654_v53 = vsel %vm506_vm4, %v649_v52, 0 }
 0x20d   : > { %947 = vmatpush3.bf16.msra.mxu0 %v654_v53 }
 0x216   : > { %v1003_v33 = vpop.eup %1002 }
 0x217   : > { %v502_v35 = vpack.c.bf16 %v1003_v33, %v1003_v33  ;;  %v489_v54 = vsel %vm471_vm3, %v1003_v33, 0.0 }
 0x219   : > { %937 = vmatmul.mubr.msk.bf16.vlgmr.msra.gmra.mrb[0].mxu1 %vm471_vm3, %v502_v35 }
 0x21a   : > { %941 = vmatpush3.bf16.xpose.msra.mxu1 %v567_v34  ;;  %942 = vmatprep.mubr.msk.bf16.mxu1 %vm1055_vm1, %v1054_v0 }
 0x221   : > { %943 = vmatmul.mubr.msk.bf16.vlgmr.msra.gmra.mrb[4].mxu1 %vm406_vm0, %v557_v36 }
 0x2ec   : > { %v544_v37 = vpop.f32.mrb[0].mxu1 }
 0x2ed   : > { %v938_v38 = vpop.f32.mrb[1].mxu1 }
 0x2ee   : > { %v547_v39 = vpop.f32.mrb[2].mxu1 }
 0x2ef   : > { %v939_v40 = vpop.f32.mrb[3].mxu1 }
 0x2f4   : > { %v603_v41 = vpop.f32.mrb[4].mxu1 }
 0x2f5   : > { %v609_v42 = vmul.f32 0.125, %v603_v41  ;;  %v944_v43 = vpop.f32.mrb[5].mxu1 }
 0x2f6   : > { %v606_v44 = vpop.f32.mrb[6].mxu1 }
 0x2f7   : > { %v945_v45 = vpop.f32.mrb[7].mxu1  ;;  %v610_v46 = vadd.f32 %v609_v42, %v467_v11 }
 0x2f9   : > { %v613_v47 = vsel %vm471_vm3, %v610_v46, -inf }
 0x2fa   : > { %614 = vmax.xlane.f32.xlu1 %v613_v47 }
 0x387   : > { %v615_v49 = vpop.xlane.xlu1 %614 }
 0x388   : > { %v616_v50 = vmax.f32 %v612_v48, %v615_v49 }
 0x38a   : > { %v617_v51 = vsub.f32 %v612_v48, %v616_v50  ;;  %698 = vst.msk [vmem:[#allocation2 + $0x8] sm:$0xff] %vm401_vm2, %v616_v50  ;;  %622 = vperm.xlu1 %1000, %v616_v50  }
 0x38c   : > { %v618_v61 = vmul.f32 1.442695, %v617_v51 }
 0x3ae   : > { %490 = vadd.xlane.f32.xlu1 %v489_v54 }
 0x409   : > { %v623_v55 = vpop.permute.xlu1 %622 }
 0x40a   : > { %v625_v56 = vsub.f32 %v610_v46, %v623_v55 }
 0x40c   : > { %v626_v57 = vmul.f32 1.442695, %v625_v56 }
 0x40e   : > { %1004 = vpow2.f32 %v626_v57 }
 0x40f   : > { %1006 = vpow2.f32 %v618_v61 }
 0x410   : > { %1008 = vpow2.f32 %v477_v62 }
 0x418   : > { %v1005_v58 = vpop.eup %1004 }
 0x419   : > { %v631_v59 = vsel %vm471_vm3, %v1005_v58, 0.0  ;;  %v644_v60 = vpack.c.bf16 %v1005_v58, %v1005_v58  ;;  %v1007_v63 = vpop.eup %1006 }
 0x41a   : > { %632 = vadd.xlane.f32.xlu0 %v631_v59  ;;  %v1009_v0 = vpop.eup %1008  ;;  %v630_v8 = vmul.f32 %v1007_v63, %v629_v7 }
 0x41b   : > { %949 = vmatmul.mubr.msk.bf16.vlgmr.msra.gmra.mrb[4].mxu0 %vm471_vm3, %v644_v60  ;;  %v488_v2 = vmul.f32 %v1009_v0, %v487_v1 }
 0x430   : > { %640 = vperm.xlu0 %999, %v1007_v63  }
 0x434   : > { %498 = vperm.xlu0 %999, %v1009_v0  }
 0x43b   : > { %v491_v3 = vpop.xlane.xlu1 %490 }
 0x43c   : > { %v492_v4 = vadd.f32 %v491_v3, %v488_v2 }
 0x43e   : > { %494 = vst.msk [vmem:[#allocation3] sm:$0xff] %vm401_vm2, %v492_v4 }
 0x445   : > { %v703_v5 = vld [vmem:[#allocation3] sm:$0xff] }
 0x446   : > { %1010 = vrcp.f32 %v703_v5 }
 0x450   : > { %v1011_v6 = vpop.eup %1010 }
 0x451   : > { %707 = vperm.xlu0 %999, %v1011_v6  }
 0x4a7   : > { %v633_v9 = vpop.xlane.xlu0 %632 }
 0x4a8   : > { %v634_v10 = vadd.f32 %v633_v9, %v630_v8 }
 0x4aa   : > { %635 = vst.msk [vmem:[#allocation3 + $0x8] sm:$0xff] %vm401_vm2, %v634_v10 }
 0x4af   : > { %v641_v11 = vpop.permute.xlu0 %640 }
 0x4b0   : > { %v643_v19 = vmul.f32 %v641_v11, %v637_v18 }
 0x4b1   : > { %v712_v13 = vld [vmem:[#allocation3 + $0x8] sm:$0xff] }
 0x4b2   : > { %1012 = vrcp.f32 %v712_v13 }
 0x4b3   : > { %v499_v14 = vpop.permute.xlu0 %498 }
 0x4b4   : > { %v501_v15 = vmul.f32 %v499_v14, %v495_v12 }
 0x4b6   : > { %v550_v16 = vadd.f32 %v544_v37, %v501_v15 }
 0x4b8   : > { %551 = vst.msk [vmem:[#allocation4] sm:$0xff] %vm406_vm0, %v550_v16 }
 0x4bc   : > { %v1013_v17 = vpop.eup %1012 }
 0x4bd   : > { %716 = vperm.xlu1 %1000, %v1013_v17  }
 0x4bf   : > { %v702_v29 = vld [vmem:[#allocation4] sm:$0xff] }
 0x4d0   : > { %v708_v28 = vpop.permute.xlu0 %707 }
 0x4d1   : > { %v710_v30 = vmul.f32 %v708_v28, %v702_v29 }
 0x4ee   : > { %v690_v20 = vpop.f32.mrb[4].mxu0 }
 0x4ef   : > { %v696_v21 = vadd.f32 %v690_v20, %v643_v19  ;;  %v950_v22 = vpop.f32.mrb[5].mxu0 }
 0x4f0   : > { %v693_v23 = vpop.f32.mrb[6].mxu0 }
 0x4f1   : > { %697 = vst.msk [vmem:[#allocation4 + $0x8] sm:$0xff] %vm406_vm0, %v696_v21  ;;  %v951_v24 = vpop.f32.mrb[7].mxu0 }
 0x4f8   : > { %v711_v26 = vld [vmem:[#allocation4 + $0x8] sm:$0xff] }
 0x53c   : > { %v717_v25 = vpop.permute.xlu1 %716 }
 0x53d   : > { %v719_v27 = vmul.f32 %v717_v25, %v711_v26 }
 0x53f   : > { %721 = vrot.lane.b32.xlu0 %v719_v27, %s1058_s12 }
 0x5b1   : > { %v722_v31 = vpop.permute.xlu0 %721 }
 0x5b2   : > { %v724_v32 = vsel %vm406_vm0, %v710_v30, %v722_v31 }
 0x5b3   : > { %v725_v33 = vpack.c.bf16 %v724_v32, %v724_v32 }
 0x5b5   : > { %726 = vst [vmem:[%s395_s5] sm:$0xf] %v725_v33 }
 0x5b6 PF: > { %s14_s19 = sadd.s32 1, %s1052_s19   ;;  %s1221_s15 = smov %s1044_s17 }
 0x5b7   : > { %p11_p10 = scmp.ge.s32.totalorder %s14_s19, 14   ;;  %s1222_s16 = smov %s1048_s18 }
 0x5b8   : > { %s1223_s17 = smov %s1226_s20  ;;  %s1224_s18 = smov %s1230_s21 }
 0x5b9   :  { %13 = sbr.rel (!%p11_p10) target bundleno = 3 (0x3), region = 86 }

// kernel: multitask_forward.18
= control target key start
LH: loop header
LB: loop body
LE: loop exit
PB: predicated region body
PF: predicated region fallthrough
CT: control target
= control target key end

     0   :  { %s2486_s21 = smov 0   ;;  %s2488_s22 = smov 0   ;;  %s2817_s0 = inlined_call_operand.vmem [shape: bf16[16,768], index: 0, kind: input, shape index: {}]   ;;  %s2818_s1 = inlined_call_operand.vmem [shape: bf16[768,768], index: 1, kind: input, shape index: {}]   ;;  %s2819_s2 = inlined_call_operand.vmem [shape: f32[1,768], index: 2, kind: input, shape index: {}]   ;;  %s2820_s3 = inlined_call_operand.vmem [shape: bf16[16,768], index: 3, kind: input, shape index: {}]   ;;  %s2821_s4 = inlined_call_operand.vmem [shape: f32[1,768], index: 4, kind: input, shape index: {}]   ;;  %s2822_s5 = inlined_call_operand.vmem [shape: f32[1,768], index: 5, kind: input, shape index: {}]   ;;  %s2823_s6 = inlined_call_operand.vmem [shape: bf16[16,768], index: 6, kind: output, shape index: {}]  }
   0x1   :  { %s2490_s23 = smov 0   ;;  %s2492_s24 = smov 0  }
   0x2   :  { %s2494_s25 = smov 0  }
   0x3 LB: > { %s25_s26 = sadd.s32 1, %s2443_s24  ;;  %p44_p1 = scmp.ne.s32.totalorder %s2435_s22, %s2431_s21  ;;  %s2447_s25 = sphi %s2494_s25, %s16_s25   ;;  %s2443_s24 = sphi %s2492_s24, %s2827_s24   ;;  %s2439_s23 = sphi %s2490_s23, %s2826_s23   ;;  %s2435_s22 = sphi %s2488_s22, %s2825_s22   ;;  %s2431_s21 = sphi %s2486_s21, %s2824_s21  }
   0x4   : > { %p26_p0 = scmp.ge.s32.totalorder %s25_s26, 2  ;;  %p45_p2 = scmp.eq.s32.totalorder %s2447_s25, 0 }
   0x5   : > { %s37_s28 = sadd.s32 1, %s2435_s22  ;;  %p1954_p5 = scmp.ge.s32.totalorder %s2447_s25, 2 }
   0x6   : > { %s2829_s26 = smov (%p26_p0, %s25_s26), 0  ;;  %p46_p3 = por %p45_p2, %p44_p1 }
   0x7   : > { %s33_s27 = ssub.s32 %s2443_s24, %s2829_s26  ;;  %230 = sbr.rel (%p1954_p5) target bundleno = 21 (0x15), region = 32 }
   0x8   : > { %p35_p4 = scmp.eq.s32.totalorder %s33_s27, 0 }
   0xa   : > { %s2521_s29 = scalar_select %p35_p4, %s2435_s22, %s37_s28  }
   0xe   : > { %233 = sbr.rel (!%p46_p3) target bundleno = 21 (0x15), region = 36  ;;  %s235_s30 = sand.u32 (%p46_p3), 1, %s2435_s22  }
   0xf   : > { %s2121_s7 = smul.u32 (%p46_p3), 12, %s2443_s24 }
  0x10   : > { %s2140_s8 = smul.u32 (%p46_p3), 24, %s235_s30 }
  0x11   : > { %s243_s11 = scalar_lea.vmem (%p46_p3), %s2817_s0, %s2121_s7 }
  0x12   : > { %v258_v0 = vld [vmem:[%s243_s11] sm:$0xff] (%p46_p3)  ;;  %v260_v1 = vld [vmem:[%s243_s11 + $0x18] sm:$0xff] (%p46_p3)  ;;  %v1956_v2 = vld [vmem:[%s243_s11 + $0x8] sm:$0xf] (%p46_p3)  ;;  %s237_s12 = scalar_lea.vmem (%p46_p3), [#allocation3], %s2140_s8 }
  0x13   : > { %259 = vst [vmem:[%s237_s12] sm:$0xff] (%p46_p3), %v258_v0  ;;  %261 = vst [vmem:[%s237_s12 + $0xc] sm:$0xff] (%p46_p3), %v260_v1  ;;  %v1958_v3 = vld [vmem:[%s243_s11 + $0x20] sm:$0xf] (%p46_p3) }
  0x14   : > { %1957 = vst [vmem:[%s237_s12 + $0x8] sm:$0xf] (%p46_p3), %v1956_v2  ;;  %1959 = vst [vmem:[%s237_s12 + $0x14] sm:$0xf] (%p46_p3), %v1958_v3 }
  0x15 PF: > { %p1960_p6 = scmp.ge.s32.totalorder %s2447_s25, 1  ;;  %p287_p7 = scmp.lt.s32.totalorder %s2447_s25, 3 }
  0x17   : > { %p288_p8 = pnand %p1960_p6, %p287_p7 }
  0x18   : > { %s294_s13 = sand.u32 (!%p288_p8), 1, %s2431_s21   ;;  %s338_s14 = smul.u32 (!%p288_p8), 48, %s2439_s23 }
  0x19   : > { %291 = sbr.rel (%p288_p8) target bundleno = 766 (0x2fe), region = 66  ;;  %p1962_p10 = scmp.ne.s32.totalorder (!%p288_p8), %s2439_s23, 0 }
  0x1a   : > { %s2141_s15 = smul.u32 (!%p288_p8), 24, %s294_s13  ;;  %p339_p9 = scmp.lt.s32.totalorder (!%p288_p8), %s338_s14, 95 }
  0x1c   : > { %s2538_s20 = scalar_lea.vmem (!%p288_p8), [#allocation3], %s2141_s15 }
  0x20   : > { %s2831_s14 = smov (!%p339_p9, %s338_s14), 95  ;;  %363 = sbr.rel (%p1962_p10) target bundleno = 40 (0x28), region = 74 }
  0x21   : > { %s2142_s16 = smul.u32 24, %s2831_s14  ;;  %v2449_v4 = vmov (!%p1962_p10), 0.0  }
  0x22   : > { %364 = vst [vmem:[#allocation2] sm:$0xff] (!%p1962_p10), %v2449_v4  ;;  %365 = vst [vmem:[#allocation2 + $0x8] sm:$0xff] (!%p1962_p10), %v2449_v4 }
  0x23   : > { %s2536_s19 = scalar_lea.vmem %s2818_s1, %s2142_s16  ;;  %366 = vst [vmem:[#allocation2 + $0x10] sm:$0xff] (!%p1962_p10), %v2449_v4  ;;  %367 = vst [vmem:[#allocation2 + $0x18] sm:$0xff] (!%p1962_p10), %v2449_v4 }
  0x24   : > { %368 = vst [vmem:[#allocation2 + $0x20] sm:$0xff] (!%p1962_p10), %v2449_v4  ;;  %369 = vst [vmem:[#allocation2 + $0x28] sm:$0xff] (!%p1962_p10), %v2449_v4 }
  0x25   : > { %370 = vst [vmem:[#allocation2 + $0x30] sm:$0xff] (!%p1962_p10), %v2449_v4  ;;  %371 = vst [vmem:[#allocation2 + $0x38] sm:$0xff] (!%p1962_p10), %v2449_v4 }
  0x26   : > { %372 = vst [vmem:[#allocation2 + $0x40] sm:$0xff] (!%p1962_p10), %v2449_v4  ;;  %373 = vst [vmem:[#allocation2 + $0x48] sm:$0xff] (!%p1962_p10), %v2449_v4 }
  0x27   : > { %374 = vst [vmem:[#allocation2 + $0x50] sm:$0xff] %v2449_v4  ;;  %375 = vst [vmem:[#allocation2 + $0x58] sm:$0xff] %v2449_v4 }
  0x28 PF: > { %v2185_v5 = vld [vmem:[%s2536_s19 + $0x4] ss:$24 sps:$4 sm:$0xff]   ;;  %v2450_v7 = vmov 0   ;;  %v2189_v8 = vld [vmem:[%s2536_s19] ss:$24 sps:$4 sm:$0xff]   ;;  %p2110_p11 = scmp.ne.s32.totalorder %s2439_s23, 1 }
  0x29   : > { %v2187_v6 = vld [vmem:[%s2536_s19 + $0x304] ss:$24 sps:$4 sm:$0xff]   ;;  %1347 = vmatprep.mubr.bf16.mxu0 %v2450_v7  ;;  %1272 = vmatprep.subr.bf16.mxu1 %v2185_v5  ;;  %v2190_v9 = vld [vmem:[%s2536_s19 + $0x300] ss:$24 sps:$4 sm:$0xff]   ;;  %v2191_v10 = vld [vmem:[%s2536_s19 + $0x34] ss:$24 sps:$4 sm:$0xff]  }
  0x2a   : > { %1315 = vmatprep.subr.bf16.mxu0 %v2187_v6  ;;  %1273 = vmatpush1.bf16.msra.mxu1 %v2189_v8  ;;  %v2193_v11 = vld [vmem:[%s2536_s19 + $0x334] ss:$24 sps:$4 sm:$0xff]   ;;  %v2195_v12 = vld [vmem:[%s2536_s19 + $0x30] ss:$24 sps:$4 sm:$0xff]   ;;  %v2197_v14 = vld [vmem:[%s2536_s19 + $0x64] ss:$24 sps:$4 sm:$0xff]  }
  0x2b   : > { %1316 = vmatpush1.bf16.msra.mxu0 %v2190_v9  ;;  %1274 = vmatprep.subr.bf16.mxu1 %v2191_v10  ;;  %v2196_v13 = vld [vmem:[%s2536_s19 + $0x330] ss:$24 sps:$4 sm:$0xff]   ;;  %v2199_v15 = vld [vmem:[%s2536_s19 + $0x364] ss:$24 sps:$4 sm:$0xff]   ;;  %v2201_v16 = vld [vmem:[%s2536_s19 + $0x60] ss:$24 sps:$4 sm:$0xff]  }
  0x2c   : > { %1317 = vmatprep.subr.bf16.mxu0 %v2193_v11  ;;  %v2202_v17 = vld [vmem:[%s2536_s19 + $0x360] ss:$24 sps:$4 sm:$0xff]   ;;  %v2203_v18 = vld [vmem:[%s2536_s19 + $0x94] ss:$24 sps:$4 sm:$0xff]   ;;  %v2207_v20 = vld [vmem:[%s2536_s19 + $0x90] ss:$24 sps:$4 sm:$0xff]  }
  0x2d   : > { %v2205_v19 = vld [vmem:[%s2536_s19 + $0x394] ss:$24 sps:$4 sm:$0xff]   ;;  %v2208_v21 = vld [vmem:[%s2536_s19 + $0x390] ss:$24 sps:$4 sm:$0xff]   ;;  %v2209_v22 = vld [vmem:[%s2536_s19 + $0xc4] ss:$24 sps:$4 sm:$0xff]  }
  0x2e   : > { %1275 = vmatpush1.bf16.msra.mxu1 %v2195_v12  ;;  %v2211_v23 = vld [vmem:[%s2536_s19 + $0x3c4] ss:$24 sps:$4 sm:$0xff]   ;;  %v2213_v24 = vld [vmem:[%s2536_s19 + $0xc0] ss:$24 sps:$4 sm:$0xff]   ;;  %v2215_v26 = vld [vmem:[%s2536_s19 + $0xf4] ss:$24 sps:$4 sm:$0xff]  }
  0x2f   : > { %1318 = vmatpush1.bf16.msra.mxu0 %v2196_v13  ;;  %1276 = vmatprep.subr.bf16.mxu1 %v2197_v14  ;;  %v2214_v25 = vld [vmem:[%s2536_s19 + $0x3c0] ss:$24 sps:$4 sm:$0xff]   ;;  %v2217_v27 = vld [vmem:[%s2536_s19 + $0x3f4] ss:$24 sps:$4 sm:$0xff]   ;;  %v2219_v28 = vld [vmem:[%s2536_s19 + $0xf0] ss:$24 sps:$4 sm:$0xff]  }
  0x30   : > { %1319 = vmatprep.subr.bf16.mxu0 %v2199_v15  ;;  %v2220_v29 = vld [vmem:[%s2536_s19 + $0x3f0] ss:$24 sps:$4 sm:$0xff]   ;;  %v2221_v30 = vld [vmem:[%s2536_s19 + $0x124] ss:$24 sps:$4 sm:$0xff]   ;;  %v2225_v32 = vld [vmem:[%s2536_s19 + $0x120] ss:$24 sps:$4 sm:$0xff]  }
  0x31   : > { %v2223_v31 = vld [vmem:[%s2536_s19 + $0x424] ss:$24 sps:$4 sm:$0xff]   ;;  %v2226_v33 = vld [vmem:[%s2536_s19 + $0x420] ss:$24 sps:$4 sm:$0xff]   ;;  %v2227_v34 = vld [vmem:[%s2536_s19 + $0x154] ss:$24 sps:$4 sm:$0xff]  }
  0x32   : > { %1277 = vmatpush1.bf16.msra.mxu1 %v2201_v16  ;;  %v2229_v35 = vld [vmem:[%s2536_s19 + $0x454] ss:$24 sps:$4 sm:$0xff]   ;;  %v2231_v36 = vld [vmem:[%s2536_s19 + $0x150] ss:$24 sps:$4 sm:$0xff]   ;;  %v2233_v38 = vld [vmem:[%s2536_s19 + $0x184] ss:$24 sps:$4 sm:$0xff]  }
  0x33   : > { %1320 = vmatpush1.bf16.msra.mxu0 %v2202_v17  ;;  %1278 = vmatprep.subr.bf16.mxu1 %v2203_v18  ;;  %v2232_v37 = vld [vmem:[%s2536_s19 + $0x450] ss:$24 sps:$4 sm:$0xff]   ;;  %v2237_v39 = vld [vmem:[%s2536_s19 + $0x14] ss:$24 sps:$4 sm:$0xff]   ;;  %v2238_v42 = vld [vmem:[%s2536_s19 + $0x180] ss:$24 sps:$4 sm:$0xff]  }
  0x34   : > { %1321 = vmatprep.subr.bf16.mxu0 %v2205_v19  ;;  %v2577_v40 = vld [vmem:[%s2538_s20 + $0x8] ss:$12 sps:$4 sm:$0xff]   ;;  %v2244_v44 = vld [vmem:[%s2536_s19 + $0x44] ss:$24 sps:$4 sm:$0xff]   ;;  %v2291_v16 = vld [vmem:[%s2536_s19 + $0x38] ss:$24 sps:$4 sm:$0xff]  }
  0x35   : > { %v2235_v41 = vld [vmem:[%s2536_s19 + $0x10] ss:$24 sps:$4 sm:$0xff]   ;;  %v2240_v43 = vld [vmem:[%s2536_s19 + $0x1b4] ss:$24 sps:$4 sm:$0xff]   ;;  %v2242_v45 = vld [vmem:[%s2536_s19 + $0x40] ss:$24 sps:$4 sm:$0xff]  }
  0x36   : > { %1279 = vmatpush1.bf16.msra.mxu1 %v2207_v20  ;;  %v2245_v46 = vld [vmem:[%s2536_s19 + $0x1b0] ss:$24 sps:$4 sm:$0xff]   ;;  %v2246_v47 = vld [vmem:[%s2536_s19 + $0x1e4] ss:$24 sps:$4 sm:$0xff]   ;;  %v2250_v48 = vld [vmem:[%s2536_s19 + $0x74] ss:$24 sps:$4 sm:$0xff]  }
  0x37   : > { %1322 = vmatpush1.bf16.msra.mxu0 %v2208_v21  ;;  %1280 = vmatprep.subr.bf16.mxu1 %v2209_v22  ;;  %v2248_v49 = vld [vmem:[%s2536_s19 + $0x70] ss:$24 sps:$4 sm:$0xff]   ;;  %v2251_v50 = vld [vmem:[%s2536_s19 + $0x1e0] ss:$24 sps:$4 sm:$0xff]   ;;  %v2252_v51 = vld [vmem:[%s2536_s19 + $0x214] ss:$24 sps:$4 sm:$0xff]  }
  0x38   : > { %1323 = vmatprep.subr.bf16.mxu0 %v2211_v23  ;;  %v2256_v52 = vld [vmem:[%s2536_s19 + $0xa4] ss:$24 sps:$4 sm:$0xff]   ;;  %v2254_v53 = vld [vmem:[%s2536_s19 + $0xa0] ss:$24 sps:$4 sm:$0xff]   ;;  %v2257_v54 = vld [vmem:[%s2536_s19 + $0x210] ss:$24 sps:$4 sm:$0xff]  }
  0x39   : > { %v2258_v55 = vld [vmem:[%s2536_s19 + $0x244] ss:$24 sps:$4 sm:$0xff]   ;;  %v2262_v57 = vld [vmem:[%s2536_s19 + $0xd4] ss:$24 sps:$4 sm:$0xff]   ;;  %v2260_v58 = vld [vmem:[%s2536_s19 + $0xd0] ss:$24 sps:$4 sm:$0xff]  }
  0x3a   : > { %1281 = vmatpush1.bf16.msra.mxu1 %v2213_v24  ;;  %v2282_v56 = vld [vmem:[%s2538_s20 + $0x4] ss:$12 sps:$4 sm:$0xff]   ;;  %v2263_v59 = vld [vmem:[%s2536_s19 + $0x240] ss:$24 sps:$4 sm:$0xff]   ;;  %v2264_v60 = vld [vmem:[%s2536_s19 + $0x274] ss:$24 sps:$4 sm:$0xff]  }
  0x3b   : > { %1324 = vmatpush1.bf16.msra.mxu0 %v2214_v25  ;;  %1282 = vmatprep.subr.bf16.mxu1 %v2215_v26  ;;  %v2268_v61 = vld [vmem:[%s2536_s19 + $0x104] ss:$24 sps:$4 sm:$0xff]   ;;  %v2266_v62 = vld [vmem:[%s2536_s19 + $0x100] ss:$24 sps:$4 sm:$0xff]   ;;  %v2269_v63 = vld [vmem:[%s2536_s19 + $0x270] ss:$24 sps:$4 sm:$0xff]  }
  0x3c   : > { %1325 = vmatprep.subr.bf16.mxu0 %v2217_v27  ;;  %1304 = vmatprep.mubr.bf16.mxu1 %v2282_v56  ;;  %v2270_v0 = vld [vmem:[%s2536_s19 + $0x2a4] ss:$24 sps:$4 sm:$0xff]   ;;  %v2274_v1 = vld [vmem:[%s2536_s19 + $0x134] ss:$24 sps:$4 sm:$0xff]   ;;  %v2272_v2 = vld [vmem:[%s2536_s19 + $0x130] ss:$24 sps:$4 sm:$0xff]  }
  0x3d   : > { %v2275_v3 = vld [vmem:[%s2536_s19 + $0x2a0] ss:$24 sps:$4 sm:$0xff]   ;;  %v2276_v4 = vld [vmem:[%s2536_s19 + $0x2d4] ss:$24 sps:$4 sm:$0xff]   ;;  %v2280_v5 = vld [vmem:[%s2536_s19 + $0x164] ss:$24 sps:$4 sm:$0xff]  }
  0x3e   : > { %1283 = vmatpush1.bf16.msra.mxu1 %v2219_v28  ;;  %v2278_v6 = vld [vmem:[%s2536_s19 + $0x160] ss:$24 sps:$4 sm:$0xff]   ;;  %v2281_v8 = vld [vmem:[%s2536_s19 + $0x2d0] ss:$24 sps:$4 sm:$0xff]   ;;  %v2287_v9 = vld [vmem:[%s2536_s19 + $0xc] ss:$24 sps:$4 sm:$0xff]  }
  0x3f   : > { %1326 = vmatpush1.bf16.msra.mxu0 %v2220_v29  ;;  %1284 = vmatprep.subr.bf16.mxu1 %v2221_v30  ;;  %v2290_v10 = vld [vmem:[%s2536_s19 + $0x194] ss:$24 sps:$4 sm:$0xff]   ;;  %v2285_v12 = vld [vmem:[%s2536_s19 + $0x8] ss:$24 sps:$4 sm:$0xff]   ;;  %v2296_v15 = vld [vmem:[%s2536_s19 + $0x1c4] ss:$24 sps:$4 sm:$0xff]  }
  0x40   : > { %1327 = vmatprep.subr.bf16.mxu0 %v2223_v31  ;;  %v2614_v11 = vld [vmem:[%s2538_s20] ss:$12 sps:$4 sm:$0xff]   ;;  %v2288_v13 = vld [vmem:[%s2536_s19 + $0x190] ss:$24 sps:$4 sm:$0xff]   ;;  %v2293_v14 = vld [vmem:[%s2536_s19 + $0x3c] ss:$24 sps:$4 sm:$0xff]  }
  0x41   : > { %v2294_v17 = vld [vmem:[%s2536_s19 + $0x1c0] ss:$24 sps:$4 sm:$0xff]   ;;  %v2299_v18 = vld [vmem:[%s2536_s19 + $0x6c] ss:$24 sps:$4 sm:$0xff]   ;;  %v2300_v21 = vld [vmem:[%s2536_s19 + $0x1f0] ss:$24 sps:$4 sm:$0xff]  }
  0x42   : > { %1285 = vmatpush1.bf16.msra.mxu1 %v2225_v32  ;;  %v2302_v19 = vld [vmem:[%s2536_s19 + $0x1f4] ss:$24 sps:$4 sm:$0xff]   ;;  %v2297_v20 = vld [vmem:[%s2536_s19 + $0x68] ss:$24 sps:$4 sm:$0xff]   ;;  %v2308_v23 = vld [vmem:[%s2536_s19 + $0x224] ss:$24 sps:$4 sm:$0xff]  }
  0x43   : > { %1328 = vmatpush1.bf16.msra.mxu0 %v2226_v33  ;;  %1286 = vmatprep.subr.bf16.mxu1 %v2227_v34  ;;  %v2305_v22 = vld [vmem:[%s2536_s19 + $0x9c] ss:$24 sps:$4 sm:$0xff]   ;;  %v2303_v24 = vld [vmem:[%s2536_s19 + $0x98] ss:$24 sps:$4 sm:$0xff]   ;;  %v2311_v26 = vld [vmem:[%s2536_s19 + $0xcc] ss:$24 sps:$4 sm:$0xff]  }
  0x44   : > { %1329 = vmatprep.subr.bf16.mxu0 %v2229_v35  ;;  %v2306_v25 = vld [vmem:[%s2536_s19 + $0x220] ss:$24 sps:$4 sm:$0xff]   ;;  %v2314_v27 = vld [vmem:[%s2536_s19 + $0x254] ss:$24 sps:$4 sm:$0xff]   ;;  %v2312_v29 = vld [vmem:[%s2536_s19 + $0x250] ss:$24 sps:$4 sm:$0xff]  }
  0x45   : > { %v2309_v28 = vld [vmem:[%s2536_s19 + $0xc8] ss:$24 sps:$4 sm:$0xff]   ;;  %v2317_v30 = vld [vmem:[%s2536_s19 + $0xfc] ss:$24 sps:$4 sm:$0xff]   ;;  %v2315_v32 = vld [vmem:[%s2536_s19 + $0xf8] ss:$24 sps:$4 sm:$0xff]  }
  0x46   : > { %1287 = vmatpush1.bf16.msra.mxu1 %v2231_v36  ;;  %v2320_v31 = vld [vmem:[%s2536_s19 + $0x284] ss:$24 sps:$4 sm:$0xff]   ;;  %v2318_v33 = vld [vmem:[%s2536_s19 + $0x280] ss:$24 sps:$4 sm:$0xff]   ;;  %v2326_v35 = vld [vmem:[%s2536_s19 + $0x2b4] ss:$24 sps:$4 sm:$0xff]  }
  0x47   : > { %1330 = vmatpush1.bf16.msra.mxu0 %v2232_v37  ;;  %1288 = vmatprep.subr.bf16.mxu1 %v2233_v38  ;;  %v2323_v34 = vld [vmem:[%s2536_s19 + $0x12c] ss:$24 sps:$4 sm:$0xff]   ;;  %v2321_v36 = vld [vmem:[%s2536_s19 + $0x128] ss:$24 sps:$4 sm:$0xff]   ;;  %v2329_v38 = vld [vmem:[%s2536_s19 + $0x15c] ss:$24 sps:$4 sm:$0xff]  }
  0x48   : > { %1444 = vmatprep.subr.bf16.mxu0 %v2237_v39  ;;  %v2324_v37 = vld [vmem:[%s2536_s19 + $0x2b0] ss:$24 sps:$4 sm:$0xff]   ;;  %v2332_v39 = vld [vmem:[%s2536_s19 + $0x2e4] ss:$24 sps:$4 sm:$0xff]  }
  0x4a   : > { %1348 = vmatmul.mubr.bf16.vlgmr.msra.gmra.mrb[0].mxu0 %v2577_v40  ;;  %1289 = vmatpush1.bf16.msra.mxu1 %v2238_v42  ;;  %v2330_v42 = vld [vmem:[%s2536_s19 + $0x2e0] ss:$24 sps:$4 sm:$0xff]  }
  0x4b   : > { %1445 = vmatpush1.bf16.msra.mxu0 %v2235_v41  ;;  %1290 = vmatprep.subr.bf16.mxu1 %v2240_v43  ;;  %v2327_v41 = vld [vmem:[%s2536_s19 + $0x158] ss:$24 sps:$4 sm:$0xff]   ;;  %v2335_v43 = vld [vmem:[%s2536_s19 + $0x18c] ss:$24 sps:$4 sm:$0xff]  }
  0x4c   : > { %1446 = vmatprep.subr.bf16.mxu0 %v2244_v44  ;;  %1476 = vmatprep.mubr.bf16.mxu0 %v2282_v56  ;;  %v2338_v44 = vld [vmem:[%s2536_s19 + $0x314] ss:$24 sps:$4 sm:$0xff]  }
  0x4e   : > { %1291 = vmatpush1.bf16.msra.mxu1 %v2245_v46  ;;  %v2336_v46 = vld [vmem:[%s2536_s19 + $0x310] ss:$24 sps:$4 sm:$0xff]  }
  0x4f   : > { %1447 = vmatpush1.bf16.msra.mxu0 %v2242_v45  ;;  %1292 = vmatprep.subr.bf16.mxu1 %v2246_v47  ;;  %v2333_v45 = vld [vmem:[%s2536_s19 + $0x188] ss:$24 sps:$4 sm:$0xff]   ;;  %v2341_v47 = vld [vmem:[%s2536_s19 + $0x1bc] ss:$24 sps:$4 sm:$0xff]  }
  0x50   : > { %1448 = vmatprep.subr.bf16.mxu0 %v2250_v48  ;;  %v2344_v48 = vld [vmem:[%s2536_s19 + $0x344] ss:$24 sps:$4 sm:$0xff]  }
  0x52   : > { %1293 = vmatpush1.bf16.msra.mxu1 %v2251_v50  ;;  %v2342_v50 = vld [vmem:[%s2536_s19 + $0x340] ss:$24 sps:$4 sm:$0xff]  }
  0x53   : > { %1449 = vmatpush1.bf16.msra.mxu0 %v2248_v49  ;;  %1294 = vmatprep.subr.bf16.mxu1 %v2252_v51  ;;  %v2339_v49 = vld [vmem:[%s2536_s19 + $0x1b8] ss:$24 sps:$4 sm:$0xff]   ;;  %v2347_v51 = vld [vmem:[%s2536_s19 + $0x1ec] ss:$24 sps:$4 sm:$0xff]  }
  0x54   : > { %1450 = vmatprep.subr.bf16.mxu0 %v2256_v52  ;;  %v2350_v52 = vld [vmem:[%s2536_s19 + $0x374] ss:$24 sps:$4 sm:$0xff]  }
  0x56   : > { %1295 = vmatpush1.bf16.msra.mxu1 %v2257_v54  ;;  %v2348_v54 = vld [vmem:[%s2536_s19 + $0x370] ss:$24 sps:$4 sm:$0xff]  }
  0x57   : > { %1451 = vmatpush1.bf16.msra.mxu0 %v2254_v53  ;;  %1296 = vmatprep.subr.bf16.mxu1 %v2258_v55  ;;  %v2345_v53 = vld [vmem:[%s2536_s19 + $0x1e8] ss:$24 sps:$4 sm:$0xff]   ;;  %v2353_v55 = vld [vmem:[%s2536_s19 + $0x21c] ss:$24 sps:$4 sm:$0xff]  }
  0x58   : > { %1452 = vmatprep.subr.bf16.mxu0 %v2262_v57  ;;  %v2351_v57 = vld [vmem:[%s2536_s19 + $0x218] ss:$24 sps:$4 sm:$0xff]  }
  0x5a   : > { %1297 = vmatpush1.bf16.msra.mxu1 %v2263_v59  ;;  %v2359_v59 = vld [vmem:[%s2536_s19 + $0x24c] ss:$24 sps:$4 sm:$0xff]  }
  0x5b   : > { %1453 = vmatpush1.bf16.msra.mxu0 %v2260_v58  ;;  %1298 = vmatprep.subr.bf16.mxu1 %v2264_v60  ;;  %v2354_v58 = vld [vmem:[%s2536_s19 + $0x3a0] ss:$24 sps:$4 sm:$0xff]   ;;  %v2362_v60 = vld [vmem:[%s2536_s19 + $0x3d4] ss:$24 sps:$4 sm:$0xff]  }
  0x5c   : > { %1454 = vmatprep.subr.bf16.mxu0 %v2268_v61  ;;  %v2357_v61 = vld [vmem:[%s2536_s19 + $0x248] ss:$24 sps:$4 sm:$0xff]  }
  0x5e   : > { %1299 = vmatpush1.bf16.msra.mxu1 %v2269_v63  ;;  %v2365_v63 = vld [vmem:[%s2536_s19 + $0x27c] ss:$24 sps:$4 sm:$0xff]  }
  0x5f   : > { %1455 = vmatpush1.bf16.msra.mxu0 %v2266_v62  ;;  %1300 = vmatprep.subr.bf16.mxu1 %v2270_v0  ;;  %v2360_v62 = vld [vmem:[%s2536_s19 + $0x3d0] ss:$24 sps:$4 sm:$0xff]   ;;  %v2368_v0 = vld [vmem:[%s2536_s19 + $0x404] ss:$24 sps:$4 sm:$0xff]  }
  0x60   : > { %1456 = vmatprep.subr.bf16.mxu0 %v2274_v1  ;;  %v2363_v1 = vld [vmem:[%s2536_s19 + $0x278] ss:$24 sps:$4 sm:$0xff]  }
  0x62   : > { %1301 = vmatpush1.bf16.msra.mxu1 %v2275_v3  ;;  %v2371_v3 = vld [vmem:[%s2536_s19 + $0x2ac] ss:$24 sps:$4 sm:$0xff]  }
  0x63   : > { %1457 = vmatpush1.bf16.msra.mxu0 %v2272_v2  ;;  %1302 = vmatprep.subr.bf16.mxu1 %v2276_v4  ;;  %v2366_v2 = vld [vmem:[%s2536_s19 + $0x400] ss:$24 sps:$4 sm:$0xff]   ;;  %v2374_v4 = vld [vmem:[%s2536_s19 + $0x434] ss:$24 sps:$4 sm:$0xff]  }
  0x64   : > { %1458 = vmatprep.subr.bf16.mxu0 %v2280_v5  ;;  %v2369_v5 = vld [vmem:[%s2536_s19 + $0x2a8] ss:$24 sps:$4 sm:$0xff]  }
  0x66   : > { %1303 = vmatpush1.bf16.msra.mxu1 %v2281_v8  ;;  %v2377_v8 = vld [vmem:[%s2536_s19 + $0x2dc] ss:$24 sps:$4 sm:$0xff]  }
  0x67   : > { %1459 = vmatpush1.bf16.msra.mxu0 %v2278_v6  ;;  %1358 = vmatprep.subr.bf16.mxu1 %v2287_v9  ;;  %v2372_v6 = vld [vmem:[%s2536_s19 + $0x430] ss:$24 sps:$4 sm:$0xff]   ;;  %v2380_v9 = vld [vmem:[%s2536_s19 + $0x464] ss:$24 sps:$4 sm:$0xff]  }
  0x68   : > { %1460 = vmatprep.subr.bf16.mxu0 %v2290_v10  ;;  %v2375_v10 = vld [vmem:[%s2536_s19 + $0x2d8] ss:$24 sps:$4 sm:$0xff]  }
  0x69   : > { %1305 = vmatmul.mubr.bf16.vlgmr.msra.gmra.mrb[0].mxu1 %v2614_v11 }
  0x6a   : > { %1359 = vmatpush1.bf16.msra.mxu1 %v2285_v12  ;;  %1390 = vmatprep.mubr.bf16.mxu1 %v2282_v56  ;;  %v2356_v56 = vld [vmem:[%s2536_s19 + $0x3a4] ss:$24 sps:$4 sm:$0xff]   ;;  %v2378_v12 = vld [vmem:[%s2536_s19 + $0x460] ss:$24 sps:$4 sm:$0xff]  }
  0x6b   : > { %1461 = vmatpush1.bf16.msra.mxu0 %v2288_v13  ;;  %1360 = vmatprep.subr.bf16.mxu1 %v2293_v14  ;;  %v2383_v13 = vld [vmem:[%s2536_s19 + $0x30c] ss:$24 sps:$4 sm:$0xff]   ;;  %v2381_v14 = vld [vmem:[%s2536_s19 + $0x308] ss:$24 sps:$4 sm:$0xff]  }
  0x6c   : > { %1462 = vmatprep.subr.bf16.mxu0 %v2296_v15  ;;  %v2386_v15 = vld [vmem:[%s2536_s19 + $0x33c] ss:$24 sps:$4 sm:$0xff]  }
  0x6e   : > { %1361 = vmatpush1.bf16.msra.mxu1 %v2291_v16  ;;  %v2384_v16 = vld [vmem:[%s2536_s19 + $0x338] ss:$24 sps:$4 sm:$0xff]  }
  0x6f   : > { %1463 = vmatpush1.bf16.msra.mxu0 %v2294_v17  ;;  %1362 = vmatprep.subr.bf16.mxu1 %v2299_v18  ;;  %v2389_v17 = vld [vmem:[%s2536_s19 + $0x36c] ss:$24 sps:$4 sm:$0xff]   ;;  %v2387_v18 = vld [vmem:[%s2536_s19 + $0x368] ss:$24 sps:$4 sm:$0xff]  }
  0x70   : > { %1464 = vmatprep.subr.bf16.mxu0 %v2302_v19  ;;  %v2392_v19 = vld [vmem:[%s2536_s19 + $0x39c] ss:$24 sps:$4 sm:$0xff]  }
  0x72   : > { %1363 = vmatpush1.bf16.msra.mxu1 %v2297_v20  ;;  %v2390_v20 = vld [vmem:[%s2536_s19 + $0x398] ss:$24 sps:$4 sm:$0xff]  }
  0x73   : > { %1465 = vmatpush1.bf16.msra.mxu0 %v2300_v21  ;;  %1364 = vmatprep.subr.bf16.mxu1 %v2305_v22  ;;  %v2393_v21 = vld [vmem:[%s2536_s19 + $0x3c8] ss:$24 sps:$4 sm:$0xff]   ;;  %v2398_v22 = vld [vmem:[%s2536_s19 + $0x3fc] ss:$24 sps:$4 sm:$0xff]  }
  0x74   : > { %1466 = vmatprep.subr.bf16.mxu0 %v2308_v23  ;;  %v2401_v23 = vld [vmem:[%s2536_s19 + $0x42c] ss:$24 sps:$4 sm:$0xff]  }
  0x76   : > { %1365 = vmatpush1.bf16.msra.mxu1 %v2303_v24  ;;  %v2399_v24 = vld [vmem:[%s2536_s19 + $0x428] ss:$24 sps:$4 sm:$0xff]  }
  0x77   : > { %1467 = vmatpush1.bf16.msra.mxu0 %v2306_v25  ;;  %1366 = vmatprep.subr.bf16.mxu1 %v2311_v26  ;;  %v2404_v25 = vld [vmem:[%s2536_s19 + $0x45c] ss:$24 sps:$4 sm:$0xff]   ;;  %v2402_v26 = vld [vmem:[%s2536_s19 + $0x458] ss:$24 sps:$4 sm:$0xff]  }
  0x78   : > { %1468 = vmatprep.subr.bf16.mxu0 %v2314_v27 }
  0x7a   : > { %1367 = vmatpush1.bf16.msra.mxu1 %v2309_v28 }
  0x7b   : > { %1469 = vmatpush1.bf16.msra.mxu0 %v2312_v29  ;;  %1368 = vmatprep.subr.bf16.mxu1 %v2317_v30 }
  0x7c   : > { %1470 = vmatprep.subr.bf16.mxu0 %v2320_v31  ;;  %v376_v31 = vld [vmem:[#allocation2] sm:$0xff] }
  0x7e   : > { %1369 = vmatpush1.bf16.msra.mxu1 %v2315_v32 }
  0x7f   : > { %1471 = vmatpush1.bf16.msra.mxu0 %v2318_v33  ;;  %1370 = vmatprep.subr.bf16.mxu1 %v2323_v34  ;;  %v377_v34 = vld [vmem:[#allocation2 + $0x8] sm:$0xff] }
  0x80   : > { %1472 = vmatprep.subr.bf16.mxu0 %v2326_v35 }
  0x82   : > { %1371 = vmatpush1.bf16.msra.mxu1 %v2321_v36 }
  0x83   : > { %1473 = vmatpush1.bf16.msra.mxu0 %v2324_v37  ;;  %1372 = vmatprep.subr.bf16.mxu1 %v2329_v38  ;;  %v382_v37 = vld [vmem:[#allocation2 + $0x30] sm:$0xff] }
  0x84   : > { %1474 = vmatprep.subr.bf16.mxu0 %v2332_v39 }
  0x86   : > { %1373 = vmatpush1.bf16.msra.mxu1 %v2327_v41 }
  0x87   : > { %1475 = vmatpush1.bf16.msra.mxu0 %v2330_v42  ;;  %1374 = vmatprep.subr.bf16.mxu1 %v2335_v43  ;;  %v383_v42 = vld [vmem:[#allocation2 + $0x38] sm:$0xff] }
  0x88   : > { %1487 = vmatprep.subr.bf16.mxu0 %v2338_v44 }
  0x8a   : > { %1477 = vmatmul.mubr.bf16.vlgmr.msra.gmra.mrb[4].mxu0 %v2614_v11  ;;  %1375 = vmatpush1.bf16.msra.mxu1 %v2333_v45 }
  0x8b   : > { %1488 = vmatpush1.bf16.msra.mxu0 %v2336_v46  ;;  %1376 = vmatprep.subr.bf16.mxu1 %v2341_v47  ;;  %v380_v47 = vld [vmem:[#allocation2 + $0x20] sm:$0xff] }
  0x8c   : > { %1489 = vmatprep.subr.bf16.mxu0 %v2344_v48  ;;  %1519 = vmatprep.mubr.bf16.mxu0 %v2450_v7  ;;  %v381_v48 = vld [vmem:[#allocation2 + $0x28] sm:$0xff] }
  0x8e   : > { %1377 = vmatpush1.bf16.msra.mxu1 %v2339_v49 }
  0x8f   : > { %1490 = vmatpush1.bf16.msra.mxu0 %v2342_v50  ;;  %1378 = vmatprep.subr.bf16.mxu1 %v2347_v51  ;;  %v386_v50 = vld [vmem:[#allocation2 + $0x50] sm:$0xff] }
  0x90   : > { %1491 = vmatprep.subr.bf16.mxu0 %v2350_v52 }
  0x92   : > { %1379 = vmatpush1.bf16.msra.mxu1 %v2345_v53  ;;  %v387_v53 = vld [vmem:[#allocation2 + $0x58] sm:$0xff] }
  0x93   : > { %1492 = vmatpush1.bf16.msra.mxu0 %v2348_v54  ;;  %1380 = vmatprep.subr.bf16.mxu1 %v2353_v55 }
  0x94   : > { %1493 = vmatprep.subr.bf16.mxu0 %v2356_v56 }
  0x96   : > { %1381 = vmatpush1.bf16.msra.mxu1 %v2351_v57 }
  0x97   : > { %1494 = vmatpush1.bf16.msra.mxu0 %v2354_v58  ;;  %1382 = vmatprep.subr.bf16.mxu1 %v2359_v59  ;;  %v378_v59 = vld [vmem:[#allocation2 + $0x10] sm:$0xff] }
  0x98   : > { %1495 = vmatprep.subr.bf16.mxu0 %v2362_v60  ;;  %v379_v60 = vld [vmem:[#allocation2 + $0x18] sm:$0xff] }
  0x9a   : > { %1383 = vmatpush1.bf16.msra.mxu1 %v2357_v61 }
  0x9b   : > { %1496 = vmatpush1.bf16.msra.mxu0 %v2360_v62  ;;  %1384 = vmatprep.subr.bf16.mxu1 %v2365_v63  ;;  %v384_v62 = vld [vmem:[#allocation2 + $0x40] sm:$0xff] }
  0x9c   : > { %1497 = vmatprep.subr.bf16.mxu0 %v2368_v0 }
  0x9e   : > { %1385 = vmatpush1.bf16.msra.mxu1 %v2363_v1  ;;  %v385_v1 = vld [vmem:[#allocation2 + $0x48] sm:$0xff] }
  0x9f   : > { %1498 = vmatpush1.bf16.msra.mxu0 %v2366_v2  ;;  %1386 = vmatprep.subr.bf16.mxu1 %v2371_v3 }
  0xa0   : > { %1499 = vmatprep.subr.bf16.mxu0 %v2374_v4 }
  0xa2   : > { %1387 = vmatpush1.bf16.msra.mxu1 %v2369_v5 }
  0xa3   : > { %1500 = vmatpush1.bf16.msra.mxu0 %v2372_v6  ;;  %1388 = vmatprep.subr.bf16.mxu1 %v2377_v8  ;;  %v1572_v8 = vlaneseq (!%p2110_p11) }
  0xa4   : > { %1501 = vmatprep.subr.bf16.mxu0 %v2380_v9 }
  0xa5   : > { %v1573_v9 = vshrl.u32 (!%p2110_p11), %v1572_v8, 7 }
  0xa6   : > { %1389 = vmatpush1.bf16.msra.mxu1 %v2375_v10  ;;  %v1614_v10 = vld [vmem:[%s2820_s3] sm:$0xff] (!%p2110_p11) }
  0xa7   : > { %1502 = vmatpush1.bf16.msra.mxu0 %v2378_v12  ;;  %1401 = vmatprep.subr.bf16.mxu1 %v2383_v13  ;;  %v1615_v12 = vld [vmem:[%s2820_s3 + $0x8] sm:$0xff] (!%p2110_p11)  ;;  %v1570_v13 = vld [vmem:[%s2819_s2] sm:$0x3f] (!%p2110_p11) }
  0xa9   : > { %1391 = vmatmul.mubr.bf16.vlgmr.msra.gmra.mrb[4].mxu1 %v2614_v11  ;;  %v2395_v11 = vld [vmem:[%s2536_s19 + $0x3cc] ss:$24 sps:$4 sm:$0xff]  }
  0xaa   : > { %1520 = vmatmul.mubr.bf16.vlgmr.msra.gmra.mrb[4].mxu0 %v2577_v40  ;;  %1402 = vmatpush1.bf16.msra.mxu1 %v2381_v14  ;;  %v1620_v14 = vunpack.c.l.bf16 (!%p2110_p11), %v1614_v10 }
  0xab   : > { %1433 = vmatprep.mubr.bf16.mxu1 %v2450_v7  ;;  %1403 = vmatprep.subr.bf16.mxu1 %v2386_v15  ;;  %v2396_v7 = vld [vmem:[%s2536_s19 + $0x3f8] ss:$24 sps:$4 sm:$0xff]  }
  0xae   : > { %1404 = vmatpush1.bf16.msra.mxu1 %v2384_v16  ;;  %v2711_v16 = vsub.s32 (!%p2110_p11), 0, %v1573_v9 }
  0xaf   : > { %1405 = vmatprep.subr.bf16.mxu1 %v2389_v17  ;;  %v2713_v17 = vsub.s32 (!%p2110_p11), 1, %v1573_v9 }
  0xb2   : > { %1406 = vmatpush1.bf16.msra.mxu1 %v2387_v18  ;;  %v2715_v18 = vsub.s32 (!%p2110_p11), 2, %v1573_v9 }
  0xb3   : > { %1407 = vmatprep.subr.bf16.mxu1 %v2392_v19  ;;  %v2717_v19 = vsub.s32 (!%p2110_p11), 3, %v1573_v9 }
  0xb6   : > { %1408 = vmatpush1.bf16.msra.mxu1 %v2390_v20 }
  0xb7   : > { %1409 = vmatprep.subr.bf16.mxu1 %v2395_v11 }
  0xba   : > { %1410 = vmatpush1.bf16.msra.mxu1 %v2393_v21 }
  0xbb   : > { %1411 = vmatprep.subr.bf16.mxu1 %v2398_v22  ;;  %v2719_v22 = vsub.s32 (!%p2110_p11), 4, %v1573_v9 }
  0xbe   : > { %1412 = vmatpush1.bf16.msra.mxu1 %v2396_v7  ;;  %v2721_v7 = vsub.s32 (!%p2110_p11), 5, %v1573_v9 }
  0xbf   : > { %1413 = vmatprep.subr.bf16.mxu1 %v2401_v23  ;;  %v1621_v23 = vunpack.c.h.bf16 (!%p2110_p11), %v1614_v10 }
  0xc2   : > { %1414 = vmatpush1.bf16.msra.mxu1 %v2399_v24  ;;  %v1622_v24 = vunpack.c.l.bf16 (!%p2110_p11), %v1615_v12 }
  0xc3   : > { %1415 = vmatprep.subr.bf16.mxu1 %v2404_v25  ;;  %v1575_v25 = vrot.slane (!%p2110_p11), %v1570_v13, %v2711_v16 }
  0xc6   : > { %1416 = vmatpush1.bf16.msra.mxu1 %v2402_v26  ;;  %v1579_v26 = vrot.slane (!%p2110_p11), %v1570_v13, %v2713_v17 }
  0xc9   : > { %1434 = vmatmul.mubr.bf16.vlgmr.msra.gmra.mrb[4].mxu1 %v2577_v40 }
 0x11d   : > { %v1349_v27 = vpop.f32.mrb[0].mxu0 }
 0x11e   : > { %v1351_v28 = vpop.f32.mrb[1].mxu0 }
 0x11f   : > { %v1353_v29 = vpop.f32.mrb[2].mxu0 }
 0x120   : > { %v1355_v30 = vpop.f32.mrb[3].mxu0 }
 0x13c   : > { %v1306_v32 = vpop.f32.mrb[0].mxu1 }
 0x13d   : > { %v1350_v33 = vadd.f32 %v1349_v27, %v1306_v32  ;;  %v1308_v35 = vpop.f32.mrb[1].mxu1  ;;  %v1583_v27 = vrot.slane (!%p2110_p11), %v1570_v13, %v2715_v18  ;;  %v1595_v32 = vrot.slane (!%p2110_p11), %v1570_v13, %v2721_v7 }
 0x13e   : > { %v1352_v36 = vadd.f32 %v1351_v28, %v1308_v35  ;;  %v1310_v38 = vpop.f32.mrb[2].mxu1  ;;  %v1587_v28 = vrot.slane (!%p2110_p11), %v1570_v13, %v2717_v19 }
 0x13f   : > { %v1530_v39 = vadd.f32 %v1350_v33, %v376_v31  ;;  %v1354_v41 = vadd.f32 %v1353_v29, %v1310_v38  ;;  %v1312_v43 = vpop.f32.mrb[3].mxu1  ;;  %v1616_v29 = vld [vmem:[%s2820_s3 + $0x10] sm:$0xff] (!%p2110_p11)  ;;  %v1591_v31 = vrot.slane (!%p2110_p11), %v1570_v13, %v2719_v22  ;;  %v1623_v33 = vunpack.c.h.bf16 (!%p2110_p11), %v1615_v12 }
 0x140   : > { %v1531_v44 = vadd.f32 %v1352_v36, %v377_v34  ;;  %v1356_v45 = vadd.f32 %v1355_v30, %v1312_v43 }
 0x141   : > { %1542 = vst [vmem:[#allocation2] sm:$0xff] %v1530_v39  ;;  %v1536_v40 = vadd.f32 %v1354_v41, %v382_v37  ;;  %v1624_v39 = vunpack.c.l.bf16 (!%p2110_p11), %v1616_v29 }
 0x142   : > { %1543 = vst [vmem:[#allocation2 + $0x8] sm:$0xff] %v1531_v44  ;;  %v1537_v46 = vadd.f32 %v1356_v45, %v383_v42 }
 0x143   : > { %1548 = vst [vmem:[#allocation2 + $0x30] sm:$0xff] %v1536_v40 }
 0x144   : > { %1549 = vst [vmem:[#allocation2 + $0x38] sm:$0xff] %v1537_v46 }
 0x148   : > { %v1558_v15 = vld [vmem:[#allocation2] sm:$0xff] (!%p2110_p11) }
 0x149   : > { %v1559_v20 = vld [vmem:[#allocation2 + $0x8] sm:$0xff] (!%p2110_p11)  ;;  %v1602_v34 = vadd.f32 (!%p2110_p11), %v1575_v25, %v1558_v15 }
 0x14a   : > { %v1603_v35 = vadd.f32 (!%p2110_p11), %v1579_v26, %v1559_v20  ;;  %v1564_v45 = vld [vmem:[#allocation2 + $0x30] sm:$0xff] (!%p2110_p11) }
 0x14b   : > { %v1632_v42 = vadd.f32 (!%p2110_p11), %v1620_v14, %v1602_v34  ;;  %v1565_v40 = vld [vmem:[#allocation2 + $0x38] sm:$0xff] (!%p2110_p11) }
 0x14c   : > { %v1633_v43 = vadd.f32 (!%p2110_p11), %v1621_v23, %v1603_v35 }
 0x17d   : > { %v1521_v49 = vpop.f32.mrb[4].mxu0 }
 0x17e   : > { %v1534_v51 = vadd.f32 %v1521_v49, %v380_v47  ;;  %v1523_v52 = vpop.f32.mrb[5].mxu0 }
 0x17f   : > { %v1535_v54 = vadd.f32 %v1523_v52, %v381_v48  ;;  %v1525_v55 = vpop.f32.mrb[6].mxu0  ;;  %v1625_v48 = vunpack.c.h.bf16 (!%p2110_p11), %v1616_v29  ;;  %v1617_v52 = vld [vmem:[%s2820_s3 + $0x18] sm:$0xff] (!%p2110_p11) }
 0x180   : > { %1546 = vst [vmem:[#allocation2 + $0x20] sm:$0xff] %v1534_v51  ;;  %v1540_v56 = vadd.f32 %v1525_v55, %v386_v50  ;;  %v1527_v57 = vpop.f32.mrb[7].mxu0  ;;  %v1644_v50 = vadd.f32 (!%p2110_p11), %v1633_v43, %v1632_v42 }
 0x181   : > { %1547 = vst [vmem:[#allocation2 + $0x28] sm:$0xff] %v1535_v54  ;;  %v1541_v58 = vadd.f32 %v1527_v57, %v387_v53  ;;  %v1608_v53 = vadd.f32 (!%p2110_p11), %v1575_v25, %v1564_v45  ;;  %v1618_v54 = vld [vmem:[%s2820_s3 + $0x20] sm:$0xff] (!%p2110_p11) }
 0x182   : > { %1552 = vst [vmem:[#allocation2 + $0x50] sm:$0xff] %v1540_v56 }
 0x183   : > { %1553 = vst [vmem:[#allocation2 + $0x58] sm:$0xff] %v1541_v58  ;;  %v1609_v58 = vadd.f32 (!%p2110_p11), %v1579_v26, %v1565_v40 }
 0x187   : > { %v1562_v30 = vld [vmem:[#allocation2 + $0x20] sm:$0xff] (!%p2110_p11) }
 0x188   : > { %v1563_v38 = vld [vmem:[#allocation2 + $0x28] sm:$0xff] (!%p2110_p11)  ;;  %v1606_v41 = vadd.f32 (!%p2110_p11), %v1591_v31, %v1562_v30 }
 0x189   : > { %v1607_v47 = vadd.f32 (!%p2110_p11), %v1595_v32, %v1563_v38  ;;  %v1568_v57 = vld [vmem:[#allocation2 + $0x50] sm:$0xff] (!%p2110_p11) }
 0x18a   : > { %v1636_v55 = vadd.f32 (!%p2110_p11), %v1624_v39, %v1606_v41 }
 0x19c   : > { %v1435_v61 = vpop.f32.mrb[4].mxu1  ;;  %1557 = sbr.rel (%p2110_p11) target bundleno = 766 (0x2fe), region = 78 }
 0x19d   : > { %v1532_v63 = vadd.f32 %v1435_v61, %v378_v59  ;;  %v1437_v0 = vpop.f32.mrb[5].mxu1 }
 0x19e   : > { %v1533_v2 = vadd.f32 %v1437_v0, %v379_v60  ;;  %v1439_v3 = vpop.f32.mrb[6].mxu1  ;;  %v1619_v60 = vld [vmem:[%s2820_s3 + $0x28] sm:$0xff] (!%p2110_p11)  ;;  %v1637_v0 = vadd.f32 (!%p2110_p11), %v1625_v48, %v1607_v47 }
 0x19f   : > { %1544 = vst [vmem:[#allocation2 + $0x10] sm:$0xff] %v1532_v63  ;;  %v1538_v4 = vadd.f32 %v1439_v3, %v384_v62  ;;  %v1441_v5 = vpop.f32.mrb[7].mxu1  ;;  %v1626_v62 = vunpack.c.l.bf16 (!%p2110_p11), %v1617_v52  ;;  %v1627_v63 = vunpack.c.h.bf16 (!%p2110_p11), %v1617_v52  ;;  %v1628_v3 = vunpack.c.l.bf16 (!%p2110_p11), %v1618_v54 }
 0x1a0   : > { %1545 = vst [vmem:[#allocation2 + $0x18] sm:$0xff] %v1533_v2  ;;  %v1539_v6 = vadd.f32 %v1441_v5, %v385_v1  ;;  %v1569_v2 = vld [vmem:[#allocation2 + $0x58] sm:$0xff] (!%p2110_p11)  ;;  %v1612_v5 = vadd.f32 (!%p2110_p11), %v1591_v31, %v1568_v57  ;;  %v1631_v14 = vunpack.c.h.bf16 (!%p2110_p11), %v1619_v60 }
 0x1a1   : > { %1550 = vst [vmem:[#allocation2 + $0x40] sm:$0xff] %v1538_v4  ;;  %v1629_v4 = vunpack.c.h.bf16 (!%p2110_p11), %v1618_v54  ;;  %v1638_v8 = vadd.f32 (!%p2110_p11), %v1626_v62, %v1608_v53  ;;  %v1639_v9 = vadd.f32 (!%p2110_p11), %v1627_v63, %v1609_v58  ;;  %v1613_v13 = vadd.f32 (!%p2110_p11), %v1595_v32, %v1569_v2 }
 0x1a2   : > { %1551 = vst [vmem:[#allocation2 + $0x48] sm:$0xff] %v1539_v6  ;;  %v1630_v6 = vunpack.c.l.bf16 (!%p2110_p11), %v1619_v60 }
 0x1a3   : > { %v1651_v20 = vadd.f32 %v1639_v9, %v1638_v8 }
 0x1a6   : > { %v1560_v11 = vld [vmem:[#allocation2 + $0x10] sm:$0xff] }
 0x1a7   : > { %v1561_v21 = vld [vmem:[#allocation2 + $0x18] sm:$0xff]  ;;  %v1604_v36 = vadd.f32 %v1583_v27, %v1560_v11 }
 0x1a8   : > { %v1605_v37 = vadd.f32 %v1587_v28, %v1561_v21  ;;  %v1566_v46 = vld [vmem:[#allocation2 + $0x40] sm:$0xff]  ;;  %v1642_v21 = vadd.f32 %v1630_v6, %v1612_v5 }
 0x1a9   : > { %v1634_v44 = vadd.f32 %v1622_v24, %v1604_v36  ;;  %v1567_v51 = vld [vmem:[#allocation2 + $0x48] sm:$0xff]  ;;  %v1610_v59 = vadd.f32 %v1583_v27, %v1566_v46  ;;  %v1643_v24 = vadd.f32 %v1631_v14, %v1613_v13 }
 0x1aa   : > { %v1635_v49 = vadd.f32 %v1623_v33, %v1605_v37  ;;  %v1611_v61 = vadd.f32 %v1587_v28, %v1567_v51 }
 0x1ab   : > { %v1645_v56 = vadd.f32 %v1644_v50, %v1634_v44  ;;  %v1640_v12 = vadd.f32 %v1628_v3, %v1610_v59 }
 0x1ac   : > { %v1641_v15 = vadd.f32 %v1629_v4, %v1611_v61 }
 0x1ad   : > { %v1646_v1 = vadd.f32 %v1645_v56, %v1635_v49  ;;  %v1652_v23 = vadd.f32 %v1651_v20, %v1640_v12 }
 0x1af   : > { %v1647_v10 = vadd.f32 %v1646_v1, %v1636_v55  ;;  %v1653_v25 = vadd.f32 %v1652_v23, %v1641_v15 }
 0x1b1   : > { %v1648_v11 = vadd.f32 %v1647_v10, %v1637_v0  ;;  %v1654_v26 = vadd.f32 %v1653_v25, %v1642_v21  ;;  %v1761_v10 = vld [vmem:[%s2822_s5] sm:$0x3f] }
 0x1b2   : > { %v1766_v23 = vrot.slane %v1761_v10, %v2711_v16  ;;  %v1774_v25 = vrot.slane %v1761_v10, %v2715_v18 }
 0x1b3   : > { %1649 = vadd.xlane.f32.xlu0 %v1648_v11  ;;  %v1655_v27 = vadd.f32 %v1654_v26, %v1643_v24  ;;  %v1778_v26 = vrot.slane %v1761_v10, %v2717_v19 }
 0x1b7   : > { %1656 = vadd.xlane.f32.xlu0 %v1655_v27 }
 0x240   : > { %v1650_v28 = vpop.xlane.xlu0 %1649 }
 0x241   : > { %v1659_v29 = vmul.f32 0.0013020834, %v1650_v28 }
 0x243   : > { %v1661_v30 = vsub.f32 %v1632_v42, %v1659_v29  ;;  %v1662_v31 = vsub.f32 %v1633_v43, %v1659_v29  ;;  %v1663_v33 = vsub.f32 %v1634_v44, %v1659_v29  ;;  %v1664_v34 = vsub.f32 %v1635_v49, %v1659_v29 }
 0x244   : > { %v1657_v36 = vpop.xlane.xlu0 %1656  ;;  %v1665_v37 = vsub.f32 %v1636_v55, %v1659_v29  ;;  %v1666_v45 = vsub.f32 %v1637_v0, %v1659_v29 }
 0x245   : > { %v1673_v35 = vmul.f32 %v1661_v30, %v1661_v30  ;;  %v1674_v32 = vmul.f32 %v1662_v31, %v1662_v31  ;;  %v1675_v38 = vmul.f32 %v1663_v33, %v1663_v33  ;;  %v1660_v41 = vmul.f32 0.0013020834, %v1657_v36 }
 0x246   : > { %v1676_v40 = vmul.f32 %v1664_v34, %v1664_v34  ;;  %v1677_v42 = vmul.f32 %v1665_v37, %v1665_v37  ;;  %v1678_v52 = vmul.f32 %v1666_v45, %v1666_v45  ;;  %v1786_v36 = vrot.slane %v1761_v10, %v2721_v7 }
 0x247   : > { %v1685_v39 = vadd.f32 %v1674_v32, %v1673_v35  ;;  %v2741_v47 = vsub.f32 %v1638_v8, %v1660_v41  ;;  %v2743_v48 = vsub.f32 %v1639_v9, %v1660_v41  ;;  %v2745_v50 = vsub.f32 %v1640_v12, %v1660_v41  ;;  %v1717_v8 = vld [vmem:[%s2821_s4] sm:$0x3f] }
 0x248   : > { %v2747_v44 = vsub.f32 %v1641_v15, %v1660_v41  ;;  %v2753_v54 = vsub.f32 %v1642_v21, %v1660_v41  ;;  %v1672_v58 = vsub.f32 %v1643_v24, %v1660_v41  ;;  %v1722_v12 = vrot.slane %v1717_v8, %v2711_v16 }
 0x249   : > { %v1686_v46 = vadd.f32 %v1685_v39, %v1675_v38  ;;  %v1679_v49 = vmul.f32 %v2741_v47, %v2741_v47  ;;  %v1680_v51 = vmul.f32 %v2743_v48, %v2743_v48  ;;  %v1681_v55 = vmul.f32 %v2745_v50, %v2745_v50 }
 0x24a   : > { %v1682_v59 = vmul.f32 %v2747_v44, %v2747_v44  ;;  %v1683_v61 = vmul.f32 %v2753_v54, %v2753_v54  ;;  %v1684_v63 = vmul.f32 %v1672_v58, %v1672_v58  ;;  %v1726_v13 = vrot.slane %v1717_v8, %v2713_v17 }
 0x24b   : > { %v1687_v43 = vadd.f32 %v1686_v46, %v1676_v40  ;;  %v1692_v56 = vadd.f32 %v1680_v51, %v1679_v49  ;;  %v1730_v14 = vrot.slane %v1717_v8, %v2715_v18  ;;  %v1734_v15 = vrot.slane %v1717_v8, %v2717_v19 }
 0x24c   : > { %v1738_v20 = vrot.slane %v1717_v8, %v2719_v22  ;;  %v1742_v11 = vrot.slane %v1717_v8, %v2721_v7  ;;  %v1770_v24 = vrot.slane %v1761_v10, %v2713_v17  ;;  %v1782_v32 = vrot.slane %v1761_v10, %v2719_v22 }
 0x24d   : > { %v1688_v53 = vadd.f32 %v1687_v43, %v1677_v42  ;;  %v1693_v60 = vadd.f32 %v1692_v56, %v1681_v55 }
 0x24f   : > { %v1689_v57 = vadd.f32 %v1688_v53, %v1678_v52  ;;  %v1694_v62 = vadd.f32 %v1693_v60, %v1682_v59 }
 0x251   : > { %1690 = vadd.xlane.f32.xlu1 %v1689_v57  ;;  %v1695_v0 = vadd.f32 %v1694_v62, %v1683_v61 }
 0x253   : > { %v1696_v1 = vadd.f32 %v1695_v0, %v1684_v63 }
 0x255   : > { %1697 = vadd.xlane.f32.xlu1 %v1696_v1 }
 0x2de   : > { %v1691_v2 = vpop.xlane.xlu1 %1690 }
 0x2df   : > { %v1699_v3 = vmul.f32 0.0013020834, %v1691_v2 }
 0x2e1   : > { %v1701_v4 = vadd.f32 1e-12, %v1699_v3 }
 0x2e2   : > { %v1698_v5 = vpop.xlane.xlu1 %1697 }
 0x2e3   : > { %2405 = vrsqrt.f32 %v1701_v4  ;;  %v1700_v6 = vmul.f32 0.0013020834, %v1698_v5 }
 0x2e5   : > { %v1702_v9 = vadd.f32 1e-12, %v1700_v6 }
 0x2e7   : > { %2407 = vrsqrt.f32 %v1702_v9 }
 0x2ed   : > { %v2406_v21 = vpop.eup %2405 }
 0x2ee   : > { %v1705_v27 = vmul.f32 %v2406_v21, %v1661_v30  ;;  %v1706_v28 = vmul.f32 %v2406_v21, %v1662_v31  ;;  %v1707_v29 = vmul.f32 %v2406_v21, %v1663_v33  ;;  %v1708_v35 = vmul.f32 %v2406_v21, %v1664_v34 }
 0x2ef   : > { %v1709_v38 = vmul.f32 %v2406_v21, %v1665_v37  ;;  %v1710_v39 = vmul.f32 %v2406_v21, %v1666_v45 }
 0x2f0   : > { %v1749_v41 = vmul.f32 %v1722_v12, %v1705_v27  ;;  %v1750_v40 = vmul.f32 %v1726_v13, %v1706_v28  ;;  %v1751_v46 = vmul.f32 %v1730_v14, %v1707_v29  ;;  %v1752_v16 = vmul.f32 %v1734_v15, %v1708_v35 }
 0x2f1   : > { %v1753_v42 = vmul.f32 %v1738_v20, %v1709_v38  ;;  %v1754_v17 = vmul.f32 %v1742_v11, %v1710_v39  ;;  %v2408_v33 = vpop.eup %2407 }
 0x2f2   : > { %v1793_v43 = vadd.f32 %v1766_v23, %v1749_v41  ;;  %v1794_v18 = vadd.f32 %v1770_v24, %v1750_v40  ;;  %v1795_v49 = vadd.f32 %v1774_v25, %v1751_v46  ;;  %v1796_v19 = vadd.f32 %v1778_v26, %v1752_v16 }
 0x2f3   : > { %v1797_v30 = vadd.f32 %v1782_v32, %v1753_v42  ;;  %v1798_v31 = vadd.f32 %v1786_v36, %v1754_v17  ;;  %v1711_v7 = vmul.f32 %v2408_v33, %v2741_v47  ;;  %v1712_v37 = vmul.f32 %v2408_v33, %v2743_v48 }
 0x2f4   : > { %v2122_v34 = vpack.c.bf16 %v1794_v18, %v1793_v43  ;;  %v2123_v51 = vpack.c.bf16 %v1796_v19, %v1795_v49  ;;  %v1713_v45 = vmul.f32 %v2408_v33, %v2745_v50  ;;  %v1714_v52 = vmul.f32 %v2408_v33, %v2747_v44 }
 0x2f5   : > { %v2124_v22 = vpack.c.bf16 %v1798_v31, %v1797_v30  ;;  %v1715_v53 = vmul.f32 %v2408_v33, %v2753_v54  ;;  %v1716_v55 = vmul.f32 %v2408_v33, %v1672_v58  ;;  %v1755_v47 = vmul.f32 %v1722_v12, %v1711_v7 }
 0x2f6   : > { %1841 = vst [vmem:[%s2823_s6] sm:$0xff] %v2122_v34  ;;  %1842 = vst [vmem:[%s2823_s6 + $0x8] sm:$0xff] %v2123_v51  ;;  %v1756_v48 = vmul.f32 %v1726_v13, %v1712_v37  ;;  %v1757_v50 = vmul.f32 %v1730_v14, %v1713_v45  ;;  %v1758_v56 = vmul.f32 %v1734_v15, %v1714_v52 }
 0x2f7   : > { %1843 = vst [vmem:[%s2823_s6 + $0x10] sm:$0xff] %v2124_v22  ;;  %v1759_v57 = vmul.f32 %v1738_v20, %v1715_v53  ;;  %v1760_v59 = vmul.f32 %v1742_v11, %v1716_v55  ;;  %v1799_v60 = vadd.f32 %v1766_v23, %v1755_v47 }
 0x2f8   : > { %v1800_v61 = vadd.f32 %v1770_v24, %v1756_v48  ;;  %v1801_v62 = vadd.f32 %v1774_v25, %v1757_v50  ;;  %v1802_v63 = vadd.f32 %v1778_v26, %v1758_v56 }
 0x2f9   : > { %v1803_v0 = vadd.f32 %v1782_v32, %v1759_v57  ;;  %v1804_v1 = vadd.f32 %v1786_v36, %v1760_v59 }
 0x2fa   : > { %v2125_v44 = vpack.c.bf16 %v1800_v61, %v1799_v60  ;;  %v2126_v2 = vpack.c.bf16 %v1802_v63, %v1801_v62 }
 0x2fb   : > { %v2127_v54 = vpack.c.bf16 %v1804_v1, %v1803_v0 }
 0x2fc   : > { %1844 = vst [vmem:[%s2823_s6 + $0x18] sm:$0xff] %v2125_v44  ;;  %1845 = vst [vmem:[%s2823_s6 + $0x20] sm:$0xff] %v2126_v2 }
 0x2fd   : > { %1846 = vst [vmem:[%s2823_s6 + $0x28] sm:$0xff] %v2127_v54 }
 0x2fe PF: > { %s16_s25 = sadd.s32 1, %s2447_s25   ;;  %s2824_s21 = smov %s2435_s22 }
 0x2ff   : > { %p13_p12 = scmp.ge.s32.totalorder %s16_s25, 4   ;;  %s2825_s22 = smov %s2521_s29 }
 0x300   : > { %s2826_s23 = smov %s2443_s24  ;;  %s2827_s24 = smov %s2829_s26 }
 0x301   :  { %15 = sbr.rel (!%p13_p12) target bundleno = 3 (0x3), region = 125 }

// kernel: multitask_forward.15
= control target key start
LH: loop header
LB: loop body
LE: loop exit
PB: predicated region body
PF: predicated region fallthrough
CT: control target
= control target key end

     0   :  { %s2883_s21 = smov 0   ;;  %s2885_s22 = smov 0   ;;  %s3265_s0 = inlined_call_operand.vmem [shape: bf16[16,3072], index: 0, kind: input, shape index: {}]   ;;  %s3266_s1 = inlined_call_operand.vmem [shape: bf16[3072,768], index: 1, kind: input, shape index: {}]   ;;  %s3267_s2 = inlined_call_operand.vmem [shape: f32[1,768], index: 2, kind: input, shape index: {}]   ;;  %s3268_s3 = inlined_call_operand.vmem [shape: bf16[16,768], index: 3, kind: input, shape index: {}]   ;;  %s3269_s4 = inlined_call_operand.vmem [shape: f32[1,768], index: 4, kind: input, shape index: {}]   ;;  %s3270_s5 = inlined_call_operand.vmem [shape: f32[1,768], index: 5, kind: input, shape index: {}]   ;;  %s3271_s6 = inlined_call_operand.vmem [shape: bf16[16,768], index: 6, kind: output, shape index: {}]  }
   0x1   :  { %s2887_s23 = smov 0   ;;  %s2889_s24 = smov 0  }
   0x2   :  { %s2891_s25 = smov 0  }
   0x3 LB: > { %s25_s26 = sadd.s32 1, %s2841_s24  ;;  %p44_p1 = scmp.ne.s32.totalorder %s2833_s22, %s2829_s21  ;;  %s2845_s25 = sphi %s2891_s25, %s16_s25   ;;  %s2841_s24 = sphi %s2889_s24, %s3275_s24   ;;  %s2837_s23 = sphi %s2887_s23, %s3274_s23   ;;  %s2833_s22 = sphi %s2885_s22, %s3273_s22   ;;  %s2829_s21 = sphi %s2883_s21, %s3272_s21  }
   0x4   : > { %p26_p0 = scmp.ge.s32.totalorder %s25_s26, 6  ;;  %p45_p2 = scmp.eq.s32.totalorder %s2845_s25, 0 }
   0x5   : > { %s37_s28 = sadd.s32 1, %s2833_s22  ;;  %p2232_p5 = scmp.ge.s32.totalorder %s2845_s25, 6 }
   0x6   : > { %s3277_s26 = smov (%p26_p0, %s25_s26), 0  ;;  %p46_p3 = por %p45_p2, %p44_p1 }
   0x7   : > { %s33_s27 = ssub.s32 %s2841_s24, %s3277_s26  ;;  %230 = sbr.rel (%p2232_p5) target bundleno = 21 (0x15), region = 32 }
   0x8   : > { %p35_p4 = scmp.eq.s32.totalorder %s33_s27, 0 }
   0xa   : > { %s2918_s29 = scalar_select %p35_p4, %s2833_s22, %s37_s28  }
   0xe   : > { %233 = sbr.rel (!%p46_p3) target bundleno = 21 (0x15), region = 36  ;;  %s235_s30 = sand.u32 (%p46_p3), 1, %s2833_s22  }
   0xf   : > { %s2448_s7 = sshll.u32 (%p46_p3), %s2841_s24, 4  ;;  %s2233_s8 = sshll.u32 (%p46_p3), %s235_s30, 5 }
  0x10   : > { %s243_s11 = scalar_lea.vmem (%p46_p3), %s3265_s0, %s2448_s7  ;;  %s237_s12 = scalar_lea.vmem (%p46_p3), [#allocation3], %s2233_s8 }
  0x11   : > { %v256_v0 = vld [vmem:[%s243_s11] sm:$0xff] (%p46_p3)  ;;  %v258_v1 = vld [vmem:[%s243_s11 + $0x8] sm:$0xff] (%p46_p3) }
  0x12   : > { %v260_v2 = vld [vmem:[%s243_s11 + $0x60] sm:$0xff] (%p46_p3)  ;;  %257 = vst [vmem:[%s237_s12] sm:$0xff] (%p46_p3), %v256_v0  ;;  %259 = vst [vmem:[%s237_s12 + $0x8] sm:$0xff] (%p46_p3), %v258_v1  ;;  %v262_v3 = vld [vmem:[%s243_s11 + $0x68] sm:$0xff] (%p46_p3) }
  0x13   : > { %261 = vst [vmem:[%s237_s12 + $0x10] sm:$0xff] (%p46_p3), %v260_v2  ;;  %263 = vst [vmem:[%s237_s12 + $0x18] sm:$0xff] (%p46_p3), %v262_v3 }
  0x15 PF: > { %p2236_p6 = scmp.ge.s32.totalorder %s2845_s25, 1  ;;  %p278_p7 = scmp.lt.s32.totalorder %s2845_s25, 7 }
  0x17   : > { %p279_p8 = pnand %p2236_p6, %p278_p7 }
  0x18   : > { %s285_s13 = sand.u32 (!%p279_p8), 1, %s2829_s21   ;;  %s2238_s14 = sshll.u32 (!%p279_p8), %s2837_s23, 6 }
  0x19   : > { %282 = sbr.rel (%p279_p8) target bundleno = 798 (0x31e), region = 63  ;;  %s2237_s15 = sshll.u32 (!%p279_p8), %s285_s13, 5 }
  0x1a   : > { %p330_p9 = scmp.lt.s32.totalorder (!%p279_p8), %s2238_s14, 383  ;;  %s2935_s20 = scalar_lea.vmem (!%p279_p8), [#allocation3], %s2237_s15 }
  0x1b   : > { %p2240_p10 = scmp.ne.s32.totalorder (!%p279_p8), %s2837_s23, 0 }
  0x20   : > { %s3279_s14 = smov (!%p330_p9, %s2238_s14), 383  ;;  %353 = sbr.rel (%p2240_p10) target bundleno = 40 (0x28), region = 71 }
  0x21   : > { %s2467_s16 = smul.u32 24, %s3279_s14  ;;  %v2847_v4 = vmov (!%p2240_p10), 0.0  }
  0x22   : > { %354 = vst [vmem:[#allocation2] sm:$0xff] (!%p2240_p10), %v2847_v4  ;;  %355 = vst [vmem:[#allocation2 + $0x8] sm:$0xff] (!%p2240_p10), %v2847_v4 }
  0x23   : > { %s2933_s19 = scalar_lea.vmem %s3266_s1, %s2467_s16  ;;  %356 = vst [vmem:[#allocation2 + $0x10] sm:$0xff] (!%p2240_p10), %v2847_v4  ;;  %357 = vst [vmem:[#allocation2 + $0x18] sm:$0xff] (!%p2240_p10), %v2847_v4 }
  0x24   : > { %358 = vst [vmem:[#allocation2 + $0x20] sm:$0xff] (!%p2240_p10), %v2847_v4  ;;  %359 = vst [vmem:[#allocation2 + $0x28] sm:$0xff] (!%p2240_p10), %v2847_v4 }
  0x25   : > { %360 = vst [vmem:[#allocation2 + $0x30] sm:$0xff] (!%p2240_p10), %v2847_v4  ;;  %361 = vst [vmem:[#allocation2 + $0x38] sm:$0xff] (!%p2240_p10), %v2847_v4 }
  0x26   : > { %362 = vst [vmem:[#allocation2 + $0x40] sm:$0xff] (!%p2240_p10), %v2847_v4  ;;  %363 = vst [vmem:[#allocation2 + $0x48] sm:$0xff] (!%p2240_p10), %v2847_v4 }
  0x27   : > { %364 = vst [vmem:[#allocation2 + $0x50] sm:$0xff] %v2847_v4  ;;  %365 = vst [vmem:[#allocation2 + $0x58] sm:$0xff] %v2847_v4 }
  0x28 PF: > { %v2509_v5 = vld [vmem:[%s2933_s19 + $0x4] ss:$24 sps:$4 sm:$0xff]   ;;  %v2513_v7 = vld [vmem:[%s2933_s19] ss:$24 sps:$4 sm:$0xff]   ;;  %v2515_v9 = vld [vmem:[%s2933_s19 + $0x34] ss:$24 sps:$4 sm:$0xff]  }
  0x29   : > { %v2511_v6 = vld [vmem:[%s2933_s19 + $0x304] ss:$24 sps:$4 sm:$0xff]   ;;  %1554 = vmatprep.subr.bf16.mxu1 %v2509_v5  ;;  %v2514_v8 = vld [vmem:[%s2933_s19 + $0x300] ss:$24 sps:$4 sm:$0xff]   ;;  %v2517_v10 = vld [vmem:[%s2933_s19 + $0x334] ss:$24 sps:$4 sm:$0xff]  }
  0x2a   : > { %1597 = vmatprep.subr.bf16.mxu0 %v2511_v6  ;;  %1555 = vmatpush1.bf16.msra.mxu1 %v2513_v7  ;;  %v2519_v11 = vld [vmem:[%s2933_s19 + $0x30] ss:$24 sps:$4 sm:$0xff]   ;;  %v2521_v13 = vld [vmem:[%s2933_s19 + $0x64] ss:$24 sps:$4 sm:$0xff]   ;;  %v2525_v15 = vld [vmem:[%s2933_s19 + $0x60] ss:$24 sps:$4 sm:$0xff]  }
  0x2b   : > { %1598 = vmatpush1.bf16.msra.mxu0 %v2514_v8  ;;  %1556 = vmatprep.subr.bf16.mxu1 %v2515_v9  ;;  %v2520_v12 = vld [vmem:[%s2933_s19 + $0x330] ss:$24 sps:$4 sm:$0xff]   ;;  %v2523_v14 = vld [vmem:[%s2933_s19 + $0x364] ss:$24 sps:$4 sm:$0xff]   ;;  %v2526_v16 = vld [vmem:[%s2933_s19 + $0x360] ss:$24 sps:$4 sm:$0xff]  }
  0x2c   : > { %1599 = vmatprep.subr.bf16.mxu0 %v2517_v10  ;;  %v2527_v17 = vld [vmem:[%s2933_s19 + $0x94] ss:$24 sps:$4 sm:$0xff]   ;;  %v2531_v19 = vld [vmem:[%s2933_s19 + $0x90] ss:$24 sps:$4 sm:$0xff]   ;;  %v2533_v21 = vld [vmem:[%s2933_s19 + $0xc4] ss:$24 sps:$4 sm:$0xff]  }
  0x2d   : > { %v2529_v18 = vld [vmem:[%s2933_s19 + $0x394] ss:$24 sps:$4 sm:$0xff]   ;;  %v2532_v20 = vld [vmem:[%s2933_s19 + $0x390] ss:$24 sps:$4 sm:$0xff]   ;;  %v2535_v22 = vld [vmem:[%s2933_s19 + $0x3c4] ss:$24 sps:$4 sm:$0xff]  }
  0x2e   : > { %1557 = vmatpush1.bf16.msra.mxu1 %v2519_v11  ;;  %v2537_v23 = vld [vmem:[%s2933_s19 + $0xc0] ss:$24 sps:$4 sm:$0xff]   ;;  %v2539_v25 = vld [vmem:[%s2933_s19 + $0xf4] ss:$24 sps:$4 sm:$0xff]   ;;  %v2543_v27 = vld [vmem:[%s2933_s19 + $0xf0] ss:$24 sps:$4 sm:$0xff]  }
  0x2f   : > { %1600 = vmatpush1.bf16.msra.mxu0 %v2520_v12  ;;  %1558 = vmatprep.subr.bf16.mxu1 %v2521_v13  ;;  %v2538_v24 = vld [vmem:[%s2933_s19 + $0x3c0] ss:$24 sps:$4 sm:$0xff]   ;;  %v2541_v26 = vld [vmem:[%s2933_s19 + $0x3f4] ss:$24 sps:$4 sm:$0xff]   ;;  %v2544_v28 = vld [vmem:[%s2933_s19 + $0x3f0] ss:$24 sps:$4 sm:$0xff]  }
  0x30   : > { %1601 = vmatprep.subr.bf16.mxu0 %v2523_v14  ;;  %v2545_v29 = vld [vmem:[%s2933_s19 + $0x124] ss:$24 sps:$4 sm:$0xff]   ;;  %v2549_v31 = vld [vmem:[%s2933_s19 + $0x120] ss:$24 sps:$4 sm:$0xff]   ;;  %v2551_v33 = vld [vmem:[%s2933_s19 + $0x154] ss:$24 sps:$4 sm:$0xff]  }
  0x31   : > { %v2547_v30 = vld [vmem:[%s2933_s19 + $0x424] ss:$24 sps:$4 sm:$0xff]   ;;  %v2550_v32 = vld [vmem:[%s2933_s19 + $0x420] ss:$24 sps:$4 sm:$0xff]   ;;  %v2553_v34 = vld [vmem:[%s2933_s19 + $0x454] ss:$24 sps:$4 sm:$0xff]  }
  0x32   : > { %1559 = vmatpush1.bf16.msra.mxu1 %v2525_v15  ;;  %v2555_v35 = vld [vmem:[%s2933_s19 + $0x150] ss:$24 sps:$4 sm:$0xff]   ;;  %v2557_v37 = vld [vmem:[%s2933_s19 + $0x184] ss:$24 sps:$4 sm:$0xff]   ;;  %v2561_v39 = vld [vmem:[%s2933_s19 + $0x180] ss:$24 sps:$4 sm:$0xff]  }
  0x33   : > { %1602 = vmatpush1.bf16.msra.mxu0 %v2526_v16  ;;  %1560 = vmatprep.subr.bf16.mxu1 %v2527_v17  ;;  %v2556_v36 = vld [vmem:[%s2933_s19 + $0x450] ss:$24 sps:$4 sm:$0xff]   ;;  %v2559_v38 = vld [vmem:[%s2933_s19 + $0x484] ss:$24 sps:$4 sm:$0xff]   ;;  %v2562_v40 = vld [vmem:[%s2933_s19 + $0x480] ss:$24 sps:$4 sm:$0xff]  }
  0x34   : > { %1603 = vmatprep.subr.bf16.mxu0 %v2529_v18  ;;  %v2563_v41 = vld [vmem:[%s2933_s19 + $0x1b4] ss:$24 sps:$4 sm:$0xff]   ;;  %v2567_v43 = vld [vmem:[%s2933_s19 + $0x1b0] ss:$24 sps:$4 sm:$0xff]   ;;  %v2569_v45 = vld [vmem:[%s2933_s19 + $0x1e4] ss:$24 sps:$4 sm:$0xff]  }
  0x35   : > { %v2565_v42 = vld [vmem:[%s2933_s19 + $0x4b4] ss:$24 sps:$4 sm:$0xff]   ;;  %v2568_v44 = vld [vmem:[%s2933_s19 + $0x4b0] ss:$24 sps:$4 sm:$0xff]   ;;  %v2571_v46 = vld [vmem:[%s2933_s19 + $0x4e4] ss:$24 sps:$4 sm:$0xff]  }
  0x36   : > { %1561 = vmatpush1.bf16.msra.mxu1 %v2531_v19  ;;  %v2573_v47 = vld [vmem:[%s2933_s19 + $0x1e0] ss:$24 sps:$4 sm:$0xff]   ;;  %v2575_v49 = vld [vmem:[%s2933_s19 + $0x214] ss:$24 sps:$4 sm:$0xff]   ;;  %v2579_v51 = vld [vmem:[%s2933_s19 + $0x210] ss:$24 sps:$4 sm:$0xff]  }
  0x37   : > { %1604 = vmatpush1.bf16.msra.mxu0 %v2532_v20  ;;  %1562 = vmatprep.subr.bf16.mxu1 %v2533_v21  ;;  %v2574_v48 = vld [vmem:[%s2933_s19 + $0x4e0] ss:$24 sps:$4 sm:$0xff]   ;;  %v2577_v50 = vld [vmem:[%s2933_s19 + $0x514] ss:$24 sps:$4 sm:$0xff]   ;;  %v2580_v52 = vld [vmem:[%s2933_s19 + $0x510] ss:$24 sps:$4 sm:$0xff]  }
  0x38   : > { %1605 = vmatprep.subr.bf16.mxu0 %v2535_v22  ;;  %v2605_v53 = vld [vmem:[%s2935_s20 + $0x4] ss:$16 sps:$4 sm:$0xff]   ;;  %v2989_v55 = vld [vmem:[%s2935_s20 + $0xc] ss:$16 sps:$4 sm:$0xff]   ;;  %v2585_v57 = vld [vmem:[%s2933_s19 + $0x240] ss:$24 sps:$4 sm:$0xff]  }
  0x39   : > { %v2581_v54 = vld [vmem:[%s2933_s19 + $0x244] ss:$24 sps:$4 sm:$0xff]   ;;  %1586 = vmatprep.mubr.bf16.mxu1 %v2605_v53  ;;  %1629 = vmatprep.mubr.bf16.mxu0 %v2989_v55  ;;  %v2586_v58 = vld [vmem:[%s2933_s19 + $0x540] ss:$24 sps:$4 sm:$0xff]   ;;  %v2587_v59 = vld [vmem:[%s2933_s19 + $0x274] ss:$24 sps:$4 sm:$0xff]  }
  0x3a   : > { %1563 = vmatpush1.bf16.msra.mxu1 %v2537_v23  ;;  %v2583_v56 = vld [vmem:[%s2933_s19 + $0x544] ss:$24 sps:$4 sm:$0xff]   ;;  %v2589_v60 = vld [vmem:[%s2933_s19 + $0x574] ss:$24 sps:$4 sm:$0xff]   ;;  %v2591_v61 = vld [vmem:[%s2933_s19 + $0x270] ss:$24 sps:$4 sm:$0xff]  }
  0x3b   : > { %1606 = vmatpush1.bf16.msra.mxu0 %v2538_v24  ;;  %1564 = vmatprep.subr.bf16.mxu1 %v2539_v25  ;;  %v2592_v62 = vld [vmem:[%s2933_s19 + $0x570] ss:$24 sps:$4 sm:$0xff]   ;;  %v2593_v63 = vld [vmem:[%s2933_s19 + $0x2a4] ss:$24 sps:$4 sm:$0xff]   ;;  %v2597_v1 = vld [vmem:[%s2933_s19 + $0x2a0] ss:$24 sps:$4 sm:$0xff]  }
  0x3c   : > { %1607 = vmatprep.subr.bf16.mxu0 %v2541_v26  ;;  %v2595_v0 = vld [vmem:[%s2933_s19 + $0x5a4] ss:$24 sps:$4 sm:$0xff]   ;;  %v2598_v2 = vld [vmem:[%s2933_s19 + $0x5a0] ss:$24 sps:$4 sm:$0xff]   ;;  %v2599_v3 = vld [vmem:[%s2933_s19 + $0x2d4] ss:$24 sps:$4 sm:$0xff]  }
  0x3d   : > { %v2601_v4 = vld [vmem:[%s2933_s19 + $0x5d4] ss:$24 sps:$4 sm:$0xff]   ;;  %v2603_v5 = vld [vmem:[%s2933_s19 + $0x2d0] ss:$24 sps:$4 sm:$0xff]   ;;  %v2622_v14 = vld [vmem:[%s2933_s19 + $0x44] ss:$24 sps:$4 sm:$0xff]  }
  0x3e   : > { %1565 = vmatpush1.bf16.msra.mxu1 %v2543_v27  ;;  %v2604_v6 = vld [vmem:[%s2933_s19 + $0x5d0] ss:$24 sps:$4 sm:$0xff]   ;;  %v2613_v7 = vld [vmem:[%s2933_s19 + $0xc] ss:$24 sps:$4 sm:$0xff]   ;;  %v2619_v13 = vld [vmem:[%s2933_s19 + $0x3c] ss:$24 sps:$4 sm:$0xff]  }
  0x3f   : > { %1608 = vmatpush1.bf16.msra.mxu0 %v2544_v28  ;;  %1566 = vmatprep.subr.bf16.mxu1 %v2545_v29  ;;  %v2616_v8 = vld [vmem:[%s2933_s19 + $0x14] ss:$24 sps:$4 sm:$0xff]   ;;  %v3010_v9 = vld [vmem:[%s2935_s20] ss:$16 sps:$4 sm:$0xff]   ;;  %v3013_v10 = vld [vmem:[%s2935_s20 + $0x8] ss:$16 sps:$4 sm:$0xff]  }
  0x40   : > { %1609 = vmatprep.subr.bf16.mxu0 %v2547_v30  ;;  %v2611_v11 = vld [vmem:[%s2933_s19 + $0x8] ss:$24 sps:$4 sm:$0xff]   ;;  %v2617_v15 = vld [vmem:[%s2933_s19 + $0x38] ss:$24 sps:$4 sm:$0xff]   ;;  %v2625_v17 = vld [vmem:[%s2933_s19 + $0x6c] ss:$24 sps:$4 sm:$0xff]  }
  0x41   : > { %v2614_v12 = vld [vmem:[%s2933_s19 + $0x10] ss:$24 sps:$4 sm:$0xff]   ;;  %v2620_v16 = vld [vmem:[%s2933_s19 + $0x40] ss:$24 sps:$4 sm:$0xff]   ;;  %v2628_v18 = vld [vmem:[%s2933_s19 + $0x74] ss:$24 sps:$4 sm:$0xff]  }
  0x42   : > { %1567 = vmatpush1.bf16.msra.mxu1 %v2549_v31  ;;  %v2623_v19 = vld [vmem:[%s2933_s19 + $0x68] ss:$24 sps:$4 sm:$0xff]   ;;  %v2631_v21 = vld [vmem:[%s2933_s19 + $0x9c] ss:$24 sps:$4 sm:$0xff]   ;;  %v2629_v23 = vld [vmem:[%s2933_s19 + $0x98] ss:$24 sps:$4 sm:$0xff]  }
  0x43   : > { %1610 = vmatpush1.bf16.msra.mxu0 %v2550_v32  ;;  %1568 = vmatprep.subr.bf16.mxu1 %v2551_v33  ;;  %v2626_v20 = vld [vmem:[%s2933_s19 + $0x70] ss:$24 sps:$4 sm:$0xff]   ;;  %v2634_v22 = vld [vmem:[%s2933_s19 + $0xa4] ss:$24 sps:$4 sm:$0xff]   ;;  %v2632_v24 = vld [vmem:[%s2933_s19 + $0xa0] ss:$24 sps:$4 sm:$0xff]  }
  0x44   : > { %1611 = vmatprep.subr.bf16.mxu0 %v2553_v34  ;;  %v2637_v25 = vld [vmem:[%s2933_s19 + $0xcc] ss:$24 sps:$4 sm:$0xff]   ;;  %v2635_v27 = vld [vmem:[%s2933_s19 + $0xc8] ss:$24 sps:$4 sm:$0xff]   ;;  %v2643_v29 = vld [vmem:[%s2933_s19 + $0xfc] ss:$24 sps:$4 sm:$0xff]  }
  0x45   : > { %v2640_v26 = vld [vmem:[%s2933_s19 + $0xd4] ss:$24 sps:$4 sm:$0xff]   ;;  %v2638_v28 = vld [vmem:[%s2933_s19 + $0xd0] ss:$24 sps:$4 sm:$0xff]   ;;  %v2646_v30 = vld [vmem:[%s2933_s19 + $0x104] ss:$24 sps:$4 sm:$0xff]  }
  0x46   : > { %1569 = vmatpush1.bf16.msra.mxu1 %v2555_v35  ;;  %v2641_v31 = vld [vmem:[%s2933_s19 + $0xf8] ss:$24 sps:$4 sm:$0xff]   ;;  %v2649_v33 = vld [vmem:[%s2933_s19 + $0x12c] ss:$24 sps:$4 sm:$0xff]   ;;  %v2647_v35 = vld [vmem:[%s2933_s19 + $0x128] ss:$24 sps:$4 sm:$0xff]  }
  0x47   : > { %1612 = vmatpush1.bf16.msra.mxu0 %v2556_v36  ;;  %1570 = vmatprep.subr.bf16.mxu1 %v2557_v37  ;;  %v2644_v32 = vld [vmem:[%s2933_s19 + $0x100] ss:$24 sps:$4 sm:$0xff]   ;;  %v2652_v34 = vld [vmem:[%s2933_s19 + $0x134] ss:$24 sps:$4 sm:$0xff]   ;;  %v2650_v36 = vld [vmem:[%s2933_s19 + $0x130] ss:$24 sps:$4 sm:$0xff]  }
  0x48   : > { %1613 = vmatprep.subr.bf16.mxu0 %v2559_v38  ;;  %v2655_v37 = vld [vmem:[%s2933_s19 + $0x15c] ss:$24 sps:$4 sm:$0xff]   ;;  %p2437_p11 = scmp.ne.s32.totalorder %s2837_s23, 5 }
  0x49   : > { %v2658_v38 = vld [vmem:[%s2933_s19 + $0x164] ss:$24 sps:$4 sm:$0xff]  }
  0x4a   : > { %1571 = vmatpush1.bf16.msra.mxu1 %v2561_v39  ;;  %v2653_v39 = vld [vmem:[%s2933_s19 + $0x158] ss:$24 sps:$4 sm:$0xff]  }
  0x4b   : > { %1614 = vmatpush1.bf16.msra.mxu0 %v2562_v40  ;;  %1572 = vmatprep.subr.bf16.mxu1 %v2563_v41  ;;  %v2656_v40 = vld [vmem:[%s2933_s19 + $0x160] ss:$24 sps:$4 sm:$0xff]   ;;  %v2661_v41 = vld [vmem:[%s2933_s19 + $0x18c] ss:$24 sps:$4 sm:$0xff]  }
  0x4c   : > { %1615 = vmatprep.subr.bf16.mxu0 %v2565_v42  ;;  %v2664_v42 = vld [vmem:[%s2933_s19 + $0x194] ss:$24 sps:$4 sm:$0xff]  }
  0x4e   : > { %1573 = vmatpush1.bf16.msra.mxu1 %v2567_v43  ;;  %v2659_v43 = vld [vmem:[%s2933_s19 + $0x188] ss:$24 sps:$4 sm:$0xff]  }
  0x4f   : > { %1616 = vmatpush1.bf16.msra.mxu0 %v2568_v44  ;;  %1574 = vmatprep.subr.bf16.mxu1 %v2569_v45  ;;  %v2662_v44 = vld [vmem:[%s2933_s19 + $0x190] ss:$24 sps:$4 sm:$0xff]   ;;  %v2667_v45 = vld [vmem:[%s2933_s19 + $0x1bc] ss:$24 sps:$4 sm:$0xff]  }
  0x50   : > { %1617 = vmatprep.subr.bf16.mxu0 %v2571_v46  ;;  %v2670_v46 = vld [vmem:[%s2933_s19 + $0x1c4] ss:$24 sps:$4 sm:$0xff]  }
  0x52   : > { %1575 = vmatpush1.bf16.msra.mxu1 %v2573_v47  ;;  %v2665_v47 = vld [vmem:[%s2933_s19 + $0x1b8] ss:$24 sps:$4 sm:$0xff]  }
  0x53   : > { %1618 = vmatpush1.bf16.msra.mxu0 %v2574_v48  ;;  %1576 = vmatprep.subr.bf16.mxu1 %v2575_v49  ;;  %v2668_v48 = vld [vmem:[%s2933_s19 + $0x1c0] ss:$24 sps:$4 sm:$0xff]   ;;  %v2673_v49 = vld [vmem:[%s2933_s19 + $0x1ec] ss:$24 sps:$4 sm:$0xff]  }
  0x54   : > { %1619 = vmatprep.subr.bf16.mxu0 %v2577_v50  ;;  %v2676_v50 = vld [vmem:[%s2933_s19 + $0x1f4] ss:$24 sps:$4 sm:$0xff]  }
  0x56   : > { %1577 = vmatpush1.bf16.msra.mxu1 %v2579_v51  ;;  %v2671_v51 = vld [vmem:[%s2933_s19 + $0x1e8] ss:$24 sps:$4 sm:$0xff]  }
  0x57   : > { %1620 = vmatpush1.bf16.msra.mxu0 %v2580_v52  ;;  %1578 = vmatprep.subr.bf16.mxu1 %v2581_v54  ;;  %v2674_v52 = vld [vmem:[%s2933_s19 + $0x1f0] ss:$24 sps:$4 sm:$0xff]   ;;  %v2682_v54 = vld [vmem:[%s2933_s19 + $0x224] ss:$24 sps:$4 sm:$0xff]  }
  0x58   : > { %1621 = vmatprep.subr.bf16.mxu0 %v2583_v56  ;;  %v2677_v56 = vld [vmem:[%s2933_s19 + $0x218] ss:$24 sps:$4 sm:$0xff]  }
  0x5a   : > { %1579 = vmatpush1.bf16.msra.mxu1 %v2585_v57  ;;  %v2680_v57 = vld [vmem:[%s2933_s19 + $0x220] ss:$24 sps:$4 sm:$0xff]  }
  0x5b   : > { %1622 = vmatpush1.bf16.msra.mxu0 %v2586_v58  ;;  %1580 = vmatprep.subr.bf16.mxu1 %v2587_v59  ;;  %v2685_v58 = vld [vmem:[%s2933_s19 + $0x24c] ss:$24 sps:$4 sm:$0xff]  }
  0x5c   : > { %1623 = vmatprep.subr.bf16.mxu0 %v2589_v60  ;;  %v2688_v59 = vld [vmem:[%s2933_s19 + $0x254] ss:$24 sps:$4 sm:$0xff]   ;;  %v2683_v60 = vld [vmem:[%s2933_s19 + $0x248] ss:$24 sps:$4 sm:$0xff]  }
  0x5e   : > { %1581 = vmatpush1.bf16.msra.mxu1 %v2591_v61  ;;  %v2686_v61 = vld [vmem:[%s2933_s19 + $0x250] ss:$24 sps:$4 sm:$0xff]  }
  0x5f   : > { %1624 = vmatpush1.bf16.msra.mxu0 %v2592_v62  ;;  %1582 = vmatprep.subr.bf16.mxu1 %v2593_v63  ;;  %v2691_v62 = vld [vmem:[%s2933_s19 + $0x27c] ss:$24 sps:$4 sm:$0xff]  }
  0x60   : > { %1625 = vmatprep.subr.bf16.mxu0 %v2595_v0  ;;  %v2694_v63 = vld [vmem:[%s2933_s19 + $0x284] ss:$24 sps:$4 sm:$0xff]   ;;  %v2689_v0 = vld [vmem:[%s2933_s19 + $0x278] ss:$24 sps:$4 sm:$0xff]  }
  0x62   : > { %1583 = vmatpush1.bf16.msra.mxu1 %v2597_v1  ;;  %v2692_v1 = vld [vmem:[%s2933_s19 + $0x280] ss:$24 sps:$4 sm:$0xff]  }
  0x63   : > { %1626 = vmatpush1.bf16.msra.mxu0 %v2598_v2  ;;  %1584 = vmatprep.subr.bf16.mxu1 %v2599_v3  ;;  %v2697_v2 = vld [vmem:[%s2933_s19 + $0x2ac] ss:$24 sps:$4 sm:$0xff]  }
  0x64   : > { %1627 = vmatprep.subr.bf16.mxu0 %v2601_v4  ;;  %v2700_v3 = vld [vmem:[%s2933_s19 + $0x2b4] ss:$24 sps:$4 sm:$0xff]   ;;  %v2695_v4 = vld [vmem:[%s2933_s19 + $0x2a8] ss:$24 sps:$4 sm:$0xff]  }
  0x66   : > { %1585 = vmatpush1.bf16.msra.mxu1 %v2603_v5  ;;  %v2698_v5 = vld [vmem:[%s2933_s19 + $0x2b0] ss:$24 sps:$4 sm:$0xff]  }
  0x67   : > { %1628 = vmatpush1.bf16.msra.mxu0 %v2604_v6  ;;  %1640 = vmatprep.subr.bf16.mxu1 %v2613_v7  ;;  %v2703_v6 = vld [vmem:[%s2933_s19 + $0x2dc] ss:$24 sps:$4 sm:$0xff]  }
  0x68   : > { %1726 = vmatprep.subr.bf16.mxu0 %v2616_v8  ;;  %v2706_v7 = vld [vmem:[%s2933_s19 + $0x2e4] ss:$24 sps:$4 sm:$0xff]   ;;  %v2701_v8 = vld [vmem:[%s2933_s19 + $0x2d8] ss:$24 sps:$4 sm:$0xff]  }
  0x69   : > { %1587 = vmatmul.mubr.bf16.vlgmr.msra.gmra.mrb[0].mxu1 %v3010_v9 }
  0x6a   : > { %1630 = vmatmul.mubr.bf16.vlgmr.msra.gmra.mrb[0].mxu0 %v3013_v10  ;;  %1641 = vmatpush1.bf16.msra.mxu1 %v2611_v11  ;;  %v2704_v11 = vld [vmem:[%s2933_s19 + $0x2e0] ss:$24 sps:$4 sm:$0xff]  }
  0x6b   : > { %1727 = vmatpush1.bf16.msra.mxu0 %v2614_v12  ;;  %1642 = vmatprep.subr.bf16.mxu1 %v2619_v13  ;;  %v2709_v12 = vld [vmem:[%s2933_s19 + $0x30c] ss:$24 sps:$4 sm:$0xff]  }
  0x6c   : > { %1728 = vmatprep.subr.bf16.mxu0 %v2622_v14  ;;  %1672 = vmatprep.mubr.bf16.mxu1 %v2605_v53  ;;  %v2712_v13 = vld [vmem:[%s2933_s19 + $0x314] ss:$24 sps:$4 sm:$0xff]   ;;  %v2707_v14 = vld [vmem:[%s2933_s19 + $0x308] ss:$24 sps:$4 sm:$0xff]  }
  0x6d   : > { %1758 = vmatprep.mubr.bf16.mxu0 %v2605_v53  ;;  %v2679_v53 = vld [vmem:[%s2933_s19 + $0x21c] ss:$24 sps:$4 sm:$0xff]  }
  0x6e   : > { %1643 = vmatpush1.bf16.msra.mxu1 %v2617_v15  ;;  %v2710_v15 = vld [vmem:[%s2933_s19 + $0x310] ss:$24 sps:$4 sm:$0xff]  }
  0x6f   : > { %1729 = vmatpush1.bf16.msra.mxu0 %v2620_v16  ;;  %1644 = vmatprep.subr.bf16.mxu1 %v2625_v17  ;;  %v2715_v16 = vld [vmem:[%s2933_s19 + $0x33c] ss:$24 sps:$4 sm:$0xff]  }
  0x70   : > { %1730 = vmatprep.subr.bf16.mxu0 %v2628_v18  ;;  %v2718_v17 = vld [vmem:[%s2933_s19 + $0x344] ss:$24 sps:$4 sm:$0xff]   ;;  %v2713_v18 = vld [vmem:[%s2933_s19 + $0x338] ss:$24 sps:$4 sm:$0xff]  }
  0x72   : > { %1645 = vmatpush1.bf16.msra.mxu1 %v2623_v19  ;;  %v2716_v19 = vld [vmem:[%s2933_s19 + $0x340] ss:$24 sps:$4 sm:$0xff]  }
  0x73   : > { %1731 = vmatpush1.bf16.msra.mxu0 %v2626_v20  ;;  %1646 = vmatprep.subr.bf16.mxu1 %v2631_v21  ;;  %v2721_v20 = vld [vmem:[%s2933_s19 + $0x36c] ss:$24 sps:$4 sm:$0xff]  }
  0x74   : > { %1732 = vmatprep.subr.bf16.mxu0 %v2634_v22  ;;  %v2724_v21 = vld [vmem:[%s2933_s19 + $0x374] ss:$24 sps:$4 sm:$0xff]   ;;  %v2722_v22 = vld [vmem:[%s2933_s19 + $0x370] ss:$24 sps:$4 sm:$0xff]  }
  0x76   : > { %1647 = vmatpush1.bf16.msra.mxu1 %v2629_v23  ;;  %v2727_v23 = vld [vmem:[%s2933_s19 + $0x39c] ss:$24 sps:$4 sm:$0xff]  }
  0x77   : > { %1733 = vmatpush1.bf16.msra.mxu0 %v2632_v24  ;;  %1648 = vmatprep.subr.bf16.mxu1 %v2637_v25  ;;  %v2730_v24 = vld [vmem:[%s2933_s19 + $0x3a4] ss:$24 sps:$4 sm:$0xff]   ;;  %v2725_v25 = vld [vmem:[%s2933_s19 + $0x398] ss:$24 sps:$4 sm:$0xff]  }
  0x78   : > { %1734 = vmatprep.subr.bf16.mxu0 %v2640_v26  ;;  %v2728_v26 = vld [vmem:[%s2933_s19 + $0x3a0] ss:$24 sps:$4 sm:$0xff]  }
  0x7a   : > { %1649 = vmatpush1.bf16.msra.mxu1 %v2635_v27  ;;  %v2736_v27 = vld [vmem:[%s2933_s19 + $0x3d4] ss:$24 sps:$4 sm:$0xff]  }
  0x7b   : > { %1735 = vmatpush1.bf16.msra.mxu0 %v2638_v28  ;;  %1650 = vmatprep.subr.bf16.mxu1 %v2643_v29  ;;  %v2731_v28 = vld [vmem:[%s2933_s19 + $0x3c8] ss:$24 sps:$4 sm:$0xff]  }
  0x7c   : > { %1736 = vmatprep.subr.bf16.mxu0 %v2646_v30  ;;  %v2734_v29 = vld [vmem:[%s2933_s19 + $0x3d0] ss:$24 sps:$4 sm:$0xff]   ;;  %v2739_v30 = vld [vmem:[%s2933_s19 + $0x3fc] ss:$24 sps:$4 sm:$0xff]  }
  0x7e   : > { %1651 = vmatpush1.bf16.msra.mxu1 %v2641_v31  ;;  %v2742_v31 = vld [vmem:[%s2933_s19 + $0x404] ss:$24 sps:$4 sm:$0xff]  }
  0x7f   : > { %1737 = vmatpush1.bf16.msra.mxu0 %v2644_v32  ;;  %1652 = vmatprep.subr.bf16.mxu1 %v2649_v33  ;;  %v2737_v32 = vld [vmem:[%s2933_s19 + $0x3f8] ss:$24 sps:$4 sm:$0xff]  }
  0x80   : > { %1738 = vmatprep.subr.bf16.mxu0 %v2652_v34  ;;  %v2740_v33 = vld [vmem:[%s2933_s19 + $0x400] ss:$24 sps:$4 sm:$0xff]   ;;  %v2745_v34 = vld [vmem:[%s2933_s19 + $0x42c] ss:$24 sps:$4 sm:$0xff]  }
  0x82   : > { %1653 = vmatpush1.bf16.msra.mxu1 %v2647_v35  ;;  %v2748_v35 = vld [vmem:[%s2933_s19 + $0x434] ss:$24 sps:$4 sm:$0xff]  }
  0x83   : > { %1739 = vmatpush1.bf16.msra.mxu0 %v2650_v36  ;;  %1654 = vmatprep.subr.bf16.mxu1 %v2655_v37  ;;  %v2743_v36 = vld [vmem:[%s2933_s19 + $0x428] ss:$24 sps:$4 sm:$0xff]  }
  0x84   : > { %1740 = vmatprep.subr.bf16.mxu0 %v2658_v38  ;;  %v2746_v37 = vld [vmem:[%s2933_s19 + $0x430] ss:$24 sps:$4 sm:$0xff]   ;;  %v2751_v38 = vld [vmem:[%s2933_s19 + $0x45c] ss:$24 sps:$4 sm:$0xff]  }
  0x86   : > { %1655 = vmatpush1.bf16.msra.mxu1 %v2653_v39  ;;  %v2754_v39 = vld [vmem:[%s2933_s19 + $0x464] ss:$24 sps:$4 sm:$0xff]  }
  0x87   : > { %1741 = vmatpush1.bf16.msra.mxu0 %v2656_v40  ;;  %1656 = vmatprep.subr.bf16.mxu1 %v2661_v41  ;;  %v2749_v40 = vld [vmem:[%s2933_s19 + $0x458] ss:$24 sps:$4 sm:$0xff]  }
  0x88   : > { %1742 = vmatprep.subr.bf16.mxu0 %v2664_v42  ;;  %v2752_v41 = vld [vmem:[%s2933_s19 + $0x460] ss:$24 sps:$4 sm:$0xff]   ;;  %v2757_v42 = vld [vmem:[%s2933_s19 + $0x48c] ss:$24 sps:$4 sm:$0xff]  }
  0x8a   : > { %1657 = vmatpush1.bf16.msra.mxu1 %v2659_v43  ;;  %v2760_v43 = vld [vmem:[%s2933_s19 + $0x494] ss:$24 sps:$4 sm:$0xff]  }
  0x8b   : > { %1743 = vmatpush1.bf16.msra.mxu0 %v2662_v44  ;;  %1658 = vmatprep.subr.bf16.mxu1 %v2667_v45  ;;  %v2755_v44 = vld [vmem:[%s2933_s19 + $0x488] ss:$24 sps:$4 sm:$0xff]  }
  0x8c   : > { %1744 = vmatprep.subr.bf16.mxu0 %v2670_v46  ;;  %v2758_v45 = vld [vmem:[%s2933_s19 + $0x490] ss:$24 sps:$4 sm:$0xff]   ;;  %v2763_v46 = vld [vmem:[%s2933_s19 + $0x4bc] ss:$24 sps:$4 sm:$0xff]  }
  0x8e   : > { %1659 = vmatpush1.bf16.msra.mxu1 %v2665_v47  ;;  %v2766_v47 = vld [vmem:[%s2933_s19 + $0x4c4] ss:$24 sps:$4 sm:$0xff]  }
  0x8f   : > { %1745 = vmatpush1.bf16.msra.mxu0 %v2668_v48  ;;  %1660 = vmatprep.subr.bf16.mxu1 %v2673_v49  ;;  %v2761_v48 = vld [vmem:[%s2933_s19 + $0x4b8] ss:$24 sps:$4 sm:$0xff]  }
  0x90   : > { %1746 = vmatprep.subr.bf16.mxu0 %v2676_v50  ;;  %v2764_v49 = vld [vmem:[%s2933_s19 + $0x4c0] ss:$24 sps:$4 sm:$0xff]   ;;  %v2769_v50 = vld [vmem:[%s2933_s19 + $0x4ec] ss:$24 sps:$4 sm:$0xff]  }
  0x92   : > { %1661 = vmatpush1.bf16.msra.mxu1 %v2671_v51  ;;  %v2772_v51 = vld [vmem:[%s2933_s19 + $0x4f4] ss:$24 sps:$4 sm:$0xff]  }
  0x93   : > { %1747 = vmatpush1.bf16.msra.mxu0 %v2674_v52  ;;  %1662 = vmatprep.subr.bf16.mxu1 %v2679_v53  ;;  %v2767_v52 = vld [vmem:[%s2933_s19 + $0x4e8] ss:$24 sps:$4 sm:$0xff]  }
  0x94   : > { %1748 = vmatprep.subr.bf16.mxu0 %v2682_v54  ;;  %v2770_v53 = vld [vmem:[%s2933_s19 + $0x4f0] ss:$24 sps:$4 sm:$0xff]   ;;  %v2775_v54 = vld [vmem:[%s2933_s19 + $0x51c] ss:$24 sps:$4 sm:$0xff]  }
  0x96   : > { %1663 = vmatpush1.bf16.msra.mxu1 %v2677_v56  ;;  %v2778_v56 = vld [vmem:[%s2933_s19 + $0x524] ss:$24 sps:$4 sm:$0xff]  }
  0x97   : > { %1749 = vmatpush1.bf16.msra.mxu0 %v2680_v57  ;;  %1664 = vmatprep.subr.bf16.mxu1 %v2685_v58  ;;  %v2773_v57 = vld [vmem:[%s2933_s19 + $0x518] ss:$24 sps:$4 sm:$0xff]  }
  0x98   : > { %1750 = vmatprep.subr.bf16.mxu0 %v2688_v59  ;;  %v2776_v58 = vld [vmem:[%s2933_s19 + $0x520] ss:$24 sps:$4 sm:$0xff]   ;;  %v2781_v59 = vld [vmem:[%s2933_s19 + $0x54c] ss:$24 sps:$4 sm:$0xff]  }
  0x9a   : > { %1665 = vmatpush1.bf16.msra.mxu1 %v2683_v60  ;;  %v2784_v60 = vld [vmem:[%s2933_s19 + $0x554] ss:$24 sps:$4 sm:$0xff]  }
  0x9b   : > { %1751 = vmatpush1.bf16.msra.mxu0 %v2686_v61  ;;  %1666 = vmatprep.subr.bf16.mxu1 %v2691_v62  ;;  %v2779_v61 = vld [vmem:[%s2933_s19 + $0x548] ss:$24 sps:$4 sm:$0xff]  }
  0x9c   : > { %1752 = vmatprep.subr.bf16.mxu0 %v2694_v63  ;;  %v2782_v62 = vld [vmem:[%s2933_s19 + $0x550] ss:$24 sps:$4 sm:$0xff]   ;;  %v2787_v63 = vld [vmem:[%s2933_s19 + $0x57c] ss:$24 sps:$4 sm:$0xff]  }
  0x9e   : > { %1667 = vmatpush1.bf16.msra.mxu1 %v2689_v0  ;;  %v2790_v0 = vld [vmem:[%s2933_s19 + $0x584] ss:$24 sps:$4 sm:$0xff]  }
  0x9f   : > { %1753 = vmatpush1.bf16.msra.mxu0 %v2692_v1  ;;  %1668 = vmatprep.subr.bf16.mxu1 %v2697_v2  ;;  %v2785_v1 = vld [vmem:[%s2933_s19 + $0x578] ss:$24 sps:$4 sm:$0xff]  }
  0xa0   : > { %1754 = vmatprep.subr.bf16.mxu0 %v2700_v3  ;;  %v2788_v2 = vld [vmem:[%s2933_s19 + $0x580] ss:$24 sps:$4 sm:$0xff]   ;;  %v2793_v3 = vld [vmem:[%s2933_s19 + $0x5ac] ss:$24 sps:$4 sm:$0xff]  }
  0xa2   : > { %1669 = vmatpush1.bf16.msra.mxu1 %v2695_v4  ;;  %v2796_v4 = vld [vmem:[%s2933_s19 + $0x5b4] ss:$24 sps:$4 sm:$0xff]  }
  0xa3   : > { %1755 = vmatpush1.bf16.msra.mxu0 %v2698_v5  ;;  %1670 = vmatprep.subr.bf16.mxu1 %v2703_v6  ;;  %v2791_v5 = vld [vmem:[%s2933_s19 + $0x5a8] ss:$24 sps:$4 sm:$0xff]  }
  0xa4   : > { %1756 = vmatprep.subr.bf16.mxu0 %v2706_v7  ;;  %v2794_v6 = vld [vmem:[%s2933_s19 + $0x5b0] ss:$24 sps:$4 sm:$0xff]   ;;  %v2799_v7 = vld [vmem:[%s2933_s19 + $0x5dc] ss:$24 sps:$4 sm:$0xff]  }
  0xa6   : > { %1671 = vmatpush1.bf16.msra.mxu1 %v2701_v8  ;;  %v2802_v8 = vld [vmem:[%s2933_s19 + $0x5e4] ss:$24 sps:$4 sm:$0xff]  }
  0xa7   : > { %1757 = vmatpush1.bf16.msra.mxu0 %v2704_v11  ;;  %1683 = vmatprep.subr.bf16.mxu1 %v2709_v12  ;;  %v2797_v11 = vld [vmem:[%s2933_s19 + $0x5d8] ss:$24 sps:$4 sm:$0xff]  }
  0xa8   : > { %1769 = vmatprep.subr.bf16.mxu0 %v2712_v13  ;;  %v2800_v12 = vld [vmem:[%s2933_s19 + $0x5e0] ss:$24 sps:$4 sm:$0xff]  }
  0xa9   : > { %1673 = vmatmul.mubr.bf16.vlgmr.msra.gmra.mrb[4].mxu1 %v3010_v9 }
  0xaa   : > { %1759 = vmatmul.mubr.bf16.vlgmr.msra.gmra.mrb[4].mxu0 %v3010_v9  ;;  %1684 = vmatpush1.bf16.msra.mxu1 %v2707_v14  ;;  %v2719_v9 = vld [vmem:[%s2933_s19 + $0x368] ss:$24 sps:$4 sm:$0xff]  }
  0xab   : > { %1770 = vmatpush1.bf16.msra.mxu0 %v2710_v15  ;;  %1685 = vmatprep.subr.bf16.mxu1 %v2715_v16  ;;  %v366_v14 = vld [vmem:[#allocation2] sm:$0xff] }
  0xac   : > { %1771 = vmatprep.subr.bf16.mxu0 %v2718_v17  ;;  %1715 = vmatprep.mubr.bf16.mxu1 %v2989_v55 }
  0xad   : > { %1801 = vmatprep.mubr.bf16.mxu0 %v2989_v55  ;;  %v2733_v55 = vld [vmem:[%s2933_s19 + $0x3cc] ss:$24 sps:$4 sm:$0xff]  }
  0xae   : > { %1686 = vmatpush1.bf16.msra.mxu1 %v2713_v18  ;;  %v367_v18 = vld [vmem:[#allocation2 + $0x8] sm:$0xff] }
  0xaf   : > { %1772 = vmatpush1.bf16.msra.mxu0 %v2716_v19  ;;  %1687 = vmatprep.subr.bf16.mxu1 %v2721_v20 }
  0xb0   : > { %1773 = vmatprep.subr.bf16.mxu0 %v2724_v21 }
  0xb2   : > { %1688 = vmatpush1.bf16.msra.mxu1 %v2719_v9  ;;  %v372_v9 = vld [vmem:[#allocation2 + $0x30] sm:$0xff] }
  0xb3   : > { %1774 = vmatpush1.bf16.msra.mxu0 %v2722_v22  ;;  %1689 = vmatprep.subr.bf16.mxu1 %v2727_v23 }
  0xb4   : > { %1775 = vmatprep.subr.bf16.mxu0 %v2730_v24 }
  0xb6   : > { %1690 = vmatpush1.bf16.msra.mxu1 %v2725_v25 }
  0xb7   : > { %1776 = vmatpush1.bf16.msra.mxu0 %v2728_v26  ;;  %1691 = vmatprep.subr.bf16.mxu1 %v2733_v55  ;;  %v373_v26 = vld [vmem:[#allocation2 + $0x38] sm:$0xff] }
  0xb8   : > { %1777 = vmatprep.subr.bf16.mxu0 %v2736_v27 }
  0xba   : > { %1692 = vmatpush1.bf16.msra.mxu1 %v2731_v28 }
  0xbb   : > { %1778 = vmatpush1.bf16.msra.mxu0 %v2734_v29  ;;  %1693 = vmatprep.subr.bf16.mxu1 %v2739_v30  ;;  %v368_v30 = vld [vmem:[#allocation2 + $0x10] sm:$0xff] }
  0xbc   : > { %1779 = vmatprep.subr.bf16.mxu0 %v2742_v31  ;;  %v370_v31 = vld [vmem:[#allocation2 + $0x20] sm:$0xff] }
  0xbe   : > { %1694 = vmatpush1.bf16.msra.mxu1 %v2737_v32  ;;  %v369_v32 = vld [vmem:[#allocation2 + $0x18] sm:$0xff] }
  0xbf   : > { %1780 = vmatpush1.bf16.msra.mxu0 %v2740_v33  ;;  %1695 = vmatprep.subr.bf16.mxu1 %v2745_v34  ;;  %v371_v33 = vld [vmem:[#allocation2 + $0x28] sm:$0xff] }
  0xc0   : > { %1781 = vmatprep.subr.bf16.mxu0 %v2748_v35 }
  0xc2   : > { %1696 = vmatpush1.bf16.msra.mxu1 %v2743_v36  ;;  %v374_v36 = vld [vmem:[#allocation2 + $0x40] sm:$0xff] }
  0xc3   : > { %1782 = vmatpush1.bf16.msra.mxu0 %v2746_v37  ;;  %1697 = vmatprep.subr.bf16.mxu1 %v2751_v38  ;;  %v376_v37 = vld [vmem:[#allocation2 + $0x50] sm:$0xff] }
  0xc4   : > { %1783 = vmatprep.subr.bf16.mxu0 %v2754_v39 }
  0xc6   : > { %1698 = vmatpush1.bf16.msra.mxu1 %v2749_v40 }
  0xc7   : > { %1784 = vmatpush1.bf16.msra.mxu0 %v2752_v41  ;;  %1699 = vmatprep.subr.bf16.mxu1 %v2757_v42  ;;  %v375_v42 = vld [vmem:[#allocation2 + $0x48] sm:$0xff] }
  0xc8   : > { %1785 = vmatprep.subr.bf16.mxu0 %v2760_v43  ;;  %v377_v43 = vld [vmem:[#allocation2 + $0x58] sm:$0xff] }
  0xca   : > { %1700 = vmatpush1.bf16.msra.mxu1 %v2755_v44 }
  0xcb   : > { %1786 = vmatpush1.bf16.msra.mxu0 %v2758_v45  ;;  %1701 = vmatprep.subr.bf16.mxu1 %v2763_v46 }
  0xcc   : > { %1787 = vmatprep.subr.bf16.mxu0 %v2766_v47 }
  0xce   : > { %1702 = vmatpush1.bf16.msra.mxu1 %v2761_v48 }
  0xcf   : > { %1788 = vmatpush1.bf16.msra.mxu0 %v2764_v49  ;;  %1703 = vmatprep.subr.bf16.mxu1 %v2769_v50 }
  0xd0   : > { %1789 = vmatprep.subr.bf16.mxu0 %v2772_v51 }
  0xd2   : > { %1704 = vmatpush1.bf16.msra.mxu1 %v2767_v52 }
  0xd3   : > { %1790 = vmatpush1.bf16.msra.mxu0 %v2770_v53  ;;  %1705 = vmatprep.subr.bf16.mxu1 %v2775_v54  ;;  %v1854_v54 = vlaneseq (!%p2437_p11) }
  0xd4   : > { %1791 = vmatprep.subr.bf16.mxu0 %v2778_v56 }
  0xd5   : > { %v1855_v56 = vshrl.u32 (!%p2437_p11), %v1854_v54, 7 }
  0xd6   : > { %1706 = vmatpush1.bf16.msra.mxu1 %v2773_v57  ;;  %v1896_v57 = vld [vmem:[%s3268_s3] sm:$0xff] (!%p2437_p11) }
  0xd7   : > { %1792 = vmatpush1.bf16.msra.mxu0 %v2776_v58  ;;  %1707 = vmatprep.subr.bf16.mxu1 %v2781_v59  ;;  %v1897_v58 = vld [vmem:[%s3268_s3 + $0x8] sm:$0xff] (!%p2437_p11)  ;;  %v1852_v59 = vld [vmem:[%s3267_s2] sm:$0x3f] (!%p2437_p11) }
  0xd8   : > { %1793 = vmatprep.subr.bf16.mxu0 %v2784_v60  ;;  %v1902_v60 = vunpack.c.l.bf16 (!%p2437_p11), %v1896_v57 }
  0xda   : > { %1708 = vmatpush1.bf16.msra.mxu1 %v2779_v61 }
  0xdb   : > { %1794 = vmatpush1.bf16.msra.mxu0 %v2782_v62  ;;  %1709 = vmatprep.subr.bf16.mxu1 %v2787_v63  ;;  %v3159_v62 = vsub.s32 (!%p2437_p11), 0, %v1855_v56  ;;  %v3161_v63 = vsub.s32 (!%p2437_p11), 1, %v1855_v56 }
  0xdc   : > { %1795 = vmatprep.subr.bf16.mxu0 %v2790_v0  ;;  %v3163_v0 = vsub.s32 (!%p2437_p11), 2, %v1855_v56 }
  0xde   : > { %1710 = vmatpush1.bf16.msra.mxu1 %v2785_v1  ;;  %v3165_v1 = vsub.s32 (!%p2437_p11), 3, %v1855_v56 }
  0xdf   : > { %1796 = vmatpush1.bf16.msra.mxu0 %v2788_v2  ;;  %1711 = vmatprep.subr.bf16.mxu1 %v2793_v3 }
  0xe0   : > { %1797 = vmatprep.subr.bf16.mxu0 %v2796_v4 }
  0xe2   : > { %1712 = vmatpush1.bf16.msra.mxu1 %v2791_v5  ;;  %v3167_v5 = vsub.s32 (!%p2437_p11), 4, %v1855_v56 }
  0xe3   : > { %1798 = vmatpush1.bf16.msra.mxu0 %v2794_v6  ;;  %1713 = vmatprep.subr.bf16.mxu1 %v2799_v7  ;;  %v3169_v6 = vsub.s32 (!%p2437_p11), 5, %v1855_v56  ;;  %v1903_v7 = vunpack.c.h.bf16 (!%p2437_p11), %v1896_v57 }
  0xe4   : > { %1799 = vmatprep.subr.bf16.mxu0 %v2802_v8  ;;  %v1904_v8 = vunpack.c.l.bf16 (!%p2437_p11), %v1897_v58 }
  0xe6   : > { %1714 = vmatpush1.bf16.msra.mxu1 %v2797_v11  ;;  %v1857_v11 = vrot.slane (!%p2437_p11), %v1852_v59, %v3159_v62 }
  0xe7   : > { %1800 = vmatpush1.bf16.msra.mxu0 %v2800_v12  ;;  %v1861_v12 = vrot.slane (!%p2437_p11), %v1852_v59, %v3161_v63 }
  0xe9   : > { %1716 = vmatmul.mubr.bf16.vlgmr.msra.gmra.mrb[4].mxu1 %v3013_v10 }
  0xea   : > { %1802 = vmatmul.mubr.bf16.vlgmr.msra.gmra.mrb[4].mxu0 %v3013_v10 }
 0x13c   : > { %v1588_v13 = vpop.f32.mrb[0].mxu1 }
 0x13d   : > { %v1631_v15 = vpop.f32.mrb[0].mxu0  ;;  %v1590_v17 = vpop.f32.mrb[1].mxu1 }
 0x13e   : > { %v1632_v16 = vadd.f32 %v1631_v15, %v1588_v13  ;;  %v1633_v19 = vpop.f32.mrb[1].mxu0  ;;  %v1592_v21 = vpop.f32.mrb[2].mxu1  ;;  %v1865_v13 = vrot.slane (!%p2437_p11), %v1852_v59, %v3163_v0  ;;  %v1898_v15 = vld [vmem:[%s3268_s3 + $0x10] sm:$0xff] (!%p2437_p11) }
 0x13f   : > { %v1634_v20 = vadd.f32 %v1633_v19, %v1590_v17  ;;  %v1635_v22 = vpop.f32.mrb[2].mxu0  ;;  %v1594_v25 = vpop.f32.mrb[3].mxu1  ;;  %v1873_v17 = vrot.slane (!%p2437_p11), %v1852_v59, %v3167_v5  ;;  %v1905_v19 = vunpack.c.h.bf16 (!%p2437_p11), %v1897_v58 }
 0x140   : > { %v1812_v23 = vadd.f32 %v1632_v16, %v366_v14  ;;  %v1636_v24 = vadd.f32 %v1635_v22, %v1592_v21  ;;  %v1637_v55 = vpop.f32.mrb[3].mxu0  ;;  %v1869_v14 = vrot.slane (!%p2437_p11), %v1852_v59, %v3165_v1 }
 0x141   : > { %v1813_v27 = vadd.f32 %v1634_v20, %v367_v18  ;;  %v1638_v28 = vadd.f32 %v1637_v55, %v1594_v25  ;;  %v1877_v18 = vrot.slane (!%p2437_p11), %v1852_v59, %v3169_v6 }
 0x142   : > { %1824 = vst [vmem:[#allocation2] sm:$0xff] %v1812_v23  ;;  %v1818_v10 = vadd.f32 %v1636_v24, %v372_v9  ;;  %v1906_v24 = vunpack.c.l.bf16 (!%p2437_p11), %v1898_v15 }
 0x143   : > { %1825 = vst [vmem:[#allocation2 + $0x8] sm:$0xff] %v1813_v27  ;;  %v1819_v29 = vadd.f32 %v1638_v28, %v373_v26 }
 0x144   : > { %1830 = vst [vmem:[#allocation2 + $0x30] sm:$0xff] %v1818_v10 }
 0x145   : > { %1831 = vst [vmem:[#allocation2 + $0x38] sm:$0xff] %v1819_v29 }
 0x149   : > { %v1840_v61 = vld [vmem:[#allocation2] sm:$0xff] (!%p2437_p11) }
 0x14a   : > { %v1841_v2 = vld [vmem:[#allocation2 + $0x8] sm:$0xff] (!%p2437_p11)  ;;  %v1884_v20 = vadd.f32 (!%p2437_p11), %v1857_v11, %v1840_v61 }
 0x14b   : > { %v1885_v21 = vadd.f32 (!%p2437_p11), %v1861_v12, %v1841_v2  ;;  %v1846_v28 = vld [vmem:[#allocation2 + $0x30] sm:$0xff] (!%p2437_p11) }
 0x14c   : > { %v1914_v26 = vadd.f32 (!%p2437_p11), %v1902_v60, %v1884_v20  ;;  %v1847_v10 = vld [vmem:[#allocation2 + $0x38] sm:$0xff] (!%p2437_p11) }
 0x14d   : > { %v1915_v55 = vadd.f32 (!%p2437_p11), %v1903_v7, %v1885_v21 }
 0x1bc   : > { %v1717_v34 = vpop.f32.mrb[4].mxu1 }
 0x1bd   : > { %v1803_v35 = vpop.f32.mrb[4].mxu0  ;;  %v1814_v38 = vadd.f32 %v1717_v34, %v368_v30  ;;  %v1719_v40 = vpop.f32.mrb[5].mxu1  ;;  %1839 = sbr.rel (%p2437_p11) target bundleno = 798 (0x31e), region = 75 }
 0x1be   : > { %v1816_v39 = vadd.f32 %v1803_v35, %v370_v31  ;;  %v1805_v41 = vpop.f32.mrb[5].mxu0  ;;  %v1815_v44 = vadd.f32 %v1719_v40, %v369_v32  ;;  %v1721_v46 = vpop.f32.mrb[6].mxu1  ;;  %v1907_v31 = vunpack.c.h.bf16 (!%p2437_p11), %v1898_v15  ;;  %v1899_v35 = vld [vmem:[%s3268_s3 + $0x18] sm:$0xff] (!%p2437_p11) }
 0x1bf   : > { %v1817_v45 = vadd.f32 %v1805_v41, %v371_v33  ;;  %v1807_v47 = vpop.f32.mrb[6].mxu0  ;;  %1826 = vst [vmem:[#allocation2 + $0x10] sm:$0xff] %v1814_v38  ;;  %v1820_v48 = vadd.f32 %v1721_v46, %v374_v36  ;;  %v1723_v50 = vpop.f32.mrb[7].mxu1  ;;  %v1926_v33 = vadd.f32 (!%p2437_p11), %v1915_v55, %v1914_v26  ;;  %v1890_v36 = vadd.f32 (!%p2437_p11), %v1857_v11, %v1846_v28 }
 0x1c0   : > { %1828 = vst [vmem:[#allocation2 + $0x20] sm:$0xff] %v1816_v39  ;;  %v1822_v49 = vadd.f32 %v1807_v47, %v376_v37  ;;  %v1809_v51 = vpop.f32.mrb[7].mxu0  ;;  %1827 = vst [vmem:[#allocation2 + $0x18] sm:$0xff] %v1815_v44  ;;  %v1821_v52 = vadd.f32 %v1723_v50, %v375_v42  ;;  %v1900_v37 = vld [vmem:[%s3268_s3 + $0x20] sm:$0xff] (!%p2437_p11)  ;;  %v1891_v41 = vadd.f32 (!%p2437_p11), %v1861_v12, %v1847_v10  ;;  %v1909_v46 = vunpack.c.h.bf16 (!%p2437_p11), %v1899_v35 }
 0x1c1   : > { %1829 = vst [vmem:[#allocation2 + $0x28] sm:$0xff] %v1817_v45  ;;  %v1823_v53 = vadd.f32 %v1809_v51, %v377_v43  ;;  %1832 = vst [vmem:[#allocation2 + $0x40] sm:$0xff] %v1820_v48  ;;  %v1901_v43 = vld [vmem:[%s3268_s3 + $0x28] sm:$0xff] (!%p2437_p11)  ;;  %v1908_v45 = vunpack.c.l.bf16 (!%p2437_p11), %v1899_v35  ;;  %v1910_v50 = vunpack.c.l.bf16 (!%p2437_p11), %v1900_v37  ;;  %v1911_v51 = vunpack.c.h.bf16 (!%p2437_p11), %v1900_v37 }
 0x1c2   : > { %1834 = vst [vmem:[#allocation2 + $0x50] sm:$0xff] %v1822_v49  ;;  %1833 = vst [vmem:[#allocation2 + $0x48] sm:$0xff] %v1821_v52  ;;  %v1921_v56 = vadd.f32 (!%p2437_p11), %v1909_v46, %v1891_v41  ;;  %v1913_v60 = vunpack.c.h.bf16 (!%p2437_p11), %v1901_v43 }
 0x1c3   : > { %1835 = vst [vmem:[#allocation2 + $0x58] sm:$0xff] %v1823_v53  ;;  %v1912_v53 = vunpack.c.l.bf16 (!%p2437_p11), %v1901_v43  ;;  %v1920_v54 = vadd.f32 (!%p2437_p11), %v1908_v45, %v1890_v36 }
 0x1c5   : > { %v1933_v2 = vadd.f32 %v1921_v56, %v1920_v54 }
 0x1c6   : > { %v1842_v3 = vld [vmem:[#allocation2 + $0x10] sm:$0xff] }
 0x1c7   : > { %v1843_v4 = vld [vmem:[#allocation2 + $0x18] sm:$0xff]  ;;  %v1844_v16 = vld [vmem:[#allocation2 + $0x20] sm:$0xff]  ;;  %v1886_v9 = vadd.f32 %v1865_v13, %v1842_v3 }
 0x1c8   : > { %v1887_v22 = vadd.f32 %v1869_v14, %v1843_v4  ;;  %v1845_v23 = vld [vmem:[#allocation2 + $0x28] sm:$0xff]  ;;  %v1888_v25 = vadd.f32 %v1873_v17, %v1844_v16  ;;  %v1848_v29 = vld [vmem:[#allocation2 + $0x40] sm:$0xff] }
 0x1c9   : > { %v1916_v27 = vadd.f32 %v1904_v8, %v1886_v9  ;;  %v1889_v30 = vadd.f32 %v1877_v18, %v1845_v23  ;;  %v1849_v34 = vld [vmem:[#allocation2 + $0x48] sm:$0xff]  ;;  %v1850_v40 = vld [vmem:[#allocation2 + $0x50] sm:$0xff]  ;;  %v1892_v42 = vadd.f32 %v1865_v13, %v1848_v29 }
 0x1ca   : > { %v1917_v32 = vadd.f32 %v1905_v19, %v1887_v22  ;;  %v1918_v38 = vadd.f32 %v1906_v24, %v1888_v25  ;;  %v1893_v44 = vadd.f32 %v1869_v14, %v1849_v34  ;;  %v1851_v49 = vld [vmem:[#allocation2 + $0x58] sm:$0xff]  ;;  %v1894_v52 = vadd.f32 %v1873_v17, %v1850_v40 }
 0x1cb   : > { %v1927_v39 = vadd.f32 %v1926_v33, %v1916_v27  ;;  %v1919_v47 = vadd.f32 %v1907_v31, %v1889_v30  ;;  %v1922_v58 = vadd.f32 %v1910_v50, %v1892_v42  ;;  %v1895_v59 = vadd.f32 %v1877_v18, %v1851_v49 }
 0x1cc   : > { %v1923_v61 = vadd.f32 %v1911_v51, %v1893_v44  ;;  %v1924_v4 = vadd.f32 %v1912_v53, %v1894_v52 }
 0x1cd   : > { %v1928_v48 = vadd.f32 %v1927_v39, %v1917_v32  ;;  %v1934_v7 = vadd.f32 %v1933_v2, %v1922_v58  ;;  %v1925_v8 = vadd.f32 %v1913_v60, %v1895_v59 }
 0x1cf   : > { %v1929_v57 = vadd.f32 %v1928_v48, %v1918_v38  ;;  %v1935_v11 = vadd.f32 %v1934_v7, %v1923_v61 }
 0x1d1   : > { %v1930_v3 = vadd.f32 %v1929_v57, %v1919_v47  ;;  %v1936_v12 = vadd.f32 %v1935_v11, %v1924_v4  ;;  %v2043_v57 = vld [vmem:[%s3270_s5] sm:$0x3f] }
 0x1d2   : > { %v2048_v7 = vrot.slane %v2043_v57, %v3159_v62  ;;  %v2056_v11 = vrot.slane %v2043_v57, %v3163_v0 }
 0x1d3   : > { %1931 = vadd.xlane.f32.xlu0 %v1930_v3  ;;  %v1937_v13 = vadd.f32 %v1936_v12, %v1925_v8  ;;  %v2060_v12 = vrot.slane %v2043_v57, %v3165_v1 }
 0x1d7   : > { %1938 = vadd.xlane.f32.xlu0 %v1937_v13 }
 0x260   : > { %v1932_v14 = vpop.xlane.xlu0 %1931 }
 0x261   : > { %v1941_v15 = vmul.f32 0.0013020834, %v1932_v14 }
 0x263   : > { %v1943_v16 = vsub.f32 %v1914_v26, %v1941_v15  ;;  %v1944_v17 = vsub.f32 %v1915_v55, %v1941_v15  ;;  %v1945_v19 = vsub.f32 %v1916_v27, %v1941_v15  ;;  %v1946_v20 = vsub.f32 %v1917_v32, %v1941_v15 }
 0x264   : > { %v1939_v9 = vpop.xlane.xlu0 %1938  ;;  %v1947_v22 = vsub.f32 %v1918_v38, %v1941_v15  ;;  %v1948_v28 = vsub.f32 %v1919_v47, %v1941_v15 }
 0x265   : > { %v1955_v21 = vmul.f32 %v1943_v16, %v1943_v16  ;;  %v1956_v18 = vmul.f32 %v1944_v17, %v1944_v17  ;;  %v1957_v23 = vmul.f32 %v1945_v19, %v1945_v19  ;;  %v1942_v25 = vmul.f32 0.0013020834, %v1939_v9 }
 0x266   : > { %v1958_v10 = vmul.f32 %v1946_v20, %v1946_v20  ;;  %v1959_v26 = vmul.f32 %v1947_v22, %v1947_v22  ;;  %v1960_v35 = vmul.f32 %v1948_v28, %v1948_v28  ;;  %v2068_v9 = vrot.slane %v2043_v57, %v3169_v6 }
 0x267   : > { %v1967_v24 = vadd.f32 %v1956_v18, %v1955_v21  ;;  %v3189_v30 = vsub.f32 %v1920_v54, %v1942_v25  ;;  %v3191_v31 = vsub.f32 %v1921_v56, %v1942_v25  ;;  %v3193_v33 = vsub.f32 %v1922_v58, %v1942_v25  ;;  %v1999_v54 = vld [vmem:[%s3269_s4] sm:$0x3f] }
 0x268   : > { %v3195_v27 = vsub.f32 %v1923_v61, %v1942_v25  ;;  %v3201_v37 = vsub.f32 %v1924_v4, %v1942_v25  ;;  %v1954_v41 = vsub.f32 %v1925_v8, %v1942_v25  ;;  %v2004_v58 = vrot.slane %v1999_v54, %v3159_v62 }
 0x269   : > { %v1968_v29 = vadd.f32 %v1967_v24, %v1957_v23  ;;  %v1961_v32 = vmul.f32 %v3189_v30, %v3189_v30  ;;  %v1962_v34 = vmul.f32 %v3191_v31, %v3191_v31  ;;  %v1963_v38 = vmul.f32 %v3193_v33, %v3193_v33 }
 0x26a   : > { %v1964_v42 = vmul.f32 %v3195_v27, %v3195_v27  ;;  %v1965_v44 = vmul.f32 %v3201_v37, %v3201_v37  ;;  %v1966_v46 = vmul.f32 %v1954_v41, %v1954_v41  ;;  %v2008_v59 = vrot.slane %v1999_v54, %v3161_v63 }
 0x26b   : > { %v1969_v55 = vadd.f32 %v1968_v29, %v1958_v10  ;;  %v1974_v39 = vadd.f32 %v1962_v34, %v1961_v32  ;;  %v2012_v60 = vrot.slane %v1999_v54, %v3163_v0  ;;  %v2016_v61 = vrot.slane %v1999_v54, %v3165_v1 }
 0x26c   : > { %v2020_v2 = vrot.slane %v1999_v54, %v3167_v5  ;;  %v2024_v3 = vrot.slane %v1999_v54, %v3169_v6  ;;  %v2052_v8 = vrot.slane %v2043_v57, %v3161_v63  ;;  %v2064_v18 = vrot.slane %v2043_v57, %v3167_v5 }
 0x26d   : > { %v1970_v36 = vadd.f32 %v1969_v55, %v1959_v26  ;;  %v1975_v43 = vadd.f32 %v1974_v39, %v1963_v38 }
 0x26f   : > { %v1971_v40 = vadd.f32 %v1970_v36, %v1960_v35  ;;  %v1976_v45 = vadd.f32 %v1975_v43, %v1964_v42 }
 0x271   : > { %1972 = vadd.xlane.f32.xlu1 %v1971_v40  ;;  %v1977_v47 = vadd.f32 %v1976_v45, %v1965_v44 }
 0x273   : > { %v1978_v48 = vadd.f32 %v1977_v47, %v1966_v46 }
 0x275   : > { %1979 = vadd.xlane.f32.xlu1 %v1978_v48 }
 0x2fe   : > { %v1973_v49 = vpop.xlane.xlu1 %1972 }
 0x2ff   : > { %v1981_v50 = vmul.f32 0.0013020834, %v1973_v49 }
 0x301   : > { %v1983_v51 = vadd.f32 1e-12, %v1981_v50 }
 0x302   : > { %v1980_v52 = vpop.xlane.xlu1 %1979 }
 0x303   : > { %2803 = vrsqrt.f32 %v1983_v51  ;;  %v1982_v53 = vmul.f32 0.0013020834, %v1980_v52 }
 0x305   : > { %v1984_v56 = vadd.f32 1e-12, %v1982_v53 }
 0x307   : > { %2805 = vrsqrt.f32 %v1984_v56 }
 0x30d   : > { %v2804_v4 = vpop.eup %2803 }
 0x30e   : > { %v1987_v13 = vmul.f32 %v2804_v4, %v1943_v16  ;;  %v1988_v14 = vmul.f32 %v2804_v4, %v1944_v17  ;;  %v1989_v15 = vmul.f32 %v2804_v4, %v1945_v19  ;;  %v1990_v21 = vmul.f32 %v2804_v4, %v1946_v20 }
 0x30f   : > { %v1991_v23 = vmul.f32 %v2804_v4, %v1947_v22  ;;  %v1992_v24 = vmul.f32 %v2804_v4, %v1948_v28 }
 0x310   : > { %v2031_v25 = vmul.f32 %v2004_v58, %v1987_v13  ;;  %v2032_v10 = vmul.f32 %v2008_v59, %v1988_v14  ;;  %v2033_v29 = vmul.f32 %v2012_v60, %v1989_v15  ;;  %v2034_v62 = vmul.f32 %v2016_v61, %v1990_v21 }
 0x311   : > { %v2035_v26 = vmul.f32 %v2020_v2, %v1991_v23  ;;  %v2036_v63 = vmul.f32 %v2024_v3, %v1992_v24  ;;  %v2806_v19 = vpop.eup %2805 }
 0x312   : > { %v2075_v55 = vadd.f32 %v2048_v7, %v2031_v25  ;;  %v2076_v0 = vadd.f32 %v2052_v8, %v2032_v10  ;;  %v2077_v32 = vadd.f32 %v2056_v11, %v2033_v29  ;;  %v2078_v1 = vadd.f32 %v2060_v12, %v2034_v62 }
 0x313   : > { %v2079_v16 = vadd.f32 %v2064_v18, %v2035_v26  ;;  %v2080_v17 = vadd.f32 %v2068_v9, %v2036_v63  ;;  %v1993_v6 = vmul.f32 %v2806_v19, %v3189_v30  ;;  %v1994_v22 = vmul.f32 %v2806_v19, %v3191_v31 }
 0x314   : > { %v2449_v20 = vpack.c.bf16 %v2076_v0, %v2075_v55  ;;  %v2450_v34 = vpack.c.bf16 %v2078_v1, %v2077_v32  ;;  %v1995_v28 = vmul.f32 %v2806_v19, %v3193_v33  ;;  %v1996_v35 = vmul.f32 %v2806_v19, %v3195_v27 }
 0x315   : > { %v2451_v5 = vpack.c.bf16 %v2080_v17, %v2079_v16  ;;  %v1997_v36 = vmul.f32 %v2806_v19, %v3201_v37  ;;  %v1998_v38 = vmul.f32 %v2806_v19, %v1954_v41  ;;  %v2037_v30 = vmul.f32 %v2004_v58, %v1993_v6 }
 0x316   : > { %2123 = vst [vmem:[%s3271_s6] sm:$0xff] %v2449_v20  ;;  %2124 = vst [vmem:[%s3271_s6 + $0x8] sm:$0xff] %v2450_v34  ;;  %v2038_v31 = vmul.f32 %v2008_v59, %v1994_v22  ;;  %v2039_v33 = vmul.f32 %v2012_v60, %v1995_v28  ;;  %v2040_v39 = vmul.f32 %v2016_v61, %v1996_v35 }
 0x317   : > { %2125 = vst [vmem:[%s3271_s6 + $0x10] sm:$0xff] %v2451_v5  ;;  %v2041_v40 = vmul.f32 %v2020_v2, %v1997_v36  ;;  %v2042_v42 = vmul.f32 %v2024_v3, %v1998_v38  ;;  %v2081_v43 = vadd.f32 %v2048_v7, %v2037_v30 }
 0x318   : > { %v2082_v44 = vadd.f32 %v2052_v8, %v2038_v31  ;;  %v2083_v45 = vadd.f32 %v2056_v11, %v2039_v33  ;;  %v2084_v46 = vadd.f32 %v2060_v12, %v2040_v39 }
 0x319   : > { %v2085_v47 = vadd.f32 %v2064_v18, %v2041_v40  ;;  %v2086_v48 = vadd.f32 %v2068_v9, %v2042_v42 }
 0x31a   : > { %v2452_v27 = vpack.c.bf16 %v2082_v44, %v2081_v43  ;;  %v2453_v49 = vpack.c.bf16 %v2084_v46, %v2083_v45 }
 0x31b   : > { %v2454_v37 = vpack.c.bf16 %v2086_v48, %v2085_v47 }
 0x31c   : > { %2126 = vst [vmem:[%s3271_s6 + $0x18] sm:$0xff] %v2452_v27  ;;  %2127 = vst [vmem:[%s3271_s6 + $0x20] sm:$0xff] %v2453_v49 }
 0x31d   : > { %2128 = vst [vmem:[%s3271_s6 + $0x28] sm:$0xff] %v2454_v37 }
 0x31e PF: > { %s16_s25 = sadd.s32 1, %s2845_s25   ;;  %s3272_s21 = smov %s2833_s22 }
 0x31f   : > { %p13_p12 = scmp.ge.s32.totalorder %s16_s25, 8   ;;  %s3273_s22 = smov %s2918_s29 }
 0x320   : > { %s3274_s23 = smov %s2841_s24  ;;  %s3275_s24 = smov %s3277_s26 }
 0x321   :  { %15 = sbr.rel (!%p13_p12) target bundleno = 3 (0x3), region = 116 }

// kernel: multitask_forward.21
= control target key start
LH: loop header
LB: loop body
LE: loop exit
PB: predicated region body
PF: predicated region fallthrough
CT: control target
= control target key end

     0   :  { %vm244_vm0 = vcmask 1041409   ;;  %vm900_vm1 = vmmov 0   ;;  %vm481_vm3 = vcmask 261120   ;;  %s1310_s1 = inlined_call_operand.vmem [shape: f32[768,32], index: 1, kind: input, shape index: {}]   ;;  %s1311_s0 = inlined_call_operand.vmem [shape: bf16[2,8,768], index: 0, kind: input, shape index: {}]   ;;  %s1312_s3 = inlined_call_operand.vmem [shape: f32[32,128], index: 3, kind: input, shape index: {}]   ;;  %s1313_s2 = inlined_call_operand.vmem [shape: f32[1,32], index: 2, kind: input, shape index: {}]   ;;  %s1314_s5 = inlined_call_operand.vmem [shape: f32[32,128], index: 5, kind: input, shape index: {}]   ;;  %s1315_s4 = inlined_call_operand.vmem [shape: f32[1,128], index: 4, kind: input, shape index: {}]   ;;  %s1316_s6 = inlined_call_operand.vmem [shape: f32[1,128], index: 6, kind: input, shape index: {}]   ;;  %s1317_s7 = inlined_call_operand.vmem [shape: f32[2,128], index: 7, kind: output, shape index: {}]  }
   0x1   :  { %v145_v0 = vld [vmem:[%s1310_s1 + $0x80] sm:$0xff]  ;;  %v146_v1 = vld [vmem:[%s1310_s1 + $0x88] sm:$0xff]  ;;  %v147_v11 = vld [vmem:[%s1310_s1 + $0x90] sm:$0xff] }
   0x2   :  { %v129_v2 = vld [vmem:[%s1310_s1] sm:$0xff]  ;;  %v788_v3 = vpack.c.bf16 %v146_v1, %v145_v0  ;;  %v130_v4 = vld [vmem:[%s1310_s1 + $0x8] sm:$0xff]  ;;  %v148_v13 = vld [vmem:[%s1310_s1 + $0x98] sm:$0xff] }
   0x3   :  { %v177_v5 = vld [vmem:[%s1310_s1 + $0x180] sm:$0xff]  ;;  %v178_v6 = vld [vmem:[%s1310_s1 + $0x188] sm:$0xff]  ;;  %v790_v7 = vpack.c.bf16 %v130_v4, %v129_v2  ;;  %v131_v14 = vld [vmem:[%s1310_s1 + $0x10] sm:$0xff]  ;;  %v792_v16 = vpack.c.bf16 %v148_v13, %v147_v11 }
   0x4   :  { %v820_v8 = vpack.c.bf16 %v178_v6, %v177_v5  ;;  %v161_v9 = vld [vmem:[%s1310_s1 + $0x100] sm:$0xff]  ;;  %v162_v10 = vld [vmem:[%s1310_s1 + $0x108] sm:$0xff]  ;;  %789 = vmatprep.subr.bf16.mxu0 %v788_v3  ;;  %v132_v15 = vld [vmem:[%s1310_s1 + $0x18] sm:$0xff] }
   0x5   :  { %v822_v12 = vpack.c.bf16 %v162_v10, %v161_v9  ;;  %791 = vmatpush3.bf16.msra.mxu0 %v790_v7  ;;  %v794_v17 = vpack.c.bf16 %v132_v15, %v131_v14  ;;  %v179_v18 = vld [vmem:[%s1310_s1 + $0x190] sm:$0xff]  ;;  %v180_v19 = vld [vmem:[%s1310_s1 + $0x198] sm:$0xff]  ;;  %v149_v23 = vld [vmem:[%s1310_s1 + $0xa0] sm:$0xff] }
   0x6   :  { %821 = vmatprep.subr.bf16.mxu1 %v820_v8  ;;  %v163_v20 = vld [vmem:[%s1310_s1 + $0x110] sm:$0xff]  ;;  %v824_v21 = vpack.c.bf16 %v180_v19, %v179_v18  ;;  %v164_v22 = vld [vmem:[%s1310_s1 + $0x118] sm:$0xff]  ;;  %v150_v24 = vld [vmem:[%s1310_s1 + $0xa8] sm:$0xff]  ;;  %793 = vmatprep.subr.bf16.mxu0 %v792_v16 }
   0x7   :  { %823 = vmatpush3.bf16.msra.mxu1 %v822_v12  ;;  %v826_v25 = vpack.c.bf16 %v164_v22, %v163_v20  ;;  %v796_v26 = vpack.c.bf16 %v150_v24, %v149_v23  ;;  %v133_v27 = vld [vmem:[%s1310_s1 + $0x20] sm:$0xff]  ;;  %v134_v28 = vld [vmem:[%s1310_s1 + $0x28] sm:$0xff]  ;;  %v151_v35 = vld [vmem:[%s1310_s1 + $0xb0] sm:$0xff] }
   0x8   :  { %v181_v29 = vld [vmem:[%s1310_s1 + $0x1a0] sm:$0xff]  ;;  %825 = vmatprep.subr.bf16.mxu1 %v824_v21  ;;  %v182_v30 = vld [vmem:[%s1310_s1 + $0x1a8] sm:$0xff]  ;;  %v798_v33 = vpack.c.bf16 %v134_v28, %v133_v27  ;;  %v152_v36 = vld [vmem:[%s1310_s1 + $0xb8] sm:$0xff] }
   0x9   :  { %v165_v31 = vld [vmem:[%s1310_s1 + $0x120] sm:$0xff]  ;;  %v166_v32 = vld [vmem:[%s1310_s1 + $0x128] sm:$0xff]  ;;  %795 = vmatpush3.bf16.msra.mxu0 %v794_v17  ;;  %v828_v34 = vpack.c.bf16 %v182_v30, %v181_v29  ;;  %v135_v37 = vld [vmem:[%s1310_s1 + $0x30] sm:$0xff]  ;;  %v800_v39 = vpack.c.bf16 %v152_v36, %v151_v35 }
   0xa   :  { %797 = vmatprep.subr.bf16.mxu0 %v796_v26  ;;  %v830_v38 = vpack.c.bf16 %v166_v32, %v165_v31  ;;  %v136_v40 = vld [vmem:[%s1310_s1 + $0x38] sm:$0xff]  ;;  %v183_v41 = vld [vmem:[%s1310_s1 + $0x1b0] sm:$0xff]  ;;  %v153_v46 = vld [vmem:[%s1310_s1 + $0xc0] sm:$0xff] }
   0xb   :  { %827 = vmatpush3.bf16.msra.mxu1 %v826_v25  ;;  %v184_v42 = vld [vmem:[%s1310_s1 + $0x1b8] sm:$0xff]  ;;  %v167_v44 = vld [vmem:[%s1310_s1 + $0x130] sm:$0xff]  ;;  %v154_v47 = vld [vmem:[%s1310_s1 + $0xc8] sm:$0xff]  ;;  %v802_v50 = vpack.c.bf16 %v136_v40, %v135_v37 }
   0xc   :  { %829 = vmatprep.subr.bf16.mxu1 %v828_v34  ;;  %v832_v43 = vpack.c.bf16 %v184_v42, %v183_v41  ;;  %v168_v45 = vld [vmem:[%s1310_s1 + $0x138] sm:$0xff]  ;;  %v137_v48 = vld [vmem:[%s1310_s1 + $0x40] sm:$0xff]  ;;  %v138_v49 = vld [vmem:[%s1310_s1 + $0x48] sm:$0xff]  ;;  %v804_v55 = vpack.c.bf16 %v154_v47, %v153_v46 }
   0xd   :  { %799 = vmatpush3.bf16.msra.mxu0 %v798_v33  ;;  %v185_v51 = vld [vmem:[%s1310_s1 + $0x1c0] sm:$0xff]  ;;  %v186_v52 = vld [vmem:[%s1310_s1 + $0x1c8] sm:$0xff]  ;;  %v834_v54 = vpack.c.bf16 %v168_v45, %v167_v44  ;;  %v155_v57 = vld [vmem:[%s1310_s1 + $0xd0] sm:$0xff]  ;;  %v806_v2 = vpack.c.bf16 %v138_v49, %v137_v48 }
   0xe   :  { %v169_v53 = vld [vmem:[%s1310_s1 + $0x140] sm:$0xff]  ;;  %801 = vmatprep.subr.bf16.mxu0 %v800_v39  ;;  %v170_v56 = vld [vmem:[%s1310_s1 + $0x148] sm:$0xff]  ;;  %v156_v58 = vld [vmem:[%s1310_s1 + $0xd8] sm:$0xff]  ;;  %v836_v59 = vpack.c.bf16 %v186_v52, %v185_v51 }
   0xf   :  { %831 = vmatpush3.bf16.msra.mxu1 %v830_v38  ;;  %v139_v60 = vld [vmem:[%s1310_s1 + $0x50] sm:$0xff]  ;;  %v140_v61 = vld [vmem:[%s1310_s1 + $0x58] sm:$0xff]  ;;  %v157_v3 = vld [vmem:[%s1310_s1 + $0xe0] sm:$0xff]  ;;  %v838_v6 = vpack.c.bf16 %v170_v56, %v169_v53  ;;  %v808_v7 = vpack.c.bf16 %v156_v58, %v155_v57 }
  0x10   :  { %833 = vmatprep.subr.bf16.mxu1 %v832_v43  ;;  %v187_v62 = vld [vmem:[%s1310_s1 + $0x1d0] sm:$0xff]  ;;  %v188_v63 = vld [vmem:[%s1310_s1 + $0x1d8] sm:$0xff]  ;;  %v158_v4 = vld [vmem:[%s1310_s1 + $0xe8] sm:$0xff]  ;;  %v810_v15 = vpack.c.bf16 %v140_v61, %v139_v60 }
  0x11   :  { %v171_v0 = vld [vmem:[%s1310_s1 + $0x150] sm:$0xff]  ;;  %v172_v1 = vld [vmem:[%s1310_s1 + $0x158] sm:$0xff]  ;;  %803 = vmatpush3.bf16.msra.mxu0 %v802_v50  ;;  %v1095_v5 = vld [vmem:[%s1310_s1 + $0x60] sm:$0xff]  ;;  %v840_v11 = vpack.c.bf16 %v188_v63, %v187_v62  ;;  %v812_v20 = vpack.c.bf16 %v158_v4, %v157_v3 }
  0x12   :  { %805 = vmatprep.subr.bf16.mxu0 %v804_v55  ;;  %v1100_v8 = vld [vmem:[%s1310_s1 + $0x68] sm:$0xff]  ;;  %v189_v9 = vld [vmem:[%s1310_s1 + $0x1e0] sm:$0xff]  ;;  %v159_v14 = vld [vmem:[%s1310_s1 + $0xf0] sm:$0xff]  ;;  %v842_v19 = vpack.c.bf16 %v172_v1, %v171_v0 }
  0x13   :  { %835 = vmatpush3.bf16.msra.mxu1 %v834_v54  ;;  %v190_v10 = vld [vmem:[%s1310_s1 + $0x1e8] sm:$0xff]  ;;  %v1111_v12 = vld [vmem:[%s1310_s1 + $0x160] sm:$0xff]  ;;  %v160_v16 = vld [vmem:[%s1310_s1 + $0xf8] sm:$0xff]  ;;  %v814_v21 = vpack.c.bf16 %v1100_v8, %v1095_v5 }
  0x14   :  { %837 = vmatprep.subr.bf16.mxu1 %v836_v59  ;;  %v174_v13 = vld [vmem:[%s1310_s1 + $0x168] sm:$0xff]  ;;  %v1125_v17 = vld [vmem:[%s1310_s1 + $0x70] sm:$0xff]  ;;  %v1130_v18 = vld [vmem:[%s1310_s1 + $0x78] sm:$0xff]  ;;  %v844_v22 = vpack.c.bf16 %v190_v10, %v189_v9  ;;  %v816_v27 = vpack.c.bf16 %v160_v16, %v159_v14 }
  0x15   :  { %807 = vmatpush3.bf16.msra.mxu0 %v806_v2  ;;  %v191_v23 = vld [vmem:[%s1310_s1 + $0x1f0] sm:$0xff]  ;;  %v192_v24 = vld [vmem:[%s1310_s1 + $0x1f8] sm:$0xff]  ;;  %v26_v25 = vld [vmem:[%s1311_s0] sm:$0xff]  ;;  %v846_v26 = vpack.c.bf16 %v174_v13, %v1111_v12  ;;  %v818_v33 = vpack.c.bf16 %v1130_v18, %v1125_v17 }
  0x16   :  { %809 = vmatprep.subr.bf16.mxu0 %v808_v7  ;;  %v29_v28 = vld [vmem:[%s1311_s0 + $0x18] sm:$0xff]  ;;  %v33_v29 = vunpack.c.h.bf16 %v26_v25  ;;  %v1150_v30 = vld [vmem:[%s1310_s1 + $0x170] sm:$0xff]  ;;  %v32_v32 = vunpack.c.l.bf16 %v26_v25  ;;  %v848_v34 = vpack.c.bf16 %v192_v24, %v191_v23  ;;  %v209_v37 = vld [vmem:[%s1310_s1 + $0x280] sm:$0xff] }
  0x17   :  { %839 = vmatpush3.bf16.msra.mxu1 %v838_v6  ;;  %v176_v31 = vld [vmem:[%s1310_s1 + $0x178] sm:$0xff]  ;;  %v39_v35 = vunpack.c.h.bf16 %v29_v28  ;;  %v38_v36 = vunpack.c.l.bf16 %v29_v28  ;;  %v210_v38 = vld [vmem:[%s1310_s1 + $0x288] sm:$0xff]  ;;  %v30_v43 = vld [vmem:[%s1311_s0 + $0x20] sm:$0xff] }
  0x18   :  { %841 = vmatprep.subr.bf16.mxu1 %v840_v11  ;;  %v27_v39 = vld [vmem:[%s1311_s0 + $0x8] sm:$0xff]  ;;  %v50_v40 = vrot.slane %v33_v29, 4  ;;  %v850_v41 = vpack.c.bf16 %v176_v31, %v1150_v30  ;;  %v44_v42 = vrot.slane %v32_v32, 4  ;;  %v852_v47 = vpack.c.bf16 %v210_v38, %v209_v37  ;;  %v212_v28 = vld [vmem:[%s1310_s1 + $0x298] sm:$0xff] }
  0x19   :  { %v35_v44 = vunpack.c.h.bf16 %v27_v39  ;;  %811 = vmatpush3.bf16.msra.mxu0 %v810_v15  ;;  %v86_v45 = vrot.slane %v39_v35, 4  ;;  %v80_v46 = vrot.slane %v38_v36, 4  ;;  %v41_v48 = vunpack.c.h.bf16 %v30_v43  ;;  %v194_v25 = vld [vmem:[%s1310_s1 + $0x208] sm:$0xff] }
  0x1a   :  { %813 = vmatprep.subr.bf16.mxu0 %v812_v20  ;;  %v51_v49 = vadd.f32 %v50_v40, %v33_v29  ;;  %v45_v50 = vadd.f32 %v44_v42, %v32_v32  ;;  %v34_v52 = vunpack.c.l.bf16 %v27_v39  ;;  %v40_v56 = vunpack.c.l.bf16 %v30_v43  ;;  %v193_v20 = vld [vmem:[%s1310_s1 + $0x200] sm:$0xff] }
  0x1b   :  { %843 = vmatpush3.bf16.msra.mxu1 %v842_v19  ;;  %v62_v51 = vrot.slane %v35_v44, 4  ;;  %v87_v53 = vadd.f32 %v86_v45, %v39_v35  ;;  %v81_v54 = vadd.f32 %v80_v46, %v38_v36  ;;  %v98_v55 = vrot.slane %v41_v48, 4  ;;  %v195_v45 = vld [vmem:[%s1310_s1 + $0x210] sm:$0xff]  ;;  %v196_v46 = vld [vmem:[%s1310_s1 + $0x218] sm:$0xff] }
  0x1c   :  { %845 = vmatprep.subr.bf16.mxu1 %v844_v22  ;;  %v52_v57 = vrot.slane %v51_v49, 2  ;;  %v46_v58 = vrot.slane %v45_v50, 2  ;;  %v56_v60 = vrot.slane %v34_v52, 4  ;;  %v92_v0 = vrot.slane %v40_v56, 4 }
  0x1d   :  { %v63_v59 = vadd.f32 %v62_v51, %v35_v44  ;;  %815 = vmatpush3.bf16.msra.mxu0 %v814_v21  ;;  %v88_v61 = vrot.slane %v87_v53, 2  ;;  %v82_v62 = vrot.slane %v81_v54, 2  ;;  %v99_v63 = vadd.f32 %v98_v55, %v41_v48 }
  0x1e   :  { %817 = vmatprep.subr.bf16.mxu0 %v816_v27  ;;  %v53_v1 = vadd.f32 %v52_v57, %v51_v49  ;;  %v47_v2 = vadd.f32 %v46_v58, %v45_v50  ;;  %v57_v4 = vadd.f32 %v56_v60, %v34_v52  ;;  %v93_v8 = vadd.f32 %v92_v0, %v40_v56  ;;  %v211_v27 = vld [vmem:[%s1310_s1 + $0x290] sm:$0xff]  ;;  %v213_v49 = vld [vmem:[%s1310_s1 + $0x2a0] sm:$0xff]  ;;  %v214_v50 = vld [vmem:[%s1310_s1 + $0x2a8] sm:$0xff] }
  0x1f   :  { %847 = vmatpush3.bf16.msra.mxu1 %v846_v26  ;;  %v64_v3 = vrot.slane %v63_v59, 2  ;;  %v89_v5 = vadd.f32 %v88_v61, %v87_v53  ;;  %v83_v6 = vadd.f32 %v82_v62, %v81_v54  ;;  %v100_v7 = vrot.slane %v99_v63, 2  ;;  %v31_v53 = vld [vmem:[%s1311_s0 + $0x28] sm:$0xff]  ;;  %v197_v58 = vld [vmem:[%s1310_s1 + $0x220] sm:$0xff]  ;;  %v215_v60 = vld [vmem:[%s1310_s1 + $0x2b0] sm:$0xff] }
  0x20   :  { %849 = vmatprep.subr.bf16.mxu1 %v848_v34  ;;  %v54_v9 = vrot.slane %v53_v1, 1  ;;  %v48_v10 = vrot.slane %v47_v2, 1  ;;  %v58_v12 = vrot.slane %v57_v4, 2  ;;  %v94_v16 = vrot.slane %v93_v8, 2  ;;  %v216_v61 = vld [vmem:[%s1310_s1 + $0x2b8] sm:$0xff] }
  0x21   :  { %v65_v11 = vadd.f32 %v64_v3, %v63_v59  ;;  %819 = vmatpush3.bf16.msra.mxu0 %v818_v33  ;;  %v90_v13 = vrot.slane %v89_v5, 1  ;;  %v84_v14 = vrot.slane %v83_v6, 1  ;;  %v101_v15 = vadd.f32 %v100_v7, %v99_v63  ;;  %v198_v59 = vld [vmem:[%s1310_s1 + $0x228] sm:$0xff]  ;;  %v199_v7 = vld [vmem:[%s1310_s1 + $0x230] sm:$0xff] }
  0x22   :  { %v55_v17 = vadd.f32 %v54_v9, %v53_v1  ;;  %v49_v18 = vadd.f32 %v48_v10, %v47_v2  ;;  %853 = vmatprep.subr.bf16.mxu0 %v852_v47  ;;  %v59_v21 = vadd.f32 %v58_v12, %v57_v4  ;;  %v95_v26 = vadd.f32 %v94_v16, %v93_v8  ;;  %v28_v47 = vld [vmem:[%s1311_s0 + $0x10] sm:$0xff]  ;;  %v200_v8 = vld [vmem:[%s1310_s1 + $0x238] sm:$0xff]  ;;  %v217_v10 = vld [vmem:[%s1310_s1 + $0x2c0] sm:$0xff] }
  0x23   :  { %851 = vmatpush3.bf16.msra.mxu1 %v850_v41  ;;  %v66_v19 = vrot.slane %v65_v11, 1  ;;  %v91_v22 = vadd.f32 %v90_v13, %v89_v5  ;;  %v85_v23 = vadd.f32 %v84_v14, %v83_v6  ;;  %v102_v24 = vrot.slane %v101_v15, 1 }
  0x24   :  { %v118_v29 = vmul.f32 0.125, %v55_v17  ;;  %v117_v30 = vmul.f32 0.125, %v49_v18  ;;  %v60_v32 = vrot.slane %v59_v21, 1  ;;  %v96_v36 = vrot.slane %v95_v26, 1  ;;  %v201_v17 = vld [vmem:[%s1310_s1 + $0x240] sm:$0xff]  ;;  %v202_v18 = vld [vmem:[%s1310_s1 + $0x248] sm:$0xff] }
  0x25   :  { %v67_v31 = vadd.f32 %v66_v19, %v65_v11  ;;  %v124_v33 = vmul.f32 0.125, %v91_v22  ;;  %v123_v34 = vmul.f32 0.125, %v85_v23  ;;  %v103_v35 = vadd.f32 %v102_v24, %v101_v15  ;;  %v218_v11 = vld [vmem:[%s1310_s1 + $0x2c8] sm:$0xff]  ;;  %v219_v24 = vld [vmem:[%s1310_s1 + $0x2d0] sm:$0xff] }
  0x26   :  { %v854_v38 = vpack.c.bf16 %v194_v25, %v193_v20  ;;  %v61_v39 = vadd.f32 %v60_v32, %v59_v21  ;;  %v856_v40 = vpack.c.bf16 %v212_v28, %v211_v27  ;;  %v97_v44 = vadd.f32 %v96_v36, %v95_v26  ;;  %v220_v25 = vld [vmem:[%s1310_s1 + $0x2d8] sm:$0xff]  ;;  %v221_v36 = vld [vmem:[%s1310_s1 + $0x2e0] sm:$0xff] }
  0x27   :  { %v120_v37 = vmul.f32 0.125, %v67_v31  ;;  %v246_v41 = vsel %vm244_vm0, %v124_v33, %v118_v29  ;;  %v245_v42 = vsel %vm244_vm0, %v123_v34, %v117_v30  ;;  %v126_v43 = vmul.f32 0.125, %v103_v35  ;;  %v203_v34 = vld [vmem:[%s1310_s1 + $0x250] sm:$0xff]  ;;  %v204_v35 = vld [vmem:[%s1310_s1 + $0x258] sm:$0xff] }
  0x28   :  { %321 = vmatprep.mubr.f32.mxu0 %v246_v41  ;;  %v119_v48 = vmul.f32 0.125, %v61_v39  ;;  %v125_v52 = vmul.f32 0.125, %v97_v44  ;;  %v858_v54 = vpack.c.bf16 %v196_v46, %v195_v45  ;;  %v37_v55 = vunpack.c.h.bf16 %v28_v47  ;;  %v205_v45 = vld [vmem:[%s1310_s1 + $0x260] sm:$0xff]  ;;  %v206_v46 = vld [vmem:[%s1310_s1 + $0x268] sm:$0xff] }
  0x29   :  { %322 = vmatmul.mubr.f32.vlgmr.msra.gmra.mrb[0].mxu0 %v245_v42  ;;  %v248_v51 = vsel %vm244_vm0, %v126_v43, %v120_v37  ;;  %v860_v57 = vpack.c.bf16 %v214_v50, %v213_v49  ;;  %v43_v62 = vunpack.c.h.bf16 %v31_v53  ;;  %v36_v0 = vunpack.c.l.bf16 %v28_v47  ;;  %v222_v37 = vld [vmem:[%s1310_s1 + $0x2e8] sm:$0xff]  ;;  %v223_v47 = vld [vmem:[%s1310_s1 + $0x2f0] sm:$0xff] }
  0x2a   :  { %391 = vmatprep.mubr.f32.mxu1 %v248_v51  ;;  %855 = vmatpush3.bf16.msra.mxu0 %v854_v38  ;;  %v247_v56 = vsel %vm244_vm0, %v125_v52, %v119_v48  ;;  %v74_v63 = vrot.slane %v37_v55, 4  ;;  %v42_v1 = vunpack.c.l.bf16 %v31_v53  ;;  %v862_v2 = vpack.c.bf16 %v198_v59, %v197_v58  ;;  %v224_v48 = vld [vmem:[%s1310_s1 + $0x2f8] sm:$0xff] }
  0x2b   :  { %857 = vmatprep.subr.bf16.mxu0 %v856_v40  ;;  %392 = vmatmul.mubr.f32.vlgmr.msra.gmra.mrb[0].mxu1 %v247_v56  ;;  %v110_v4 = vrot.slane %v43_v62, 4  ;;  %v68_v5 = vrot.slane %v36_v0, 4  ;;  %v864_v6 = vpack.c.bf16 %v216_v61, %v215_v60  ;;  %v866_v16 = vpack.c.bf16 %v200_v8, %v199_v7  ;;  %v470_v60 = vld [vmem:[%s1312_s3] sm:$0xff]  ;;  %v471_v61 = vld [vmem:[%s1312_s3 + $0x8] sm:$0xff] }
  0x2c   :  { %v75_v3 = vadd.f32 %v74_v63, %v37_v55  ;;  %v104_v9 = vrot.slane %v42_v1, 4  ;;  %v868_v22 = vpack.c.bf16 %v218_v11, %v217_v10  ;;  %v870_v28 = vpack.c.bf16 %v202_v18, %v201_v17  ;;  %v208_v55 = vld [vmem:[%s1310_s1 + $0x278] sm:$0xff]  ;;  %v556_v17 = vld [vmem:[%s1314_s5 + $0x8] sm:$0xff] }
  0x2d   :  { %v111_v13 = vadd.f32 %v110_v4, %v43_v62  ;;  %v69_v14 = vadd.f32 %v68_v5, %v36_v0  ;;  %v872_v33 = vpack.c.bf16 %v220_v25, %v219_v24  ;;  %v874_v40 = vpack.c.bf16 %v204_v35, %v203_v34  ;;  %v472_v0 = vld [vmem:[%s1312_s3 + $0x10] sm:$0xff]  ;;  %v646_v5 = vld [vmem:[%s1313_s2] ss:$0 sm:$0xff] }
  0x2e   :  { %859 = vmatpush3.bf16.msra.mxu0 %v858_v54  ;;  %v76_v12 = vrot.slane %v75_v3, 2  ;;  %v105_v15 = vadd.f32 %v104_v9, %v42_v1  ;;  %v876_v44 = vpack.c.bf16 %v222_v37, %v221_v36  ;;  %v878_v50 = vpack.c.bf16 %v206_v46, %v205_v45  ;;  %v207_v54 = vld [vmem:[%s1310_s1 + $0x270] sm:$0xff]  ;;  %v473_v1 = vld [vmem:[%s1312_s3 + $0x18] sm:$0xff] }
  0x2f   :  { %861 = vmatprep.subr.bf16.mxu0 %v860_v57  ;;  %v112_v20 = vrot.slane %v111_v13, 2  ;;  %v70_v21 = vrot.slane %v69_v14, 2  ;;  %v880_v53 = vpack.c.bf16 %v224_v48, %v223_v47  ;;  %v882_v56 = vpack.c.bf16 %v208_v55, %v207_v54 }
  0x30   :  { %v77_v19 = vadd.f32 %v76_v12, %v75_v3  ;;  %v106_v23 = vrot.slane %v105_v15, 2  ;;  %v885_v62 = vpack.c.bf16 %v471_v61, %v470_v60  ;;  %v899_v63 = vmov 0.0|0.0  }
  0x31   :  { %v113_v27 = vadd.f32 %v112_v20, %v111_v13  ;;  %v71_v31 = vadd.f32 %v70_v21, %v69_v14  ;;  %884 = vmatprep.subr.bf16.mxu1 %v899_v63  ;;  %v901_v3 = vmov 0.0   ;;  %v557_v21 = vld [vmem:[%s1314_s5 + $0x10] sm:$0xff] }
  0x32   :  { %863 = vmatpush3.bf16.msra.mxu0 %v862_v2  ;;  %v78_v26 = vrot.slane %v77_v19, 1  ;;  %v107_v32 = vadd.f32 %v106_v23, %v105_v15  ;;  %886 = vmatpush3.bf16.msra.mxu1 %v885_v62  ;;  %v888_v2 = vpack.c.bf16 %v473_v1, %v472_v0 }
  0x33   :  { %865 = vmatprep.subr.bf16.mxu0 %v864_v6  ;;  %v114_v30 = vrot.slane %v113_v27, 1  ;;  %v72_v42 = vrot.slane %v71_v31, 1  ;;  %887 = vmatprep.subr.bf16.mxu1 %v899_v63 }
  0x34   :  { %v79_v29 = vadd.f32 %v78_v26, %v77_v19  ;;  %v108_v43 = vrot.slane %v107_v32, 1  ;;  %774 = vmatprep.mubr.msk.f32.mxu1 %vm900_vm1, %v901_v3 }
  0x35   :  { %v115_v38 = vadd.f32 %v114_v30, %v113_v27  ;;  %v73_v51 = vadd.f32 %v72_v42, %v71_v31  ;;  %v647_v27 = vld [vmem:[%s1315_s4] ss:$0 sm:$0xff] }
  0x36   :  { %867 = vmatpush3.bf16.msra.mxu0 %v866_v16  ;;  %v122_v39 = vmul.f32 0.125, %v79_v29  ;;  %v109_v52 = vadd.f32 %v108_v43, %v107_v32  ;;  %889 = vmatpush3.bf16.msra.mxu1 %v888_v2  ;;  %v555_v16 = vld [vmem:[%s1314_s5] sm:$0xff] }
  0x37   :  { %869 = vmatprep.subr.bf16.mxu0 %v868_v22  ;;  %v128_v41 = vmul.f32 0.125, %v115_v38  ;;  %v121_v57 = vmul.f32 0.125, %v73_v51  ;;  %890 = vmatprep.subr.bf16.mxu1 %v899_v63  ;;  %v891_v20 = vpack.c.bf16 %v556_v17, %v555_v16  ;;  %v558_v22 = vld [vmem:[%s1314_s5 + $0x18] sm:$0xff]  ;;  %v650_v30 = vld [vmem:[%s1316_s6] ss:$0 sm:$0xff] }
  0x38   :  { %v127_v58 = vmul.f32 0.125, %v109_v52  ;;  %v894_v24 = vpack.c.bf16 %v558_v22, %v557_v21 }
  0x39   :  { %v250_v49 = vsel %vm244_vm0, %v128_v41, %v122_v39 }
  0x3a   :  { %871 = vmatpush3.bf16.msra.mxu0 %v870_v28  ;;  %461 = vmatprep.mubr.f32.mxu0 %v250_v49  ;;  %v249_v59 = vsel %vm244_vm0, %v127_v58, %v121_v57 }
  0x3b   :  { %873 = vmatprep.subr.bf16.mxu0 %v872_v33 }
  0x3e   :  { %875 = vmatpush3.bf16.msra.mxu0 %v874_v40 }
  0x3f   :  { %877 = vmatprep.subr.bf16.mxu0 %v876_v44 }
  0x42   :  { %879 = vmatpush3.bf16.msra.mxu0 %v878_v50 }
  0x43   :  { %881 = vmatprep.subr.bf16.mxu0 %v880_v53 }
  0x46   :  { %883 = vmatpush3.bf16.msra.mxu0 %v882_v56 }
  0x49   :  { %462 = vmatmul.mubr.f32.vlgmr.msra.gmra.mrb[2].mxu0 %v249_v59 }
  0xfc   :  { %v683_v4 = vpop.f32.mrb[0].mxu0 }
  0xfd   :  { %v684_v6 = vpop.f32.mrb[1].mxu0 }
  0xfe   :  { %v685_v7 = vadd.f32 %v684_v6, %v683_v4  ;;  %v718_v8 = vpop.f32.mrb[0].mxu1 }
  0xff   :  { %v719_v10 = vpop.f32.mrb[1].mxu1 }
 0x100   :  { %v324_v9 = vadd.f32 %v685_v7, %v646_v5  ;;  %v720_v11 = vadd.f32 %v719_v10, %v718_v8 }
 0x102   :  { %v394_v12 = vadd.f32 %v720_v11, %v324_v9 }
 0x11c   :  { %v753_v13 = vpop.f32.mrb[2].mxu0 }
 0x11d   :  { %v754_v14 = vpop.f32.mrb[3].mxu0 }
 0x11e   :  { %v755_v15 = vadd.f32 %v754_v14, %v753_v13 }
 0x120   :  { %v464_v18 = vadd.f32 %v755_v15, %v394_v12 }
 0x122   :  { %vm467_vm2 = vcmp.gt.f32.partialorder %v464_v18, 0.0  ;;  %v468_v19 = vmul.f32 0.01, %v464_v18 }
 0x124   :  { %v469_v23 = vsel %vm467_vm2, %v464_v18, %v468_v19 }
 0x125   :  { %775 = vmatmul.mubr.msk.f32.vlgmr.msra.gmra.mrb[2].mxu1 %vm481_vm3, %v469_v23 }
 0x126   :  { %892 = vmatpush3.bf16.msra.mxu1 %v891_v20  ;;  %785 = vmatprep.mubr.msk.f32.mxu1 %vm900_vm1, %v901_v3 }
 0x127   :  { %893 = vmatprep.subr.bf16.mxu1 %v899_v63 }
 0x12a   :  { %895 = vmatpush3.bf16.msra.mxu1 %v894_v24 }
 0x12d   :  { %786 = vmatmul.mubr.msk.f32.vlgmr.msra.gmra.mrb[4].mxu1 %vm481_vm3, %v464_v18 }
 0x1f8   :  { %v551_v25 = vpop.f32.mrb[2].mxu1 }
 0x1f9   :  { %v776_v26 = vpop.f32.mrb[3].mxu1  ;;  %v552_v28 = vadd.f32 %v647_v27, %v551_v25 }
 0x200   :  { %v628_v29 = vpop.f32.mrb[4].mxu1 }
 0x201   :  { %v632_v31 = vadd.f32 %v628_v29, %v552_v28  ;;  %v787_v32 = vpop.f32.mrb[5].mxu1 }
 0x203   :  { %v640_v33 = vadd.f32 %v650_v30, %v632_v31 }
 0x205   :  { %641 = vst [vmem:[%s1317_s7] sm:$0x3] %v640_v33 }

</bundles_post_ra>
